<compile_context>
chip_gen: v6e
topology: v6e:2x2x1
jax: 0.10.0
libtpu: 0.0.40
codegen_flags: <defaults>
</compile_context>

<pallas_src>
import functools
import math

import jax
import jax.numpy as jnp
import numpy as np
from jax import lax
from jax.experimental import pallas as pl
from jax.experimental.pallas import tpu as pltpu

FRAME_STACK = 4
NUM_HEADS = 8
EMBED_DIM = 512
KSIZE = 3


# ------------------------------ Pallas kernel -------------------------------

def _fused_perception_kernel(x_ref,
                             sel1_ref, w1_ref, b1_ref,
                             sel2_ref, w2_ref, b2_ref,
                             sel3_ref, w3_ref, b3_ref,
                             wfc_ref, bfc_ref,
                             wat_ref, bat_ref,
                             o_ref, *, batch):
    """Whole forward in one kernel; every intermediate stays in VMEM/vregs.

    Activations are 2D (rows, channels): rows ordered (h, w, b), channels on the
    lane dim.  Conv tap k=(kh,kw):  acc += (G_k @ a) @ w_k  with G_k a 0/1 gather
    matrix encoding shift + stride + zero-padding for that tap.
    """
    cdt = jnp.bfloat16

    def conv3x3_relu(a, sel_ref, w_ref, b_ref, rows_out, cin):
        cout = w_ref.shape[1]
        acc = jnp.zeros((rows_out, cout), jnp.float32)
        for k in range(KSIZE * KSIZE):
            g_k = sel_ref[k * rows_out:(k + 1) * rows_out, :]     # (rows_out, rows_in)
            w_k = w_ref[k * cin:(k + 1) * cin, :]                  # (cin, cout)
            window = jnp.dot(g_k, a, preferred_element_type=jnp.float32)  # shifted/strided/padded tap
            acc = acc + jnp.dot(window.astype(cdt), w_k,
                                preferred_element_type=jnp.float32)
        return jnp.maximum(acc + b_ref[...], 0.0).astype(cdt)      # bias + ReLU in f32

    x = x_ref[...]                                                 # (16*16*B, 4) bf16
    a1 = conv3x3_relu(x,  sel1_ref, w1_ref, b1_ref, rows_out=8 * 8 * batch, cin=4)    # (8*8*B, 32)
    a2 = conv3x3_relu(a1, sel2_ref, w2_ref, b2_ref, rows_out=4 * 4 * batch, cin=32)   # (4*4*B, 64)
    a3 = conv3x3_relu(a2, sel3_ref, w3_ref, b3_ref, rows_out=4 * 4 * batch, cin=64)   # (4*4*B, 64)

    # nn.Flatten + fc, chained inside the same kernel.  The NCHW flatten order is
    # absorbed into a one-time column permutation of fc_w (see
    # prepare_kernel_operands); the contraction over the 16 spatial positions is
    # done as 16 accumulating sub-GEMMs on contiguous row blocks of a3.
    h = jnp.zeros((batch, EMBED_DIM), jnp.float32)
    for p in range(16):
        feat_p = a3[p * batch:(p + 1) * batch, :]                  # (B, 64)   spatial position p
        wfc_p = wfc_ref[p * 64:(p + 1) * 64, :]                    # (64, 512)
        h = h + jnp.dot(feat_p, wfc_p, preferred_element_type=jnp.float32)
    h = h + bfc_ref[...]                                           # no ReLU after fc (matches module)

    # MultiheadAttention with seq_len == 1: softmax over one key == 1 exactly, so
    # attn == v.  Wv and out_proj were folded at init into wat/bat; q/k are gone.
    out = jnp.dot(h.astype(cdt), wat_ref[...], preferred_element_type=jnp.float32)
    o_ref[...] = out + bat_ref[...]


def perception_forward(ops, x_nchw):
    """Module-boundary NCHW input -> (B, 512), via one fused Pallas kernel."""
    B, C, H, W = x_nchw.shape
    # Only per-call layout op: flatten the 8 KiB input to (h, w, b)-rows x channel cols.
    x2d = x_nchw.transpose(2, 3, 0, 1).reshape(H * W * B, C).astype(jnp.bfloat16)
    vmem = pl.BlockSpec(memory_space=pltpu.MemorySpace.VMEM)
    return pl.pallas_call(
        functools.partial(_fused_perception_kernel, batch=B),
        out_shape=jax.ShapeDtypeStruct((B, EMBED_DIM), jnp.float32),
        in_specs=[vmem] * 14,
        out_specs=vmem,
    )(x2d,
      ops["sel1"], ops["w1"], ops["b1"],
      ops["sel2"], ops["w2"], ops["b2"],
      ops["sel3"], ops["w3"], ops["b3"],
      ops["wfc"], ops["bfc"], ops["wat"], ops["bat"])


# ----------------------- One-time parameter preparation ---------------------

def build_gather_matrices(hin, win, stride, batch):
    """0/1 gather matrices realizing a 3x3 / pad=1 conv's 9 taps (shift + stride +
    zero padding) on (h, w, b)-ordered activation rows.
    Returns (9 * Hout*Wout*B, Hin*Win*B), tap-major."""
    hout = (hin + 2 - KSIZE) // stride + 1
    wout = (win + 2 - KSIZE) // stride + 1
    rows_out, rows_in = hout * wout * batch, hin * win * batch
    sel = np.zeros((KSIZE * KSIZE, rows_out, rows_in), np.float32)
    for kh in range(KSIZE):
        for kw in range(KSIZE):
            k = kh * KSIZE + kw
            for ho in range(hout):
                h = stride * ho + kh - 1
                if not 0 <= h < hin:
                    continue
                for wo in range(wout):
                    w = stride * wo + kw - 1
                    if not 0 <= w < win:
                        continue
                    for b in range(batch):
                        sel[k, (ho * wout + wo) * batch + b, (h * win + w) * batch + b] = 1.0
    return sel.reshape(KSIZE * KSIZE * rows_out, rows_in)


def prepare_kernel_operands(params, batch):
    """Hoist ALL weight re-layouts / folds / bf16 casts out of the forward pass."""
    bf = lambda a: jnp.asarray(a, jnp.bfloat16)
    f32row = lambda a: jnp.asarray(a, jnp.float32).reshape(1, -1)

    def conv_w(w):  # torch (Cout, Cin, 3, 3) -> (9*Cin, Cout), rows (kh, kw, ci)
        cout, cin = w.shape[0], w.shape[1]
        return bf(jnp.transpose(w, (2, 3, 1, 0)).reshape(KSIZE * KSIZE * cin, cout))

    E = EMBED_DIM
    # fc: absorb the NCHW flatten (index = c*16 + h*4 + w) into a column permutation
    # so rows are grouped (h, w)-block-major, channel-minor -> (16*64, 512).
    fcw = params["fc_w"].reshape(E, 64, 4, 4)            # (n, c, h, w)
    wfc = jnp.transpose(fcw, (2, 3, 1, 0)).reshape(16 * 64, E)
    # seq_len==1 attention collapse: out = (x @ Wv^T + bv) @ Wo^T + bo
    wv = params["in_proj_w"][2 * E:]
    bv = params["in_proj_b"][2 * E:]
    wo = params["out_proj_w"]
    bo = params["out_proj_b"]
    wat = wv.T @ wo.T                                     # (512, 512), folded in f32
    bat = bv @ wo.T + bo

    return {
        "sel1": bf(build_gather_matrices(16, 16, 2, batch)),
        "w1": conv_w(params["conv1_w"]), "b1": f32row(params["conv1_b"]),
        "sel2": bf(build_gather_matrices(8, 8, 2, batch)),
        "w2": conv_w(params["conv2_w"]), "b2": f32row(params["conv2_b"]),
        "sel3": bf(build_gather_matrices(4, 4, 1, batch)),
        "w3": conv_w(params["conv3_w"]), "b3": f32row(params["conv3_b"]),
        "wfc": bf(wfc), "bfc": f32row(params["fc_b"]),
        "wat": bf(wat), "bat": f32row(bat),
    }


def init_params(key, in_channels):
    ks = jax.random.split(key, 12)

    def w(k, shape, fan_in):
        return jax.random.normal(k, shape, jnp.float32) / math.sqrt(fan_in)

    feature_size = 64 * 4 * 4   # 16x16 -> /2 -> 8x8 -> /2 -> 4x4, 64 channels
    return {
        "conv1_w": w(ks[0], (32, in_channels, 3, 3), in_channels * 9),
        "conv1_b": w(ks[1], (32,), in_channels * 9),
        "conv2_w": w(ks[2], (64, 32, 3, 3), 32 * 9),
        "conv2_b": w(ks[3], (64,), 32 * 9),
        "conv3_w": w(ks[4], (64, 64, 3, 3), 64 * 9),
        "conv3_b": w(ks[5], (64,), 64 * 9),
        "fc_w": w(ks[6], (EMBED_DIM, feature_size), feature_size),   # torch Linear: (out, in)
        "fc_b": w(ks[7], (EMBED_DIM,), feature_size),
        "in_proj_w": w(ks[8], (3 * EMBED_DIM, EMBED_DIM), EMBED_DIM),  # torch MHA in_proj
        "in_proj_b": w(ks[9], (3 * EMBED_DIM,), EMBED_DIM),
        "out_proj_w": w(ks[10], (EMBED_DIM, EMBED_DIM), EMBED_DIM),
        "out_proj_b": w(ks[11], (EMBED_DIM,), EMBED_DIM),
    }


# ----------------------------- f32 reference --------------------------------

def reference_forward(params, x):
    """Plain-JAX f32 reference with full (un-collapsed) MHA math, for validation."""
    def conv(x, w, b, stride):
        y = lax.conv_general_dilated(x, w, (stride, stride), ((1, 1), (1, 1)),
                                     dimension_numbers=("NCHW", "OIHW", "NCHW"))
        return jnp.maximum(y + b[None, :, None, None], 0.0)

    x = conv(x, params["conv1_w"], params["conv1_b"], 2)
    x = conv(x, params["conv2_w"], params["conv2_b"], 2)
    x = conv(x, params["conv3_w"], params["conv3_b"], 1)
    feat = x.reshape(x.shape[0], -1)
    h = feat @ params["fc_w"].T + params["fc_b"]
    E, H = EMBED_DIM, NUM_HEADS
    D = E // H
    q = h @ params["in_proj_w"][:E].T + params["in_proj_b"][:E]
    k = h @ params["in_proj_w"][E:2 * E].T + params["in_proj_b"][E:2 * E]
    v = h @ params["in_proj_w"][2 * E:].T + params["in_proj_b"][2 * E:]
    B = h.shape[0]
    qh, kh, vh = (t.reshape(B, H, D) for t in (q, k, v))
    scores = jnp.sum(qh * kh, axis=-1, keepdims=True) / math.sqrt(D)   # (B, H, 1): one key
    attn = jax.nn.softmax(scores, axis=-1) * vh                        # softmax over 1 key == 1
    ctx = attn.reshape(B, E)
    return ctx @ params["out_proj_w"].T + params["out_proj_b"]


# ---------------------------------- main -------------------------------------

if __name__ == "__main__":
    key = jax.random.PRNGKey(0)
    k_x, k_p = jax.random.split(key)
    input_shape = (1, 16, 16)                      # (C, H, W) per frame
    in_channels = input_shape[0] * FRAME_STACK     # 4
    batch = 2
    x = jax.random.normal(k_x, (batch, in_channels, *input_shape[1:]), jnp.float32)
    params = init_params(k_p, in_channels)
    ops = prepare_kernel_operands(params, batch)   # one-time layout/fold work

    out = jax.block_until_ready(jax.jit(perception_forward)(ops, x))
    assert out.shape == (batch, EMBED_DIM)
    assert bool(jnp.all(jnp.isfinite(out)))

    ref = jax.jit(reference_forward)(params, x)
    max_err = float(jnp.max(jnp.abs(out - ref)))
    assert max_err < 0.5, f"kernel deviates from reference: max_err={max_err}"
    print("KERNEL_OK")
</pallas_src>

<mosaic_0001>
module attributes {stable_mosaic.version = 11 : i64} {
  func.func @_fused_perception_kernel(%arg0: memref<512x4xbf16, #tpu.memory_space<vmem>>, %arg1: memref<1152x512xbf16, #tpu.memory_space<vmem>>, %arg2: memref<36x32xbf16, #tpu.memory_space<vmem>>, %arg3: memref<1x32xf32, #tpu.memory_space<vmem>>, %arg4: memref<288x128xbf16, #tpu.memory_space<vmem>>, %arg5: memref<288x64xbf16, #tpu.memory_space<vmem>>, %arg6: memref<1x64xf32, #tpu.memory_space<vmem>>, %arg7: memref<288x32xbf16, #tpu.memory_space<vmem>>, %arg8: memref<576x64xbf16, #tpu.memory_space<vmem>>, %arg9: memref<1x64xf32, #tpu.memory_space<vmem>>, %arg10: memref<1024x512xbf16, #tpu.memory_space<vmem>>, %arg11: memref<1x512xf32, #tpu.memory_space<vmem>>, %arg12: memref<512x512xbf16, #tpu.memory_space<vmem>>, %arg13: memref<1x512xf32, #tpu.memory_space<vmem>>, %arg14: memref<2x512xf32, #tpu.memory_space<vmem>>) attributes {dimension_semantics = [], scalar_prefetch = 0 : i64, scratch_operands = 0 : i64, tpu.core_type = #tpu.core_type<tc>} {
    %c0 = arith.constant 0 : index
    %c0_0 = arith.constant 0 : index
    %0 = vector.load %arg0[%c0, %c0_0] : memref<512x4xbf16, #tpu.memory_space<vmem>>, vector<512x4xbf16>
    %cst = arith.constant 0.000000e+00 : f32
    %1 = vector.broadcast %cst : f32 to vector<128x32xf32>
    %c0_1 = arith.constant 0 : index
    %c0_2 = arith.constant 0 : index
    %2 = vector.load %arg1[%c0_1, %c0_2] : memref<1152x512xbf16, #tpu.memory_space<vmem>>, vector<128x512xbf16>
    %c0_3 = arith.constant 0 : index
    %c0_4 = arith.constant 0 : index
    %3 = vector.load %arg2[%c0_3, %c0_4] : memref<36x32xbf16, #tpu.memory_space<vmem>>, vector<4x32xbf16>
    %cst_5 = arith.constant dense<0.000000e+00> : vector<128x4xf32>
    %4 = tpu.matmul %2, %0, %cst_5 {dimension_numbers = #tpu.dot_dimension_numbers<[1], [0], [0], [1], [0, 0, 1, 1], [], []>} : vector<128x512xbf16>, vector<512x4xbf16>, vector<128x4xf32> -> vector<128x4xf32>
    %5 = arith.truncf %4 : vector<128x4xf32> to vector<128x4xbf16>
    %cst_6 = arith.constant dense<0.000000e+00> : vector<128x32xf32>
    %6 = tpu.matmul %5, %3, %cst_6 {dimension_numbers = #tpu.dot_dimension_numbers<[1], [0], [0], [1], [0, 0, 1, 1], [], []>} : vector<128x4xbf16>, vector<4x32xbf16>, vector<128x32xf32> -> vector<128x32xf32>
    %7 = arith.addf %1, %6 : vector<128x32xf32>
    %c128 = arith.constant 128 : index
    %c0_7 = arith.constant 0 : index
    %8 = vector.load %arg1[%c128, %c0_7] : memref<1152x512xbf16, #tpu.memory_space<vmem>>, vector<128x512xbf16>
    %c4 = arith.constant 4 : index
    %c0_8 = arith.constant 0 : index
    %9 = vector.load %arg2[%c4, %c0_8] : memref<36x32xbf16, #tpu.memory_space<vmem>>, vector<4x32xbf16>
    %cst_9 = arith.constant dense<0.000000e+00> : vector<128x4xf32>
    %10 = tpu.matmul %8, %0, %cst_9 {dimension_numbers = #tpu.dot_dimension_numbers<[1], [0], [0], [1], [0, 0, 1, 1], [], []>} : vector<128x512xbf16>, vector<512x4xbf16>, vector<128x4xf32> -> vector<128x4xf32>
    %11 = arith.truncf %10 : vector<128x4xf32> to vector<128x4xbf16>
    %cst_10 = arith.constant dense<0.000000e+00> : vector<128x32xf32>
    %12 = tpu.matmul %11, %9, %cst_10 {dimension_numbers = #tpu.dot_dimension_numbers<[1], [0], [0], [1], [0, 0, 1, 1], [], []>} : vector<128x4xbf16>, vector<4x32xbf16>, vector<128x32xf32> -> vector<128x32xf32>
    %13 = arith.addf %7, %12 : vector<128x32xf32>
    %c256 = arith.constant 256 : index
    %c0_11 = arith.constant 0 : index
    %14 = vector.load %arg1[%c256, %c0_11] : memref<1152x512xbf16, #tpu.memory_space<vmem>>, vector<128x512xbf16>
    %c8 = arith.constant 8 : index
    %c0_12 = arith.constant 0 : index
    %15 = vector.load %arg2[%c8, %c0_12] : memref<36x32xbf16, #tpu.memory_space<vmem>>, vector<4x32xbf16>
    %cst_13 = arith.constant dense<0.000000e+00> : vector<128x4xf32>
    %16 = tpu.matmul %14, %0, %cst_13 {dimension_numbers = #tpu.dot_dimension_numbers<[1], [0], [0], [1], [0, 0, 1, 1], [], []>} : vector<128x512xbf16>, vector<512x4xbf16>, vector<128x4xf32> -> vector<128x4xf32>
    %17 = arith.truncf %16 : vector<128x4xf32> to vector<128x4xbf16>
    %cst_14 = arith.constant dense<0.000000e+00> : vector<128x32xf32>
    %18 = tpu.matmul %17, %15, %cst_14 {dimension_numbers = #tpu.dot_dimension_numbers<[1], [0], [0], [1], [0, 0, 1, 1], [], []>} : vector<128x4xbf16>, vector<4x32xbf16>, vector<128x32xf32> -> vector<128x32xf32>
    %19 = arith.addf %13, %18 : vector<128x32xf32>
    %c384 = arith.constant 384 : index
    %c0_15 = arith.constant 0 : index
    %20 = vector.load %arg1[%c384, %c0_15] : memref<1152x512xbf16, #tpu.memory_space<vmem>>, vector<128x512xbf16>
    %c12 = arith.constant 12 : index
    %c0_16 = arith.constant 0 : index
    %21 = vector.load %arg2[%c12, %c0_16] : memref<36x32xbf16, #tpu.memory_space<vmem>>, vector<4x32xbf16>
    %cst_17 = arith.constant dense<0.000000e+00> : vector<128x4xf32>
    %22 = tpu.matmul %20, %0, %cst_17 {dimension_numbers = #tpu.dot_dimension_numbers<[1], [0], [0], [1], [0, 0, 1, 1], [], []>} : vector<128x512xbf16>, vector<512x4xbf16>, vector<128x4xf32> -> vector<128x4xf32>
    %23 = arith.truncf %22 : vector<128x4xf32> to vector<128x4xbf16>
    %cst_18 = arith.constant dense<0.000000e+00> : vector<128x32xf32>
    %24 = tpu.matmul %23, %21, %cst_18 {dimension_numbers = #tpu.dot_dimension_numbers<[1], [0], [0], [1], [0, 0, 1, 1], [], []>} : vector<128x4xbf16>, vector<4x32xbf16>, vector<128x32xf32> -> vector<128x32xf32>
    %25 = arith.addf %19, %24 : vector<128x32xf32>
    %c512 = arith.constant 512 : index
    %c0_19 = arith.constant 0 : index
    %26 = vector.load %arg1[%c512, %c0_19] : memref<1152x512xbf16, #tpu.memory_space<vmem>>, vector<128x512xbf16>
    %c16 = arith.constant 16 : index
    %c0_20 = arith.constant 0 : index
    %27 = vector.load %arg2[%c16, %c0_20] : memref<36x32xbf16, #tpu.memory_space<vmem>>, vector<4x32xbf16>
    %cst_21 = arith.constant dense<0.000000e+00> : vector<128x4xf32>
    %28 = tpu.matmul %26, %0, %cst_21 {dimension_numbers = #tpu.dot_dimension_numbers<[1], [0], [0], [1], [0, 0, 1, 1], [], []>} : vector<128x512xbf16>, vector<512x4xbf16>, vector<128x4xf32> -> vector<128x4xf32>
    %29 = arith.truncf %28 : vector<128x4xf32> to vector<128x4xbf16>
    %cst_22 = arith.constant dense<0.000000e+00> : vector<128x32xf32>
    %30 = tpu.matmul %29, %27, %cst_22 {dimension_numbers = #tpu.dot_dimension_numbers<[1], [0], [0], [1], [0, 0, 1, 1], [], []>} : vector<128x4xbf16>, vector<4x32xbf16>, vector<128x32xf32> -> vector<128x32xf32>
    %31 = arith.addf %25, %30 : vector<128x32xf32>
    %c640 = arith.constant 640 : index
    %c0_23 = arith.constant 0 : index
    %32 = vector.load %arg1[%c640, %c0_23] : memref<1152x512xbf16, #tpu.memory_space<vmem>>, vector<128x512xbf16>
    %c20 = arith.constant 20 : index
    %c0_24 = arith.constant 0 : index
    %33 = vector.load %arg2[%c20, %c0_24] : memref<36x32xbf16, #tpu.memory_space<vmem>>, vector<4x32xbf16>
    %cst_25 = arith.constant dense<0.000000e+00> : vector<128x4xf32>
    %34 = tpu.matmul %32, %0, %cst_25 {dimension_numbers = #tpu.dot_dimension_numbers<[1], [0], [0], [1], [0, 0, 1, 1], [], []>} : vector<128x512xbf16>, vector<512x4xbf16>, vector<128x4xf32> -> vector<128x4xf32>
    %35 = arith.truncf %34 : vector<128x4xf32> to vector<128x4xbf16>
    %cst_26 = arith.constant dense<0.000000e+00> : vector<128x32xf32>
    %36 = tpu.matmul %35, %33, %cst_26 {dimension_numbers = #tpu.dot_dimension_numbers<[1], [0], [0], [1], [0, 0, 1, 1], [], []>} : vector<128x4xbf16>, vector<4x32xbf16>, vector<128x32xf32> -> vector<128x32xf32>
    %37 = arith.addf %31, %36 : vector<128x32xf32>
    %c768 = arith.constant 768 : index
    %c0_27 = arith.constant 0 : index
    %38 = vector.load %arg1[%c768, %c0_27] : memref<1152x512xbf16, #tpu.memory_space<vmem>>, vector<128x512xbf16>
    %c24 = arith.constant 24 : index
    %c0_28 = arith.constant 0 : index
    %39 = vector.load %arg2[%c24, %c0_28] : memref<36x32xbf16, #tpu.memory_space<vmem>>, vector<4x32xbf16>
    %cst_29 = arith.constant dense<0.000000e+00> : vector<128x4xf32>
    %40 = tpu.matmul %38, %0, %cst_29 {dimension_numbers = #tpu.dot_dimension_numbers<[1], [0], [0], [1], [0, 0, 1, 1], [], []>} : vector<128x512xbf16>, vector<512x4xbf16>, vector<128x4xf32> -> vector<128x4xf32>
    %41 = arith.truncf %40 : vector<128x4xf32> to vector<128x4xbf16>
    %cst_30 = arith.constant dense<0.000000e+00> : vector<128x32xf32>
    %42 = tpu.matmul %41, %39, %cst_30 {dimension_numbers = #tpu.dot_dimension_numbers<[1], [0], [0], [1], [0, 0, 1, 1], [], []>} : vector<128x4xbf16>, vector<4x32xbf16>, vector<128x32xf32> -> vector<128x32xf32>
    %43 = arith.addf %37, %42 : vector<128x32xf32>
    %c896 = arith.constant 896 : index
    %c0_31 = arith.constant 0 : index
    %44 = vector.load %arg1[%c896, %c0_31] : memref<1152x512xbf16, #tpu.memory_space<vmem>>, vector<128x512xbf16>
    %c28 = arith.constant 28 : index
    %c0_32 = arith.constant 0 : index
    %45 = vector.load %arg2[%c28, %c0_32] : memref<36x32xbf16, #tpu.memory_space<vmem>>, vector<4x32xbf16>
    %cst_33 = arith.constant dense<0.000000e+00> : vector<128x4xf32>
    %46 = tpu.matmul %44, %0, %cst_33 {dimension_numbers = #tpu.dot_dimension_numbers<[1], [0], [0], [1], [0, 0, 1, 1], [], []>} : vector<128x512xbf16>, vector<512x4xbf16>, vector<128x4xf32> -> vector<128x4xf32>
    %47 = arith.truncf %46 : vector<128x4xf32> to vector<128x4xbf16>
    %cst_34 = arith.constant dense<0.000000e+00> : vector<128x32xf32>
    %48 = tpu.matmul %47, %45, %cst_34 {dimension_numbers = #tpu.dot_dimension_numbers<[1], [0], [0], [1], [0, 0, 1, 1], [], []>} : vector<128x4xbf16>, vector<4x32xbf16>, vector<128x32xf32> -> vector<128x32xf32>
    %49 = arith.addf %43, %48 : vector<128x32xf32>
    %c1024 = arith.constant 1024 : index
    %c0_35 = arith.constant 0 : index
    %50 = vector.load %arg1[%c1024, %c0_35] : memref<1152x512xbf16, #tpu.memory_space<vmem>>, vector<128x512xbf16>
    %c32 = arith.constant 32 : index
    %c0_36 = arith.constant 0 : index
    %51 = vector.load %arg2[%c32, %c0_36] : memref<36x32xbf16, #tpu.memory_space<vmem>>, vector<4x32xbf16>
    %cst_37 = arith.constant dense<0.000000e+00> : vector<128x4xf32>
    %52 = tpu.matmul %50, %0, %cst_37 {dimension_numbers = #tpu.dot_dimension_numbers<[1], [0], [0], [1], [0, 0, 1, 1], [], []>} : vector<128x512xbf16>, vector<512x4xbf16>, vector<128x4xf32> -> vector<128x4xf32>
    %53 = arith.truncf %52 : vector<128x4xf32> to vector<128x4xbf16>
    %cst_38 = arith.constant dense<0.000000e+00> : vector<128x32xf32>
    %54 = tpu.matmul %53, %51, %cst_38 {dimension_numbers = #tpu.dot_dimension_numbers<[1], [0], [0], [1], [0, 0, 1, 1], [], []>} : vector<128x4xbf16>, vector<4x32xbf16>, vector<128x32xf32> -> vector<128x32xf32>
    %55 = arith.addf %49, %54 : vector<128x32xf32>
    %c0_39 = arith.constant 0 : index
    %c0_40 = arith.constant 0 : index
    %56 = vector.load %arg3[%c0_39, %c0_40] : memref<1x32xf32, #tpu.memory_space<vmem>>, vector<1x32xf32>
    %57 = vector.broadcast %56 : vector<1x32xf32> to vector<128x32xf32>
    %58 = arith.addf %55, %57 : vector<128x32xf32>
    %cst_41 = arith.constant 0.000000e+00 : f32
    %59 = vector.broadcast %cst_41 : f32 to vector<128x32xf32>
    %60 = arith.maximumf %58, %59 : vector<128x32xf32>
    %61 = arith.truncf %60 : vector<128x32xf32> to vector<128x32xbf16>
    %cst_42 = arith.constant 0.000000e+00 : f32
    %62 = vector.broadcast %cst_42 : f32 to vector<32x64xf32>
    %c0_43 = arith.constant 0 : index
    %c0_44 = arith.constant 0 : index
    %63 = vector.load %arg4[%c0_43, %c0_44] : memref<288x128xbf16, #tpu.memory_space<vmem>>, vector<32x128xbf16>
    %c0_45 = arith.constant 0 : index
    %c0_46 = arith.constant 0 : index
    %64 = vector.load %arg5[%c0_45, %c0_46] : memref<288x64xbf16, #tpu.memory_space<vmem>>, vector<32x64xbf16>
    %cst_47 = arith.constant dense<0.000000e+00> : vector<32x32xf32>
    %65 = tpu.matmul %63, %61, %cst_47 {dimension_numbers = #tpu.dot_dimension_numbers<[1], [0], [0], [1], [0, 0, 1, 1], [], []>} : vector<32x128xbf16>, vector<128x32xbf16>, vector<32x32xf32> -> vector<32x32xf32>
    %66 = arith.truncf %65 : vector<32x32xf32> to vector<32x32xbf16>
    %cst_48 = arith.constant dense<0.000000e+00> : vector<32x64xf32>
    %67 = tpu.matmul %66, %64, %cst_48 {dimension_numbers = #tpu.dot_dimension_numbers<[1], [0], [0], [1], [0, 0, 1, 1], [], []>} : vector<32x32xbf16>, vector<32x64xbf16>, vector<32x64xf32> -> vector<32x64xf32>
    %68 = arith.addf %62, %67 : vector<32x64xf32>
    %c32_49 = arith.constant 32 : index
    %c0_50 = arith.constant 0 : index
    %69 = vector.load %arg4[%c32_49, %c0_50] : memref<288x128xbf16, #tpu.memory_space<vmem>>, vector<32x128xbf16>
    %c32_51 = arith.constant 32 : index
    %c0_52 = arith.constant 0 : index
    %70 = vector.load %arg5[%c32_51, %c0_52] : memref<288x64xbf16, #tpu.memory_space<vmem>>, vector<32x64xbf16>
    %cst_53 = arith.constant dense<0.000000e+00> : vector<32x32xf32>
    %71 = tpu.matmul %69, %61, %cst_53 {dimension_numbers = #tpu.dot_dimension_numbers<[1], [0], [0], [1], [0, 0, 1, 1], [], []>} : vector<32x128xbf16>, vector<128x32xbf16>, vector<32x32xf32> -> vector<32x32xf32>
    %72 = arith.truncf %71 : vector<32x32xf32> to vector<32x32xbf16>
    %cst_54 = arith.constant dense<0.000000e+00> : vector<32x64xf32>
    %73 = tpu.matmul %72, %70, %cst_54 {dimension_numbers = #tpu.dot_dimension_numbers<[1], [0], [0], [1], [0, 0, 1, 1], [], []>} : vector<32x32xbf16>, vector<32x64xbf16>, vector<32x64xf32> -> vector<32x64xf32>
    %74 = arith.addf %68, %73 : vector<32x64xf32>
    %c64 = arith.constant 64 : index
    %c0_55 = arith.constant 0 : index
    %75 = vector.load %arg4[%c64, %c0_55] : memref<288x128xbf16, #tpu.memory_space<vmem>>, vector<32x128xbf16>
    %c64_56 = arith.constant 64 : index
    %c0_57 = arith.constant 0 : index
    %76 = vector.load %arg5[%c64_56, %c0_57] : memref<288x64xbf16, #tpu.memory_space<vmem>>, vector<32x64xbf16>
    %cst_58 = arith.constant dense<0.000000e+00> : vector<32x32xf32>
    %77 = tpu.matmul %75, %61, %cst_58 {dimension_numbers = #tpu.dot_dimension_numbers<[1], [0], [0], [1], [0, 0, 1, 1], [], []>} : vector<32x128xbf16>, vector<128x32xbf16>, vector<32x32xf32> -> vector<32x32xf32>
    %78 = arith.truncf %77 : vector<32x32xf32> to vector<32x32xbf16>
    %cst_59 = arith.constant dense<0.000000e+00> : vector<32x64xf32>
    %79 = tpu.matmul %78, %76, %cst_59 {dimension_numbers = #tpu.dot_dimension_numbers<[1], [0], [0], [1], [0, 0, 1, 1], [], []>} : vector<32x32xbf16>, vector<32x64xbf16>, vector<32x64xf32> -> vector<32x64xf32>
    %80 = arith.addf %74, %79 : vector<32x64xf32>
    %c96 = arith.constant 96 : index
    %c0_60 = arith.constant 0 : index
    %81 = vector.load %arg4[%c96, %c0_60] : memref<288x128xbf16, #tpu.memory_space<vmem>>, vector<32x128xbf16>
    %c96_61 = arith.constant 96 : index
    %c0_62 = arith.constant 0 : index
    %82 = vector.load %arg5[%c96_61, %c0_62] : memref<288x64xbf16, #tpu.memory_space<vmem>>, vector<32x64xbf16>
    %cst_63 = arith.constant dense<0.000000e+00> : vector<32x32xf32>
    %83 = tpu.matmul %81, %61, %cst_63 {dimension_numbers = #tpu.dot_dimension_numbers<[1], [0], [0], [1], [0, 0, 1, 1], [], []>} : vector<32x128xbf16>, vector<128x32xbf16>, vector<32x32xf32> -> vector<32x32xf32>
    %84 = arith.truncf %83 : vector<32x32xf32> to vector<32x32xbf16>
    %cst_64 = arith.constant dense<0.000000e+00> : vector<32x64xf32>
    %85 = tpu.matmul %84, %82, %cst_64 {dimension_numbers = #tpu.dot_dimension_numbers<[1], [0], [0], [1], [0, 0, 1, 1], [], []>} : vector<32x32xbf16>, vector<32x64xbf16>, vector<32x64xf32> -> vector<32x64xf32>
    %86 = arith.addf %80, %85 : vector<32x64xf32>
    %c128_65 = arith.constant 128 : index
    %c0_66 = arith.constant 0 : index
    %87 = vector.load %arg4[%c128_65, %c0_66] : memref<288x128xbf16, #tpu.memory_space<vmem>>, vector<32x128xbf16>
    %c128_67 = arith.constant 128 : index
    %c0_68 = arith.constant 0 : index
    %88 = vector.load %arg5[%c128_67, %c0_68] : memref<288x64xbf16, #tpu.memory_space<vmem>>, vector<32x64xbf16>
    %cst_69 = arith.constant dense<0.000000e+00> : vector<32x32xf32>
    %89 = tpu.matmul %87, %61, %cst_69 {dimension_numbers = #tpu.dot_dimension_numbers<[1], [0], [0], [1], [0, 0, 1, 1], [], []>} : vector<32x128xbf16>, vector<128x32xbf16>, vector<32x32xf32> -> vector<32x32xf32>
    %90 = arith.truncf %89 : vector<32x32xf32> to vector<32x32xbf16>
    %cst_70 = arith.constant dense<0.000000e+00> : vector<32x64xf32>
    %91 = tpu.matmul %90, %88, %cst_70 {dimension_numbers = #tpu.dot_dimension_numbers<[1], [0], [0], [1], [0, 0, 1, 1], [], []>} : vector<32x32xbf16>, vector<32x64xbf16>, vector<32x64xf32> -> vector<32x64xf32>
    %92 = arith.addf %86, %91 : vector<32x64xf32>
    %c160 = arith.constant 160 : index
    %c0_71 = arith.constant 0 : index
    %93 = vector.load %arg4[%c160, %c0_71] : memref<288x128xbf16, #tpu.memory_space<vmem>>, vector<32x128xbf16>
    %c160_72 = arith.constant 160 : index
    %c0_73 = arith.constant 0 : index
    %94 = vector.load %arg5[%c160_72, %c0_73] : memref<288x64xbf16, #tpu.memory_space<vmem>>, vector<32x64xbf16>
    %cst_74 = arith.constant dense<0.000000e+00> : vector<32x32xf32>
    %95 = tpu.matmul %93, %61, %cst_74 {dimension_numbers = #tpu.dot_dimension_numbers<[1], [0], [0], [1], [0, 0, 1, 1], [], []>} : vector<32x128xbf16>, vector<128x32xbf16>, vector<32x32xf32> -> vector<32x32xf32>
    %96 = arith.truncf %95 : vector<32x32xf32> to vector<32x32xbf16>
    %cst_75 = arith.constant dense<0.000000e+00> : vector<32x64xf32>
    %97 = tpu.matmul %96, %94, %cst_75 {dimension_numbers = #tpu.dot_dimension_numbers<[1], [0], [0], [1], [0, 0, 1, 1], [], []>} : vector<32x32xbf16>, vector<32x64xbf16>, vector<32x64xf32> -> vector<32x64xf32>
    %98 = arith.addf %92, %97 : vector<32x64xf32>
    %c192 = arith.constant 192 : index
    %c0_76 = arith.constant 0 : index
    %99 = vector.load %arg4[%c192, %c0_76] : memref<288x128xbf16, #tpu.memory_space<vmem>>, vector<32x128xbf16>
    %c192_77 = arith.constant 192 : index
    %c0_78 = arith.constant 0 : index
    %100 = vector.load %arg5[%c192_77, %c0_78] : memref<288x64xbf16, #tpu.memory_space<vmem>>, vector<32x64xbf16>
    %cst_79 = arith.constant dense<0.000000e+00> : vector<32x32xf32>
    %101 = tpu.matmul %99, %61, %cst_79 {dimension_numbers = #tpu.dot_dimension_numbers<[1], [0], [0], [1], [0, 0, 1, 1], [], []>} : vector<32x128xbf16>, vector<128x32xbf16>, vector<32x32xf32> -> vector<32x32xf32>
    %102 = arith.truncf %101 : vector<32x32xf32> to vector<32x32xbf16>
    %cst_80 = arith.constant dense<0.000000e+00> : vector<32x64xf32>
    %103 = tpu.matmul %102, %100, %cst_80 {dimension_numbers = #tpu.dot_dimension_numbers<[1], [0], [0], [1], [0, 0, 1, 1], [], []>} : vector<32x32xbf16>, vector<32x64xbf16>, vector<32x64xf32> -> vector<32x64xf32>
    %104 = arith.addf %98, %103 : vector<32x64xf32>
    %c224 = arith.constant 224 : index
    %c0_81 = arith.constant 0 : index
    %105 = vector.load %arg4[%c224, %c0_81] : memref<288x128xbf16, #tpu.memory_space<vmem>>, vector<32x128xbf16>
    %c224_82 = arith.constant 224 : index
    %c0_83 = arith.constant 0 : index
    %106 = vector.load %arg5[%c224_82, %c0_83] : memref<288x64xbf16, #tpu.memory_space<vmem>>, vector<32x64xbf16>
    %cst_84 = arith.constant dense<0.000000e+00> : vector<32x32xf32>
    %107 = tpu.matmul %105, %61, %cst_84 {dimension_numbers = #tpu.dot_dimension_numbers<[1], [0], [0], [1], [0, 0, 1, 1], [], []>} : vector<32x128xbf16>, vector<128x32xbf16>, vector<32x32xf32> -> vector<32x32xf32>
    %108 = arith.truncf %107 : vector<32x32xf32> to vector<32x32xbf16>
    %cst_85 = arith.constant dense<0.000000e+00> : vector<32x64xf32>
    %109 = tpu.matmul %108, %106, %cst_85 {dimension_numbers = #tpu.dot_dimension_numbers<[1], [0], [0], [1], [0, 0, 1, 1], [], []>} : vector<32x32xbf16>, vector<32x64xbf16>, vector<32x64xf32> -> vector<32x64xf32>
    %110 = arith.addf %104, %109 : vector<32x64xf32>
    %c256_86 = arith.constant 256 : index
    %c0_87 = arith.constant 0 : index
    %111 = vector.load %arg4[%c256_86, %c0_87] : memref<288x128xbf16, #tpu.memory_space<vmem>>, vector<32x128xbf16>
    %c256_88 = arith.constant 256 : index
    %c0_89 = arith.constant 0 : index
    %112 = vector.load %arg5[%c256_88, %c0_89] : memref<288x64xbf16, #tpu.memory_space<vmem>>, vector<32x64xbf16>
    %cst_90 = arith.constant dense<0.000000e+00> : vector<32x32xf32>
    %113 = tpu.matmul %111, %61, %cst_90 {dimension_numbers = #tpu.dot_dimension_numbers<[1], [0], [0], [1], [0, 0, 1, 1], [], []>} : vector<32x128xbf16>, vector<128x32xbf16>, vector<32x32xf32> -> vector<32x32xf32>
    %114 = arith.truncf %113 : vector<32x32xf32> to vector<32x32xbf16>
    %cst_91 = arith.constant dense<0.000000e+00> : vector<32x64xf32>
    %115 = tpu.matmul %114, %112, %cst_91 {dimension_numbers = #tpu.dot_dimension_numbers<[1], [0], [0], [1], [0, 0, 1, 1], [], []>} : vector<32x32xbf16>, vector<32x64xbf16>, vector<32x64xf32> -> vector<32x64xf32>
    %116 = arith.addf %110, %115 : vector<32x64xf32>
    %c0_92 = arith.constant 0 : index
    %c0_93 = arith.constant 0 : index
    %117 = vector.load %arg6[%c0_92, %c0_93] : memref<1x64xf32, #tpu.memory_space<vmem>>, vector<1x64xf32>
    %118 = vector.broadcast %117 : vector<1x64xf32> to vector<32x64xf32>
    %119 = arith.addf %116, %118 : vector<32x64xf32>
    %cst_94 = arith.constant 0.000000e+00 : f32
    %120 = vector.broadcast %cst_94 : f32 to vector<32x64xf32>
    %121 = arith.maximumf %119, %120 : vector<32x64xf32>
    %122 = arith.truncf %121 : vector<32x64xf32> to vector<32x64xbf16>
    %cst_95 = arith.constant 0.000000e+00 : f32
    %123 = vector.broadcast %cst_95 : f32 to vector<32x64xf32>
    %c0_96 = arith.constant 0 : index
    %c0_97 = arith.constant 0 : index
    %124 = vector.load %arg7[%c0_96, %c0_97] : memref<288x32xbf16, #tpu.memory_space<vmem>>, vector<32x32xbf16>
    %c0_98 = arith.constant 0 : index
    %c0_99 = arith.constant 0 : index
    %125 = vector.load %arg8[%c0_98, %c0_99] : memref<576x64xbf16, #tpu.memory_space<vmem>>, vector<64x64xbf16>
    %cst_100 = arith.constant dense<0.000000e+00> : vector<32x64xf32>
    %126 = tpu.matmul %124, %122, %cst_100 {dimension_numbers = #tpu.dot_dimension_numbers<[1], [0], [0], [1], [0, 0, 1, 1], [], []>} : vector<32x32xbf16>, vector<32x64xbf16>, vector<32x64xf32> -> vector<32x64xf32>
    %127 = arith.truncf %126 : vector<32x64xf32> to vector<32x64xbf16>
    %cst_101 = arith.constant dense<0.000000e+00> : vector<32x64xf32>
    %128 = tpu.matmul %127, %125, %cst_101 {dimension_numbers = #tpu.dot_dimension_numbers<[1], [0], [0], [1], [0, 0, 1, 1], [], []>} : vector<32x64xbf16>, vector<64x64xbf16>, vector<32x64xf32> -> vector<32x64xf32>
    %129 = arith.addf %123, %128 : vector<32x64xf32>
    %c32_102 = arith.constant 32 : index
    %c0_103 = arith.constant 0 : index
    %130 = vector.load %arg7[%c32_102, %c0_103] : memref<288x32xbf16, #tpu.memory_space<vmem>>, vector<32x32xbf16>
    %c64_104 = arith.constant 64 : index
    %c0_105 = arith.constant 0 : index
    %131 = vector.load %arg8[%c64_104, %c0_105] : memref<576x64xbf16, #tpu.memory_space<vmem>>, vector<64x64xbf16>
    %cst_106 = arith.constant dense<0.000000e+00> : vector<32x64xf32>
    %132 = tpu.matmul %130, %122, %cst_106 {dimension_numbers = #tpu.dot_dimension_numbers<[1], [0], [0], [1], [0, 0, 1, 1], [], []>} : vector<32x32xbf16>, vector<32x64xbf16>, vector<32x64xf32> -> vector<32x64xf32>
    %133 = arith.truncf %132 : vector<32x64xf32> to vector<32x64xbf16>
    %cst_107 = arith.constant dense<0.000000e+00> : vector<32x64xf32>
    %134 = tpu.matmul %133, %131, %cst_107 {dimension_numbers = #tpu.dot_dimension_numbers<[1], [0], [0], [1], [0, 0, 1, 1], [], []>} : vector<32x64xbf16>, vector<64x64xbf16>, vector<32x64xf32> -> vector<32x64xf32>
    %135 = arith.addf %129, %134 : vector<32x64xf32>
    %c64_108 = arith.constant 64 : index
    %c0_109 = arith.constant 0 : index
    %136 = vector.load %arg7[%c64_108, %c0_109] : memref<288x32xbf16, #tpu.memory_space<vmem>>, vector<32x32xbf16>
    %c128_110 = arith.constant 128 : index
    %c0_111 = arith.constant 0 : index
    %137 = vector.load %arg8[%c128_110, %c0_111] : memref<576x64xbf16, #tpu.memory_space<vmem>>, vector<64x64xbf16>
    %cst_112 = arith.constant dense<0.000000e+00> : vector<32x64xf32>
    %138 = tpu.matmul %136, %122, %cst_112 {dimension_numbers = #tpu.dot_dimension_numbers<[1], [0], [0], [1], [0, 0, 1, 1], [], []>} : vector<32x32xbf16>, vector<32x64xbf16>, vector<32x64xf32> -> vector<32x64xf32>
    %139 = arith.truncf %138 : vector<32x64xf32> to vector<32x64xbf16>
    %cst_113 = arith.constant dense<0.000000e+00> : vector<32x64xf32>
    %140 = tpu.matmul %139, %137, %cst_113 {dimension_numbers = #tpu.dot_dimension_numbers<[1], [0], [0], [1], [0, 0, 1, 1], [], []>} : vector<32x64xbf16>, vector<64x64xbf16>, vector<32x64xf32> -> vector<32x64xf32>
    %141 = arith.addf %135, %140 : vector<32x64xf32>
    %c96_114 = arith.constant 96 : index
    %c0_115 = arith.constant 0 : index
    %142 = vector.load %arg7[%c96_114, %c0_115] : memref<288x32xbf16, #tpu.memory_space<vmem>>, vector<32x32xbf16>
    %c192_116 = arith.constant 192 : index
    %c0_117 = arith.constant 0 : index
    %143 = vector.load %arg8[%c192_116, %c0_117] : memref<576x64xbf16, #tpu.memory_space<vmem>>, vector<64x64xbf16>
    %cst_118 = arith.constant dense<0.000000e+00> : vector<32x64xf32>
    %144 = tpu.matmul %142, %122, %cst_118 {dimension_numbers = #tpu.dot_dimension_numbers<[1], [0], [0], [1], [0, 0, 1, 1], [], []>} : vector<32x32xbf16>, vector<32x64xbf16>, vector<32x64xf32> -> vector<32x64xf32>
    %145 = arith.truncf %144 : vector<32x64xf32> to vector<32x64xbf16>
    %cst_119 = arith.constant dense<0.000000e+00> : vector<32x64xf32>
    %146 = tpu.matmul %145, %143, %cst_119 {dimension_numbers = #tpu.dot_dimension_numbers<[1], [0], [0], [1], [0, 0, 1, 1], [], []>} : vector<32x64xbf16>, vector<64x64xbf16>, vector<32x64xf32> -> vector<32x64xf32>
    %147 = arith.addf %141, %146 : vector<32x64xf32>
    %c128_120 = arith.constant 128 : index
    %c0_121 = arith.constant 0 : index
    %148 = vector.load %arg7[%c128_120, %c0_121] : memref<288x32xbf16, #tpu.memory_space<vmem>>, vector<32x32xbf16>
    %c256_122 = arith.constant 256 : index
    %c0_123 = arith.constant 0 : index
    %149 = vector.load %arg8[%c256_122, %c0_123] : memref<576x64xbf16, #tpu.memory_space<vmem>>, vector<64x64xbf16>
    %cst_124 = arith.constant dense<0.000000e+00> : vector<32x64xf32>
    %150 = tpu.matmul %148, %122, %cst_124 {dimension_numbers = #tpu.dot_dimension_numbers<[1], [0], [0], [1], [0, 0, 1, 1], [], []>} : vector<32x32xbf16>, vector<32x64xbf16>, vector<32x64xf32> -> vector<32x64xf32>
    %151 = arith.truncf %150 : vector<32x64xf32> to vector<32x64xbf16>
    %cst_125 = arith.constant dense<0.000000e+00> : vector<32x64xf32>
    %152 = tpu.matmul %151, %149, %cst_125 {dimension_numbers = #tpu.dot_dimension_numbers<[1], [0], [0], [1], [0, 0, 1, 1], [], []>} : vector<32x64xbf16>, vector<64x64xbf16>, vector<32x64xf32> -> vector<32x64xf32>
    %153 = arith.addf %147, %152 : vector<32x64xf32>
    %c160_126 = arith.constant 160 : index
    %c0_127 = arith.constant 0 : index
    %154 = vector.load %arg7[%c160_126, %c0_127] : memref<288x32xbf16, #tpu.memory_space<vmem>>, vector<32x32xbf16>
    %c320 = arith.constant 320 : index
    %c0_128 = arith.constant 0 : index
    %155 = vector.load %arg8[%c320, %c0_128] : memref<576x64xbf16, #tpu.memory_space<vmem>>, vector<64x64xbf16>
    %cst_129 = arith.constant dense<0.000000e+00> : vector<32x64xf32>
    %156 = tpu.matmul %154, %122, %cst_129 {dimension_numbers = #tpu.dot_dimension_numbers<[1], [0], [0], [1], [0, 0, 1, 1], [], []>} : vector<32x32xbf16>, vector<32x64xbf16>, vector<32x64xf32> -> vector<32x64xf32>
    %157 = arith.truncf %156 : vector<32x64xf32> to vector<32x64xbf16>
    %cst_130 = arith.constant dense<0.000000e+00> : vector<32x64xf32>
    %158 = tpu.matmul %157, %155, %cst_130 {dimension_numbers = #tpu.dot_dimension_numbers<[1], [0], [0], [1], [0, 0, 1, 1], [], []>} : vector<32x64xbf16>, vector<64x64xbf16>, vector<32x64xf32> -> vector<32x64xf32>
    %159 = arith.addf %153, %158 : vector<32x64xf32>
    %c192_131 = arith.constant 192 : index
    %c0_132 = arith.constant 0 : index
    %160 = vector.load %arg7[%c192_131, %c0_132] : memref<288x32xbf16, #tpu.memory_space<vmem>>, vector<32x32xbf16>
    %c384_133 = arith.constant 384 : index
    %c0_134 = arith.constant 0 : index
    %161 = vector.load %arg8[%c384_133, %c0_134] : memref<576x64xbf16, #tpu.memory_space<vmem>>, vector<64x64xbf16>
    %cst_135 = arith.constant dense<0.000000e+00> : vector<32x64xf32>
    %162 = tpu.matmul %160, %122, %cst_135 {dimension_numbers = #tpu.dot_dimension_numbers<[1], [0], [0], [1], [0, 0, 1, 1], [], []>} : vector<32x32xbf16>, vector<32x64xbf16>, vector<32x64xf32> -> vector<32x64xf32>
    %163 = arith.truncf %162 : vector<32x64xf32> to vector<32x64xbf16>
    %cst_136 = arith.constant dense<0.000000e+00> : vector<32x64xf32>
    %164 = tpu.matmul %163, %161, %cst_136 {dimension_numbers = #tpu.dot_dimension_numbers<[1], [0], [0], [1], [0, 0, 1, 1], [], []>} : vector<32x64xbf16>, vector<64x64xbf16>, vector<32x64xf32> -> vector<32x64xf32>
    %165 = arith.addf %159, %164 : vector<32x64xf32>
    %c224_137 = arith.constant 224 : index
    %c0_138 = arith.constant 0 : index
    %166 = vector.load %arg7[%c224_137, %c0_138] : memref<288x32xbf16, #tpu.memory_space<vmem>>, vector<32x32xbf16>
    %c448 = arith.constant 448 : index
    %c0_139 = arith.constant 0 : index
    %167 = vector.load %arg8[%c448, %c0_139] : memref<576x64xbf16, #tpu.memory_space<vmem>>, vector<64x64xbf16>
    %cst_140 = arith.constant dense<0.000000e+00> : vector<32x64xf32>
    %168 = tpu.matmul %166, %122, %cst_140 {dimension_numbers = #tpu.dot_dimension_numbers<[1], [0], [0], [1], [0, 0, 1, 1], [], []>} : vector<32x32xbf16>, vector<32x64xbf16>, vector<32x64xf32> -> vector<32x64xf32>
    %169 = arith.truncf %168 : vector<32x64xf32> to vector<32x64xbf16>
    %cst_141 = arith.constant dense<0.000000e+00> : vector<32x64xf32>
    %170 = tpu.matmul %169, %167, %cst_141 {dimension_numbers = #tpu.dot_dimension_numbers<[1], [0], [0], [1], [0, 0, 1, 1], [], []>} : vector<32x64xbf16>, vector<64x64xbf16>, vector<32x64xf32> -> vector<32x64xf32>
    %171 = arith.addf %165, %170 : vector<32x64xf32>
    %c256_142 = arith.constant 256 : index
    %c0_143 = arith.constant 0 : index
    %172 = vector.load %arg7[%c256_142, %c0_143] : memref<288x32xbf16, #tpu.memory_space<vmem>>, vector<32x32xbf16>
    %c512_144 = arith.constant 512 : index
    %c0_145 = arith.constant 0 : index
    %173 = vector.load %arg8[%c512_144, %c0_145] : memref<576x64xbf16, #tpu.memory_space<vmem>>, vector<64x64xbf16>
    %cst_146 = arith.constant dense<0.000000e+00> : vector<32x64xf32>
    %174 = tpu.matmul %172, %122, %cst_146 {dimension_numbers = #tpu.dot_dimension_numbers<[1], [0], [0], [1], [0, 0, 1, 1], [], []>} : vector<32x32xbf16>, vector<32x64xbf16>, vector<32x64xf32> -> vector<32x64xf32>
    %175 = arith.truncf %174 : vector<32x64xf32> to vector<32x64xbf16>
    %cst_147 = arith.constant dense<0.000000e+00> : vector<32x64xf32>
    %176 = tpu.matmul %175, %173, %cst_147 {dimension_numbers = #tpu.dot_dimension_numbers<[1], [0], [0], [1], [0, 0, 1, 1], [], []>} : vector<32x64xbf16>, vector<64x64xbf16>, vector<32x64xf32> -> vector<32x64xf32>
    %177 = arith.addf %171, %176 : vector<32x64xf32>
    %c0_148 = arith.constant 0 : index
    %c0_149 = arith.constant 0 : index
    %178 = vector.load %arg9[%c0_148, %c0_149] : memref<1x64xf32, #tpu.memory_space<vmem>>, vector<1x64xf32>
    %179 = vector.broadcast %178 : vector<1x64xf32> to vector<32x64xf32>
    %180 = arith.addf %177, %179 : vector<32x64xf32>
    %cst_150 = arith.constant 0.000000e+00 : f32
    %181 = vector.broadcast %cst_150 : f32 to vector<32x64xf32>
    %182 = arith.maximumf %180, %181 : vector<32x64xf32>
    %183 = arith.truncf %182 : vector<32x64xf32> to vector<32x64xbf16>
    %cst_151 = arith.constant 0.000000e+00 : f32
    %184 = vector.broadcast %cst_151 : f32 to vector<2x512xf32>
    %185 = vector.extract_strided_slice %183 {offsets = [0, 0], sizes = [2, 64], strides = [1, 1]} : vector<32x64xbf16> to vector<2x64xbf16>
    %c0_152 = arith.constant 0 : index
    %c0_153 = arith.constant 0 : index
    %186 = vector.load %arg10[%c0_152, %c0_153] : memref<1024x512xbf16, #tpu.memory_space<vmem>>, vector<64x512xbf16>
    %cst_154 = arith.constant dense<0.000000e+00> : vector<2x512xf32>
    %187 = tpu.matmul %185, %186, %cst_154 {dimension_numbers = #tpu.dot_dimension_numbers<[1], [0], [0], [1], [0, 0, 1, 1], [], []>} : vector<2x64xbf16>, vector<64x512xbf16>, vector<2x512xf32> -> vector<2x512xf32>
    %188 = arith.addf %184, %187 : vector<2x512xf32>
    %189 = vector.extract_strided_slice %183 {offsets = [2, 0], sizes = [2, 64], strides = [1, 1]} : vector<32x64xbf16> to vector<2x64xbf16>
    %c64_155 = arith.constant 64 : index
    %c0_156 = arith.constant 0 : index
    %190 = vector.load %arg10[%c64_155, %c0_156] : memref<1024x512xbf16, #tpu.memory_space<vmem>>, vector<64x512xbf16>
    %cst_157 = arith.constant dense<0.000000e+00> : vector<2x512xf32>
    %191 = tpu.matmul %189, %190, %cst_157 {dimension_numbers = #tpu.dot_dimension_numbers<[1], [0], [0], [1], [0, 0, 1, 1], [], []>} : vector<2x64xbf16>, vector<64x512xbf16>, vector<2x512xf32> -> vector<2x512xf32>
    %192 = arith.addf %188, %191 : vector<2x512xf32>
    %193 = vector.extract_strided_slice %183 {offsets = [4, 0], sizes = [2, 64], strides = [1, 1]} : vector<32x64xbf16> to vector<2x64xbf16>
    %c128_158 = arith.constant 128 : index
    %c0_159 = arith.constant 0 : index
    %194 = vector.load %arg10[%c128_158, %c0_159] : memref<1024x512xbf16, #tpu.memory_space<vmem>>, vector<64x512xbf16>
    %cst_160 = arith.constant dense<0.000000e+00> : vector<2x512xf32>
    %195 = tpu.matmul %193, %194, %cst_160 {dimension_numbers = #tpu.dot_dimension_numbers<[1], [0], [0], [1], [0, 0, 1, 1], [], []>} : vector<2x64xbf16>, vector<64x512xbf16>, vector<2x512xf32> -> vector<2x512xf32>
    %196 = arith.addf %192, %195 : vector<2x512xf32>
    %197 = vector.extract_strided_slice %183 {offsets = [6, 0], sizes = [2, 64], strides = [1, 1]} : vector<32x64xbf16> to vector<2x64xbf16>
    %c192_161 = arith.constant 192 : index
    %c0_162 = arith.constant 0 : index
    %198 = vector.load %arg10[%c192_161, %c0_162] : memref<1024x512xbf16, #tpu.memory_space<vmem>>, vector<64x512xbf16>
    %cst_163 = arith.constant dense<0.000000e+00> : vector<2x512xf32>
    %199 = tpu.matmul %197, %198, %cst_163 {dimension_numbers = #tpu.dot_dimension_numbers<[1], [0], [0], [1], [0, 0, 1, 1], [], []>} : vector<2x64xbf16>, vector<64x512xbf16>, vector<2x512xf32> -> vector<2x512xf32>
    %200 = arith.addf %196, %199 : vector<2x512xf32>
    %201 = vector.extract_strided_slice %183 {offsets = [8, 0], sizes = [2, 64], strides = [1, 1]} : vector<32x64xbf16> to vector<2x64xbf16>
    %c256_164 = arith.constant 256 : index
    %c0_165 = arith.constant 0 : index
    %202 = vector.load %arg10[%c256_164, %c0_165] : memref<1024x512xbf16, #tpu.memory_space<vmem>>, vector<64x512xbf16>
    %cst_166 = arith.constant dense<0.000000e+00> : vector<2x512xf32>
    %203 = tpu.matmul %201, %202, %cst_166 {dimension_numbers = #tpu.dot_dimension_numbers<[1], [0], [0], [1], [0, 0, 1, 1], [], []>} : vector<2x64xbf16>, vector<64x512xbf16>, vector<2x512xf32> -> vector<2x512xf32>
    %204 = arith.addf %200, %203 : vector<2x512xf32>
    %205 = vector.extract_strided_slice %183 {offsets = [10, 0], sizes = [2, 64], strides = [1, 1]} : vector<32x64xbf16> to vector<2x64xbf16>
    %c320_167 = arith.constant 320 : index
    %c0_168 = arith.constant 0 : index
    %206 = vector.load %arg10[%c320_167, %c0_168] : memref<1024x512xbf16, #tpu.memory_space<vmem>>, vector<64x512xbf16>
    %cst_169 = arith.constant dense<0.000000e+00> : vector<2x512xf32>
    %207 = tpu.matmul %205, %206, %cst_169 {dimension_numbers = #tpu.dot_dimension_numbers<[1], [0], [0], [1], [0, 0, 1, 1], [], []>} : vector<2x64xbf16>, vector<64x512xbf16>, vector<2x512xf32> -> vector<2x512xf32>
    %208 = arith.addf %204, %207 : vector<2x512xf32>
    %209 = vector.extract_strided_slice %183 {offsets = [12, 0], sizes = [2, 64], strides = [1, 1]} : vector<32x64xbf16> to vector<2x64xbf16>
    %c384_170 = arith.constant 384 : index
    %c0_171 = arith.constant 0 : index
    %210 = vector.load %arg10[%c384_170, %c0_171] : memref<1024x512xbf16, #tpu.memory_space<vmem>>, vector<64x512xbf16>
    %cst_172 = arith.constant dense<0.000000e+00> : vector<2x512xf32>
    %211 = tpu.matmul %209, %210, %cst_172 {dimension_numbers = #tpu.dot_dimension_numbers<[1], [0], [0], [1], [0, 0, 1, 1], [], []>} : vector<2x64xbf16>, vector<64x512xbf16>, vector<2x512xf32> -> vector<2x512xf32>
    %212 = arith.addf %208, %211 : vector<2x512xf32>
    %213 = vector.extract_strided_slice %183 {offsets = [14, 0], sizes = [2, 64], strides = [1, 1]} : vector<32x64xbf16> to vector<2x64xbf16>
    %c448_173 = arith.constant 448 : index
    %c0_174 = arith.constant 0 : index
    %214 = vector.load %arg10[%c448_173, %c0_174] : memref<1024x512xbf16, #tpu.memory_space<vmem>>, vector<64x512xbf16>
    %cst_175 = arith.constant dense<0.000000e+00> : vector<2x512xf32>
    %215 = tpu.matmul %213, %214, %cst_175 {dimension_numbers = #tpu.dot_dimension_numbers<[1], [0], [0], [1], [0, 0, 1, 1], [], []>} : vector<2x64xbf16>, vector<64x512xbf16>, vector<2x512xf32> -> vector<2x512xf32>
    %216 = arith.addf %212, %215 : vector<2x512xf32>
    %217 = vector.extract_strided_slice %183 {offsets = [16, 0], sizes = [2, 64], strides = [1, 1]} : vector<32x64xbf16> to vector<2x64xbf16>
    %c512_176 = arith.constant 512 : index
    %c0_177 = arith.constant 0 : index
    %218 = vector.load %arg10[%c512_176, %c0_177] : memref<1024x512xbf16, #tpu.memory_space<vmem>>, vector<64x512xbf16>
    %cst_178 = arith.constant dense<0.000000e+00> : vector<2x512xf32>
    %219 = tpu.matmul %217, %218, %cst_178 {dimension_numbers = #tpu.dot_dimension_numbers<[1], [0], [0], [1], [0, 0, 1, 1], [], []>} : vector<2x64xbf16>, vector<64x512xbf16>, vector<2x512xf32> -> vector<2x512xf32>
    %220 = arith.addf %216, %219 : vector<2x512xf32>
    %221 = vector.extract_strided_slice %183 {offsets = [18, 0], sizes = [2, 64], strides = [1, 1]} : vector<32x64xbf16> to vector<2x64xbf16>
    %c576 = arith.constant 576 : index
    %c0_179 = arith.constant 0 : index
    %222 = vector.load %arg10[%c576, %c0_179] : memref<1024x512xbf16, #tpu.memory_space<vmem>>, vector<64x512xbf16>
    %cst_180 = arith.constant dense<0.000000e+00> : vector<2x512xf32>
    %223 = tpu.matmul %221, %222, %cst_180 {dimension_numbers = #tpu.dot_dimension_numbers<[1], [0], [0], [1], [0, 0, 1, 1], [], []>} : vector<2x64xbf16>, vector<64x512xbf16>, vector<2x512xf32> -> vector<2x512xf32>
    %224 = arith.addf %220, %223 : vector<2x512xf32>
    %225 = vector.extract_strided_slice %183 {offsets = [20, 0], sizes = [2, 64], strides = [1, 1]} : vector<32x64xbf16> to vector<2x64xbf16>
    %c640_181 = arith.constant 640 : index
    %c0_182 = arith.constant 0 : index
    %226 = vector.load %arg10[%c640_181, %c0_182] : memref<1024x512xbf16, #tpu.memory_space<vmem>>, vector<64x512xbf16>
    %cst_183 = arith.constant dense<0.000000e+00> : vector<2x512xf32>
    %227 = tpu.matmul %225, %226, %cst_183 {dimension_numbers = #tpu.dot_dimension_numbers<[1], [0], [0], [1], [0, 0, 1, 1], [], []>} : vector<2x64xbf16>, vector<64x512xbf16>, vector<2x512xf32> -> vector<2x512xf32>
    %228 = arith.addf %224, %227 : vector<2x512xf32>
    %229 = vector.extract_strided_slice %183 {offsets = [22, 0], sizes = [2, 64], strides = [1, 1]} : vector<32x64xbf16> to vector<2x64xbf16>
    %c704 = arith.constant 704 : index
    %c0_184 = arith.constant 0 : index
    %230 = vector.load %arg10[%c704, %c0_184] : memref<1024x512xbf16, #tpu.memory_space<vmem>>, vector<64x512xbf16>
    %cst_185 = arith.constant dense<0.000000e+00> : vector<2x512xf32>
    %231 = tpu.matmul %229, %230, %cst_185 {dimension_numbers = #tpu.dot_dimension_numbers<[1], [0], [0], [1], [0, 0, 1, 1], [], []>} : vector<2x64xbf16>, vector<64x512xbf16>, vector<2x512xf32> -> vector<2x512xf32>
    %232 = arith.addf %228, %231 : vector<2x512xf32>
    %233 = vector.extract_strided_slice %183 {offsets = [24, 0], sizes = [2, 64], strides = [1, 1]} : vector<32x64xbf16> to vector<2x64xbf16>
    %c768_186 = arith.constant 768 : index
    %c0_187 = arith.constant 0 : index
    %234 = vector.load %arg10[%c768_186, %c0_187] : memref<1024x512xbf16, #tpu.memory_space<vmem>>, vector<64x512xbf16>
    %cst_188 = arith.constant dense<0.000000e+00> : vector<2x512xf32>
    %235 = tpu.matmul %233, %234, %cst_188 {dimension_numbers = #tpu.dot_dimension_numbers<[1], [0], [0], [1], [0, 0, 1, 1], [], []>} : vector<2x64xbf16>, vector<64x512xbf16>, vector<2x512xf32> -> vector<2x512xf32>
    %236 = arith.addf %232, %235 : vector<2x512xf32>
    %237 = vector.extract_strided_slice %183 {offsets = [26, 0], sizes = [2, 64], strides = [1, 1]} : vector<32x64xbf16> to vector<2x64xbf16>
    %c832 = arith.constant 832 : index
    %c0_189 = arith.constant 0 : index
    %238 = vector.load %arg10[%c832, %c0_189] : memref<1024x512xbf16, #tpu.memory_space<vmem>>, vector<64x512xbf16>
    %cst_190 = arith.constant dense<0.000000e+00> : vector<2x512xf32>
    %239 = tpu.matmul %237, %238, %cst_190 {dimension_numbers = #tpu.dot_dimension_numbers<[1], [0], [0], [1], [0, 0, 1, 1], [], []>} : vector<2x64xbf16>, vector<64x512xbf16>, vector<2x512xf32> -> vector<2x512xf32>
    %240 = arith.addf %236, %239 : vector<2x512xf32>
    %241 = vector.extract_strided_slice %183 {offsets = [28, 0], sizes = [2, 64], strides = [1, 1]} : vector<32x64xbf16> to vector<2x64xbf16>
    %c896_191 = arith.constant 896 : index
    %c0_192 = arith.constant 0 : index
    %242 = vector.load %arg10[%c896_191, %c0_192] : memref<1024x512xbf16, #tpu.memory_space<vmem>>, vector<64x512xbf16>
    %cst_193 = arith.constant dense<0.000000e+00> : vector<2x512xf32>
    %243 = tpu.matmul %241, %242, %cst_193 {dimension_numbers = #tpu.dot_dimension_numbers<[1], [0], [0], [1], [0, 0, 1, 1], [], []>} : vector<2x64xbf16>, vector<64x512xbf16>, vector<2x512xf32> -> vector<2x512xf32>
    %244 = arith.addf %240, %243 : vector<2x512xf32>
    %245 = vector.extract_strided_slice %183 {offsets = [30, 0], sizes = [2, 64], strides = [1, 1]} : vector<32x64xbf16> to vector<2x64xbf16>
    %c960 = arith.constant 960 : index
    %c0_194 = arith.constant 0 : index
    %246 = vector.load %arg10[%c960, %c0_194] : memref<1024x512xbf16, #tpu.memory_space<vmem>>, vector<64x512xbf16>
    %cst_195 = arith.constant dense<0.000000e+00> : vector<2x512xf32>
    %247 = tpu.matmul %245, %246, %cst_195 {dimension_numbers = #tpu.dot_dimension_numbers<[1], [0], [0], [1], [0, 0, 1, 1], [], []>} : vector<2x64xbf16>, vector<64x512xbf16>, vector<2x512xf32> -> vector<2x512xf32>
    %248 = arith.addf %244, %247 : vector<2x512xf32>
    %c0_196 = arith.constant 0 : index
    %c0_197 = arith.constant 0 : index
    %249 = vector.load %arg11[%c0_196, %c0_197] : memref<1x512xf32, #tpu.memory_space<vmem>>, vector<1x512xf32>
    %250 = vector.broadcast %249 : vector<1x512xf32> to vector<2x512xf32>
    %251 = arith.addf %248, %250 : vector<2x512xf32>
    %252 = arith.truncf %251 : vector<2x512xf32> to vector<2x512xbf16>
    %c0_198 = arith.constant 0 : index
    %c0_199 = arith.constant 0 : index
    %253 = vector.load %arg12[%c0_198, %c0_199] : memref<512x512xbf16, #tpu.memory_space<vmem>>, vector<512x512xbf16>
    %cst_200 = arith.constant dense<0.000000e+00> : vector<2x512xf32>
    %254 = tpu.matmul %252, %253, %cst_200 {dimension_numbers = #tpu.dot_dimension_numbers<[1], [0], [0], [1], [0, 0, 1, 1], [], []>} : vector<2x512xbf16>, vector<512x512xbf16>, vector<2x512xf32> -> vector<2x512xf32>
    %c0_201 = arith.constant 0 : index
    %c0_202 = arith.constant 0 : index
    %255 = vector.load %arg13[%c0_201, %c0_202] : memref<1x512xf32, #tpu.memory_space<vmem>>, vector<1x512xf32>
    %256 = vector.broadcast %255 : vector<1x512xf32> to vector<2x512xf32>
    %257 = arith.addf %254, %256 : vector<2x512xf32>
    %c0_203 = arith.constant 0 : index
    %c0_204 = arith.constant 0 : index
    %258 = vector.load %arg14[%c0_203, %c0_204] : memref<2x512xf32, #tpu.memory_space<vmem>>, vector<2x512xf32>
    tpu.vector_store %arg14[%c0_203, %c0_204], %257 {strides = array<i32>} : memref<2x512xf32, #tpu.memory_space<vmem>>, vector<2x512xf32>,
    return
  }
}

</mosaic_0001>

<bundles_post_ra>
// kernel: perception_forward.1
= control target key start
LH: loop header
LB: loop body
LE: loop exit
PB: predicated region body
PF: predicated region fallthrough
CT: control target
= control target key end

     0   :  { %19 = vsyncpa [#allocation3], 0  ;;  %s19452_s0 = inlined_call_operand.vmem [shape: bf16[512,4], index: 0, kind: input, shape index: {}]   ;;  %s19453_s1 = inlined_call_operand.hbm [shape: bf16[1152,512], index: 1, kind: input, shape index: {}]   ;;  %s19454_s2 = inlined_call_operand.vmem [shape: bf16[36,32], index: 2, kind: input, shape index: {}]   ;;  %s19455_s3 = inlined_call_operand.hbm [shape: f32[1,32], index: 3, kind: input, shape index: {}]   ;;  %s19456_s4 = inlined_call_operand.hbm [shape: bf16[288,128], index: 4, kind: input, shape index: {}]   ;;  %s19457_s5 = inlined_call_operand.vmem [shape: bf16[288,64], index: 5, kind: input, shape index: {}]   ;;  %s19458_s6 = inlined_call_operand.hbm [shape: f32[1,64], index: 6, kind: input, shape index: {}]   ;;  %s19459_s7 = inlined_call_operand.vmem [shape: bf16[288,32], index: 7, kind: input, shape index: {}]   ;;  %s19460_s8 = inlined_call_operand.vmem [shape: bf16[576,64], index: 8, kind: input, shape index: {}]   ;;  %s19461_s9 = inlined_call_operand.hbm [shape: f32[1,64], index: 9, kind: input, shape index: {}]   ;;  %s19462_s10 = inlined_call_operand.hbm [shape: bf16[1024,512], index: 10, kind: input, shape index: {}]   ;;  %s19463_s11 = inlined_call_operand.hbm [shape: f32[1,512], index: 11, kind: input, shape index: {}]   ;;  %s19464_s12 = inlined_call_operand.vmem [shape: bf16[512,512], index: 12, kind: input, shape index: {}]   ;;  %s19465_s13 = inlined_call_operand.hbm [shape: f32[1,512], index: 13, kind: input, shape index: {}]   ;;  %s19466_s14 = inlined_call_operand.hbm [shape: f32[2,512], index: 14, kind: output, shape index: {}]  }
   0x1   :  { %20 = vsyncpa [#allocation6], 0 }
   0x2   :  { %21 = vsyncpa [#allocation9], 0 }
   0x3   :  { %22 = vsyncpa [#allocation12], 0 }
   0x4   :  { %23 = vsyncpa [#allocation15], 0 }
   0x5   :  { %24 = vsyncpa [#allocation4], 0  ;;  %s16481_s29 = smov [#allocation5]   ;;  %s16482_s15 = smov [#allocation8]  }
   0x6   :  { %s47_s30 = sshll.u32 %s16481_s29, 4  ;;  %s71_s16 = sshll.u32 %s16482_s15, 4  ;;  %s48_s30 = int_to_ptr.vmem [resolvable:$true] %s47_s30  ;;  %s72_s16 = int_to_ptr.vmem [resolvable:$true] %s71_s16 }
   0x7   :  { %s16297_s17 = scalar_lea.vmem %s48_s30, 16  ;;  %s16301_s18 = scalar_lea.vmem %s48_s30, 32 }
   0x8   :  { %p16298_p0 = scmp.ne.s32.totalorder %s48_s30, %s16297_s17  ;;  %p16302_p1 = scmp.lt.s32.totalorder %s48_s30, %s48_s30 }
   0x9   :  { %p16303_p2 = scmp.lt.s32.totalorder %s16301_s18, %s16297_s17 }
   0xb   :  { %p16304_p3 = por %p16303_p2, %p16302_p1 }
   0xd   :  { %p16305_p4 = pnand %p16304_p3, %p16298_p0 }
   0xf   :  { %16308 = shalt.err (!%p16305_p4)
}
  0x10   :  { %50 = dma.hbm_to_vmem [thread:$0]  %s19455_s3, 16, %s48_s30, [#allocation6]  }
  0x11   :  { %s16317_s21 = scalar_lea.vmem %s72_s16, 16  ;;  %s16321_s22 = scalar_lea.vmem %s72_s16, 32 }
  0x12   :  { %p16318_p5 = scmp.ne.s32.totalorder %s72_s16, %s16317_s21  ;;  %p16322_p6 = scmp.lt.s32.totalorder %s72_s16, %s72_s16 }
  0x13   :  { %p16323_p7 = scmp.lt.s32.totalorder %s16321_s22, %s16317_s21 }
  0x15   :  { %p16324_p8 = por %p16323_p7, %p16322_p6 }
  0x17   :  { %p16325_p9 = pnand %p16324_p8, %p16318_p5 }
  0x19   :  { %16328 = shalt.err (!%p16325_p9)
}
  0x1a   :  { %74 = dma.hbm_to_vmem [thread:$0]  %s19458_s6, 16, %s72_s16, [#allocation9]  }
  0x1b   :  { %s16483_s25 = smov [#allocation11]   ;;  %s16484_s27 = smov [#allocation2]  }
  0x1c   :  { %s94_s26 = sshll.u32 %s16483_s25, 4  ;;  %s32_s28 = sshll.u32 %s16484_s27, 4  ;;  %s95_s26 = int_to_ptr.vmem [resolvable:$true] %s94_s26  ;;  %s33_s28 = int_to_ptr.vmem [resolvable:$true] %s32_s28 }
  0x1d   :  { %s16337_s29 = scalar_lea.vmem %s95_s26, 32768  ;;  %p16342_p11 = scmp.lt.s32.totalorder %s95_s26, %s95_s26 }
  0x1e   :  { %p16338_p10 = scmp.ne.s32.totalorder %s95_s26, %s16337_s29  ;;  %p16343_p12 = scmp.lt.s32.totalorder %s16337_s29, %s16337_s29 }
  0x20   :  { %p16344_p13 = por %p16343_p12, %p16342_p11 }
  0x22   :  { %p16345_p0 = pnand %p16344_p13, %p16338_p10 }
  0x24   :  { %16348 = shalt.err (!%p16345_p0)
}
  0x25   :  { %s16485_s3 = smov 256   ;;  %s16486_s30 = smov 16  }
  0x26   :  { %100 = dma.hbm_to_vmem [thread:$0]  %s19462_s10, 32768, %s95_s26, [#allocation12], %s16485_s3, %s16485_s3, %s16486_s30  }
  0x27   :  { %s16357_s6 = scalar_lea.vmem %s33_s28, 36864  ;;  %p16362_p2 = scmp.lt.s32.totalorder %s33_s28, %s33_s28 }
  0x28   :  { %p16358_p1 = scmp.ne.s32.totalorder %s33_s28, %s16357_s6  ;;  %p16363_p3 = scmp.lt.s32.totalorder %s16357_s6, %s16357_s6 }
  0x2a   :  { %p16364_p4 = por %p16363_p3, %p16362_p2 }
  0x2c   :  { %p16365_p5 = pnand %p16364_p4, %p16358_p1 }
  0x2e   :  { %16368 = shalt.err (!%p16365_p5)
}
  0x2f   :  { %38 = dma.hbm_to_vmem [thread:$0]  %s19453_s1, 36864, %s33_s28, [#allocation3], %s16485_s3, %s16485_s3, %s16486_s30  }
  0x30   :  { %s16487_s19 = smov [#allocation7]  }
  0x31   :  { %s56_s20 = sshll.u32 %s16487_s19, 4  ;;  %s57_s20 = int_to_ptr.vmem [resolvable:$true] %s56_s20 }
  0x32   :  { %s16377_s21 = scalar_lea.vmem %s57_s20, 2304  ;;  %p16382_p7 = scmp.lt.s32.totalorder %s57_s20, %s57_s20 }
  0x33   :  { %p16378_p6 = scmp.ne.s32.totalorder %s57_s20, %s16377_s21  ;;  %p16383_p8 = scmp.lt.s32.totalorder %s16377_s21, %s16377_s21 }
  0x35   :  { %p16384_p9 = por %p16383_p8, %p16382_p7 }
  0x37   :  { %p16385_p10 = pnand %p16384_p9, %p16378_p6 }
  0x39   :  { %16388 = shalt.err (!%p16385_p10)
}
  0x3a   :  { %s16488_s10 = smov 64   ;;  %s16489_s22 = smov 4  }
  0x3b   :  { %62 = dma.hbm_to_vmem [thread:$0]  %s19456_s4, 2304, %s57_s20, [#allocation6], %s16488_s10, %s16488_s10, %s16489_s22  }
  0x3c   :  { %s16490_s25 = smov [#allocation10]   ;;  %s16491_s1 = smov [#allocation13]  }
  0x3d   :  { %s85_s26 = sshll.u32 %s16490_s25, 4  ;;  %s107_s27 = sshll.u32 %s16491_s1, 4  ;;  %s86_s26 = int_to_ptr.vmem [resolvable:$true] %s85_s26  ;;  %s108_s27 = int_to_ptr.vmem [resolvable:$true] %s107_s27 }
  0x3e   :  { %s16397_s28 = scalar_lea.vmem %s86_s26, 16  ;;  %s16401_s29 = scalar_lea.vmem %s86_s26, 32 }
  0x3f   :  { %p16398_p11 = scmp.ne.s32.totalorder %s86_s26, %s16397_s28  ;;  %p16402_p12 = scmp.lt.s32.totalorder %s86_s26, %s86_s26 }
  0x40   :  { %p16403_p13 = scmp.lt.s32.totalorder %s16401_s29, %s16397_s28 }
  0x42   :  { %p16404_p0 = por %p16403_p13, %p16402_p12 }
  0x44   :  { %p16405_p1 = pnand %p16404_p0, %p16398_p11 }
  0x46   :  { %16408 = shalt.err (!%p16405_p1)
}
  0x47   :  { %88 = dma.hbm_to_vmem [thread:$0]  %s19461_s9, 16, %s86_s26, [#allocation9]  }
  0x48   :  { %s16417_s15 = scalar_lea.vmem %s108_s27, 64  ;;  %p16422_p3 = scmp.lt.s32.totalorder %s108_s27, %s108_s27 }
  0x49   :  { %p16418_p2 = scmp.ne.s32.totalorder %s108_s27, %s16417_s15  ;;  %p16423_p4 = scmp.lt.s32.totalorder %s16417_s15, %s16417_s15 }
  0x4b   :  { %p16424_p5 = por %p16423_p4, %p16422_p3 }
  0x4d   :  { %p16425_p6 = pnand %p16424_p5, %p16418_p2 }
  0x4f   :  { %16428 = shalt.err (!%p16425_p6)
}
  0x50   :  { %110 = dma.hbm_to_vmem [thread:$0]  %s19463_s11, 64, %s108_s27, [#allocation12]  }
  0x51   :  { %s16492_s6 = smov [#allocation14]  }
  0x52   :  { %s119_s16 = sshll.u32 %s16492_s6, 4  ;;  %s120_s16 = int_to_ptr.vmem [resolvable:$true] %s119_s16 }
  0x53   :  { %s16437_s18 = scalar_lea.vmem %s120_s16, 64  ;;  %p16442_p8 = scmp.lt.s32.totalorder %s120_s16, %s120_s16 }
  0x54   :  { %p16438_p7 = scmp.ne.s32.totalorder %s120_s16, %s16437_s18  ;;  %p16443_p9 = scmp.lt.s32.totalorder %s16437_s18, %s16437_s18 }
  0x56   :  { %p16444_p10 = por %p16443_p9, %p16442_p8 }
  0x58   :  { %p16445_p11 = pnand %p16444_p10, %p16438_p7 }
  0x5a   :  { %16448 = shalt.err (!%p16445_p11)
}
  0x5b   :  { %122 = dma.hbm_to_vmem [thread:$0]  %s19465_s13, 64, %s120_s16, [#allocation15]  }
  0x5c   :  { %16469 = dma.done.wait [#allocation3], 36864  }
  0x5d   :  { %16470 = vsyncadd [#allocation3], 4294930432 }
  0x5e   :  { %16471 = dma.done.wait [#allocation6], 2320  }
  0x5f   :  { %16472 = vsyncadd [#allocation6], 4294964976 }
  0x60   :  { %16473 = dma.done.wait [#allocation9], 32  }
  0x61   :  { %16474 = vsyncadd [#allocation9], 4294967264 }
  0x62   :  { %16475 = dma.done.wait [#allocation12], 32832  }
  0x63   :  { %16476 = vsyncadd [#allocation12], 4294934464 }
  0x64   :  { %16477 = dma.done.wait [#allocation15], 64  }
  0x65   :  { %16478 = vsyncadd [#allocation15], 4294967232  ;;  %v16598_v0 = vld [vmem:[%s19452_s0 + $0x78] sm:$0xff]   ;;  %v16621_v4 = vld [vmem:[%s19452_s0 + $0x70] sm:$0xff]   ;;  %vm1223_vm0 = vcmask 1041408   ;;  %vm1198_vm1 = vcmask 31744  }
  0x66   :  { %v16603_v1 = vld [vmem:[%s19452_s0 + $0xf8] sm:$0xff]   ;;  %12961 = vmatprep.subr.bf16.mxu0 %v16598_v0  ;;  %v16627_v5 = vld [vmem:[%s19452_s0 + $0xf0] sm:$0xff]   ;;  %v16645_v8 = vld [vmem:[%s19452_s0 + $0x68] sm:$0xff]   ;;  %vm5406_vm2 = vcmask 261120   ;;  %vm6722_vm3 = vcmask 523264  }
  0x67   :  { %v16609_v2 = vld [vmem:[%s19452_s0 + $0x38] sm:$0xff]   ;;  %13025 = vmatprep.subr.bf16.mxu1 %v16603_v1  ;;  %v16633_v6 = vld [vmem:[%s19452_s0 + $0x30] sm:$0xff]   ;;  %v16651_v9 = vld [vmem:[%s19452_s0 + $0xe8] sm:$0xff]  }
  0x68   :  { %v16615_v3 = vld [vmem:[%s19452_s0 + $0xb8] sm:$0xff]   ;;  %12962 = vmatpush3.bf16.msra.mxu0 %v16609_v2  ;;  %v16639_v7 = vld [vmem:[%s19452_s0 + $0xb0] sm:$0xff]   ;;  %v16657_v10 = vld [vmem:[%s19452_s0 + $0x28] sm:$0xff]  }
  0x69   :  { %13026 = vmatpush3.bf16.msra.mxu1 %v16615_v3  ;;  %12963 = vmatprep.subr.bf16.mxu0 %v16621_v4  ;;  %v16663_v11 = vld [vmem:[%s19452_s0 + $0xa8] sm:$0xff]   ;;  %v16669_v12 = vld [vmem:[%s19452_s0 + $0x60] sm:$0xff]   ;;  %v16693_v16 = vld [vmem:[%s19452_s0 + $0x58] sm:$0xff]  }
  0x6a   :  { %13027 = vmatprep.subr.bf16.mxu1 %v16627_v5  ;;  %v16675_v13 = vld [vmem:[%s19452_s0 + $0xe0] sm:$0xff]   ;;  %v16699_v17 = vld [vmem:[%s19452_s0 + $0xd8] sm:$0xff]   ;;  %v16717_v20 = vld [vmem:[%s19452_s0 + $0x50] sm:$0xff]  }
  0x6b   :  { %v16681_v14 = vld [vmem:[%s19452_s0 + $0x20] sm:$0xff]   ;;  %v16705_v18 = vld [vmem:[%s19452_s0 + $0x18] sm:$0xff]   ;;  %v16723_v21 = vld [vmem:[%s19452_s0 + $0xd0] sm:$0xff]  }
  0x6c   :  { %12964 = vmatpush3.bf16.msra.mxu0 %v16633_v6  ;;  %v16687_v15 = vld [vmem:[%s19452_s0 + $0xa0] sm:$0xff]   ;;  %v16711_v19 = vld [vmem:[%s19452_s0 + $0x98] sm:$0xff]   ;;  %v16729_v22 = vld [vmem:[%s19452_s0 + $0x10] sm:$0xff]  }
  0x6d   :  { %13028 = vmatpush3.bf16.msra.mxu1 %v16639_v7  ;;  %12965 = vmatprep.subr.bf16.mxu0 %v16645_v8  ;;  %v16735_v23 = vld [vmem:[%s19452_s0 + $0x90] sm:$0xff]   ;;  %v16741_v24 = vld [vmem:[%s19452_s0 + $0x48] sm:$0xff]   ;;  %v16765_v28 = vld [vmem:[%s19452_s0 + $0x40] sm:$0xff]  }
  0x6e   :  { %13029 = vmatprep.subr.bf16.mxu1 %v16651_v9  ;;  %v16747_v25 = vld [vmem:[%s19452_s0 + $0xc8] sm:$0xff]   ;;  %v16771_v29 = vld [vmem:[%s19452_s0 + $0xc0] sm:$0xff]  }
  0x6f   :  { %v16753_v26 = vld [vmem:[%s19452_s0 + $0x8] sm:$0xff]   ;;  %v16777_v30 = vld [vmem:[%s19452_s0] sm:$0xff]  }
  0x70   :  { %12966 = vmatpush3.bf16.msra.mxu0 %v16657_v10  ;;  %v16759_v27 = vld [vmem:[%s19452_s0 + $0x88] sm:$0xff]   ;;  %v16783_v31 = vld [vmem:[%s19452_s0 + $0x80] sm:$0xff]  }
  0x71   :  { %13030 = vmatpush3.bf16.msra.mxu1 %v16663_v11  ;;  %12967 = vmatprep.subr.bf16.mxu0 %v16669_v12  ;;  %v15076_v32 = vld [vmem:[#allocation2] ss:$16 sps:$4 sm:$0xff]   ;;  %v15078_v33 = vld [vmem:[#allocation2 + $0x4] ss:$16 sps:$4 sm:$0xff]   ;;  %v15079_v34 = vld [vmem:[#allocation2 + $0x8] ss:$16 sps:$4 sm:$0xff]  }
  0x72   :  { %13031 = vmatprep.subr.bf16.mxu1 %v16675_v13  ;;  %v15081_v35 = vld [vmem:[#allocation2 + $0xc] ss:$16 sps:$4 sm:$0xff]   ;;  %629 = vmatprep.mubr.bf16.mxu0 %v15078_v33  ;;  %v15082_v36 = vld [vmem:[#allocation2 + $0x24] ss:$16 sps:$4 sm:$0xff]   ;;  %v15086_v38 = vld [vmem:[#allocation2 + $0x20] ss:$16 sps:$4 sm:$0xff]  }
  0x73   :  { %726 = vmatprep.mubr.bf16.mxu1 %v15081_v35  ;;  %v15084_v37 = vld [vmem:[#allocation2 + $0x2c] ss:$16 sps:$4 sm:$0xff]   ;;  %v15087_v39 = vld [vmem:[#allocation2 + $0x28] ss:$16 sps:$4 sm:$0xff]   ;;  %v15088_v40 = vld [vmem:[#allocation2 + $0x44] ss:$16 sps:$4 sm:$0xff]  }
  0x74   :  { %12968 = vmatpush3.bf16.msra.mxu0 %v16681_v14  ;;  %v15090_v41 = vld [vmem:[#allocation2 + $0x4c] ss:$16 sps:$4 sm:$0xff]   ;;  %v15092_v42 = vld [vmem:[#allocation2 + $0x40] ss:$16 sps:$4 sm:$0xff]   ;;  %v15093_v43 = vld [vmem:[#allocation2 + $0x48] ss:$16 sps:$4 sm:$0xff]  }
  0x75   :  { %13032 = vmatpush3.bf16.msra.mxu1 %v16687_v15  ;;  %12969 = vmatprep.subr.bf16.mxu0 %v16693_v16  ;;  %v15094_v44 = vld [vmem:[#allocation2 + $0x64] ss:$16 sps:$4 sm:$0xff]   ;;  %v15096_v45 = vld [vmem:[#allocation2 + $0x6c] ss:$16 sps:$4 sm:$0xff]   ;;  %v15098_v46 = vld [vmem:[#allocation2 + $0x60] ss:$16 sps:$4 sm:$0xff]  }
  0x76   :  { %13033 = vmatprep.subr.bf16.mxu1 %v16699_v17  ;;  %v15099_v47 = vld [vmem:[#allocation2 + $0x68] ss:$16 sps:$4 sm:$0xff]   ;;  %v15100_v48 = vld [vmem:[#allocation2 + $0x84] ss:$16 sps:$4 sm:$0xff]   ;;  %v15102_v49 = vld [vmem:[#allocation2 + $0x8c] ss:$16 sps:$4 sm:$0xff]  }
  0x77   :  { %v15104_v50 = vld [vmem:[#allocation2 + $0x80] ss:$16 sps:$4 sm:$0xff]   ;;  %v15105_v51 = vld [vmem:[#allocation2 + $0x88] ss:$16 sps:$4 sm:$0xff]   ;;  %v15106_v52 = vld [vmem:[#allocation2 + $0xa4] ss:$16 sps:$4 sm:$0xff]  }
  0x78   :  { %12970 = vmatpush3.bf16.msra.mxu0 %v16705_v18  ;;  %v15108_v53 = vld [vmem:[#allocation2 + $0xac] ss:$16 sps:$4 sm:$0xff]   ;;  %v15110_v54 = vld [vmem:[#allocation2 + $0xa0] ss:$16 sps:$4 sm:$0xff]   ;;  %v15111_v55 = vld [vmem:[#allocation2 + $0xa8] ss:$16 sps:$4 sm:$0xff]  }
  0x79   :  { %13034 = vmatpush3.bf16.msra.mxu1 %v16711_v19  ;;  %12971 = vmatprep.subr.bf16.mxu0 %v16717_v20  ;;  %v15112_v56 = vld [vmem:[#allocation2 + $0xc4] ss:$16 sps:$4 sm:$0xff]   ;;  %v15114_v57 = vld [vmem:[#allocation2 + $0xcc] ss:$16 sps:$4 sm:$0xff]   ;;  %v15116_v58 = vld [vmem:[#allocation2 + $0xc0] ss:$16 sps:$4 sm:$0xff]  }
  0x7a   :  { %13035 = vmatprep.subr.bf16.mxu1 %v16723_v21  ;;  %v15117_v59 = vld [vmem:[#allocation2 + $0xc8] ss:$16 sps:$4 sm:$0xff]   ;;  %v15118_v60 = vld [vmem:[#allocation2 + $0xe4] ss:$16 sps:$4 sm:$0xff]   ;;  %v15120_v61 = vld [vmem:[#allocation2 + $0xec] ss:$16 sps:$4 sm:$0xff]  }
  0x7b   :  { %v15122_v62 = vld [vmem:[#allocation2 + $0xe0] ss:$16 sps:$4 sm:$0xff]   ;;  %v15123_v63 = vld [vmem:[#allocation2 + $0xe8] ss:$16 sps:$4 sm:$0xff]  }
  0x7c   :  { %12972 = vmatpush3.bf16.msra.mxu0 %v16729_v22  ;;  %v15171_v33 = vld [vmem:[#allocation2 + $0x1e8] ss:$16 sps:$4 sm:$0xff]  }
  0x7d   :  { %13036 = vmatpush3.bf16.msra.mxu1 %v16735_v23  ;;  %12973 = vmatprep.subr.bf16.mxu0 %v16741_v24 }
  0x7e   :  { %13037 = vmatprep.subr.bf16.mxu1 %v16747_v25 }
  0x80   :  { %12974 = vmatpush3.bf16.msra.mxu0 %v16753_v26 }
  0x81   :  { %13038 = vmatpush3.bf16.msra.mxu1 %v16759_v27  ;;  %12975 = vmatprep.subr.bf16.mxu0 %v16765_v28 }
  0x82   :  { %13039 = vmatprep.subr.bf16.mxu1 %v16771_v29 }
  0x84   :  { %12976 = vmatpush3.bf16.msra.mxu0 %v16777_v30 }
  0x85   :  { %13040 = vmatpush3.bf16.msra.mxu1 %v16783_v31  ;;  %13089 = vmatprep.subr.bf16.mxu0 %v16598_v0  ;;  %v15126_v0 = vld [vmem:[#allocation2 + $0x104] ss:$16 sps:$4 sm:$0xff]  }
  0x86   :  { %13153 = vmatprep.subr.bf16.mxu1 %v16603_v1 }
  0x87   :  { %630 = vmatmul.mubr.bf16.vlgmr.msra.gmra.mxu0 %v15076_v32  ;;  %v15170_v32 = vld [vmem:[#allocation2 + $0x1e0] ss:$16 sps:$4 sm:$0xff]  }
  0x88   :  { %727 = vmatmul.mubr.bf16.vlgmr.msra.gmra.mxu1 %v15079_v34  ;;  %637 = vmatprep.mubr.bf16.mxu0 %v15082_v36  ;;  %v15172_v34 = vld [vmem:[%s19454_s2] ss:$0 sps:$4 sm:$0xcc]  }
  0x89   :  { %734 = vmatprep.mubr.bf16.mxu1 %v15084_v37  ;;  %13090 = vmatpush3.bf16.msra.mxu0 %v16609_v2  ;;  %v15129_v2 = vld [vmem:[#allocation2 + $0x10c] ss:$16 sps:$4 sm:$0xff]   ;;  %v1197_v35 = vrot.slane %v15172_v34, 2 }
  0x8a   :  { %13154 = vmatpush3.bf16.msra.mxu1 %v16615_v3  ;;  %13091 = vmatprep.subr.bf16.mxu0 %v16621_v4  ;;  %v15124_v3 = vld [vmem:[#allocation2 + $0x100] ss:$16 sps:$4 sm:$0xff]   ;;  %v15127_v4 = vld [vmem:[#allocation2 + $0x108] ss:$16 sps:$4 sm:$0xff]  }
  0x8b   :  { %13155 = vmatprep.subr.bf16.mxu1 %v16627_v5  ;;  %v15130_v5 = vld [vmem:[#allocation2 + $0x124] ss:$16 sps:$4 sm:$0xff]   ;;  %v1225_v36 = vsel %vm1223_vm0, %v1197_v35, 0  ;;  %v16833_v37 = vld [vmem:[%s19452_s0 + $0x78] sm:$0xff]   ;;  %v16183_v34 = vld [vmem:[%s19452_s0 + $0xa8] sm:$0xff]  }
  0x8d   :  { %13092 = vmatpush3.bf16.msra.mxu0 %v16633_v6  ;;  %v15132_v6 = vld [vmem:[#allocation2 + $0x12c] ss:$16 sps:$4 sm:$0xff]  }
  0x8e   :  { %13156 = vmatpush3.bf16.msra.mxu1 %v16639_v7  ;;  %13093 = vmatprep.subr.bf16.mxu0 %v16645_v8  ;;  %v15134_v7 = vld [vmem:[#allocation2 + $0x120] ss:$16 sps:$4 sm:$0xff]   ;;  %v15135_v8 = vld [vmem:[#allocation2 + $0x128] ss:$16 sps:$4 sm:$0xff]  }
  0x8f   :  { %638 = vmatmul.mubr.bf16.gmra.mxu0 %v15086_v38  ;;  %13157 = vmatprep.subr.bf16.mxu1 %v16651_v9  ;;  %v15136_v9 = vld [vmem:[#allocation2 + $0x144] ss:$16 sps:$4 sm:$0xff]  }
  0x90   :  { %735 = vmatmul.mubr.bf16.gmra.mxu1 %v15087_v39  ;;  %645 = vmatprep.mubr.bf16.mxu0 %v15088_v40 }
  0x91   :  { %742 = vmatprep.mubr.bf16.mxu1 %v15090_v41  ;;  %13094 = vmatpush3.bf16.msra.mxu0 %v16657_v10  ;;  %v15138_v10 = vld [vmem:[#allocation2 + $0x14c] ss:$16 sps:$4 sm:$0xff]  }
  0x92   :  { %13158 = vmatpush3.bf16.msra.mxu1 %v16663_v11  ;;  %13095 = vmatprep.subr.bf16.mxu0 %v16669_v12  ;;  %v15140_v11 = vld [vmem:[#allocation2 + $0x140] ss:$16 sps:$4 sm:$0xff]   ;;  %v15141_v12 = vld [vmem:[#allocation2 + $0x148] ss:$16 sps:$4 sm:$0xff]  }
  0x93   :  { %13159 = vmatprep.subr.bf16.mxu1 %v16675_v13  ;;  %v15142_v13 = vld [vmem:[#allocation2 + $0x164] ss:$16 sps:$4 sm:$0xff]  }
  0x95   :  { %13096 = vmatpush3.bf16.msra.mxu0 %v16681_v14  ;;  %v15144_v14 = vld [vmem:[#allocation2 + $0x16c] ss:$16 sps:$4 sm:$0xff]  }
  0x96   :  { %13160 = vmatpush3.bf16.msra.mxu1 %v16687_v15  ;;  %13097 = vmatprep.subr.bf16.mxu0 %v16693_v16  ;;  %v244_v15 = vld [vmem:[%s19454_s2] sm:$0x3] }
  0x97   :  { %646 = vmatmul.mubr.bf16.gmra.mxu0 %v15092_v42  ;;  %13161 = vmatprep.subr.bf16.mxu1 %v16699_v17  ;;  %v15146_v16 = vld [vmem:[#allocation2 + $0x160] ss:$16 sps:$4 sm:$0xff]   ;;  %v1349_v17 = vsel %vm1223_vm0, %v244_v15, 0 }
  0x98   :  { %743 = vmatmul.mubr.bf16.gmra.mxu1 %v15093_v43  ;;  %653 = vmatprep.mubr.bf16.mxu0 %v15094_v44 }
  0x99   :  { %750 = vmatprep.mubr.bf16.mxu1 %v15096_v45  ;;  %13098 = vmatpush3.bf16.msra.mxu0 %v16705_v18  ;;  %v15147_v18 = vld [vmem:[#allocation2 + $0x168] ss:$16 sps:$4 sm:$0xff]  }
  0x9a   :  { %13162 = vmatpush3.bf16.msra.mxu1 %v16711_v19  ;;  %13099 = vmatprep.subr.bf16.mxu0 %v16717_v20  ;;  %v15148_v19 = vld [vmem:[#allocation2 + $0x184] ss:$16 sps:$4 sm:$0xff]   ;;  %v15150_v20 = vld [vmem:[#allocation2 + $0x18c] ss:$16 sps:$4 sm:$0xff]  }
  0x9b   :  { %13163 = vmatprep.subr.bf16.mxu1 %v16723_v21  ;;  %v15152_v21 = vld [vmem:[#allocation2 + $0x180] ss:$16 sps:$4 sm:$0xff]  }
  0x9d   :  { %13100 = vmatpush3.bf16.msra.mxu0 %v16729_v22  ;;  %v15153_v22 = vld [vmem:[#allocation2 + $0x188] ss:$16 sps:$4 sm:$0xff]  }
  0x9e   :  { %13164 = vmatpush3.bf16.msra.mxu1 %v16735_v23  ;;  %13101 = vmatprep.subr.bf16.mxu0 %v16741_v24  ;;  %v15154_v23 = vld [vmem:[#allocation2 + $0x1a4] ss:$16 sps:$4 sm:$0xff]   ;;  %v15156_v24 = vld [vmem:[#allocation2 + $0x1ac] ss:$16 sps:$4 sm:$0xff]  }
  0x9f   :  { %654 = vmatmul.mubr.bf16.gmra.mxu0 %v15098_v46  ;;  %13165 = vmatprep.subr.bf16.mxu1 %v16747_v25  ;;  %v15158_v25 = vld [vmem:[#allocation2 + $0x1a0] ss:$16 sps:$4 sm:$0xff]  }
  0xa0   :  { %751 = vmatmul.mubr.bf16.gmra.mxu1 %v15099_v47  ;;  %661 = vmatprep.mubr.bf16.mxu0 %v15100_v48 }
  0xa1   :  { %758 = vmatprep.mubr.bf16.mxu1 %v15102_v49  ;;  %13102 = vmatpush3.bf16.msra.mxu0 %v16753_v26  ;;  %v15159_v26 = vld [vmem:[#allocation2 + $0x1a8] ss:$16 sps:$4 sm:$0xff]  }
  0xa2   :  { %13166 = vmatpush3.bf16.msra.mxu1 %v16759_v27  ;;  %13103 = vmatprep.subr.bf16.mxu0 %v16765_v28  ;;  %v15160_v27 = vld [vmem:[#allocation2 + $0x1c4] ss:$16 sps:$4 sm:$0xff]   ;;  %v15162_v28 = vld [vmem:[#allocation2 + $0x1cc] ss:$16 sps:$4 sm:$0xff]  }
  0xa3   :  { %13167 = vmatprep.subr.bf16.mxu1 %v16771_v29  ;;  %v15165_v29 = vld [vmem:[#allocation2 + $0x1c8] ss:$16 sps:$4 sm:$0xff]  }
  0xa5   :  { %13104 = vmatpush3.bf16.msra.mxu0 %v16777_v30  ;;  %v15166_v30 = vld [vmem:[#allocation2 + $0x1e4] ss:$16 sps:$4 sm:$0xff]  }
  0xa6   :  { %13168 = vmatpush3.bf16.msra.mxu1 %v16783_v31  ;;  %v15168_v31 = vld [vmem:[#allocation2 + $0x1ec] ss:$16 sps:$4 sm:$0xff]   ;;  %15020 = vmatprep.subr.msk.bf16.mxu0 %vm1223_vm0, %v1197_v35 }
  0xa7   :  { %662 = vmatmul.mubr.bf16.gmra.mxu0 %v15104_v50  ;;  %15021 = vmatprep.subr.msk.bf16.mxu1 %vm1223_vm0, %v244_v15 }
  0xa8   :  { %759 = vmatmul.mubr.bf16.gmra.mxu1 %v15105_v51  ;;  %669 = vmatprep.mubr.bf16.mxu0 %v15106_v52 }
  0xa9   :  { %766 = vmatprep.mubr.bf16.mxu1 %v15108_v53 }
  0xaf   :  { %670 = vmatmul.mubr.bf16.gmra.mxu0 %v15110_v54 }
  0xb0   :  { %767 = vmatmul.mubr.bf16.gmra.mxu1 %v15111_v55  ;;  %677 = vmatprep.mubr.bf16.mxu0 %v15112_v56 }
  0xb1   :  { %774 = vmatprep.mubr.bf16.mxu1 %v15114_v57 }
  0xb7   :  { %678 = vmatmul.mubr.bf16.gmra.mxu0 %v15116_v58 }
  0xb8   :  { %775 = vmatmul.mubr.bf16.gmra.mxu1 %v15117_v59  ;;  %685 = vmatprep.mubr.bf16.mxu0 %v15118_v60 }
  0xb9   :  { %782 = vmatprep.mubr.bf16.mxu1 %v15120_v61 }
  0xbf   :  { %686 = vmatmul.mubr.bf16.gmra.mxu0 %v15122_v62 }
  0xc0   :  { %783 = vmatmul.mubr.bf16.gmra.mxu1 %v15123_v63  ;;  %1024 = vmatprep.mubr.bf16.mxu0 %v15126_v0 }
  0xc1   :  { %1121 = vmatprep.mubr.bf16.mxu1 %v15129_v2 }
  0xc7   :  { %1025 = vmatmul.mubr.bf16.vlgmr.msra.gmra.mxu0 %v15124_v3 }
  0xc8   :  { %1122 = vmatmul.mubr.bf16.vlgmr.msra.gmra.mxu1 %v15127_v4  ;;  %1032 = vmatprep.mubr.bf16.mxu0 %v15130_v5 }
  0xc9   :  { %1129 = vmatprep.mubr.bf16.mxu1 %v15132_v6  ;;  %14429 = vmatpush3.bf16.msra.mxu1 %v1349_v17 }
  0xca   :  { %13299 = vmatprep.subr.bf16.mxu1 %v16603_v1  ;;  %v15164_v1 = vld [vmem:[#allocation2 + $0x1c0] ss:$16 sps:$4 sm:$0xff]   ;;  %14411 = vmatpush3.bf16.msra.mxu0 %v1225_v36 }
  0xcb   :  { %13235 = vmatprep.subr.bf16.mxu0 %v16833_v37 }
  0xcf   :  { %1033 = vmatmul.mubr.bf16.gmra.mxu0 %v15134_v7 }
  0xd0   :  { %1130 = vmatmul.mubr.bf16.gmra.mxu1 %v15135_v8  ;;  %1040 = vmatprep.mubr.bf16.mxu0 %v15136_v9 }
  0xd1   :  { %1137 = vmatprep.mubr.bf16.mxu1 %v15138_v10 }
  0xd7   :  { %1041 = vmatmul.mubr.bf16.gmra.mxu0 %v15140_v11 }
  0xd8   :  { %1138 = vmatmul.mubr.bf16.gmra.mxu1 %v15141_v12  ;;  %1048 = vmatprep.mubr.bf16.mxu0 %v15142_v13 }
  0xd9   :  { %1145 = vmatprep.mubr.bf16.mxu1 %v15144_v14 }
  0xdf   :  { %1049 = vmatmul.mubr.bf16.gmra.mxu0 %v15146_v16  ;;  %v16179_v16 = vld [vmem:[%s19452_s0 + $0xb8] sm:$0xff]  }
  0xe0   :  { %1146 = vmatmul.mubr.bf16.gmra.mxu1 %v15147_v18  ;;  %1056 = vmatprep.mubr.bf16.mxu0 %v15148_v19  ;;  %v16180_v19 = vld [vmem:[%s19452_s0 + $0xf0] sm:$0xff]  }
  0xe1   :  { %1153 = vmatprep.mubr.bf16.mxu1 %v15150_v20 }
  0xe7   :  { %1057 = vmatmul.mubr.bf16.gmra.mxu0 %v15152_v21 }
  0xe8   :  { %1154 = vmatmul.mubr.bf16.gmra.mxu1 %v15153_v22  ;;  %1064 = vmatprep.mubr.bf16.mxu0 %v15154_v23 }
  0xe9   :  { %1161 = vmatprep.mubr.bf16.mxu1 %v15156_v24 }
  0xef   :  { %1065 = vmatmul.mubr.bf16.gmra.mxu0 %v15158_v25  ;;  %v16181_v25 = vld [vmem:[%s19452_s0 + $0xb0] sm:$0xff]  }
  0xf0   :  { %1162 = vmatmul.mubr.bf16.gmra.mxu1 %v15159_v26  ;;  %1072 = vmatprep.mubr.bf16.mxu0 %v15160_v27 }
  0xf1   :  { %1169 = vmatprep.mubr.bf16.mxu1 %v15162_v28  ;;  %v16182_v28 = vld [vmem:[%s19452_s0 + $0xe8] sm:$0xff]  }
  0xf7   :  { %1073 = vmatmul.mubr.bf16.gmra.mxu0 %v15164_v1 }
  0xf8   :  { %1170 = vmatmul.mubr.bf16.gmra.mxu1 %v15165_v29  ;;  %1080 = vmatprep.mubr.bf16.mxu0 %v15166_v30 }
  0xf9   :  { %1177 = vmatprep.mubr.bf16.mxu1 %v15168_v31 }
  0xff   :  { %1081 = vmatmul.mubr.bf16.gmra.mxu0 %v15170_v32 }
 0x100   :  { %1178 = vmatmul.mubr.bf16.gmra.mxu1 %v15171_v33 }
 0x147   :  { %v12977_v38 = vpop.f32.mrf.mxu0 }
 0x148   :  { %v13041_v39 = vpop.f32.mrf.mxu1 }
 0x149   :  { %v12978_v40 = vpop.f32.mrf.mxu0 }
 0x14a   :  { %v13042_v41 = vpop.f32.mrf.mxu1  ;;  %v12979_v44 = vadd.f32 %v12978_v40, %v12977_v38  ;;  %v16184_v38 = vld [vmem:[%s19452_s0 + $0xe0] sm:$0xff]  }
 0x14b   :  { %v12980_v42 = vpop.f32.mrf.mxu0  ;;  %v13043_v45 = vadd.f32 %v13042_v41, %v13041_v39 }
 0x14c   :  { %v13044_v43 = vpop.f32.mrf.mxu1 }
 0x14d   :  { %v12981_v46 = vpop.f32.mrf.mxu0  ;;  %v729_v52 = vadd.f32 %v13043_v45, %v12979_v44  ;;  %v16185_v44 = vld [vmem:[%s19452_s0 + $0xa0] sm:$0xff]  }
 0x14e   :  { %v12982_v47 = vadd.f32 %v12981_v46, %v12980_v42  ;;  %v13045_v48 = vpop.f32.mrf.mxu1 }
 0x14f   :  { %v13046_v49 = vadd.f32 %v13045_v48, %v13044_v43  ;;  %v12983_v50 = vpop.f32.mrf.mxu0 }
 0x150   :  { %v13047_v51 = vpop.f32.mrf.mxu1 }
 0x151   :  { %v732_v53 = vadd.f32 %v13046_v49, %v12982_v47  ;;  %v12984_v54 = vpop.f32.mrf.mxu0  ;;  %v16186_v47 = vld [vmem:[%s19452_s0 + $0xd8] sm:$0xff]  }
 0x152   :  { %v13048_v55 = vpop.f32.mrf.mxu1  ;;  %v12985_v59 = vadd.f32 %v12984_v54, %v12983_v50  ;;  %v16187_v54 = vld [vmem:[%s19452_s0 + $0x98] sm:$0xff]  }
 0x153   :  { %v791_v56 = vpack.c.bf16 %v732_v53, %v729_v52  ;;  %v12986_v57 = vpop.f32.mrf.mxu0  ;;  %v13049_v60 = vadd.f32 %v13048_v55, %v13047_v51 }
 0x154   :  { %v13050_v58 = vpop.f32.mrf.mxu1 }
 0x155   :  { %14430 = vmatprep.mubr.msk.bf16.mxu1 %vm1198_vm1, %v791_v56  ;;  %v12987_v61 = vpop.f32.mrf.mxu0  ;;  %v737_v4 = vadd.f32 %v13049_v60, %v12985_v59 }
 0x156   :  { %v12988_v62 = vadd.f32 %v12987_v61, %v12986_v57  ;;  %v13051_v63 = vpop.f32.mrf.mxu1  ;;  %v16188_v57 = vld [vmem:[%s19452_s0 + $0xd0] sm:$0xff]  }
 0x157   :  { %v13052_v0 = vadd.f32 %v13051_v63, %v13050_v58  ;;  %v12989_v2 = vpop.f32.mrf.mxu0  ;;  %v16189_v63 = vld [vmem:[%s19452_s0 + $0x90] sm:$0xff]  }
 0x158   :  { %v13053_v3 = vpop.f32.mrf.mxu1 }
 0x159   :  { %v740_v5 = vadd.f32 %v13052_v0, %v12988_v62  ;;  %v12990_v6 = vpop.f32.mrf.mxu0 }
 0x15a   :  { %v13054_v7 = vpop.f32.mrf.mxu1  ;;  %v12991_v11 = vadd.f32 %v12990_v6, %v12989_v2 }
 0x15b   :  { %v792_v8 = vpack.c.bf16 %v740_v5, %v737_v4  ;;  %v12992_v9 = vpop.f32.mrf.mxu0  ;;  %v13055_v12 = vadd.f32 %v13054_v7, %v13053_v3  ;;  %v16190_v3 = vld [vmem:[%s19452_s0 + $0xc8] sm:$0xff]  }
 0x15c   :  { %v13056_v10 = vpop.f32.mrf.mxu1 }
 0x15d   :  { %14431 = vmatmul.mubr.msk.bf16.vlgmr.msra.gmra.mxu1 %vm1198_vm1, %v792_v8  ;;  %v12993_v13 = vpop.f32.mrf.mxu0  ;;  %v745_v21 = vadd.f32 %v13055_v12, %v12991_v11 }
 0x15e   :  { %v12994_v14 = vadd.f32 %v12993_v13, %v12992_v9  ;;  %v13057_v15 = vpop.f32.mrf.mxu1  ;;  %13300 = vmatpush3.bf16.msra.mxu1 %v16179_v16  ;;  %v16192_v13 = vld [vmem:[%s19452_s0 + $0xc0] sm:$0xff]  }
 0x15f   :  { %v13058_v17 = vadd.f32 %v13057_v15, %v13056_v10  ;;  %v12995_v18 = vpop.f32.mrf.mxu0  ;;  %13301 = vmatprep.subr.bf16.mxu1 %v16180_v19  ;;  %v16191_v10 = vld [vmem:[%s19452_s0 + $0x88] sm:$0xff]   ;;  %v16193_v19 = vld [vmem:[%s19452_s0 + $0x80] sm:$0xff]  }
 0x160   :  { %v13059_v20 = vpop.f32.mrf.mxu1 }
 0x161   :  { %v748_v22 = vadd.f32 %v13058_v17, %v12994_v14  ;;  %v12996_v23 = vpop.f32.mrf.mxu0 }
 0x162   :  { %v13060_v24 = vpop.f32.mrf.mxu1  ;;  %13302 = vmatpush3.bf16.msra.mxu1 %v16181_v25  ;;  %v12997_v29 = vadd.f32 %v12996_v23, %v12995_v18 }
 0x163   :  { %v793_v26 = vpack.c.bf16 %v748_v22, %v745_v21  ;;  %v12998_v27 = vpop.f32.mrf.mxu0  ;;  %13303 = vmatprep.subr.bf16.mxu1 %v16182_v28  ;;  %v13061_v30 = vadd.f32 %v13060_v24, %v13059_v20 }
 0x164   :  { %v13062_v1 = vpop.f32.mrf.mxu1 }
 0x165   :  { %14434 = vmatprep.mubr.msk.bf16.mxu1 %vm1198_vm1, %v793_v26  ;;  %v12999_v31 = vpop.f32.mrf.mxu0  ;;  %v753_v40 = vadd.f32 %v13061_v30, %v12997_v29 }
 0x166   :  { %v13000_v32 = vadd.f32 %v12999_v31, %v12998_v27  ;;  %v13063_v33 = vpop.f32.mrf.mxu1  ;;  %13304 = vmatpush3.bf16.msra.mxu1 %v16183_v34 }
 0x167   :  { %v13064_v35 = vadd.f32 %v13063_v33, %v13062_v1  ;;  %v13001_v36 = vpop.f32.mrf.mxu0  ;;  %13305 = vmatprep.subr.bf16.mxu1 %v16184_v38 }
 0x168   :  { %v13065_v39 = vpop.f32.mrf.mxu1 }
 0x169   :  { %v756_v41 = vadd.f32 %v13064_v35, %v13000_v32  ;;  %v13002_v42 = vpop.f32.mrf.mxu0 }
 0x16a   :  { %v13066_v43 = vpop.f32.mrf.mxu1  ;;  %13306 = vmatpush3.bf16.msra.mxu1 %v16185_v44  ;;  %v13003_v49 = vadd.f32 %v13002_v42, %v13001_v36 }
 0x16b   :  { %v794_v45 = vpack.c.bf16 %v756_v41, %v753_v40  ;;  %v13004_v46 = vpop.f32.mrf.mxu0  ;;  %13307 = vmatprep.subr.bf16.mxu1 %v16186_v47  ;;  %v13067_v50 = vadd.f32 %v13066_v43, %v13065_v39 }
 0x16c   :  { %v13068_v48 = vpop.f32.mrf.mxu1 }
 0x16d   :  { %14435 = vmatmul.mubr.msk.bf16.gmra.mxu1 %vm1198_vm1, %v794_v45  ;;  %v13005_v51 = vpop.f32.mrf.mxu0  ;;  %v761_v59 = vadd.f32 %v13067_v50, %v13003_v49  ;;  %v15175_v45 = vld [vmem:[#allocation2 + $0x20c] ss:$16 sps:$4 sm:$0xff]  }
 0x16e   :  { %v13006_v52 = vadd.f32 %v13005_v51, %v13004_v46  ;;  %v13069_v53 = vpop.f32.mrf.mxu1  ;;  %13308 = vmatpush3.bf16.msra.mxu1 %v16187_v54 }
 0x16f   :  { %v13070_v55 = vadd.f32 %v13069_v53, %v13068_v48  ;;  %v13007_v56 = vpop.f32.mrf.mxu0  ;;  %13309 = vmatprep.subr.bf16.mxu1 %v16188_v57 }
 0x170   :  { %v13071_v58 = vpop.f32.mrf.mxu1 }
 0x171   :  { %v764_v60 = vadd.f32 %v13070_v55, %v13006_v52  ;;  %v13008_v61 = vpop.f32.mrf.mxu0 }
 0x172   :  { %v13072_v62 = vpop.f32.mrf.mxu1  ;;  %13310 = vmatpush3.bf16.msra.mxu1 %v16189_v63  ;;  %v13009_v5 = vadd.f32 %v13008_v61, %v13007_v56 }
 0x173   :  { %v795_v0 = vpack.c.bf16 %v764_v60, %v761_v59  ;;  %v13010_v2 = vpop.f32.mrf.mxu0  ;;  %13311 = vmatprep.subr.bf16.mxu1 %v16190_v3  ;;  %v13073_v6 = vadd.f32 %v13072_v62, %v13071_v58  ;;  %v15173_v60 = vld [vmem:[#allocation2 + $0x208] ss:$16 sps:$4 sm:$0xff]   ;;  %v15179_v62 = vld [vmem:[#allocation2 + $0x22c] ss:$16 sps:$4 sm:$0xff]  }
 0x174   :  { %v13074_v4 = vpop.f32.mrf.mxu1 }
 0x175   :  { %14438 = vmatprep.mubr.msk.bf16.mxu1 %vm1198_vm1, %v795_v0  ;;  %v13011_v7 = vpop.f32.mrf.mxu0  ;;  %v769_v15 = vadd.f32 %v13073_v6, %v13009_v5 }
 0x176   :  { %v13012_v8 = vadd.f32 %v13011_v7, %v13010_v2  ;;  %v13075_v9 = vpop.f32.mrf.mxu1  ;;  %13312 = vmatpush3.bf16.msra.mxu1 %v16191_v10 }
 0x177   :  { %v13076_v11 = vadd.f32 %v13075_v9, %v13074_v4  ;;  %v13013_v12 = vpop.f32.mrf.mxu0  ;;  %13313 = vmatprep.subr.bf16.mxu1 %v16192_v13 }
 0x178   :  { %v13077_v14 = vpop.f32.mrf.mxu1 }
 0x179   :  { %v772_v16 = vadd.f32 %v13076_v11, %v13012_v8  ;;  %v13014_v17 = vpop.f32.mrf.mxu0 }
 0x17a   :  { %v13078_v18 = vpop.f32.mrf.mxu1  ;;  %13314 = vmatpush3.bf16.msra.mxu1 %v16193_v19  ;;  %v13015_v23 = vadd.f32 %v13014_v17, %v13013_v12  ;;  %v16194_v12 = vld [vmem:[%s19452_s0 + $0x38] sm:$0xff]  }
 0x17b   :  { %v796_v20 = vpack.c.bf16 %v772_v16, %v769_v15  ;;  %v13016_v21 = vpop.f32.mrf.mxu0  ;;  %13372 = vmatprep.subr.bf16.mxu1 %v16833_v37  ;;  %v13079_v24 = vadd.f32 %v13078_v18, %v13077_v14  ;;  %v15181_v15 = vld [vmem:[#allocation2 + $0x228] ss:$16 sps:$4 sm:$0xff]   ;;  %v16195_v16 = vld [vmem:[%s19452_s0 + $0x70] sm:$0xff]   ;;  %v15185_v18 = vld [vmem:[#allocation2 + $0x24c] ss:$16 sps:$4 sm:$0xff]  }
 0x17c   :  { %v13080_v22 = vpop.f32.mrf.mxu1 }
 0x17d   :  { %14439 = vmatmul.mubr.msk.bf16.gmra.mxu1 %vm1198_vm1, %v796_v20  ;;  %v13017_v25 = vpop.f32.mrf.mxu0  ;;  %v777_v30 = vadd.f32 %v13079_v24, %v13015_v23  ;;  %v16196_v23 = vld [vmem:[%s19452_s0 + $0x30] sm:$0xff]  }
 0x17e   :  { %v13018_v26 = vadd.f32 %v13017_v25, %v13016_v21  ;;  %v13081_v27 = vpop.f32.mrf.mxu1 }
 0x17f   :  { %v13082_v28 = vadd.f32 %v13081_v27, %v13080_v22  ;;  %v13019_v1 = vpop.f32.mrf.mxu0 }
 0x180   :  { %v13083_v29 = vpop.f32.mrf.mxu1 }
 0x181   :  { %v780_v31 = vadd.f32 %v13082_v28, %v13018_v26  ;;  %v13020_v32 = vpop.f32.mrf.mxu0  ;;  %v16197_v26 = vld [vmem:[%s19452_s0 + $0x68] sm:$0xff]  }
 0x182   :  { %v13084_v33 = vpop.f32.mrf.mxu1  ;;  %v13021_v38 = vadd.f32 %v13020_v32, %v13019_v1 }
 0x183   :  { %v797_v34 = vpack.c.bf16 %v780_v31, %v777_v30  ;;  %v13022_v35 = vpop.f32.mrf.mxu0  ;;  %v13085_v37 = vadd.f32 %v13084_v33, %v13083_v29 }
 0x184   :  { %v13086_v36 = vpop.f32.mrf.mxu1 }
 0x185   :  { %14442 = vmatprep.mubr.msk.bf16.mxu1 %vm1198_vm1, %v797_v34  ;;  %v13023_v39 = vpop.f32.mrf.mxu0  ;;  %v785_v46 = vadd.f32 %v13085_v37, %v13021_v38  ;;  %v15187_v34 = vld [vmem:[#allocation2 + $0x248] ss:$16 sps:$4 sm:$0xff]   ;;  %v15191_v38 = vld [vmem:[#allocation2 + $0x26c] ss:$16 sps:$4 sm:$0xff]   ;;  %v16199_v37 = vld [vmem:[%s19452_s0 + $0x60] sm:$0xff]  }
 0x186   :  { %v13024_v40 = vadd.f32 %v13023_v39, %v13022_v35  ;;  %v13087_v41 = vpop.f32.mrf.mxu1  ;;  %v16198_v35 = vld [vmem:[%s19452_s0 + $0x28] sm:$0xff]  }
 0x187   :  { %v13088_v42 = vadd.f32 %v13087_v41, %v13086_v36  ;;  %v13105_v43 = vpop.f32.mrf.mxu0 }
 0x188   :  { %v13169_v44 = vpop.f32.mrf.mxu1 }
 0x189   :  { %v788_v47 = vadd.f32 %v13088_v42, %v13024_v40  ;;  %v13106_v48 = vpop.f32.mrf.mxu0 }
 0x18a   :  { %v13170_v49 = vpop.f32.mrf.mxu1  ;;  %v13107_v53 = vadd.f32 %v13106_v48, %v13105_v43 }
 0x18b   :  { %v798_v50 = vpack.c.bf16 %v788_v47, %v785_v46  ;;  %v13108_v51 = vpop.f32.mrf.mxu0  ;;  %v13171_v54 = vadd.f32 %v13170_v49, %v13169_v44  ;;  %v16919_v47 = vld [vmem:[%s19452_s0 + $0x58] sm:$0xff]  }
 0x18c   :  { %v13172_v52 = vpop.f32.mrf.mxu1 }
 0x18d   :  { %14443 = vmatmul.mubr.msk.bf16.gmra.mxu1 %vm1198_vm1, %v798_v50  ;;  %v13109_v55 = vpop.f32.mrf.mxu0  ;;  %v1124_v63 = vadd.f32 %v13171_v54, %v13107_v53 }
 0x18e   :  { %v13110_v56 = vadd.f32 %v13109_v55, %v13108_v51  ;;  %v13173_v57 = vpop.f32.mrf.mxu1  ;;  %1770 = vmatprep.mubr.bf16.mxu1 %v15175_v45  ;;  %v16913_v45 = vld [vmem:[%s19452_s0 + $0x20] sm:$0xff]   ;;  %v15193_v55 = vld [vmem:[#allocation2 + $0x268] ss:$16 sps:$4 sm:$0xff]  }
 0x18f   :  { %v13174_v58 = vadd.f32 %v13173_v57, %v13172_v52  ;;  %v13111_v59 = vpop.f32.mrf.mxu0 }
 0x190   :  { %v13175_v61 = vpop.f32.mrf.mxu1 }
 0x191   :  { %v1127_v0 = vadd.f32 %v13174_v58, %v13110_v56  ;;  %v13112_v2 = vpop.f32.mrf.mxu0  ;;  %v16926_v56 = vld [vmem:[%s19452_s0 + $0x18] sm:$0xff]  }
 0x192   :  { %v13176_v3 = vpop.f32.mrf.mxu1  ;;  %v13113_v7 = vadd.f32 %v13112_v2, %v13111_v59  ;;  %v15197_v58 = vld [vmem:[#allocation2 + $0x28c] ss:$16 sps:$4 sm:$0xff]   ;;  %v16932_v59 = vld [vmem:[%s19452_s0 + $0x50] sm:$0xff]  }
 0x193   :  { %v1186_v4 = vpack.c.bf16 %v1127_v0, %v1124_v63  ;;  %v13114_v5 = vpop.f32.mrf.mxu0  ;;  %v13177_v8 = vadd.f32 %v13176_v3, %v13175_v61  ;;  %v16940_v3 = vld [vmem:[%s19452_s0 + $0x10] sm:$0xff]  }
 0x194   :  { %v13178_v6 = vpop.f32.mrf.mxu1 }
 0x195   :  { %14412 = vmatprep.mubr.msk.bf16.mxu0 %vm1198_vm1, %v1186_v4  ;;  %v13115_v9 = vpop.f32.mrf.mxu0  ;;  %1771 = vmatmul.mubr.bf16.vlgmr.msra.gmra.mxu1 %v15173_v60  ;;  %v1132_v19 = vadd.f32 %v13177_v8, %v13113_v7 }
 0x196   :  { %v13116_v10 = vadd.f32 %v13115_v9, %v13114_v5  ;;  %v13179_v11 = vpop.f32.mrf.mxu1  ;;  %1778 = vmatprep.mubr.bf16.mxu1 %v15179_v62  ;;  %13373 = vmatpush3.bf16.msra.mxu1 %v16194_v12  ;;  %v16946_v5 = vld [vmem:[%s19452_s0 + $0x48] sm:$0xff]  }
 0x197   :  { %v13180_v13 = vadd.f32 %v13179_v11, %v13178_v6  ;;  %v13117_v14 = vpop.f32.mrf.mxu0  ;;  %13374 = vmatprep.subr.bf16.mxu1 %v16195_v16 }
 0x198   :  { %v13181_v17 = vpop.f32.mrf.mxu1 }
 0x199   :  { %v1135_v20 = vadd.f32 %v13180_v13, %v13116_v10  ;;  %v13118_v21 = vpop.f32.mrf.mxu0  ;;  %v15199_v13 = vld [vmem:[#allocation2 + $0x288] ss:$16 sps:$4 sm:$0xff]  }
 0x19a   :  { %v13182_v22 = vpop.f32.mrf.mxu1  ;;  %13375 = vmatpush3.bf16.msra.mxu1 %v16196_v23  ;;  %v13119_v28 = vadd.f32 %v13118_v21, %v13117_v14  ;;  %v16955_v14 = vld [vmem:[%s19452_s0 + $0x8] sm:$0xff]  }
 0x19b   :  { %v1187_v24 = vpack.c.bf16 %v1135_v20, %v1132_v19  ;;  %v13120_v25 = vpop.f32.mrf.mxu0  ;;  %13376 = vmatprep.subr.bf16.mxu1 %v16197_v26  ;;  %v13183_v1 = vadd.f32 %v13182_v22, %v13181_v17  ;;  %v16961_v17 = vld [vmem:[%s19452_s0 + $0x40] sm:$0xff]  }
 0x19c   :  { %v13184_v27 = vpop.f32.mrf.mxu1 }
 0x19d   :  { %14413 = vmatmul.mubr.msk.bf16.vlgmr.msra.gmra.mxu0 %vm1198_vm1, %v1187_v24  ;;  %v13121_v29 = vpop.f32.mrf.mxu0  ;;  %1779 = vmatmul.mubr.bf16.gmra.mxu1 %v15181_v15  ;;  %v1140_v39 = vadd.f32 %v13183_v1, %v13119_v28  ;;  %v16969_v24 = vld [vmem:[%s19452_s0] sm:$0xff]  }
 0x19e   :  { %v13122_v30 = vadd.f32 %v13121_v29, %v13120_v25  ;;  %v13185_v31 = vpop.f32.mrf.mxu1  ;;  %13236 = vmatpush3.bf16.msra.mxu0 %v16194_v12  ;;  %1786 = vmatprep.mubr.bf16.mxu1 %v15185_v18 }
 0x19f   :  { %v13186_v32 = vadd.f32 %v13185_v31, %v13184_v27  ;;  %v13123_v33 = vpop.f32.mrf.mxu0  ;;  %13237 = vmatprep.subr.bf16.mxu0 %v16195_v16  ;;  %13377 = vmatpush3.bf16.msra.mxu1 %v16198_v35  ;;  %v15203_v16 = vld [vmem:[#allocation2 + $0x2ac] ss:$16 sps:$4 sm:$0xff]  }
 0x1a0   :  { %v13187_v36 = vpop.f32.mrf.mxu1  ;;  %13378 = vmatprep.subr.bf16.mxu1 %v16199_v37 }
 0x1a1   :  { %v1143_v40 = vadd.f32 %v13186_v32, %v13122_v30  ;;  %v13124_v41 = vpop.f32.mrf.mxu0 }
 0x1a2   :  { %v13188_v42 = vpop.f32.mrf.mxu1  ;;  %13238 = vmatpush3.bf16.msra.mxu0 %v16196_v23  ;;  %v13125_v48 = vadd.f32 %v13124_v41, %v13123_v33  ;;  %v15205_v33 = vld [vmem:[#allocation2 + $0x2a8] ss:$16 sps:$4 sm:$0xff]  }
 0x1a3   :  { %v1188_v43 = vpack.c.bf16 %v1143_v40, %v1140_v39  ;;  %v13126_v44 = vpop.f32.mrf.mxu0  ;;  %13239 = vmatprep.subr.bf16.mxu0 %v16197_v26  ;;  %13379 = vmatpush3.bf16.msra.mxu1 %v16913_v45  ;;  %v13189_v49 = vadd.f32 %v13188_v42, %v13187_v36  ;;  %v16975_v26 = vld [vmem:[%s19452_s0 + $0xf8] sm:$0xff]  }
 0x1a4   :  { %v13190_v46 = vpop.f32.mrf.mxu1  ;;  %13380 = vmatprep.subr.bf16.mxu1 %v16919_v47 }
 0x1a5   :  { %14416 = vmatprep.mubr.msk.bf16.mxu0 %vm1198_vm1, %v1188_v43  ;;  %v13127_v50 = vpop.f32.mrf.mxu0  ;;  %1787 = vmatmul.mubr.bf16.gmra.mxu1 %v15187_v34  ;;  %v1148_v60 = vadd.f32 %v13189_v49, %v13125_v48 }
 0x1a6   :  { %v13128_v51 = vadd.f32 %v13127_v50, %v13126_v44  ;;  %v13191_v52 = vpop.f32.mrf.mxu1  ;;  %13240 = vmatpush3.bf16.msra.mxu0 %v16198_v35  ;;  %1794 = vmatprep.mubr.bf16.mxu1 %v15191_v38  ;;  %v15209_v35 = vld [vmem:[#allocation2 + $0x2cc] ss:$16 sps:$4 sm:$0xff]  }
 0x1a7   :  { %v13192_v53 = vadd.f32 %v13191_v52, %v13190_v46  ;;  %v13129_v54 = vpop.f32.mrf.mxu0  ;;  %13241 = vmatprep.subr.bf16.mxu0 %v16199_v37  ;;  %13381 = vmatpush3.bf16.msra.mxu1 %v16926_v56 }
 0x1a8   :  { %v13193_v57 = vpop.f32.mrf.mxu1  ;;  %13382 = vmatprep.subr.bf16.mxu1 %v16932_v59 }
 0x1a9   :  { %v1151_v61 = vadd.f32 %v13192_v53, %v13128_v51  ;;  %v13130_v62 = vpop.f32.mrf.mxu0 }
 0x1aa   :  { %v13194_v63 = vpop.f32.mrf.mxu1  ;;  %13242 = vmatpush3.bf16.msra.mxu0 %v16913_v45  ;;  %v13131_v6 = vadd.f32 %v13130_v62, %v13129_v54 }
 0x1ab   :  { %v1189_v0 = vpack.c.bf16 %v1151_v61, %v1148_v60  ;;  %v13132_v2 = vpop.f32.mrf.mxu0  ;;  %13243 = vmatprep.subr.bf16.mxu0 %v16919_v47  ;;  %13383 = vmatpush3.bf16.msra.mxu1 %v16940_v3  ;;  %v13195_v7 = vadd.f32 %v13194_v63, %v13193_v57  ;;  %v15211_v57 = vld [vmem:[#allocation2 + $0x2c8] ss:$16 sps:$4 sm:$0xff]   ;;  %v15215_v60 = vld [vmem:[#allocation2 + $0x2ec] ss:$16 sps:$4 sm:$0xff]  }
 0x1ac   :  { %v13196_v4 = vpop.f32.mrf.mxu1  ;;  %13384 = vmatprep.subr.bf16.mxu1 %v16946_v5 }
 0x1ad   :  { %14417 = vmatmul.mubr.msk.bf16.gmra.mxu0 %vm1198_vm1, %v1189_v0  ;;  %v13133_v8 = vpop.f32.mrf.mxu0  ;;  %1795 = vmatmul.mubr.bf16.gmra.mxu1 %v15193_v55  ;;  %v1156_v18 = vadd.f32 %v13195_v7, %v13131_v6 }
 0x1ae   :  { %v13134_v9 = vadd.f32 %v13133_v8, %v13132_v2  ;;  %v13197_v10 = vpop.f32.mrf.mxu1  ;;  %13244 = vmatpush3.bf16.msra.mxu0 %v16926_v56  ;;  %1802 = vmatprep.mubr.bf16.mxu1 %v15197_v58 }
 0x1af   :  { %v13198_v11 = vadd.f32 %v13197_v10, %v13196_v4  ;;  %v13135_v12 = vpop.f32.mrf.mxu0  ;;  %13245 = vmatprep.subr.bf16.mxu0 %v16932_v59  ;;  %13385 = vmatpush3.bf16.msra.mxu1 %v16955_v14 }
 0x1b0   :  { %v13199_v15 = vpop.f32.mrf.mxu1  ;;  %13386 = vmatprep.subr.bf16.mxu1 %v16961_v17 }
 0x1b1   :  { %v1159_v19 = vadd.f32 %v13198_v11, %v13134_v9  ;;  %v13136_v20 = vpop.f32.mrf.mxu0  ;;  %v15217_v11 = vld [vmem:[#allocation2 + $0x2e8] ss:$16 sps:$4 sm:$0xff]  }
 0x1b2   :  { %v13200_v21 = vpop.f32.mrf.mxu1  ;;  %13246 = vmatpush3.bf16.msra.mxu0 %v16940_v3  ;;  %v13137_v27 = vadd.f32 %v13136_v20, %v13135_v12  ;;  %v15178_v12 = vld [vmem:[#allocation2 + $0x204] ss:$16 sps:$4 sm:$0xff]   ;;  %v15190_v20 = vld [vmem:[#allocation2 + $0x240] ss:$16 sps:$4 sm:$0xff]  }
 0x1b3   :  { %v1190_v22 = vpack.c.bf16 %v1159_v19, %v1156_v18  ;;  %v13138_v23 = vpop.f32.mrf.mxu0  ;;  %13247 = vmatprep.subr.bf16.mxu0 %v16946_v5  ;;  %13387 = vmatpush3.bf16.msra.mxu1 %v16969_v24  ;;  %v13201_v28 = vadd.f32 %v13200_v21, %v13199_v15  ;;  %v15176_v15 = vld [vmem:[#allocation2 + $0x200] ss:$16 sps:$4 sm:$0xff]   ;;  %v15188_v19 = vld [vmem:[#allocation2 + $0x244] ss:$16 sps:$4 sm:$0xff]  }
 0x1b4   :  { %v13202_v25 = vpop.f32.mrf.mxu1  ;;  %15004 = vmatprep.subr.bf16.mxu1 %v16975_v26  ;;  %v15184_v18 = vld [vmem:[#allocation2 + $0x220] ss:$16 sps:$4 sm:$0xff]   ;;  %v15194_v21 = vld [vmem:[#allocation2 + $0x264] ss:$16 sps:$4 sm:$0xff]  }
 0x1b5   :  { %14420 = vmatprep.mubr.msk.bf16.mxu0 %vm1198_vm1, %v1190_v22  ;;  %v13139_v1 = vpop.f32.mrf.mxu0  ;;  %1803 = vmatmul.mubr.bf16.gmra.mxu1 %v15199_v13  ;;  %v1164_v36 = vadd.f32 %v13201_v28, %v13137_v27  ;;  %v15196_v22 = vld [vmem:[#allocation2 + $0x260] ss:$16 sps:$4 sm:$0xff]   ;;  %v15206_v27 = vld [vmem:[#allocation2 + $0x2a4] ss:$16 sps:$4 sm:$0xff]  }
 0x1b6   :  { %v13140_v29 = vadd.f32 %v13139_v1, %v13138_v23  ;;  %v13203_v30 = vpop.f32.mrf.mxu1  ;;  %13248 = vmatpush3.bf16.msra.mxu0 %v16955_v14  ;;  %1810 = vmatprep.mubr.bf16.mxu1 %v15203_v16  ;;  %v15182_v16 = vld [vmem:[#allocation2 + $0x224] ss:$16 sps:$4 sm:$0xff]   ;;  %v15208_v28 = vld [vmem:[#allocation2 + $0x2a0] ss:$16 sps:$4 sm:$0xff]  }
 0x1b7   :  { %v13204_v31 = vadd.f32 %v13203_v30, %v13202_v25  ;;  %v13141_v32 = vpop.f32.mrf.mxu0  ;;  %13249 = vmatprep.subr.bf16.mxu0 %v16961_v17  ;;  %v15200_v23 = vld [vmem:[#allocation2 + $0x284] ss:$16 sps:$4 sm:$0xff]   ;;  %v15202_v25 = vld [vmem:[#allocation2 + $0x280] ss:$16 sps:$4 sm:$0xff]  }
 0x1b8   :  { %v13205_v34 = vpop.f32.mrf.mxu1  ;;  %v15212_v1 = vld [vmem:[#allocation2 + $0x2c4] ss:$16 sps:$4 sm:$0xff]  }
 0x1b9   :  { %v1167_v38 = vadd.f32 %v13204_v31, %v13140_v29  ;;  %v13142_v37 = vpop.f32.mrf.mxu0  ;;  %v15214_v29 = vld [vmem:[#allocation2 + $0x2c0] ss:$16 sps:$4 sm:$0xff]   ;;  %v15218_v30 = vld [vmem:[#allocation2 + $0x2e4] ss:$16 sps:$4 sm:$0xff]  }
 0x1ba   :  { %v13206_v39 = vpop.f32.mrf.mxu1  ;;  %13250 = vmatpush3.bf16.msra.mxu0 %v16969_v24  ;;  %v13143_v43 = vadd.f32 %v13142_v37, %v13141_v32  ;;  %v15220_v31 = vld [vmem:[#allocation2 + $0x2e0] ss:$16 sps:$4 sm:$0xff]   ;;  %v1480_v32 = vld [vmem:[%s19454_s2 + $0x4] sm:$0x3] }
 0x1bb   :  { %v1191_v40 = vpack.c.bf16 %v1167_v38, %v1164_v36  ;;  %v13144_v41 = vpop.f32.mrf.mxu0  ;;  %v13207_v44 = vadd.f32 %v13206_v39, %v13205_v34  ;;  %15022 = vmatprep.subr.msk.bf16.mxu0 %vm1223_vm0, %v1480_v32 }
 0x1bc   :  { %v13208_v42 = vpop.f32.mrf.mxu1 }
 0x1bd   :  { %14421 = vmatmul.mubr.msk.bf16.gmra.mxu0 %vm1198_vm1, %v1191_v40  ;;  %v13145_v46 = vpop.f32.mrf.mxu0  ;;  %1811 = vmatmul.mubr.bf16.gmra.mxu1 %v15205_v33  ;;  %v1172_v53 = vadd.f32 %v13207_v44, %v13143_v43  ;;  %v1868_v33 = vsel %vm1223_vm0, %v1480_v32, 0  ;;  %v15223_v43 = vld [vmem:[#allocation2 + $0x304] ss:$16 sps:$4 sm:$0xff]  }
 0x1be   :  { %v13146_v48 = vadd.f32 %v13145_v46, %v13144_v41  ;;  %v13209_v49 = vpop.f32.mrf.mxu1  ;;  %1818 = vmatprep.mubr.bf16.mxu1 %v15209_v35  ;;  %v15221_v46 = vld [vmem:[#allocation2 + $0x300] ss:$16 sps:$4 sm:$0xff]  }
 0x1bf   :  { %v13210_v50 = vadd.f32 %v13209_v49, %v13208_v42  ;;  %v13147_v51 = vpop.f32.mrf.mxu0 }
 0x1c0   :  { %v13211_v52 = vpop.f32.mrf.mxu1 }
 0x1c1   :  { %v1175_v54 = vadd.f32 %v13210_v50, %v13146_v48  ;;  %v13148_v55 = vpop.f32.mrf.mxu0  ;;  %v17012_v48 = vld [vmem:[%s19452_s0 + $0xb8] sm:$0xff]   ;;  %v17020_v50 = vld [vmem:[%s19452_s0 + $0xf0] sm:$0xff]  }
 0x1c2   :  { %v13212_v58 = vpop.f32.mrf.mxu1  ;;  %v13149_v0 = vadd.f32 %v13148_v55, %v13147_v51  ;;  %v15226_v51 = vld [vmem:[#allocation2 + $0x324] ss:$16 sps:$4 sm:$0xff]   ;;  %v17034_v55 = vld [vmem:[%s19452_s0 + $0xe8] sm:$0xff]  }
 0x1c3   :  { %v1192_v61 = vpack.c.bf16 %v1175_v54, %v1172_v53  ;;  %v13150_v62 = vpop.f32.mrf.mxu0  ;;  %v13213_v2 = vadd.f32 %v13212_v58, %v13211_v52  ;;  %v17026_v52 = vld [vmem:[%s19452_s0 + $0xb0] sm:$0xff]   ;;  %v17042_v58 = vld [vmem:[%s19452_s0 + $0xa8] sm:$0xff]  }
 0x1c4   :  { %v13214_v63 = vpop.f32.mrf.mxu1  ;;  %v15224_v54 = vld [vmem:[#allocation2 + $0x320] ss:$16 sps:$4 sm:$0xff]  }
 0x1c5   :  { %14424 = vmatprep.mubr.msk.bf16.mxu0 %vm1198_vm1, %v1192_v61  ;;  %v13151_v4 = vpop.f32.mrf.mxu0  ;;  %1819 = vmatmul.mubr.bf16.gmra.mxu1 %v15211_v57  ;;  %v1180_v9 = vadd.f32 %v13213_v2, %v13149_v0  ;;  %v17050_v61 = vld [vmem:[%s19452_s0 + $0xe0] sm:$0xff]  }
 0x1c6   :  { %v13152_v6 = vadd.f32 %v13151_v4, %v13150_v62  ;;  %v13215_v7 = vpop.f32.mrf.mxu1  ;;  %1826 = vmatprep.mubr.bf16.mxu1 %v15215_v60  ;;  %v17058_v0 = vld [vmem:[%s19452_s0 + $0xa0] sm:$0xff]  }
 0x1c7   :  { %v13216_v8 = vadd.f32 %v13215_v7, %v13214_v63  ;;  %v15229_v63 = vld [vmem:[#allocation2 + $0x344] ss:$16 sps:$4 sm:$0xff]   ;;  %v15227_v4 = vld [vmem:[#allocation2 + $0x340] ss:$16 sps:$4 sm:$0xff]  }
 0x1c9   :  { %v1183_v10 = vadd.f32 %v13216_v8, %v13152_v6  ;;  %v17066_v6 = vld [vmem:[%s19452_s0 + $0xd8] sm:$0xff]  }
 0x1ca   :  { %v17074_v8 = vld [vmem:[%s19452_s0 + $0x98] sm:$0xff]  }
 0x1cb   :  { %v1193_v13 = vpack.c.bf16 %v1183_v10, %v1180_v9  ;;  %v17080_v9 = vld [vmem:[%s19452_s0 + $0xd0] sm:$0xff]  }
 0x1cd   :  { %14425 = vmatmul.mubr.msk.bf16.gmra.mxu0 %vm1198_vm1, %v1193_v13  ;;  %1827 = vmatmul.mubr.bf16.gmra.mxu1 %v15217_v11  ;;  %v15230_v11 = vld [vmem:[#allocation2 + $0x360] ss:$16 sps:$4 sm:$0xff]  }
 0x1ce   :  { %1673 = vmatprep.mubr.bf16.mxu0 %v15178_v12  ;;  %2208 = vmatprep.mubr.bf16.mxu1 %v15223_v43  ;;  %v15232_v12 = vld [vmem:[#allocation2 + $0x364] ss:$16 sps:$4 sm:$0xff]  }
 0x1cf   :  { %v17088_v13 = vld [vmem:[%s19452_s0 + $0x90] sm:$0xff]  }
 0x1d5   :  { %1674 = vmatmul.mubr.bf16.vlgmr.msra.gmra.mxu0 %v15176_v15  ;;  %2209 = vmatmul.mubr.bf16.vlgmr.msra.gmra.mxu1 %v15221_v46  ;;  %v17094_v15 = vld [vmem:[%s19452_s0 + $0xc8] sm:$0xff]  }
 0x1d6   :  { %1681 = vmatprep.mubr.bf16.mxu0 %v15182_v16  ;;  %14447 = vmatpush3.bf16.msra.mxu0 %v1868_v33  ;;  %v15242_v33 = vld [vmem:[#allocation2 + $0x3a0] ss:$16 sps:$4 sm:$0xff]  }
 0x1d7   :  { %13436 = vmatprep.subr.bf16.mxu0 %v16975_v26  ;;  %15012 = vmatpush3.bf16.msra.mxu1 %v17012_v48 }
 0x1d8   :  { %15005 = vmatprep.subr.bf16.mxu1 %v17020_v50  ;;  %2216 = vmatprep.mubr.bf16.mxu1 %v15226_v51 }
 0x1db   :  { %15013 = vmatpush3.bf16.msra.mxu1 %v17026_v52 }
 0x1dc   :  { %15006 = vmatprep.subr.bf16.mxu1 %v17034_v55 }
 0x1dd   :  { %1682 = vmatmul.mubr.bf16.gmra.mxu0 %v15184_v18  ;;  %2217 = vmatmul.mubr.bf16.gmra.mxu1 %v15224_v54 }
 0x1de   :  { %1689 = vmatprep.mubr.bf16.mxu0 %v15188_v19  ;;  %2224 = vmatprep.mubr.bf16.mxu1 %v15229_v63 }
 0x1df   :  { %15014 = vmatpush3.bf16.msra.mxu1 %v17042_v58 }
 0x1e0   :  { %15007 = vmatprep.subr.bf16.mxu1 %v17050_v61 }
 0x1e3   :  { %15015 = vmatpush3.bf16.msra.mxu1 %v17058_v0 }
 0x1e4   :  { %15008 = vmatprep.subr.bf16.mxu1 %v17066_v6 }
 0x1e5   :  { %1690 = vmatmul.mubr.bf16.gmra.mxu0 %v15190_v20  ;;  %2225 = vmatmul.mubr.bf16.gmra.mxu1 %v15227_v4  ;;  %v17104_v20 = vld [vmem:[%s19452_s0 + $0x88] sm:$0xff]  }
 0x1e6   :  { %1697 = vmatprep.mubr.bf16.mxu0 %v15194_v21  ;;  %2232 = vmatprep.mubr.bf16.mxu1 %v15232_v12  ;;  %v15248_v12 = vld [vmem:[#allocation2 + $0x3c0] ss:$16 sps:$4 sm:$0xff]  }
 0x1e7   :  { %15016 = vmatpush3.bf16.msra.mxu1 %v17074_v8 }
 0x1e8   :  { %15009 = vmatprep.subr.bf16.mxu1 %v17080_v9 }
 0x1eb   :  { %15017 = vmatpush3.bf16.msra.mxu1 %v17088_v13 }
 0x1ec   :  { %15010 = vmatprep.subr.bf16.mxu1 %v17094_v15 }
 0x1ed   :  { %1698 = vmatmul.mubr.bf16.gmra.mxu0 %v15196_v22  ;;  %2233 = vmatmul.mubr.bf16.gmra.mxu1 %v15230_v11  ;;  %v17110_v22 = vld [vmem:[%s19452_s0 + $0xc0] sm:$0xff]  }
 0x1ee   :  { %1705 = vmatprep.mubr.bf16.mxu0 %v15200_v23 }
 0x1ef   :  { %15018 = vmatpush3.bf16.msra.mxu1 %v17104_v20 }
 0x1f0   :  { %15011 = vmatprep.subr.bf16.mxu1 %v17110_v22 }
 0x1f5   :  { %1706 = vmatmul.mubr.bf16.gmra.mxu0 %v15202_v25 }
 0x1f6   :  { %1713 = vmatprep.mubr.bf16.mxu0 %v15206_v27 }
 0x1fd   :  { %1714 = vmatmul.mubr.bf16.gmra.mxu0 %v15208_v28 }
 0x1fe   :  { %1721 = vmatprep.mubr.bf16.mxu0 %v15212_v1  ;;  %v15236_v1 = vld [vmem:[#allocation2 + $0x380] ss:$16 sps:$4 sm:$0xff]  }
 0x205   :  { %1722 = vmatmul.mubr.bf16.gmra.mxu0 %v15214_v29  ;;  %v15238_v29 = vld [vmem:[#allocation2 + $0x384] ss:$16 sps:$4 sm:$0xff]  }
 0x206   :  { %1729 = vmatprep.mubr.bf16.mxu0 %v15218_v30  ;;  %v17124_v30 = vld [vmem:[%s19452_s0 + $0x80] sm:$0xff]   ;;  %2240 = vmatprep.mubr.bf16.mxu1 %v15238_v29 }
 0x207   :  { %15019 = vmatpush3.bf16.msra.mxu1 %v17124_v30 }
 0x208   :  { %2241 = vmatmul.mubr.bf16.gmra.mxu1 %v15236_v1  ;;  %v15254_v1 = vld [vmem:[#allocation2 + $0x3e0] ss:$16 sps:$4 sm:$0xff]  }
 0x20d   :  { %1730 = vmatmul.mubr.bf16.gmra.mxu0 %v15220_v31 }
 0x21d   :  { %v14432_v34 = vpop.f32.mrf.mxu1 }
 0x21f   :  { %v16991_v35 = vpop.f32.mrf.mxu1 }
 0x221   :  { %v16993_v36 = vpop.f32.mrf.mxu1 }
 0x223   :  { %v16995_v38 = vpop.f32.mrf.mxu1 }
 0x224   :  { %19479 = vst [vmem:[#allocation23_spill] sm:$0xff] %v16995_v38  ;;  %v15262_v38 = vld [vmem:[#allocation2 + $0x3ec] ss:$16 sps:$4 sm:$0xff]  }
 0x22d   :  { %v16997_v37 = vpop.f32.mrf.mxu1 }
 0x22f   :  { %v16999_v39 = vpop.f32.mrf.mxu1 }
 0x231   :  { %v17001_v40 = vpop.f32.mrf.mxu1 }
 0x233   :  { %v17003_v41 = vpop.f32.mrf.mxu1 }
 0x234   :  { %19480 = vst [vmem:[#allocation24_spill] sm:$0xff] %v17003_v41 }
 0x23d   :  { %v17005_v42 = vpop.f32.mrf.mxu1 }
 0x23f   :  { %v17007_v44 = vpop.f32.mrf.mxu1 }
 0x241   :  { %v17015_v49 = vpop.f32.mrf.mxu1 }
 0x243   :  { %v17029_v53 = vpop.f32.mrf.mxu1 }
 0x244   :  { %19481 = vst [vmem:[#allocation25_spill] sm:$0xff] %v17029_v53 }
 0x24d   :  { %v17037_v57 = vpop.f32.mrf.mxu1 }
 0x24f   :  { %v17045_v60 = vpop.f32.mrf.mxu1 }
 0x251   :  { %v17053_v62 = vpop.f32.mrf.mxu1 }
 0x253   :  { %v17061_v2 = vpop.f32.mrf.mxu1 }
 0x254   :  { %19482 = vst [vmem:[#allocation26_spill] sm:$0xff] %v17061_v2 }
 0x255   :  { %v17069_v7 = vpop.f32.mrf.mxu1 }
 0x257   :  { %v17083_v10 = vpop.f32.mrf.mxu1 }
 0x259   :  { %v17097_v18 = vpop.f32.mrf.mxu1 }
 0x25b   :  { %v17116_v27 = vpop.f32.mrf.mxu1 }
 0x25d   :  { %v14414_v16 = vpop.f32.mrf.mxu0  ;;  %v17127_v31 = vpop.f32.mrf.mxu1 }
 0x25e   :  { %v17099_v19 = vadd.f32 %v14432_v34, %v14414_v16  ;;  %v15244_v34 = vld [vmem:[#allocation2 + $0x3a4] ss:$16 sps:$4 sm:$0xff]  }
 0x25f   :  { %v1261_v21 = vpop.f32.mrf.mxu0  ;;  %v17129_v32 = vpop.f32.mrf.mxu1  ;;  %2248 = vmatprep.mubr.bf16.mxu1 %v15244_v34  ;;  %v15250_v16 = vld [vmem:[#allocation2 + $0x3c4] ss:$16 sps:$4 sm:$0xff]  }
 0x260   :  { %v17114_v23 = vadd.f32 %v16991_v35, %v1261_v21  ;;  %2249 = vmatmul.mubr.bf16.gmra.mxu1 %v15242_v33 }
 0x261   :  { %v14415_v25 = vpop.f32.mrf.mxu0  ;;  %v17133_v43 = vpop.f32.mrf.mxu1  ;;  %2256 = vmatprep.mubr.bf16.mxu1 %v15250_v16  ;;  %v15260_v16 = vld [vmem:[#allocation2 + $0x3e8] ss:$16 sps:$4 sm:$0xff]  }
 0x262   :  { %v17119_v28 = vadd.f32 %v16993_v36, %v14415_v25 }
 0x263   :  { %v17131_v35 = vpop.f32.mrf.mxu0  ;;  %v13325_v4 = vpop.f32.mrf.mxu1 }
 0x264   :  { %19483 = vst [vmem:[#allocation27_spill] sm:$0xff] %v17131_v35 }
 0x265   :  { %v17144_v21 = vpop.f32.mrf.mxu1 }
 0x267   :  { %v17146_v25 = vpop.f32.mrf.mxu1 }
 0x268   :  { %2257 = vmatmul.mubr.bf16.gmra.mxu1 %v15248_v12 }
 0x269   :  { %v13330_v33 = vpop.f32.mrf.mxu1 }
 0x26d   :  { %v14418_v36 = vpop.f32.mrf.mxu0 }
 0x26e   :  { %v17136_v46 = vadd.f32 %v16997_v37, %v14418_v36  ;;  %v15256_v37 = vld [vmem:[#allocation2 + $0x3e4] ss:$16 sps:$4 sm:$0xff]  }
 0x26f   :  { %v1277_v51 = vpop.f32.mrf.mxu0  ;;  %2264 = vmatprep.mubr.bf16.mxu1 %v15256_v37 }
 0x270   :  { %v17139_v54 = vadd.f32 %v16999_v39, %v1277_v51  ;;  %2265 = vmatmul.mubr.bf16.gmra.mxu1 %v15254_v1 }
 0x271   :  { %v14419_v63 = vpop.f32.mrf.mxu0  ;;  %2361 = vmatprep.mubr.bf16.mxu1 %v15262_v38 }
 0x272   :  { %19484 = vst [vmem:[#allocation28_spill] sm:$0xff] %v17139_v54  ;;  %v17142_v11 = vadd.f32 %v17001_v40, %v14419_v63  ;;  %v13331_v63 = vpop.f32.mrf.mxu1 }
 0x273   :  { %v17148_v29 = vpop.f32.mrf.mxu0 }
 0x274   :  { %19485 = vst [vmem:[#allocation29_spill] sm:$0xff] %v17142_v11  ;;  %19486 = vst [vmem:[#allocation30_spill] sm:$0xff] %v17148_v29  ;;  %v17159_v35 = vpop.f32.mrf.mxu1 }
 0x276   :  { %v17161_v37 = vpop.f32.mrf.mxu1 }
 0x278   :  { %2362 = vmatmul.mubr.bf16.vlgmr.msra.gmra.mxu1 %v15260_v16 }
 0x27d   :  { %v14422_v39 = vpop.f32.mrf.mxu0 }
 0x27e   :  { %v17151_v34 = vadd.f32 %v17005_v42, %v14422_v39  ;;  %v17165_v39 = vpop.f32.mrf.mxu1 }
 0x27f   :  { %v1293_v40 = vpop.f32.mrf.mxu0 }
 0x280   :  { %19487 = vst [vmem:[#allocation31_spill] sm:$0xff] %v17151_v34  ;;  %v17154_v36 = vadd.f32 %v17007_v44, %v1293_v40  ;;  %v13337_v41 = vpop.f32.mrf.mxu1 }
 0x281   :  { %v14423_v51 = vpop.f32.mrf.mxu0 }
 0x282   :  { %19488 = vst [vmem:[#allocation32_spill] sm:$0xff] %v17154_v36  ;;  %v17157_v12 = vadd.f32 %v17015_v49, %v14423_v51  ;;  %v17178_v53 = vpop.f32.mrf.mxu1 }
 0x283   :  { %v17163_v1 = vpop.f32.mrf.mxu0 }
 0x284   :  { %19489 = vst [vmem:[#allocation33_spill] sm:$0xff] %v17157_v12  ;;  %19490 = vst [vmem:[#allocation34_spill] sm:$0xff] %v17163_v1  ;;  %v17180_v12 = vpop.f32.mrf.mxu1 }
 0x28d   :  { %v14426_v42 = vpop.f32.mrf.mxu0 }
 0x28e   :  { %v17168_v44 = vadd.f32 %v17037_v57, %v14426_v42 }
 0x28f   :  { %v1309_v40 = vpop.f32.mrf.mxu0 }
 0x290   :  { %19491 = vst [vmem:[#allocation35_spill] sm:$0xff] %v17168_v44  ;;  %v17171_v49 = vadd.f32 %v17045_v60, %v1309_v40  ;;  %v13317_v60 = vadd.f32 %v17083_v10, %v17069_v7  ;;  %v13320_v40 = vadd.f32 %v17116_v27, %v17097_v18  ;;  %v13326_v7 = vadd.f32 %v13325_v4, %v17133_v43 }
 0x291   :  { %v14427_v51 = vpop.f32.mrf.mxu0 }
 0x292   :  { %19492 = vst [vmem:[#allocation36_spill] sm:$0xff] %v17171_v49  ;;  %v17174_v38 = vadd.f32 %v17053_v62, %v14427_v51  ;;  %v13342_v51 = vpop.f32.mrf.mxu1 }
 0x293   :  { %v17176_v16 = vpop.f32.mrf.mxu0 }
 0x294   :  { %19493 = vst [vmem:[#allocation37_spill] sm:$0xff] %v17174_v38  ;;  %19494 = vst [vmem:[#allocation38_spill] sm:$0xff] %v17176_v16  ;;  %v13343_v11 = vpop.f32.mrf.mxu1 }
 0x295   :  { %v13251_v29 = vpop.f32.mrf.mxu0 }
 0x297   :  { %v13252_v1 = vpop.f32.mrf.mxu0 }
 0x298   :  { %v13253_v57 = vadd.f32 %v13252_v1, %v13251_v29  ;;  %v13323_v1 = vadd.f32 %v17129_v32, %v17127_v31  ;;  %v13329_v31 = vadd.f32 %v17146_v25, %v17144_v21  ;;  %v13332_v32 = vadd.f32 %v13331_v63, %v13330_v33 }
 0x299   :  { %v13254_v2 = vpop.f32.mrf.mxu0  ;;  %v13335_v25 = vadd.f32 %v17161_v37, %v17159_v35  ;;  %v13338_v33 = vadd.f32 %v13337_v41, %v17165_v39  ;;  %v13341_v41 = vadd.f32 %v17180_v12, %v17178_v53  ;;  %v13344_v37 = vadd.f32 %v13343_v11, %v13342_v51 }
 0x29a   :  { %v1773_v38 = vadd.f32 %v13317_v60, %v13253_v57 }
 0x29b   :  { %v13255_v42 = vpop.f32.mrf.mxu0 }
 0x29c   :  { %v13256_v49 = vadd.f32 %v13255_v42, %v13254_v2  ;;  %v17190_v2 = vpop.f32.mrf.mxu1 }
 0x29d   :  { %v13257_v62 = vpop.f32.mrf.mxu0 }
 0x29e   :  { %v1776_v16 = vadd.f32 %v13320_v40, %v13256_v49 }
 0x29f   :  { %v13258_v44 = vpop.f32.mrf.mxu0 }
 0x2a0   :  { %v1835_v36 = vpack.c.bf16 %v1776_v16, %v1773_v38  ;;  %v13259_v54 = vadd.f32 %v13258_v44, %v13257_v62  ;;  %v13346_v16 = vpop.f32.mrf.mxu1 }
 0x2a1   :  { %v13260_v34 = vpop.f32.mrf.mxu0  ;;  %v13347_v11 = vadd.f32 %v13346_v16, %v17190_v2 }
 0x2a2   :  { %14448 = vmatprep.mubr.msk.bf16.mxu0 %vm1198_vm1, %v1835_v36  ;;  %v1781_v27 = vadd.f32 %v13323_v1, %v13259_v54  ;;  %v13348_v54 = vpop.f32.mrf.mxu1 }
 0x2a3   :  { %v13261_v29 = vpop.f32.mrf.mxu0 }
 0x2a4   :  { %v13262_v10 = vadd.f32 %v13261_v29, %v13260_v34  ;;  %v13349_v1 = vpop.f32.mrf.mxu1 }
 0x2a5   :  { %v13263_v18 = vpop.f32.mrf.mxu0  ;;  %v13350_v12 = vadd.f32 %v13349_v1, %v13348_v54 }
 0x2a6   :  { %v1784_v57 = vadd.f32 %v13326_v7, %v13262_v10 }
 0x2a7   :  { %v13264_v49 = vpop.f32.mrf.mxu0 }
 0x2a8   :  { %v1836_v42 = vpack.c.bf16 %v1784_v57, %v1781_v27  ;;  %v13265_v60 = vadd.f32 %v13264_v49, %v13263_v18  ;;  %v13351_v18 = vpop.f32.mrf.mxu1 }
 0x2a9   :  { %v13266_v38 = vpop.f32.mrf.mxu0 }
 0x2aa   :  { %14449 = vmatmul.mubr.msk.bf16.vlgmr.msra.gmra.mxu0 %vm1198_vm1, %v1836_v42  ;;  %v1789_v34 = vadd.f32 %v13329_v31, %v13265_v60  ;;  %v13352_v60 = vpop.f32.mrf.mxu1 }
 0x2ab   :  { %v13267_v36 = vpop.f32.mrf.mxu0  ;;  %13437 = vmatpush3.bf16.msra.mxu0 %v17012_v48 }
 0x2ac   :  { %v13268_v43 = vadd.f32 %v13267_v36, %v13266_v38  ;;  %13438 = vmatprep.subr.bf16.mxu0 %v17020_v50 }
 0x2ad   :  { %v13269_v4 = vpop.f32.mrf.mxu0 }
 0x2ae   :  { %v1792_v44 = vadd.f32 %v13332_v32, %v13268_v43  ;;  %v13354_v32 = vpop.f32.mrf.mxu1 }
 0x2af   :  { %v13270_v40 = vpop.f32.mrf.mxu0  ;;  %13439 = vmatpush3.bf16.msra.mxu0 %v17026_v52 }
 0x2b0   :  { %v1837_v62 = vpack.c.bf16 %v1792_v44, %v1789_v34  ;;  %13440 = vmatprep.subr.bf16.mxu0 %v17034_v55  ;;  %v13271_v7 = vadd.f32 %v13270_v40, %v13269_v4 }
 0x2b1   :  { %v13272_v29 = vpop.f32.mrf.mxu0 }
 0x2b2   :  { %14452 = vmatprep.mubr.msk.bf16.mxu0 %vm1198_vm1, %v1837_v62  ;;  %v1797_v27 = vadd.f32 %v13335_v25, %v13271_v7  ;;  %v13355_v62 = vpop.f32.mrf.mxu1 }
 0x2b3   :  { %v13273_v21 = vpop.f32.mrf.mxu0  ;;  %13441 = vmatpush3.bf16.msra.mxu0 %v17042_v58 }
 0x2b4   :  { %v13274_v63 = vadd.f32 %v13273_v21, %v13272_v29  ;;  %13442 = vmatprep.subr.bf16.mxu0 %v17050_v61  ;;  %v13357_v21 = vpop.f32.mrf.mxu1 }
 0x2b5   :  { %v13275_v10 = vpop.f32.mrf.mxu0 }
 0x2b6   :  { %v1800_v57 = vadd.f32 %v13338_v33, %v13274_v63  ;;  %v13358_v16 = vpop.f32.mrf.mxu1 }
 0x2b7   :  { %v13276_v49 = vpop.f32.mrf.mxu0  ;;  %13443 = vmatpush3.bf16.msra.mxu0 %v17058_v0 }
 0x2b8   :  { %v1838_v42 = vpack.c.bf16 %v1800_v57, %v1797_v27  ;;  %13444 = vmatprep.subr.bf16.mxu0 %v17066_v6  ;;  %v13277_v36 = vadd.f32 %v13276_v49, %v13275_v10  ;;  %v17222_v27 = vld [vmem:[%s19452_s0 + $0x78] sm:$0xff]   ;;  %v13353_v57 = vadd.f32 %v13352_v60, %v13351_v18  ;;  %v13356_v49 = vadd.f32 %v13355_v62, %v13354_v32 }
 0x2b9   :  { %v13278_v38 = vpop.f32.mrf.mxu0  ;;  %v15235_v18 = vld [vmem:[#allocation2 + $0x30c] ss:$16 sps:$4 sm:$0xff]   ;;  %v15233_v32 = vld [vmem:[#allocation2 + $0x308] ss:$16 sps:$4 sm:$0xff]  }
 0x2ba   :  { %14453 = vmatmul.mubr.msk.bf16.gmra.mxu0 %vm1198_vm1, %v1838_v42  ;;  %v1805_v43 = vadd.f32 %v13341_v41, %v13277_v36  ;;  %v15241_v62 = vld [vmem:[#allocation2 + $0x32c] ss:$16 sps:$4 sm:$0xff]  }
 0x2bb   :  { %v13279_v35 = vpop.f32.mrf.mxu0  ;;  %13445 = vmatpush3.bf16.msra.mxu0 %v17074_v8 }
 0x2bc   :  { %v13280_v39 = vadd.f32 %v13279_v35, %v13278_v38  ;;  %13446 = vmatprep.subr.bf16.mxu0 %v17080_v9  ;;  %v13360_v38 = vpop.f32.mrf.mxu1 }
 0x2bd   :  { %v13281_v31 = vpop.f32.mrf.mxu0 }
 0x2be   :  { %v1808_v4 = vadd.f32 %v13344_v37, %v13280_v39 }
 0x2bf   :  { %v13282_v34 = vpop.f32.mrf.mxu0  ;;  %13447 = vmatpush3.bf16.msra.mxu0 %v17088_v13 }
 0x2c0   :  { %v1839_v44 = vpack.c.bf16 %v1808_v4, %v1805_v43  ;;  %13448 = vmatprep.subr.bf16.mxu0 %v17094_v15  ;;  %v13283_v29 = vadd.f32 %v13282_v34, %v13281_v31  ;;  %v13361_v31 = vpop.f32.mrf.mxu1 }
 0x2c1   :  { %v13284_v40 = vpop.f32.mrf.mxu0 }
 0x2c2   :  { %14456 = vmatprep.mubr.msk.bf16.mxu0 %vm1198_vm1, %v1839_v44  ;;  %v1813_v25 = vadd.f32 %v13347_v11, %v13283_v29  ;;  %v13359_v44 = vadd.f32 %v13358_v16, %v13357_v21  ;;  %v15247_v21 = vld [vmem:[#allocation2 + $0x34c] ss:$16 sps:$4 sm:$0xff]  }
 0x2c3   :  { %v13285_v53 = vpop.f32.mrf.mxu0  ;;  %13449 = vmatpush3.bf16.msra.mxu0 %v17104_v20  ;;  %v15253_v16 = vld [vmem:[#allocation2 + $0x36c] ss:$16 sps:$4 sm:$0xff]  }
 0x2c4   :  { %v13286_v51 = vadd.f32 %v13285_v53, %v13284_v40  ;;  %13450 = vmatprep.subr.bf16.mxu0 %v17110_v22  ;;  %v13362_v40 = vadd.f32 %v13361_v31, %v13360_v38  ;;  %v15278_v31 = vld [vmem:[#allocation2 + $0x424] ss:$16 sps:$4 sm:$0xff]  }
 0x2c5   :  { %v13287_v7 = vpop.f32.mrf.mxu0 }
 0x2c6   :  { %v1816_v33 = vadd.f32 %v13350_v12, %v13286_v51  ;;  %v17231_v12 = vld [vmem:[%s19452_s0 + $0x38] sm:$0xff]   ;;  %v17237_v51 = vld [vmem:[%s19452_s0 + $0x70] sm:$0xff]  }
 0x2c7   :  { %v13288_v63 = vpop.f32.mrf.mxu0  ;;  %13451 = vmatpush3.bf16.msra.mxu0 %v17124_v30 }
 0x2c8   :  { %v1840_v10 = vpack.c.bf16 %v1816_v33, %v1813_v25  ;;  %13509 = vmatprep.subr.bf16.mxu0 %v17222_v27  ;;  %v13289_v54 = vadd.f32 %v13288_v63, %v13287_v7  ;;  %v15239_v7 = vld [vmem:[#allocation2 + $0x328] ss:$16 sps:$4 sm:$0xff]   ;;  %v17243_v25 = vld [vmem:[%s19452_s0 + $0x30] sm:$0xff]  }
 0x2c9   :  { %v13290_v2 = vpop.f32.mrf.mxu0  ;;  %v17249_v33 = vld [vmem:[%s19452_s0 + $0x68] sm:$0xff]  }
 0x2ca   :  { %14457 = vmatmul.mubr.msk.bf16.gmra.mxu0 %vm1198_vm1, %v1840_v10  ;;  %v1821_v35 = vadd.f32 %v13353_v57, %v13289_v54  ;;  %v17255_v63 = vld [vmem:[%s19452_s0 + $0x28] sm:$0xff]   ;;  %v17261_v10 = vld [vmem:[%s19452_s0 + $0x60] sm:$0xff]  }
 0x2cb   :  { %v13291_v1 = vpop.f32.mrf.mxu0  ;;  %v15251_v54 = vld [vmem:[#allocation2 + $0x368] ss:$16 sps:$4 sm:$0xff]  }
 0x2cc   :  { %v13292_v42 = vadd.f32 %v13291_v1, %v13290_v2  ;;  %v15245_v2 = vld [vmem:[#allocation2 + $0x348] ss:$16 sps:$4 sm:$0xff]   ;;  %v15259_v1 = vld [vmem:[#allocation2 + $0x38c] ss:$16 sps:$4 sm:$0xff]  }
 0x2cd   :  { %v13293_v36 = vpop.f32.mrf.mxu0  ;;  %v15266_v57 = vld [vmem:[#allocation2 + $0x3c8] ss:$16 sps:$4 sm:$0xff]  }
 0x2ce   :  { %v1824_v41 = vadd.f32 %v13356_v49, %v13292_v42 }
 0x2cf   :  { %v13294_v37 = vpop.f32.mrf.mxu0 }
 0x2d0   :  { %v1841_v39 = vpack.c.bf16 %v1824_v41, %v1821_v35  ;;  %v13295_v4 = vadd.f32 %v13294_v37, %v13293_v36  ;;  %v15272_v41 = vld [vmem:[#allocation2 + $0x404] ss:$16 sps:$4 sm:$0xff]   ;;  %v15270_v37 = vld [vmem:[#allocation2 + $0x400] ss:$16 sps:$4 sm:$0xff]  }
 0x2d1   :  { %v13296_v43 = vpop.f32.mrf.mxu0 }
 0x2d2   :  { %14460 = vmatprep.mubr.msk.bf16.mxu0 %vm1198_vm1, %v1841_v39  ;;  %v1829_v53 = vadd.f32 %v13359_v44, %v13295_v4 }
 0x2d3   :  { %v13297_v34 = vpop.f32.mrf.mxu0 }
 0x2d4   :  { %v13298_v29 = vadd.f32 %v13297_v34, %v13296_v43  ;;  %v15276_v43 = vld [vmem:[#allocation2 + $0x420] ss:$16 sps:$4 sm:$0xff]  }
 0x2d6   :  { %v1832_v11 = vadd.f32 %v13362_v40, %v13298_v29 }
 0x2d8   :  { %v1842_v60 = vpack.c.bf16 %v1832_v11, %v1829_v53 }
 0x2da   :  { %14461 = vmatmul.mubr.msk.bf16.gmra.mxu0 %vm1198_vm1, %v1842_v60  ;;  %v15284_v60 = vld [vmem:[#allocation2 + $0x444] ss:$16 sps:$4 sm:$0xff]  }
 0x2db   :  { %2305 = vmatprep.mubr.bf16.mxu0 %v15235_v18 }
 0x2e2   :  { %2306 = vmatmul.mubr.bf16.vlgmr.msra.gmra.mxu0 %v15233_v32  ;;  %v15282_v32 = vld [vmem:[#allocation2 + $0x440] ss:$16 sps:$4 sm:$0xff]  }
 0x2e3   :  { %2313 = vmatprep.mubr.bf16.mxu0 %v15241_v62  ;;  %13510 = vmatpush3.bf16.msra.mxu0 %v17231_v12 }
 0x2e4   :  { %13511 = vmatprep.subr.bf16.mxu0 %v17237_v51 }
 0x2e7   :  { %13512 = vmatpush3.bf16.msra.mxu0 %v17243_v25 }
 0x2e8   :  { %13513 = vmatprep.subr.bf16.mxu0 %v17249_v33 }
 0x2ea   :  { %2314 = vmatmul.mubr.bf16.gmra.mxu0 %v15239_v7  ;;  %v15290_v7 = vld [vmem:[#allocation2 + $0x464] ss:$16 sps:$4 sm:$0xff]  }
 0x2eb   :  { %2321 = vmatprep.mubr.bf16.mxu0 %v15247_v21  ;;  %13514 = vmatpush3.bf16.msra.mxu0 %v17255_v63 }
 0x2ec   :  { %13515 = vmatprep.subr.bf16.mxu0 %v17261_v10 }
 0x2ef   :  { %13516 = vmatpush3.bf16.msra.mxu0 %v16913_v45  ;;  %v15257_v45 = vld [vmem:[#allocation2 + $0x388] ss:$16 sps:$4 sm:$0xff]  }
 0x2f0   :  { %13517 = vmatprep.subr.bf16.mxu0 %v16919_v47  ;;  %v15265_v47 = vld [vmem:[#allocation2 + $0x3ac] ss:$16 sps:$4 sm:$0xff]  }
 0x2f2   :  { %2322 = vmatmul.mubr.bf16.gmra.mxu0 %v15245_v2  ;;  %v15288_v2 = vld [vmem:[#allocation2 + $0x460] ss:$16 sps:$4 sm:$0xff]  }
 0x2f3   :  { %2329 = vmatprep.mubr.bf16.mxu0 %v15253_v16  ;;  %13518 = vmatpush3.bf16.msra.mxu0 %v16926_v56  ;;  %v15263_v56 = vld [vmem:[#allocation2 + $0x3a8] ss:$16 sps:$4 sm:$0xff]  }
 0x2f4   :  { %13519 = vmatprep.subr.bf16.mxu0 %v16932_v59  ;;  %v15268_v59 = vld [vmem:[#allocation2 + $0x3cc] ss:$16 sps:$4 sm:$0xff]  }
 0x2f7   :  { %13520 = vmatpush3.bf16.msra.mxu0 %v16940_v3  ;;  %v15269_v3 = vld [vmem:[%s19454_s2 + $0x4] ss:$0 sps:$4 sm:$0xcc]  }
 0x2f8   :  { %13521 = vmatprep.subr.bf16.mxu0 %v16946_v5  ;;  %v2381_v5 = vrot.slane %v15269_v3, 2  ;;  %v15296_v3 = vld [vmem:[#allocation2 + $0x484] ss:$16 sps:$4 sm:$0xff]  }
 0x2fa   :  { %2330 = vmatmul.mubr.bf16.gmra.mxu0 %v15251_v54  ;;  %15023 = vmatprep.subr.msk.bf16.mxu1 %vm1223_vm0, %v2381_v5 }
 0x2fb   :  { %2337 = vmatprep.mubr.bf16.mxu0 %v15259_v1  ;;  %13522 = vmatpush3.bf16.msra.mxu0 %v16955_v14  ;;  %v2407_v14 = vsel %vm1223_vm0, %v2381_v5, 0  ;;  %v19499_v1 = vld [vmem:[#allocation28_spill] sm:$0xff] }
 0x2fc   :  { %13523 = vmatprep.subr.bf16.mxu0 %v16961_v17  ;;  %14465 = vmatpush3.bf16.msra.mxu1 %v2407_v14  ;;  %v17279_v17 = vpop.f32.mrf.mxu1  ;;  %v15294_v5 = vld [vmem:[#allocation2 + $0x480] ss:$16 sps:$4 sm:$0xff]  }
 0x2fd   :  { %13573 = vmatprep.subr.bf16.mxu1 %v16975_v26 }
 0x2ff   :  { %13524 = vmatpush3.bf16.msra.mxu0 %v16969_v24  ;;  %v17281_v24 = vpop.f32.mrf.mxu1 }
 0x301   :  { %v17283_v49 = vpop.f32.mrf.mxu1 }
 0x302   :  { %2338 = vmatmul.mubr.bf16.gmra.mxu0 %v15257_v45 }
 0x303   :  { %2345 = vmatprep.mubr.bf16.mxu0 %v15265_v47  ;;  %v17285_v42 = vpop.f32.mrf.mxu1 }
 0x305   :  { %v17287_v38 = vpop.f32.mrf.mxu1 }
 0x307   :  { %v17289_v36 = vpop.f32.mrf.mxu1 }
 0x309   :  { %v17291_v35 = vpop.f32.mrf.mxu1 }
 0x30a   :  { %2346 = vmatmul.mubr.bf16.gmra.mxu0 %v15263_v56  ;;  %v19501_v56 = vld [vmem:[#allocation29_spill] sm:$0xff] }
 0x30b   :  { %2353 = vmatprep.mubr.bf16.mxu0 %v15268_v59  ;;  %v17293_v39 = vpop.f32.mrf.mxu1 }
 0x30d   :  { %v17295_v26 = vpop.f32.mrf.mxu1 }
 0x30f   :  { %v17300_v44 = vpop.f32.mrf.mxu1 }
 0x311   :  { %v17308_v18 = vpop.f32.mrf.mxu1 }
 0x312   :  { %2354 = vmatmul.mubr.bf16.gmra.mxu0 %v15266_v57 }
 0x313   :  { %2747 = vmatprep.mubr.bf16.mxu0 %v15272_v41  ;;  %v17310_v62 = vpop.f32.mrf.mxu1  ;;  %v15302_v41 = vld [vmem:[#allocation2 + $0x4a4] ss:$16 sps:$4 sm:$0xff]  }
 0x31a   :  { %2748 = vmatmul.mubr.bf16.vlgmr.msra.gmra.mxu0 %v15270_v37 }
 0x31b   :  { %2755 = vmatprep.mubr.bf16.mxu0 %v15278_v31  ;;  %v15300_v31 = vld [vmem:[#allocation2 + $0x4a0] ss:$16 sps:$4 sm:$0xff]  }
 0x322   :  { %2756 = vmatmul.mubr.bf16.gmra.mxu0 %v15276_v43 }
 0x323   :  { %2763 = vmatprep.mubr.bf16.mxu0 %v15284_v60 }
 0x32a   :  { %2764 = vmatmul.mubr.bf16.gmra.mxu0 %v15282_v32  ;;  %v19506_v32 = vld [vmem:[#allocation32_spill] sm:$0xff] }
 0x32b   :  { %2771 = vmatprep.mubr.bf16.mxu0 %v15290_v7 }
 0x332   :  { %2772 = vmatmul.mubr.bf16.gmra.mxu0 %v15288_v2 }
 0x333   :  { %2779 = vmatprep.mubr.bf16.mxu0 %v15296_v3 }
 0x33a   :  { %2780 = vmatmul.mubr.bf16.gmra.mxu0 %v15294_v5 }
 0x33b   :  { %2787 = vmatprep.mubr.bf16.mxu0 %v15302_v41  ;;  %v15314_v41 = vld [vmem:[#allocation2 + $0x4e4] ss:$16 sps:$4 sm:$0xff]  }
 0x342   :  { %2788 = vmatmul.mubr.bf16.gmra.mxu0 %v15300_v31 }
 0x36a   :  { %v14450_v4 = vpop.f32.mrf.mxu0 }
 0x36b   :  { %v17298_v34 = vadd.f32 %v14450_v4, %v17099_v19  ;;  %v17312_v19 = vpop.f32.mrf.mxu1  ;;  %v19504_v4 = vld [vmem:[#allocation31_spill] sm:$0xff] }
 0x36c   :  { %v1904_v40 = vpop.f32.mrf.mxu0 }
 0x36d   :  { %v17303_v29 = vadd.f32 %v1904_v40, %v17114_v23  ;;  %v17319_v16 = vpop.f32.mrf.mxu1 }
 0x36e   :  { %v14451_v53 = vpop.f32.mrf.mxu0 }
 0x36f   :  { %19495 = vst [vmem:[#allocation39_spill] sm:$0xff] %v17303_v29  ;;  %v17306_v11 = vadd.f32 %v14451_v53, %v17119_v28  ;;  %v17327_v57 = vpop.f32.mrf.mxu1 }
 0x370   :  { %v17314_v21 = vpop.f32.mrf.mxu0 }
 0x371   :  { %19496 = vst [vmem:[#allocation40_spill] sm:$0xff] %v17306_v11  ;;  %19497 = vst [vmem:[#allocation41_spill] sm:$0xff] %v17314_v21  ;;  %v17329_v14 = vpop.f32.mrf.mxu1  ;;  %v19513_v21 = vld [vmem:[#allocation36_spill] sm:$0xff] }
 0x37a   :  { %v14454_v23 = vpop.f32.mrf.mxu0 }
 0x37b   :  { %v17317_v28 = vadd.f32 %v14454_v23, %v17136_v46  ;;  %v17331_v46 = vpop.f32.mrf.mxu1  ;;  %v19508_v23 = vld [vmem:[#allocation33_spill] sm:$0xff] }
 0x37c   :  { %v1920_v54 = vpop.f32.mrf.mxu0 }
 0x37d   :  { %19498 = vst [vmem:[#allocation42_spill] sm:$0xff] %v17317_v28  ;;  %v17322_v45 = vadd.f32 %v1920_v54, %v19499_v1  ;;  %v17338_v53 = vpop.f32.mrf.mxu1 }
 0x37e   :  { %v14455_v47 = vpop.f32.mrf.mxu0 }
 0x37f   :  { %19500 = vst [vmem:[#allocation28_spill] sm:$0xff] %v17322_v45  ;;  %v17325_v59 = vadd.f32 %v14455_v47, %v19501_v56  ;;  %v17346_v1 = vpop.f32.mrf.mxu1  ;;  %v15308_v47 = vld [vmem:[#allocation2 + $0x4c4] ss:$16 sps:$4 sm:$0xff]   ;;  %v15306_v56 = vld [vmem:[#allocation2 + $0x4c0] ss:$16 sps:$4 sm:$0xff]  }
 0x380   :  { %v17333_v37 = vpop.f32.mrf.mxu0  ;;  %2795 = vmatprep.mubr.bf16.mxu0 %v15308_v47 }
 0x381   :  { %19502 = vst [vmem:[#allocation29_spill] sm:$0xff] %v17325_v59  ;;  %19503 = vst [vmem:[#allocation43_spill] sm:$0xff] %v17333_v37  ;;  %2796 = vmatmul.mubr.bf16.gmra.mxu0 %v15306_v56  ;;  %v17348_v3 = vpop.f32.mrf.mxu1  ;;  %v19515_v37 = vld [vmem:[#allocation37_spill] sm:$0xff] }
 0x382   :  { %2803 = vmatprep.mubr.bf16.mxu0 %v15314_v41 }
 0x383   :  { %v17350_v5 = vpop.f32.mrf.mxu1 }
 0x38a   :  { %v14458_v43 = vpop.f32.mrf.mxu0 }
 0x38b   :  { %v17336_v40 = vadd.f32 %v14458_v43, %v19504_v4  ;;  %v15312_v43 = vld [vmem:[#allocation2 + $0x4e0] ss:$16 sps:$4 sm:$0xff]  }
 0x38c   :  { %v1936_v60 = vpop.f32.mrf.mxu0  ;;  %2804 = vmatmul.mubr.bf16.gmra.mxu0 %v15312_v43 }
 0x38d   :  { %19505 = vst [vmem:[#allocation31_spill] sm:$0xff] %v17336_v40  ;;  %v17341_v7 = vadd.f32 %v1936_v60, %v19506_v32  ;;  %v19511_v60 = vld [vmem:[#allocation35_spill] sm:$0xff] }
 0x38e   :  { %v14459_v2 = vpop.f32.mrf.mxu0 }
 0x38f   :  { %19507 = vst [vmem:[#allocation32_spill] sm:$0xff] %v17341_v7  ;;  %v17344_v54 = vadd.f32 %v14459_v2, %v19508_v23  ;;  %v17357_v2 = vpop.f32.mrf.mxu1 }
 0x390   :  { %v17352_v31 = vpop.f32.mrf.mxu0 }
 0x391   :  { %19509 = vst [vmem:[#allocation33_spill] sm:$0xff] %v17344_v54  ;;  %19510 = vst [vmem:[#allocation44_spill] sm:$0xff] %v17352_v31  ;;  %v17365_v7 = vpop.f32.mrf.mxu1 }
 0x393   :  { %v17369_v40 = vpop.f32.mrf.mxu1 }
 0x39a   :  { %v14462_v4 = vpop.f32.mrf.mxu0 }
 0x39b   :  { %v17355_v32 = vadd.f32 %v14462_v4, %v19511_v60 }
 0x39c   :  { %v1952_v23 = vpop.f32.mrf.mxu0 }
 0x39d   :  { %19512 = vst [vmem:[#allocation35_spill] sm:$0xff] %v17355_v32  ;;  %v17360_v47 = vadd.f32 %v1952_v23, %v19513_v21  ;;  %v17371_v32 = vpop.f32.mrf.mxu1  ;;  %v13390_v21 = vadd.f32 %v17281_v24, %v17279_v17  ;;  %v13396_v17 = vadd.f32 %v17289_v36, %v17287_v38  ;;  %v13399_v24 = vadd.f32 %v17293_v39, %v17291_v35 }
 0x39e   :  { %v14463_v56 = vpop.f32.mrf.mxu0  ;;  %v13402_v38 = vadd.f32 %v17300_v44, %v17295_v26  ;;  %v13405_v36 = vadd.f32 %v17310_v62, %v17308_v18  ;;  %v13411_v18 = vadd.f32 %v17329_v14, %v17327_v57 }
 0x39f   :  { %19514 = vst [vmem:[#allocation36_spill] sm:$0xff] %v17360_v47  ;;  %v17363_v54 = vadd.f32 %v14463_v56, %v19515_v37  ;;  %v13393_v37 = vadd.f32 %v17285_v42, %v17283_v49 }
 0x3a0   :  { %v17367_v31 = vpop.f32.mrf.mxu0 }
 0x3a1   :  { %19516 = vst [vmem:[#allocation37_spill] sm:$0xff] %v17363_v54  ;;  %19517 = vst [vmem:[#allocation45_spill] sm:$0xff] %v17367_v31  ;;  %v17377_v31 = vpop.f32.mrf.mxu1 }
 0x3a2   :  { %v13452_v41 = vpop.f32.mrf.mxu0 }
 0x3a4   :  { %v13453_v43 = vpop.f32.mrf.mxu0 }
 0x3a5   :  { %v13454_v60 = vadd.f32 %v13453_v43, %v13452_v41  ;;  %v17380_v41 = vpop.f32.mrf.mxu1 }
 0x3a6   :  { %v13455_v4 = vpop.f32.mrf.mxu0 }
 0x3a7   :  { %v2308_v54 = vadd.f32 %v13454_v60, %v13390_v21  ;;  %v17386_v60 = vpop.f32.mrf.mxu1 }
 0x3a8   :  { %v13456_v59 = vpop.f32.mrf.mxu0 }
 0x3a9   :  { %v13457_v23 = vadd.f32 %v13456_v59, %v13455_v4 }
 0x3aa   :  { %v13458_v56 = vpop.f32.mrf.mxu0 }
 0x3ab   :  { %v2311_v47 = vadd.f32 %v13457_v23, %v13393_v37 }
 0x3ac   :  { %v13459_v45 = vpop.f32.mrf.mxu0 }
 0x3ad   :  { %v2370_v28 = vpack.c.bf16 %v2311_v47, %v2308_v54  ;;  %v13460_v29 = vadd.f32 %v13459_v45, %v13458_v56 }
 0x3ae   :  { %v13461_v11 = vpop.f32.mrf.mxu0 }
 0x3af   :  { %14466 = vmatprep.mubr.msk.bf16.mxu1 %vm1198_vm1, %v2370_v28  ;;  %v2316_v59 = vadd.f32 %v13460_v29, %v13396_v17  ;;  %v17389_v28 = vpop.f32.mrf.mxu1 }
 0x3b0   :  { %v13462_v43 = vpop.f32.mrf.mxu0 }
 0x3b1   :  { %v13463_v49 = vadd.f32 %v13462_v43, %v13461_v11  ;;  %v13431_v23 = vpop.f32.mrf.mxu1 }
 0x3b2   :  { %v13464_v42 = vpop.f32.mrf.mxu0 }
 0x3b3   :  { %v2319_v4 = vadd.f32 %v13463_v49, %v13399_v24  ;;  %v13433_v26 = vpop.f32.mrf.mxu1 }
 0x3b4   :  { %v13465_v54 = vpop.f32.mrf.mxu0 }
 0x3b5   :  { %v2371_v47 = vpack.c.bf16 %v2319_v4, %v2316_v59  ;;  %v13466_v21 = vadd.f32 %v13465_v54, %v13464_v42  ;;  %v13434_v49 = vpop.f32.mrf.mxu1 }
 0x3b6   :  { %v13467_v45 = vpop.f32.mrf.mxu0 }
 0x3b7   :  { %14467 = vmatmul.mubr.msk.bf16.vlgmr.msra.gmra.mxu1 %vm1198_vm1, %v2371_v47  ;;  %v2324_v29 = vadd.f32 %v13466_v21, %v13402_v38  ;;  %v13494_v54 = vpop.f32.mrf.mxu1 }
 0x3b8   :  { %v13468_v37 = vpop.f32.mrf.mxu0  ;;  %13574 = vmatpush3.bf16.msra.mxu1 %v17012_v48 }
 0x3b9   :  { %v13469_v35 = vadd.f32 %v13468_v37, %v13467_v45  ;;  %13575 = vmatprep.subr.bf16.mxu1 %v17020_v50  ;;  %v13408_v50 = vadd.f32 %v17319_v16, %v17312_v19  ;;  %v13417_v16 = vadd.f32 %v17348_v3, %v17346_v1 }
 0x3ba   :  { %v13470_v39 = vpop.f32.mrf.mxu0 }
 0x3bb   :  { %v2327_v11 = vadd.f32 %v13469_v35, %v13405_v36 }
 0x3bc   :  { %v13471_v56 = vpop.f32.mrf.mxu0  ;;  %13576 = vmatpush3.bf16.msra.mxu1 %v17026_v52 }
 0x3bd   :  { %v2372_v43 = vpack.c.bf16 %v2327_v11, %v2324_v29  ;;  %13577 = vmatprep.subr.bf16.mxu1 %v17034_v55  ;;  %v13472_v17 = vadd.f32 %v13471_v56, %v13470_v39  ;;  %v13435_v29 = vadd.f32 %v13434_v49, %v13433_v26  ;;  %v13429_v56 = vadd.f32 %v17386_v60, %v17380_v41  ;;  %v15285_v41 = vld [vmem:[#allocation2 + $0x448] ss:$16 sps:$4 sm:$0xff]   ;;  %v15293_v60 = vld [vmem:[#allocation2 + $0x46c] ss:$16 sps:$4 sm:$0xff]  }
 0x3be   :  { %v13473_v48 = vpop.f32.mrf.mxu0  ;;  %v15291_v49 = vld [vmem:[#allocation2 + $0x468] ss:$16 sps:$4 sm:$0xff]  }
 0x3bf   :  { %14470 = vmatprep.mubr.msk.bf16.mxu1 %vm1198_vm1, %v2372_v43  ;;  %v2332_v24 = vadd.f32 %v13472_v17, %v13408_v50  ;;  %v15273_v50 = vld [vmem:[#allocation2 + $0x408] ss:$16 sps:$4 sm:$0xff]  }
 0x3c0   :  { %v13474_v44 = vpop.f32.mrf.mxu0  ;;  %13578 = vmatpush3.bf16.msra.mxu1 %v17042_v58 }
 0x3c1   :  { %v13475_v62 = vadd.f32 %v13474_v44, %v13473_v48  ;;  %13579 = vmatprep.subr.bf16.mxu1 %v17050_v61  ;;  %v13414_v61 = vadd.f32 %v17338_v53, %v17331_v46  ;;  %v13423_v53 = vadd.f32 %v17369_v40, %v17365_v7  ;;  %v13426_v7 = vadd.f32 %v17377_v31, %v17371_v32  ;;  %v15279_v31 = vld [vmem:[#allocation2 + $0x428] ss:$16 sps:$4 sm:$0xff]   ;;  %v15287_v32 = vld [vmem:[#allocation2 + $0x44c] ss:$16 sps:$4 sm:$0xff]  }
 0x3c2   :  { %v13476_v52 = vpop.f32.mrf.mxu0 }
 0x3c3   :  { %v2335_v55 = vadd.f32 %v13475_v62, %v13411_v18  ;;  %v15281_v18 = vld [vmem:[#allocation2 + $0x42c] ss:$16 sps:$4 sm:$0xff]   ;;  %v17443_v62 = vld [vmem:[%s19452_s0 + $0x20] sm:$0xff]  }
 0x3c4   :  { %v13477_v42 = vpop.f32.mrf.mxu0  ;;  %13580 = vmatpush3.bf16.msra.mxu1 %v17058_v0 }
 0x3c5   :  { %v2373_v59 = vpack.c.bf16 %v2335_v55, %v2332_v24  ;;  %13581 = vmatprep.subr.bf16.mxu1 %v17066_v6  ;;  %v13478_v4 = vadd.f32 %v13477_v42, %v13476_v52  ;;  %v13495_v6 = vpop.f32.mrf.mxu1  ;;  %v17449_v52 = vld [vmem:[%s19452_s0 + $0x58] sm:$0xff]   ;;  %v17461_v55 = vld [vmem:[%s19452_s0 + $0x50] sm:$0xff]  }
 0x3c6   :  { %v13479_v58 = vpop.f32.mrf.mxu0  ;;  %v17455_v24 = vld [vmem:[%s19452_s0 + $0x18] sm:$0xff]  }
 0x3c7   :  { %14471 = vmatmul.mubr.msk.bf16.gmra.mxu1 %vm1198_vm1, %v2373_v59  ;;  %v2340_v14 = vadd.f32 %v13478_v4, %v13414_v61  ;;  %v13497_v37 = vpop.f32.mrf.mxu1  ;;  %v15299_v42 = vld [vmem:[#allocation2 + $0x48c] ss:$16 sps:$4 sm:$0xff]   ;;  %v17467_v59 = vld [vmem:[%s19452_s0 + $0x10] sm:$0xff]  }
 0x3c8   :  { %v13480_v19 = vpop.f32.mrf.mxu0  ;;  %13582 = vmatpush3.bf16.msra.mxu1 %v17074_v8  ;;  %v17479_v4 = vld [vmem:[%s19452_s0 + $0x8] sm:$0xff]  }
 0x3c9   :  { %v13481_v57 = vadd.f32 %v13480_v19, %v13479_v58  ;;  %13583 = vmatprep.subr.bf16.mxu1 %v17080_v9  ;;  %v13420_v9 = vadd.f32 %v17357_v2, %v17350_v5  ;;  %v13498_v3 = vpop.f32.mrf.mxu1  ;;  %v13496_v5 = vadd.f32 %v13495_v6, %v13494_v54  ;;  %v17473_v58 = vld [vmem:[%s19452_s0 + $0x48] sm:$0xff]   ;;  %v17485_v54 = vld [vmem:[%s19452_s0 + $0x40] sm:$0xff]  }
 0x3ca   :  { %v13482_v0 = vpop.f32.mrf.mxu0  ;;  %v13499_v2 = vadd.f32 %v13498_v3, %v13497_v37  ;;  %v15297_v19 = vld [vmem:[#allocation2 + $0x488] ss:$16 sps:$4 sm:$0xff]   ;;  %v15305_v61 = vld [vmem:[#allocation2 + $0x4ac] ss:$16 sps:$4 sm:$0xff]   ;;  %v15324_v3 = vld [vmem:[#allocation2 + $0x520] ss:$16 sps:$4 sm:$0xff]  }
 0x3cb   :  { %v2343_v47 = vadd.f32 %v13481_v57, %v13417_v16  ;;  %v17491_v16 = vld [vmem:[%s19452_s0] sm:$0xff]   ;;  %v15303_v57 = vld [vmem:[#allocation2 + $0x4a8] ss:$16 sps:$4 sm:$0xff]   ;;  %v15317_v6 = vld [vmem:[#allocation2 + $0x4ec] ss:$16 sps:$4 sm:$0xff]  }
 0x3cc   :  { %v13483_v45 = vpop.f32.mrf.mxu0  ;;  %13584 = vmatpush3.bf16.msra.mxu1 %v17088_v13  ;;  %v2367_v48 = vadd.f32 %v13499_v2, %v13435_v29  ;;  %v19519_v2 = vld [vmem:[#allocation40_spill] sm:$0xff] }
 0x3cd   :  { %v2374_v21 = vpack.c.bf16 %v2343_v47, %v2340_v14  ;;  %13585 = vmatprep.subr.bf16.mxu1 %v17094_v15  ;;  %v13484_v38 = vadd.f32 %v13483_v45, %v13482_v0  ;;  %v15311_v0 = vld [vmem:[#allocation2 + $0x4cc] ss:$16 sps:$4 sm:$0xff]   ;;  %v15309_v14 = vld [vmem:[#allocation2 + $0x4c8] ss:$16 sps:$4 sm:$0xff]  }
 0x3ce   :  { %v13485_v8 = vpop.f32.mrf.mxu0  ;;  %v15315_v47 = vld [vmem:[#allocation2 + $0x4e8] ss:$16 sps:$4 sm:$0xff]  }
 0x3cf   :  { %14474 = vmatprep.mubr.msk.bf16.mxu1 %vm1198_vm1, %v2374_v21  ;;  %v2348_v15 = vadd.f32 %v13484_v38, %v13420_v9  ;;  %v2554_v45 = vld [vmem:[%s19454_s2 + $0x8] sm:$0x3]  ;;  %v15318_v9 = vld [vmem:[#allocation2 + $0x500] ss:$16 sps:$4 sm:$0xff]  }
 0x3d0   :  { %v13486_v46 = vpop.f32.mrf.mxu0  ;;  %13586 = vmatpush3.bf16.msra.mxu1 %v17104_v20  ;;  %v13432_v20 = vadd.f32 %v13431_v23, %v17389_v28  ;;  %v15275_v23 = vld [vmem:[#allocation2 + $0x40c] ss:$16 sps:$4 sm:$0xff]   ;;  %15024 = vmatprep.subr.msk.bf16.mxu0 %vm1223_vm0, %v2554_v45  ;;  %v2942_v21 = vsel %vm1223_vm0, %v2554_v45, 0 }
 0x3d1   :  { %v13487_v1 = vadd.f32 %v13486_v46, %v13485_v8  ;;  %13587 = vmatprep.subr.bf16.mxu1 %v17110_v22  ;;  %14483 = vmatpush3.bf16.msra.mxu0 %v2942_v21  ;;  %v17502_v8 = vld [vmem:[%s19452_s0 + $0xf8] sm:$0xff]   ;;  %v15320_v46 = vld [vmem:[#allocation2 + $0x504] ss:$16 sps:$4 sm:$0xff]  }
 0x3d2   :  { %v13488_v13 = vpop.f32.mrf.mxu0  ;;  %v2364_v43 = vadd.f32 %v13496_v5, %v13432_v20  ;;  %13710 = vmatprep.subr.bf16.mxu0 %v17502_v8  ;;  %v19518_v20 = vld [vmem:[#allocation39_spill] sm:$0xff] }
 0x3d3   :  { %v2351_v36 = vadd.f32 %v13487_v1, %v13423_v53 }
 0x3d4   :  { %v13489_v35 = vpop.f32.mrf.mxu0  ;;  %13588 = vmatpush3.bf16.msra.mxu1 %v17124_v30  ;;  %v2377_v26 = vpack.c.bf16 %v2367_v48, %v2364_v43  ;;  %v15336_v48 = vld [vmem:[#allocation2 + $0x560] ss:$16 sps:$4 sm:$0xff]  }
 0x3d5   :  { %v2375_v39 = vpack.c.bf16 %v2351_v36, %v2348_v15  ;;  %13646 = vmatprep.subr.bf16.mxu1 %v17222_v27  ;;  %v13490_v40 = vadd.f32 %v13489_v35, %v13488_v13  ;;  %v15326_v13 = vld [vmem:[#allocation2 + $0x524] ss:$16 sps:$4 sm:$0xff]  }
 0x3d6   :  { %v13491_v11 = vpop.f32.mrf.mxu0 }
 0x3d7   :  { %14475 = vmatmul.mubr.msk.bf16.gmra.mxu1 %vm1198_vm1, %v2375_v39  ;;  %v2356_v17 = vadd.f32 %v13490_v40, %v13426_v7  ;;  %v15330_v7 = vld [vmem:[#allocation2 + $0x540] ss:$16 sps:$4 sm:$0xff]  }
 0x3d8   :  { %v13492_v22 = vpop.f32.mrf.mxu0 }
 0x3d9   :  { %v13493_v30 = vadd.f32 %v13492_v22, %v13491_v11  ;;  %v15332_v22 = vld [vmem:[#allocation2 + $0x544] ss:$16 sps:$4 sm:$0xff]  }
 0x3da   :  { %v17505_v37 = vpop.f32.mrf.mxu0 }
 0x3db   :  { %v2359_v44 = vadd.f32 %v13493_v30, %v13429_v56  ;;  %v15338_v30 = vld [vmem:[#allocation2 + $0x564] ss:$16 sps:$4 sm:$0xff]  }
 0x3dc   :  { %v17507_v38 = vpop.f32.mrf.mxu0 }
 0x3dd   :  { %v2376_v28 = vpack.c.bf16 %v2359_v44, %v2356_v17  ;;  %v19521_v44 = vld [vmem:[#allocation42_spill] sm:$0xff] }
 0x3de   :  { %v17509_v53 = vpop.f32.mrf.mxu0 }
 0x3df   :  { %14478 = vmatprep.mubr.msk.bf16.mxu1 %vm1198_vm1, %v2376_v28 }
 0x3e0   :  { %14479 = vmatmul.mubr.msk.bf16.gmra.mxu1 %vm1198_vm1, %v2377_v26  ;;  %v17511_v1 = vpop.f32.mrf.mxu0 }
 0x3e1   :  { %2844 = vmatprep.mubr.bf16.mxu1 %v15275_v23 }
 0x3e2   :  { %v17516_v35 = vpop.f32.mrf.mxu0 }
 0x3e4   :  { %v17524_v40 = vpop.f32.mrf.mxu0 }
 0x3e6   :  { %v17526_v56 = vpop.f32.mrf.mxu0 }
 0x3e8   :  { %2845 = vmatmul.mubr.bf16.vlgmr.msra.gmra.mxu1 %v15273_v50  ;;  %v19522_v50 = vld [vmem:[#allocation28_spill] sm:$0xff] }
 0x3e9   :  { %2852 = vmatprep.mubr.bf16.mxu1 %v15281_v18  ;;  %13647 = vmatpush3.bf16.msra.mxu1 %v17231_v12 }
 0x3ea   :  { %13648 = vmatprep.subr.bf16.mxu1 %v17237_v51 }
 0x3ed   :  { %13649 = vmatpush3.bf16.msra.mxu1 %v17243_v25 }
 0x3ee   :  { %13650 = vmatprep.subr.bf16.mxu1 %v17249_v33 }
 0x3f0   :  { %2853 = vmatmul.mubr.bf16.gmra.mxu1 %v15279_v31 }
 0x3f1   :  { %2860 = vmatprep.mubr.bf16.mxu1 %v15287_v32  ;;  %13651 = vmatpush3.bf16.msra.mxu1 %v17255_v63  ;;  %v19523_v32 = vld [vmem:[#allocation29_spill] sm:$0xff] }
 0x3f2   :  { %13652 = vmatprep.subr.bf16.mxu1 %v17261_v10 }
 0x3f5   :  { %13653 = vmatpush3.bf16.msra.mxu1 %v17443_v62 }
 0x3f6   :  { %13654 = vmatprep.subr.bf16.mxu1 %v17449_v52 }
 0x3f8   :  { %2861 = vmatmul.mubr.bf16.gmra.mxu1 %v15285_v41 }
 0x3f9   :  { %2868 = vmatprep.mubr.bf16.mxu1 %v15293_v60  ;;  %13655 = vmatpush3.bf16.msra.mxu1 %v17455_v24 }
 0x3fa   :  { %13656 = vmatprep.subr.bf16.mxu1 %v17461_v55 }
 0x3fd   :  { %13657 = vmatpush3.bf16.msra.mxu1 %v17467_v59 }
 0x3fe   :  { %13658 = vmatprep.subr.bf16.mxu1 %v17473_v58 }
 0x400   :  { %2869 = vmatmul.mubr.bf16.gmra.mxu1 %v15291_v49  ;;  %v15344_v49 = vld [vmem:[#allocation2 + $0x584] ss:$16 sps:$4 sm:$0xff]  }
 0x401   :  { %2876 = vmatprep.mubr.bf16.mxu1 %v15299_v42  ;;  %13659 = vmatpush3.bf16.msra.mxu1 %v17479_v4  ;;  %v15342_v42 = vld [vmem:[#allocation2 + $0x580] ss:$16 sps:$4 sm:$0xff]  }
 0x402   :  { %13660 = vmatprep.subr.bf16.mxu1 %v17485_v54 }
 0x405   :  { %13661 = vmatpush3.bf16.msra.mxu1 %v17491_v16 }
 0x408   :  { %2877 = vmatmul.mubr.bf16.gmra.mxu1 %v15297_v19 }
 0x409   :  { %2884 = vmatprep.mubr.bf16.mxu1 %v15305_v61 }
 0x410   :  { %2885 = vmatmul.mubr.bf16.gmra.mxu1 %v15303_v57  ;;  %v15350_v57 = vld [vmem:[#allocation2 + $0x5a4] ss:$16 sps:$4 sm:$0xff]  }
 0x411   :  { %2892 = vmatprep.mubr.bf16.mxu1 %v15311_v0 }
 0x418   :  { %2893 = vmatmul.mubr.bf16.gmra.mxu1 %v15309_v14  ;;  %v15348_v14 = vld [vmem:[#allocation2 + $0x5a0] ss:$16 sps:$4 sm:$0xff]  }
 0x419   :  { %2900 = vmatprep.mubr.bf16.mxu1 %v15317_v6 }
 0x420   :  { %2901 = vmatmul.mubr.bf16.gmra.mxu1 %v15315_v47  ;;  %v19525_v47 = vld [vmem:[#allocation31_spill] sm:$0xff] }
 0x421   :  { %3282 = vmatprep.mubr.bf16.mxu1 %v15320_v46 }
 0x428   :  { %3283 = vmatmul.mubr.bf16.vlgmr.msra.gmra.mxu1 %v15318_v9  ;;  %v19526_v9 = vld [vmem:[#allocation32_spill] sm:$0xff] }
 0x429   :  { %3290 = vmatprep.mubr.bf16.mxu1 %v15326_v13 }
 0x430   :  { %3291 = vmatmul.mubr.bf16.gmra.mxu1 %v15324_v3 }
 0x431   :  { %3298 = vmatprep.mubr.bf16.mxu1 %v15332_v22  ;;  %v15354_v22 = vld [vmem:[#allocation2 + $0x5c0] ss:$16 sps:$4 sm:$0xff]  }
 0x438   :  { %3299 = vmatmul.mubr.bf16.gmra.mxu1 %v15330_v7 }
 0x439   :  { %3306 = vmatprep.mubr.bf16.mxu1 %v15338_v30 }
 0x440   :  { %3307 = vmatmul.mubr.bf16.gmra.mxu1 %v15336_v48  ;;  %v19529_v48 = vld [vmem:[#allocation35_spill] sm:$0xff] }
 0x441   :  { %3314 = vmatprep.mubr.bf16.mxu1 %v15344_v49  ;;  %v15362_v49 = vld [vmem:[#allocation2 + $0x5e4] ss:$16 sps:$4 sm:$0xff]  }
 0x448   :  { %3315 = vmatmul.mubr.bf16.gmra.mxu1 %v15342_v42  ;;  %v19531_v42 = vld [vmem:[#allocation37_spill] sm:$0xff] }
 0x449   :  { %3322 = vmatprep.mubr.bf16.mxu1 %v15350_v57 }
 0x450   :  { %3323 = vmatmul.mubr.bf16.gmra.mxu1 %v15348_v14  ;;  %v15360_v14 = vld [vmem:[#allocation2 + $0x5e0] ss:$16 sps:$4 sm:$0xff]  }
 0x477   :  { %v14468_v15 = vpop.f32.mrf.mxu1 }
 0x478   :  { %v17514_v36 = vadd.f32 %v14468_v15, %v17298_v34  ;;  %v17528_v34 = vpop.f32.mrf.mxu0  ;;  %v19527_v15 = vld [vmem:[#allocation33_spill] sm:$0xff] }
 0x479   :  { %v2443_v39 = vpop.f32.mrf.mxu1 }
 0x47a   :  { %v17519_v29 = vadd.f32 %v2443_v39, %v19518_v20  ;;  %v17535_v23 = vpop.f32.mrf.mxu0 }
 0x47b   :  { %v14469_v5 = vpop.f32.mrf.mxu1 }
 0x47c   :  { %v17522_v11 = vadd.f32 %v14469_v5, %v19519_v2  ;;  %v17543_v60 = vpop.f32.mrf.mxu0  ;;  %v15356_v5 = vld [vmem:[#allocation2 + $0x5c4] ss:$16 sps:$4 sm:$0xff]  }
 0x47d   :  { %v17530_v43 = vpop.f32.mrf.mxu1  ;;  %3330 = vmatprep.mubr.bf16.mxu1 %v15356_v5 }
 0x47e   :  { %19520 = vst [vmem:[#allocation39_spill] sm:$0xff] %v17530_v43  ;;  %v17545_v19 = vpop.f32.mrf.mxu0  ;;  %3331 = vmatmul.mubr.bf16.gmra.mxu1 %v15354_v22 }
 0x47f   :  { %3338 = vmatprep.mubr.bf16.mxu1 %v15362_v49 }
 0x480   :  { %v17547_v61 = vpop.f32.mrf.mxu0 }
 0x482   :  { %v17554_v21 = vpop.f32.mrf.mxu0 }
 0x484   :  { %v17562_v20 = vpop.f32.mrf.mxu0 }
 0x486   :  { %v17566_v30 = vpop.f32.mrf.mxu0  ;;  %3339 = vmatmul.mubr.bf16.gmra.mxu1 %v15360_v14 }
 0x487   :  { %v14472_v17 = vpop.f32.mrf.mxu1 }
 0x488   :  { %v17533_v28 = vadd.f32 %v14472_v17, %v19521_v44 }
 0x489   :  { %v2459_v26 = vpop.f32.mrf.mxu1 }
 0x48a   :  { %v17538_v18 = vadd.f32 %v2459_v26, %v19522_v50  ;;  %v19530_v26 = vld [vmem:[#allocation36_spill] sm:$0xff] }
 0x48b   :  { %v14473_v31 = vpop.f32.mrf.mxu1 }
 0x48c   :  { %v17541_v41 = vadd.f32 %v14473_v31, %v19523_v32  ;;  %v17574_v32 = vpop.f32.mrf.mxu0 }
 0x48d   :  { %v17549_v0 = vpop.f32.mrf.mxu1 }
 0x48e   :  { %19524 = vst [vmem:[#allocation40_spill] sm:$0xff] %v17549_v0 }
 0x497   :  { %v14476_v6 = vpop.f32.mrf.mxu1 }
 0x498   :  { %v17552_v45 = vadd.f32 %v14476_v6, %v19525_v47 }
 0x499   :  { %v2475_v46 = vpop.f32.mrf.mxu1 }
 0x49a   :  { %v17557_v13 = vadd.f32 %v2475_v46, %v19526_v9  ;;  %v17581_v46 = vpop.f32.mrf.mxu0 }
 0x49b   :  { %v14477_v3 = vpop.f32.mrf.mxu1 }
 0x49c   :  { %v17560_v39 = vadd.f32 %v14477_v3, %v19527_v15  ;;  %v17583_v15 = vpop.f32.mrf.mxu0 }
 0x49d   :  { %v17564_v2 = vpop.f32.mrf.mxu1 }
 0x49e   :  { %19528 = vst [vmem:[#allocation42_spill] sm:$0xff] %v17564_v2 }
 0x4a0   :  { %v14480_v7 = vpop.f32.mrf.mxu1 }
 0x4a1   :  { %v17569_v17 = vadd.f32 %v14480_v7, %v19529_v48  ;;  %v13527_v7 = vadd.f32 %v17507_v38, %v17505_v37  ;;  %v13530_v48 = vadd.f32 %v17511_v1, %v17509_v53  ;;  %v13533_v37 = vadd.f32 %v17524_v40, %v17516_v35  ;;  %v17606_v35 = vld [vmem:[%s19452_s0 + $0xb8] sm:$0xff]  }
 0x4a2   :  { %v2491_v44 = vpop.f32.mrf.mxu1  ;;  %v13536_v38 = vadd.f32 %v17528_v34, %v17526_v56  ;;  %v13539_v40 = vadd.f32 %v17543_v60, %v17535_v23  ;;  %v13542_v56 = vadd.f32 %v17547_v61, %v17545_v19  ;;  %v17622_v23 = vld [vmem:[%s19452_s0 + $0xb0] sm:$0xff]   ;;  %v17628_v19 = vld [vmem:[%s19452_s0 + $0xe8] sm:$0xff]  }
 0x4a3   :  { %v17572_v50 = vadd.f32 %v2491_v44, %v19530_v26 }
 0x4a4   :  { %v14481_v31 = vpop.f32.mrf.mxu1 }
 0x4a5   :  { %v17577_v57 = vadd.f32 %v14481_v31, %v19531_v42  ;;  %v17589_v31 = vpop.f32.mrf.mxu0 }
 0x4a6   :  { %v17579_v6 = vpop.f32.mrf.mxu1 }
 0x4a7   :  { %19532 = vst [vmem:[#allocation28_spill] sm:$0xff] %v17579_v6  ;;  %v17591_v2 = vpop.f32.mrf.mxu0 }
 0x4a8   :  { %v13589_v47 = vpop.f32.mrf.mxu1 }
 0x4aa   :  { %v13590_v9 = vpop.f32.mrf.mxu1 }
 0x4ab   :  { %v13591_v5 = vadd.f32 %v13590_v9, %v13589_v47  ;;  %v17598_v9 = vpop.f32.mrf.mxu0 }
 0x4ac   :  { %v13592_v3 = vpop.f32.mrf.mxu1 }
 0x4ad   :  { %v2847_v49 = vadd.f32 %v13591_v5, %v13527_v7 }
 0x4ae   :  { %v13593_v22 = vpop.f32.mrf.mxu1 }
 0x4af   :  { %v13594_v44 = vadd.f32 %v13593_v22, %v13592_v3 }
 0x4b0   :  { %v13595_v26 = vpop.f32.mrf.mxu1 }
 0x4b1   :  { %v2850_v42 = vadd.f32 %v13594_v44, %v13530_v48  ;;  %v17600_v44 = vpop.f32.mrf.mxu0 }
 0x4b2   :  { %v13596_v14 = vpop.f32.mrf.mxu1 }
 0x4b3   :  { %v2909_v43 = vpack.c.bf16 %v2850_v42, %v2847_v49  ;;  %v13597_v6 = vadd.f32 %v13596_v14, %v13595_v26  ;;  %v13558_v49 = vpop.f32.mrf.mxu0 }
 0x4b4   :  { %v13598_v0 = vpop.f32.mrf.mxu1 }
 0x4b5   :  { %14484 = vmatprep.mubr.msk.bf16.mxu0 %vm1198_vm1, %v2909_v43  ;;  %v2855_v3 = vadd.f32 %v13597_v6, %v13533_v37  ;;  %v13559_v37 = vpop.f32.mrf.mxu0 }
 0x4b6   :  { %v13599_v47 = vpop.f32.mrf.mxu1 }
 0x4b7   :  { %v13600_v53 = vadd.f32 %v13599_v47, %v13598_v0  ;;  %v17616_v0 = vld [vmem:[%s19452_s0 + $0xf0] sm:$0xff]  }
 0x4b8   :  { %v13601_v1 = vpop.f32.mrf.mxu1 }
 0x4b9   :  { %v2858_v5 = vadd.f32 %v13600_v53, %v13536_v38 }
 0x4ba   :  { %v13602_v22 = vpop.f32.mrf.mxu1 }
 0x4bb   :  { %v2910_v7 = vpack.c.bf16 %v2858_v5, %v2855_v3  ;;  %v13603_v26 = vadd.f32 %v13602_v22, %v13601_v1  ;;  %v17635_v1 = vld [vmem:[%s19452_s0 + $0xa8] sm:$0xff]   ;;  %v13545_v3 = vadd.f32 %v17562_v20, %v17554_v21  ;;  %v13548_v5 = vadd.f32 %v17574_v32, %v17566_v30  ;;  %v17651_v21 = vld [vmem:[%s19452_s0 + $0xa0] sm:$0xff]   ;;  %v17657_v30 = vld [vmem:[%s19452_s0 + $0xd8] sm:$0xff]  }
 0x4bc   :  { %v13604_v48 = vpop.f32.mrf.mxu1 }
 0x4bd   :  { %14485 = vmatmul.mubr.msk.bf16.vlgmr.msra.gmra.mxu0 %vm1198_vm1, %v2910_v7  ;;  %v2863_v42 = vadd.f32 %v13603_v26, %v13539_v40  ;;  %v17645_v7 = vld [vmem:[%s19452_s0 + $0xe0] sm:$0xff]   ;;  %v13561_v26 = vpop.f32.mrf.mxu0 }
 0x4be   :  { %v13605_v43 = vpop.f32.mrf.mxu1  ;;  %13711 = vmatpush3.bf16.msra.mxu0 %v17606_v35 }
 0x4bf   :  { %v13606_v34 = vadd.f32 %v13605_v43, %v13604_v48  ;;  %13712 = vmatprep.subr.bf16.mxu0 %v17616_v0 }
 0x4c0   :  { %v13607_v6 = vpop.f32.mrf.mxu1 }
 0x4c1   :  { %v2866_v14 = vadd.f32 %v13606_v34, %v13542_v56  ;;  %v13562_v34 = vpop.f32.mrf.mxu0 }
 0x4c2   :  { %v13608_v47 = vpop.f32.mrf.mxu1  ;;  %13713 = vmatpush3.bf16.msra.mxu0 %v17622_v23 }
 0x4c3   :  { %v2911_v60 = vpack.c.bf16 %v2866_v14, %v2863_v42  ;;  %13714 = vmatprep.subr.bf16.mxu0 %v17628_v19  ;;  %v13609_v38 = vadd.f32 %v13608_v47, %v13607_v6  ;;  %v17664_v14 = vld [vmem:[%s19452_s0 + $0x98] sm:$0xff]   ;;  %v13551_v47 = vadd.f32 %v17583_v15, %v17581_v46  ;;  %v17680_v46 = vld [vmem:[%s19452_s0 + $0x90] sm:$0xff]   ;;  %v17686_v15 = vld [vmem:[%s19452_s0 + $0xc8] sm:$0xff]  }
 0x4c4   :  { %v13610_v61 = vpop.f32.mrf.mxu1  ;;  %19534 = vst [vmem:[#allocation31_spill] sm:$0xff] %v17680_v46  ;;  %19535 = vst [vmem:[#allocation32_spill] sm:$0xff] %v17686_v15 }
 0x4c5   :  { %14488 = vmatprep.mubr.msk.bf16.mxu0 %vm1198_vm1, %v2911_v60  ;;  %v2871_v43 = vadd.f32 %v13609_v38, %v13545_v3  ;;  %v13554_v60 = vadd.f32 %v17591_v2, %v17589_v31  ;;  %v17674_v38 = vld [vmem:[%s19452_s0 + $0xd0] sm:$0xff]   ;;  %v13564_v3 = vpop.f32.mrf.mxu0 }
 0x4c6   :  { %v13611_v53 = vpop.f32.mrf.mxu1  ;;  %13715 = vmatpush3.bf16.msra.mxu0 %v17635_v1  ;;  %19533 = vst [vmem:[#allocation29_spill] sm:$0xff] %v17674_v38 }
 0x4c7   :  { %v13612_v22 = vadd.f32 %v13611_v53, %v13610_v61  ;;  %13716 = vmatprep.subr.bf16.mxu0 %v17645_v7 }
 0x4c8   :  { %v13613_v48 = vpop.f32.mrf.mxu1 }
 0x4c9   :  { %v2874_v40 = vadd.f32 %v13612_v22, %v13548_v5 }
 0x4ca   :  { %v13614_v56 = vpop.f32.mrf.mxu1  ;;  %13717 = vmatpush3.bf16.msra.mxu0 %v17651_v21 }
 0x4cb   :  { %v2912_v20 = vpack.c.bf16 %v2874_v40, %v2871_v43  ;;  %13718 = vmatprep.subr.bf16.mxu0 %v17657_v30  ;;  %v13615_v6 = vadd.f32 %v13614_v56, %v13613_v48  ;;  %v13565_v43 = vpop.f32.mrf.mxu0 }
 0x4cc   :  { %v13616_v32 = vpop.f32.mrf.mxu1 }
 0x4cd   :  { %14489 = vmatmul.mubr.msk.bf16.gmra.mxu0 %vm1198_vm1, %v2912_v20  ;;  %v2879_v5 = vadd.f32 %v13615_v6, %v13551_v47  ;;  %v17693_v20 = vld [vmem:[%s19452_s0 + $0x88] sm:$0xff]   ;;  %v13560_v6 = vadd.f32 %v13559_v37, %v13558_v49  ;;  %v17701_v47 = vld [vmem:[%s19452_s0 + $0xc0] sm:$0xff]  }
 0x4ce   :  { %v13617_v42 = vpop.f32.mrf.mxu1  ;;  %13719 = vmatpush3.bf16.msra.mxu0 %v17664_v14  ;;  %19536 = vst [vmem:[#allocation33_spill] sm:$0xff] %v17693_v20  ;;  %19537 = vst [vmem:[#allocation35_spill] sm:$0xff] %v17701_v47 }
 0x4cf   :  { %v13618_v61 = vadd.f32 %v13617_v42, %v13616_v32  ;;  %13720 = vmatprep.subr.bf16.mxu0 %v17674_v38  ;;  %v13557_v32 = vadd.f32 %v17600_v44, %v17598_v9 }
 0x4d0   :  { %v13619_v53 = vpop.f32.mrf.mxu1 }
 0x4d1   :  { %v2882_v22 = vadd.f32 %v13618_v61, %v13554_v60  ;;  %v13567_v61 = vpop.f32.mrf.mxu0 }
 0x4d2   :  { %v13620_v48 = vpop.f32.mrf.mxu1  ;;  %13721 = vmatpush3.bf16.msra.mxu0 %v17680_v46 }
 0x4d3   :  { %v2913_v2 = vpack.c.bf16 %v2882_v22, %v2879_v5  ;;  %13722 = vmatprep.subr.bf16.mxu0 %v17686_v15  ;;  %v13621_v40 = vadd.f32 %v13620_v48, %v13619_v53  ;;  %v17707_v48 = vld [vmem:[%s19452_s0 + $0x80] sm:$0xff]   ;;  %v13568_v44 = vpop.f32.mrf.mxu0 }
 0x4d4   :  { %v13622_v31 = vpop.f32.mrf.mxu1  ;;  %19538 = vst [vmem:[#allocation36_spill] sm:$0xff] %v17707_v48 }
 0x4d5   :  { %14492 = vmatprep.mubr.msk.bf16.mxu0 %vm1198_vm1, %v2913_v2  ;;  %v2887_v53 = vadd.f32 %v13621_v40, %v13557_v32  ;;  %v13566_v40 = vadd.f32 %v13565_v43, %v13564_v3  ;;  %v13570_v32 = vpop.f32.mrf.mxu0  ;;  %v15321_v3 = vld [vmem:[#allocation2 + $0x508] ss:$16 sps:$4 sm:$0xff]   ;;  %v15329_v43 = vld [vmem:[#allocation2 + $0x52c] ss:$16 sps:$4 sm:$0xff]  }
 0x4d6   :  { %v13623_v56 = vpop.f32.mrf.mxu1  ;;  %13723 = vmatpush3.bf16.msra.mxu0 %v17693_v20 }
 0x4d7   :  { %v13624_v42 = vadd.f32 %v13623_v56, %v13622_v31  ;;  %13724 = vmatprep.subr.bf16.mxu0 %v17701_v47  ;;  %v13563_v31 = vadd.f32 %v13562_v34, %v13561_v26  ;;  %v13571_v46 = vpop.f32.mrf.mxu0  ;;  %v15323_v26 = vld [vmem:[#allocation2 + $0x50c] ss:$16 sps:$4 sm:$0xff]  }
 0x4d8   :  { %v13625_v60 = vpop.f32.mrf.mxu1 }
 0x4d9   :  { %v2890_v5 = vadd.f32 %v13624_v42, %v13560_v6 }
 0x4da   :  { %v13626_v22 = vpop.f32.mrf.mxu1  ;;  %13725 = vmatpush3.bf16.msra.mxu0 %v17707_v48 }
 0x4db   :  { %v2914_v9 = vpack.c.bf16 %v2890_v5, %v2887_v53  ;;  %13783 = vmatprep.subr.bf16.mxu0 %v17222_v27  ;;  %v13627_v37 = vadd.f32 %v13626_v22, %v13625_v60  ;;  %v13569_v5 = vadd.f32 %v13568_v44, %v13567_v61  ;;  %v13572_v60 = vadd.f32 %v13571_v46, %v13570_v32  ;;  %v15341_v46 = vld [vmem:[#allocation2 + $0x56c] ss:$16 sps:$4 sm:$0xff]  }
 0x4dc   :  { %v13628_v49 = vpop.f32.mrf.mxu1 }
 0x4dd   :  { %14493 = vmatmul.mubr.msk.bf16.gmra.mxu0 %vm1198_vm1, %v2914_v9  ;;  %v2895_v42 = vadd.f32 %v13627_v37, %v13563_v31  ;;  %v15375_v31 = vld [vmem:[#allocation2 + $0x624] ss:$16 sps:$4 sm:$0xff]  }
 0x4de   :  { %v13629_v2 = vpop.f32.mrf.mxu1 }
 0x4df   :  { %v13630_v56 = vadd.f32 %v13629_v2, %v13628_v49 }
 0x4e0   :  { %v13631_v6 = vpop.f32.mrf.mxu1 }
 0x4e1   :  { %v2898_v47 = vadd.f32 %v13630_v56, %v13566_v40  ;;  %v15373_v56 = vld [vmem:[#allocation2 + $0x620] ss:$16 sps:$4 sm:$0xff]  }
 0x4e2   :  { %v13632_v20 = vpop.f32.mrf.mxu1 }
 0x4e3   :  { %v2915_v15 = vpack.c.bf16 %v2898_v47, %v2895_v42  ;;  %v13633_v53 = vadd.f32 %v13632_v20, %v13631_v6  ;;  %v15335_v20 = vld [vmem:[#allocation2 + $0x54c] ss:$16 sps:$4 sm:$0xff]   ;;  %v15367_v47 = vld [vmem:[#allocation2 + $0x600] ss:$16 sps:$4 sm:$0xff]  }
 0x4e4   :  { %v13634_v48 = vpop.f32.mrf.mxu1  ;;  %v15379_v42 = vld [vmem:[#allocation2 + $0x640] ss:$16 sps:$4 sm:$0xff]  }
 0x4e5   :  { %14496 = vmatprep.mubr.msk.bf16.mxu0 %vm1198_vm1, %v2915_v15  ;;  %v2903_v9 = vadd.f32 %v13633_v53, %v13569_v5  ;;  %v15327_v15 = vld [vmem:[#allocation2 + $0x528] ss:$16 sps:$4 sm:$0xff]  }
 0x4e6   :  { %v13635_v27 = vpop.f32.mrf.mxu1 }
 0x4e7   :  { %v13636_v22 = vadd.f32 %v13635_v27, %v13634_v48 }
 0x4e9   :  { %v2906_v38 = vadd.f32 %v13636_v22, %v13572_v60 }
 0x4eb   :  { %v2916_v34 = vpack.c.bf16 %v2906_v38, %v2903_v9  ;;  %v15333_v38 = vld [vmem:[#allocation2 + $0x548] ss:$16 sps:$4 sm:$0xff]  }
 0x4ed   :  { %14497 = vmatmul.mubr.msk.bf16.gmra.mxu0 %vm1198_vm1, %v2916_v34 }
 0x4ee   :  { %3379 = vmatprep.mubr.bf16.mxu0 %v15323_v26  ;;  %v15387_v26 = vld [vmem:[#allocation2 + $0x664] ss:$16 sps:$4 sm:$0xff]  }
 0x4f5   :  { %3380 = vmatmul.mubr.bf16.vlgmr.msra.gmra.mxu0 %v15321_v3  ;;  %v15385_v3 = vld [vmem:[#allocation2 + $0x660] ss:$16 sps:$4 sm:$0xff]  }
 0x4f6   :  { %3387 = vmatprep.mubr.bf16.mxu0 %v15329_v43  ;;  %13784 = vmatpush3.bf16.msra.mxu0 %v17231_v12  ;;  %v15339_v12 = vld [vmem:[#allocation2 + $0x568] ss:$16 sps:$4 sm:$0xff]  }
 0x4f7   :  { %13785 = vmatprep.subr.bf16.mxu0 %v17237_v51  ;;  %v15347_v51 = vld [vmem:[#allocation2 + $0x58c] ss:$16 sps:$4 sm:$0xff]  }
 0x4fa   :  { %13786 = vmatpush3.bf16.msra.mxu0 %v17243_v25  ;;  %v15345_v25 = vld [vmem:[#allocation2 + $0x588] ss:$16 sps:$4 sm:$0xff]  }
 0x4fb   :  { %13787 = vmatprep.subr.bf16.mxu0 %v17249_v33  ;;  %v15353_v33 = vld [vmem:[#allocation2 + $0x5ac] ss:$16 sps:$4 sm:$0xff]  }
 0x4fd   :  { %3388 = vmatmul.mubr.bf16.gmra.mxu0 %v15327_v15 }
 0x4fe   :  { %3395 = vmatprep.mubr.bf16.mxu0 %v15335_v20  ;;  %13788 = vmatpush3.bf16.msra.mxu0 %v17255_v63  ;;  %v15351_v63 = vld [vmem:[#allocation2 + $0x5a8] ss:$16 sps:$4 sm:$0xff]   ;;  %v15391_v20 = vld [vmem:[#allocation2 + $0x680] ss:$16 sps:$4 sm:$0xff]  }
 0x4ff   :  { %13789 = vmatprep.subr.bf16.mxu0 %v17261_v10  ;;  %v15359_v10 = vld [vmem:[#allocation2 + $0x5cc] ss:$16 sps:$4 sm:$0xff]  }
 0x502   :  { %13790 = vmatpush3.bf16.msra.mxu0 %v17443_v62  ;;  %v15357_v62 = vld [vmem:[#allocation2 + $0x5c8] ss:$16 sps:$4 sm:$0xff]  }
 0x503   :  { %13791 = vmatprep.subr.bf16.mxu0 %v17449_v52  ;;  %v15365_v52 = vld [vmem:[#allocation2 + $0x5ec] ss:$16 sps:$4 sm:$0xff]  }
 0x505   :  { %3396 = vmatmul.mubr.bf16.gmra.mxu0 %v15333_v38 }
 0x506   :  { %3403 = vmatprep.mubr.bf16.mxu0 %v15341_v46  ;;  %13792 = vmatpush3.bf16.msra.mxu0 %v17455_v24  ;;  %v15363_v24 = vld [vmem:[#allocation2 + $0x5e8] ss:$16 sps:$4 sm:$0xff]  }
 0x507   :  { %13793 = vmatprep.subr.bf16.mxu0 %v17461_v55  ;;  %v15366_v55 = vld [vmem:[%s19454_s2 + $0x8] ss:$0 sps:$4 sm:$0xcc]  }
 0x50a   :  { %13794 = vmatpush3.bf16.msra.mxu0 %v17467_v59  ;;  %v3455_v59 = vrot.slane %v15366_v55, 2  ;;  %v15403_v55 = vld [vmem:[#allocation2 + $0x6c0] ss:$16 sps:$4 sm:$0xff]  }
 0x50b   :  { %13795 = vmatprep.subr.bf16.mxu0 %v17473_v58 }
 0x50c   :  { %15025 = vmatprep.subr.msk.bf16.mxu1 %vm1223_vm0, %v3455_v59  ;;  %v3481_v58 = vsel %vm1223_vm0, %v3455_v59, 0 }
 0x50d   :  { %3404 = vmatmul.mubr.bf16.gmra.mxu0 %v15339_v12  ;;  %14501 = vmatpush3.bf16.msra.mxu1 %v3481_v58 }
 0x50e   :  { %3411 = vmatprep.mubr.bf16.mxu0 %v15347_v51  ;;  %13796 = vmatpush3.bf16.msra.mxu0 %v17479_v4  ;;  %v17735_v4 = vpop.f32.mrf.mxu1 }
 0x50f   :  { %13797 = vmatprep.subr.bf16.mxu0 %v17485_v54  ;;  %13847 = vmatprep.subr.bf16.mxu1 %v17502_v8 }
 0x510   :  { %v17737_v54 = vpop.f32.mrf.mxu1 }
 0x512   :  { %13798 = vmatpush3.bf16.msra.mxu0 %v17491_v16  ;;  %v15369_v16 = vld [vmem:[#allocation2 + $0x604] ss:$16 sps:$4 sm:$0xff]   ;;  %v17739_v48 = vpop.f32.mrf.mxu1 }
 0x514   :  { %v17747_v8 = vpop.f32.mrf.mxu1 }
 0x515   :  { %3412 = vmatmul.mubr.bf16.gmra.mxu0 %v15345_v25 }
 0x516   :  { %3419 = vmatprep.mubr.bf16.mxu0 %v15353_v33  ;;  %v17752_v32 = vpop.f32.mrf.mxu1 }
 0x518   :  { %v17754_v6 = vpop.f32.mrf.mxu1 }
 0x51a   :  { %v17758_v27 = vpop.f32.mrf.mxu1 }
 0x51c   :  { %v17766_v9 = vpop.f32.mrf.mxu1 }
 0x51d   :  { %3420 = vmatmul.mubr.bf16.gmra.mxu0 %v15351_v63  ;;  %v15399_v63 = vld [vmem:[#allocation2 + $0x6a4] ss:$16 sps:$4 sm:$0xff]  }
 0x51e   :  { %3427 = vmatprep.mubr.bf16.mxu0 %v15359_v10  ;;  %v17771_v43 = vpop.f32.mrf.mxu1 }
 0x520   :  { %v17773_v15 = vpop.f32.mrf.mxu1 }
 0x522   :  { %v17777_v46 = vpop.f32.mrf.mxu1 }
 0x524   :  { %v17785_v33 = vpop.f32.mrf.mxu1 }
 0x525   :  { %3428 = vmatmul.mubr.bf16.gmra.mxu0 %v15357_v62  ;;  %v15397_v62 = vld [vmem:[#allocation2 + $0x6a0] ss:$16 sps:$4 sm:$0xff]  }
 0x526   :  { %3435 = vmatprep.mubr.bf16.mxu0 %v15365_v52  ;;  %v17790_v52 = vpop.f32.mrf.mxu1 }
 0x52d   :  { %3436 = vmatmul.mubr.bf16.gmra.mxu0 %v15363_v24  ;;  %v17792_v24 = vpop.f32.mrf.mxu1 }
 0x52e   :  { %3821 = vmatprep.mubr.bf16.mxu0 %v15369_v16 }
 0x52f   :  { %v17796_v58 = vpop.f32.mrf.mxu1 }
 0x535   :  { %3822 = vmatmul.mubr.bf16.vlgmr.msra.gmra.mxu0 %v15367_v47 }
 0x536   :  { %3829 = vmatprep.mubr.bf16.mxu0 %v15375_v31 }
 0x53d   :  { %3830 = vmatmul.mubr.bf16.gmra.mxu0 %v15373_v56  ;;  %v15409_v56 = vld [vmem:[#allocation2 + $0x6e0] ss:$16 sps:$4 sm:$0xff]  }
 0x57d   :  { %v14486_v61 = vpop.f32.mrf.mxu0 }
 0x57e   :  { %v17742_v44 = vadd.f32 %v14486_v61, %v17514_v36  ;;  %v15381_v36 = vld [vmem:[#allocation2 + $0x644] ss:$16 sps:$4 sm:$0xff]  }
 0x57f   :  { %v2978_v49 = vpop.f32.mrf.mxu0  ;;  %3837 = vmatprep.mubr.bf16.mxu0 %v15381_v36 }
 0x580   :  { %v17745_v37 = vadd.f32 %v2978_v49, %v17519_v29  ;;  %3838 = vmatmul.mubr.bf16.gmra.mxu0 %v15379_v42  ;;  %v13684_v49 = vpop.f32.mrf.mxu1 }
 0x581   :  { %v14487_v2 = vpop.f32.mrf.mxu0  ;;  %3845 = vmatprep.mubr.bf16.mxu0 %v15387_v26 }
 0x582   :  { %v17750_v40 = vadd.f32 %v14487_v2, %v17522_v11  ;;  %v15411_v2 = vld [vmem:[#allocation2 + $0x6e4] ss:$16 sps:$4 sm:$0xff]  }
 0x583   :  { %v17756_v53 = vpop.f32.mrf.mxu0 }
 0x584   :  { %19539 = vst [vmem:[#allocation37_spill] sm:$0xff] %v17756_v53 }
 0x588   :  { %3846 = vmatmul.mubr.bf16.gmra.mxu0 %v15385_v3  ;;  %v13664_v3 = vadd.f32 %v17737_v54, %v17735_v4  ;;  %v13673_v4 = vadd.f32 %v17766_v9, %v17758_v27 }
 0x58d   :  { %v14490_v29 = vpop.f32.mrf.mxu0 }
 0x58e   :  { %v17761_v5 = vadd.f32 %v14490_v29, %v17533_v28  ;;  %v15393_v28 = vld [vmem:[#allocation2 + $0x684] ss:$16 sps:$4 sm:$0xff]   ;;  %v17809_v29 = vpop.f32.mrf.mxu1 }
 0x58f   :  { %v2994_v11 = vpop.f32.mrf.mxu0  ;;  %3853 = vmatprep.mubr.bf16.mxu0 %v15393_v28 }
 0x590   :  { %v17764_v60 = vadd.f32 %v2994_v11, %v17538_v18  ;;  %3854 = vmatmul.mubr.bf16.gmra.mxu0 %v15391_v20 }
 0x591   :  { %v14491_v22 = vpop.f32.mrf.mxu0  ;;  %3861 = vmatprep.mubr.bf16.mxu0 %v15399_v63 }
 0x592   :  { %v17769_v34 = vadd.f32 %v14491_v22, %v17541_v41  ;;  %v17811_v22 = vpop.f32.mrf.mxu1 }
 0x593   :  { %v17775_v38 = vpop.f32.mrf.mxu0 }
 0x594   :  { %19540 = vst [vmem:[#allocation46_spill] sm:$0xff] %v17775_v38 }
 0x598   :  { %3862 = vmatmul.mubr.bf16.gmra.mxu0 %v15397_v62 }
 0x59d   :  { %v14494_v18 = vpop.f32.mrf.mxu0 }
 0x59e   :  { %v17780_v12 = vadd.f32 %v14494_v18, %v17552_v45  ;;  %v15405_v45 = vld [vmem:[#allocation2 + $0x6c4] ss:$16 sps:$4 sm:$0xff]   ;;  %v13689_v18 = vpop.f32.mrf.mxu1 }
 0x59f   :  { %v3010_v41 = vpop.f32.mrf.mxu0  ;;  %3869 = vmatprep.mubr.bf16.mxu0 %v15405_v45 }
 0x5a0   :  { %v17783_v51 = vadd.f32 %v3010_v41, %v17557_v13  ;;  %3870 = vmatmul.mubr.bf16.gmra.mxu0 %v15403_v55  ;;  %v13690_v55 = vpop.f32.mrf.mxu1 }
 0x5a1   :  { %v14495_v25 = vpop.f32.mrf.mxu0  ;;  %3877 = vmatprep.mubr.bf16.mxu0 %v15411_v2 }
 0x5a2   :  { %v17788_v10 = vadd.f32 %v14495_v25, %v17560_v39 }
 0x5a3   :  { %v17794_v59 = vpop.f32.mrf.mxu0 }
 0x5a4   :  { %19541 = vst [vmem:[#allocation47_spill] sm:$0xff] %v17794_v59 }
 0x5a8   :  { %3878 = vmatmul.mubr.bf16.gmra.mxu0 %v15409_v56 }
 0x5ad   :  { %v14498_v13 = vpop.f32.mrf.mxu0 }
 0x5ae   :  { %v17799_v16 = vadd.f32 %v14498_v13, %v17569_v17 }
 0x5af   :  { %v3026_v39 = vpop.f32.mrf.mxu0 }
 0x5b0   :  { %v17802_v47 = vadd.f32 %v3026_v39, %v17572_v50 }
 0x5b1   :  { %v14499_v61 = vpop.f32.mrf.mxu0 }
 0x5b2   :  { %v17805_v31 = vadd.f32 %v14499_v61, %v17577_v57  ;;  %v13667_v57 = vadd.f32 %v17747_v8, %v17739_v48  ;;  %v13670_v61 = vadd.f32 %v17754_v6, %v17752_v32  ;;  %v17822_v8 = vpop.f32.mrf.mxu1  ;;  %v13676_v32 = vadd.f32 %v17773_v15, %v17771_v43 }
 0x5b3   :  { %v17807_v36 = vpop.f32.mrf.mxu0  ;;  %v13679_v6 = vadd.f32 %v17785_v33, %v17777_v46  ;;  %v13685_v15 = vadd.f32 %v13684_v49, %v17796_v58  ;;  %v19543_v49 = vld [vmem:[#allocation29_spill] sm:$0xff] }
 0x5b4   :  { %19542 = vst [vmem:[#allocation48_spill] sm:$0xff] %v17807_v36 }
 0x5b5   :  { %v13726_v42 = vpop.f32.mrf.mxu0 }
 0x5b7   :  { %v13727_v17 = vpop.f32.mrf.mxu0 }
 0x5b8   :  { %v13728_v50 = vadd.f32 %v13727_v17, %v13726_v42 }
 0x5b9   :  { %v13729_v11 = vpop.f32.mrf.mxu0 }
 0x5ba   :  { %v3382_v41 = vadd.f32 %v13728_v50, %v13664_v3  ;;  %v13693_v50 = vpop.f32.mrf.mxu1 }
 0x5bb   :  { %v13730_v26 = vpop.f32.mrf.mxu0 }
 0x5bc   :  { %v13731_v28 = vadd.f32 %v13730_v26, %v13729_v11 }
 0x5bd   :  { %v13732_v20 = vpop.f32.mrf.mxu0 }
 0x5be   :  { %v3385_v25 = vadd.f32 %v13731_v28, %v13667_v57  ;;  %v13695_v57 = vpop.f32.mrf.mxu1 }
 0x5bf   :  { %v13733_v63 = vpop.f32.mrf.mxu0 }
 0x5c0   :  { %v3444_v62 = vpack.c.bf16 %v3385_v25, %v3382_v41  ;;  %v13734_v13 = vadd.f32 %v13733_v63, %v13732_v20  ;;  %v13696_v63 = vpop.f32.mrf.mxu1 }
 0x5c1   :  { %v13735_v45 = vpop.f32.mrf.mxu0 }
 0x5c2   :  { %14502 = vmatprep.mubr.msk.bf16.mxu1 %vm1198_vm1, %v3444_v62  ;;  %v3390_v2 = vadd.f32 %v13734_v13, %v13670_v61  ;;  %v13698_v33 = vpop.f32.mrf.mxu1 }
 0x5c3   :  { %v13736_v39 = vpop.f32.mrf.mxu0 }
 0x5c4   :  { %v13737_v54 = vadd.f32 %v13736_v39, %v13735_v45 }
 0x5c5   :  { %v13738_v48 = vpop.f32.mrf.mxu0 }
 0x5c6   :  { %v3393_v56 = vadd.f32 %v13737_v54, %v13673_v4 }
 0x5c7   :  { %v13739_v42 = vpop.f32.mrf.mxu0 }
 0x5c8   :  { %v3445_v17 = vpack.c.bf16 %v3393_v56, %v3390_v2  ;;  %v13740_v26 = vadd.f32 %v13739_v42, %v13738_v48  ;;  %v19544_v56 = vld [vmem:[#allocation31_spill] sm:$0xff] }
 0x5c9   :  { %v13741_v11 = vpop.f32.mrf.mxu0 }
 0x5ca   :  { %14503 = vmatmul.mubr.msk.bf16.vlgmr.msra.gmra.mxu1 %vm1198_vm1, %v3445_v17  ;;  %v3398_v28 = vadd.f32 %v13740_v26, %v13676_v32  ;;  %v19545_v17 = vld [vmem:[#allocation32_spill] sm:$0xff]  ;;  %v19547_v32 = vld [vmem:[#allocation35_spill] sm:$0xff] }
 0x5cb   :  { %v13742_v3 = vpop.f32.mrf.mxu0  ;;  %13848 = vmatpush3.bf16.msra.mxu1 %v17606_v35 }
 0x5cc   :  { %v13743_v27 = vadd.f32 %v13742_v3, %v13741_v11  ;;  %13849 = vmatprep.subr.bf16.mxu1 %v17616_v0  ;;  %v13682_v0 = vadd.f32 %v17792_v24, %v17790_v52  ;;  %v13691_v24 = vadd.f32 %v13690_v55, %v13689_v18  ;;  %v13694_v18 = vadd.f32 %v13693_v50, %v17822_v8 }
 0x5cd   :  { %v13744_v9 = vpop.f32.mrf.mxu0  ;;  %v13697_v55 = vadd.f32 %v13696_v63, %v13695_v57 }
 0x5ce   :  { %v3401_v20 = vadd.f32 %v13743_v27, %v13679_v6 }
 0x5cf   :  { %v13745_v41 = vpop.f32.mrf.mxu0  ;;  %13850 = vmatpush3.bf16.msra.mxu1 %v17622_v23 }
 0x5d0   :  { %v3446_v25 = vpack.c.bf16 %v3401_v20, %v3398_v28  ;;  %13851 = vmatprep.subr.bf16.mxu1 %v17628_v19  ;;  %v13746_v62 = vadd.f32 %v13745_v41, %v13744_v9  ;;  %v19548_v41 = vld [vmem:[#allocation36_spill] sm:$0xff] }
 0x5d1   :  { %v13747_v35 = vpop.f32.mrf.mxu0 }
 0x5d2   :  { %14506 = vmatprep.mubr.msk.bf16.mxu1 %vm1198_vm1, %v3446_v25  ;;  %v3406_v45 = vadd.f32 %v13746_v62, %v13682_v0 }
 0x5d3   :  { %v13748_v43 = vpop.f32.mrf.mxu0  ;;  %13852 = vmatpush3.bf16.msra.mxu1 %v17635_v1  ;;  %v13699_v1 = vpop.f32.mrf.mxu1 }
 0x5d4   :  { %v13749_v46 = vadd.f32 %v13748_v43, %v13747_v35  ;;  %13853 = vmatprep.subr.bf16.mxu1 %v17645_v7  ;;  %v13688_v7 = vadd.f32 %v17811_v22, %v17809_v29  ;;  %v19546_v22 = vld [vmem:[#allocation33_spill] sm:$0xff]  ;;  %v13700_v62 = vadd.f32 %v13699_v1, %v13698_v33 }
 0x5d5   :  { %v13750_v23 = vpop.f32.mrf.mxu0  ;;  %v17856_v35 = vld [vmem:[%s19452_s0 + $0x78] sm:$0xff]  }
 0x5d6   :  { %v3409_v19 = vadd.f32 %v13749_v46, %v13685_v15  ;;  %v15372_v33 = vld [vmem:[#allocation2 + $0x60c] ss:$16 sps:$4 sm:$0xff]  }
 0x5d7   :  { %v13751_v13 = vpop.f32.mrf.mxu0  ;;  %13854 = vmatpush3.bf16.msra.mxu1 %v17651_v21  ;;  %v13701_v21 = vpop.f32.mrf.mxu1 }
 0x5d8   :  { %v3447_v39 = vpack.c.bf16 %v3409_v19, %v3406_v45  ;;  %13855 = vmatprep.subr.bf16.mxu1 %v17657_v30  ;;  %v13752_v4 = vadd.f32 %v13751_v13, %v13750_v23 }
 0x5d9   :  { %v13753_v61 = vpop.f32.mrf.mxu0  ;;  %v13702_v26 = vpop.f32.mrf.mxu1 }
 0x5da   :  { %14507 = vmatmul.mubr.msk.bf16.gmra.mxu1 %vm1198_vm1, %v3447_v39  ;;  %v3414_v48 = vadd.f32 %v13752_v4, %v13688_v7  ;;  %v13703_v43 = vadd.f32 %v13702_v26, %v13701_v21  ;;  %v15370_v21 = vld [vmem:[#allocation2 + $0x608] ss:$16 sps:$4 sm:$0xff]  }
 0x5db   :  { %v13754_v52 = vpop.f32.mrf.mxu0  ;;  %13856 = vmatpush3.bf16.msra.mxu1 %v17664_v14  ;;  %v13704_v27 = vpop.f32.mrf.mxu1  ;;  %v17889_v26 = vld [vmem:[%s19452_s0 + $0x28] sm:$0xff]  }
 0x5dc   :  { %v13755_v58 = vadd.f32 %v13754_v52, %v13753_v61  ;;  %13857 = vmatprep.subr.bf16.mxu1 %v19543_v49 }
 0x5dd   :  { %v13756_v54 = vpop.f32.mrf.mxu0  ;;  %v13705_v8 = vpop.f32.mrf.mxu1 }
 0x5de   :  { %v3417_v2 = vadd.f32 %v13755_v58, %v13691_v24  ;;  %v13706_v7 = vadd.f32 %v13705_v8, %v13704_v27  ;;  %v15396_v27 = vld [vmem:[#allocation2 + $0x68c] ss:$16 sps:$4 sm:$0xff]  }
 0x5df   :  { %v13757_v30 = vpop.f32.mrf.mxu0  ;;  %13858 = vmatpush3.bf16.msra.mxu1 %v19544_v56  ;;  %v13707_v15 = vpop.f32.mrf.mxu1  ;;  %v15376_v56 = vld [vmem:[#allocation2 + $0x628] ss:$16 sps:$4 sm:$0xff]   ;;  %v15402_v8 = vld [vmem:[#allocation2 + $0x6ac] ss:$16 sps:$4 sm:$0xff]  }
 0x5e0   :  { %v3448_v42 = vpack.c.bf16 %v3417_v2, %v3414_v48  ;;  %13859 = vmatprep.subr.bf16.mxu1 %v19545_v17  ;;  %v13758_v14 = vadd.f32 %v13757_v30, %v13756_v54  ;;  %v15378_v48 = vld [vmem:[#allocation2 + $0x62c] ss:$16 sps:$4 sm:$0xff]   ;;  %v17871_v30 = vld [vmem:[%s19452_s0 + $0x70] sm:$0xff]  }
 0x5e1   :  { %v13759_v11 = vpop.f32.mrf.mxu0  ;;  %v13708_v39 = vpop.f32.mrf.mxu1  ;;  %v17865_v2 = vld [vmem:[%s19452_s0 + $0x38] sm:$0xff]   ;;  %v17877_v17 = vld [vmem:[%s19452_s0 + $0x30] sm:$0xff]  }
 0x5e2   :  { %14510 = vmatprep.mubr.msk.bf16.mxu1 %vm1198_vm1, %v3448_v42  ;;  %v3422_v9 = vadd.f32 %v13758_v14, %v13694_v18  ;;  %v13709_v24 = vadd.f32 %v13708_v39, %v13707_v15  ;;  %v15384_v42 = vld [vmem:[#allocation2 + $0x64c] ss:$16 sps:$4 sm:$0xff]   ;;  %v17895_v14 = vld [vmem:[%s19452_s0 + $0x60] sm:$0xff]  }
 0x5e3   :  { %v13760_v29 = vpop.f32.mrf.mxu0  ;;  %13860 = vmatpush3.bf16.msra.mxu1 %v19546_v22  ;;  %v15390_v22 = vld [vmem:[#allocation2 + $0x66c] ss:$16 sps:$4 sm:$0xff]   ;;  %v17901_v18 = vld [vmem:[%s19452_s0 + $0x20] sm:$0xff]  }
 0x5e4   :  { %v13761_v3 = vadd.f32 %v13760_v29, %v13759_v11  ;;  %13861 = vmatprep.subr.bf16.mxu1 %v19547_v32  ;;  %v17883_v11 = vld [vmem:[%s19452_s0 + $0x68] sm:$0xff]   ;;  %v17919_v32 = vld [vmem:[%s19452_s0 + $0x50] sm:$0xff]  }
 0x5e5   :  { %v13762_v6 = vpop.f32.mrf.mxu0  ;;  %v15382_v29 = vld [vmem:[#allocation2 + $0x648] ss:$16 sps:$4 sm:$0xff]   ;;  %v3628_v15 = vld [vmem:[%s19454_s2 + $0xc] sm:$0x3]  ;;  %v15415_v39 = vld [vmem:[#allocation2 + $0x700] ss:$16 sps:$4 sm:$0xff]  }
 0x5e6   :  { %v3425_v28 = vadd.f32 %v13761_v3, %v13697_v55  ;;  %v17907_v55 = vld [vmem:[%s19452_s0 + $0x58] sm:$0xff]   ;;  %15026 = vmatprep.subr.msk.bf16.mxu0 %vm1223_vm0, %v3628_v15 }
 0x5e7   :  { %v13763_v20 = vpop.f32.mrf.mxu0  ;;  %13862 = vmatpush3.bf16.msra.mxu1 %v19548_v41  ;;  %v17913_v3 = vld [vmem:[%s19452_s0 + $0x18] sm:$0xff]   ;;  %v17943_v41 = vld [vmem:[%s19452_s0 + $0x40] sm:$0xff]  }
 0x5e8   :  { %v3449_v25 = vpack.c.bf16 %v3425_v28, %v3422_v9  ;;  %13920 = vmatprep.subr.bf16.mxu1 %v17856_v35  ;;  %v13764_v57 = vadd.f32 %v13763_v20, %v13762_v6  ;;  %v15388_v6 = vld [vmem:[#allocation2 + $0x668] ss:$16 sps:$4 sm:$0xff]   ;;  %v17925_v9 = vld [vmem:[%s19452_s0 + $0x10] sm:$0xff]  }
 0x5e9   :  { %v13765_v50 = vpop.f32.mrf.mxu0  ;;  %v17931_v28 = vld [vmem:[%s19452_s0 + $0x48] sm:$0xff]  }
 0x5ea   :  { %14511 = vmatmul.mubr.msk.bf16.gmra.mxu1 %vm1198_vm1, %v3449_v25  ;;  %v3430_v23 = vadd.f32 %v13764_v57, %v13700_v62  ;;  %v17937_v20 = vld [vmem:[%s19452_s0 + $0x8] sm:$0xff]  }
 0x5eb   :  { %v13766_v63 = vpop.f32.mrf.mxu0  ;;  %v15394_v25 = vld [vmem:[#allocation2 + $0x688] ss:$16 sps:$4 sm:$0xff]  }
 0x5ec   :  { %v13767_v0 = vadd.f32 %v13766_v63, %v13765_v50  ;;  %v17949_v50 = vld [vmem:[%s19452_s0] sm:$0xff]   ;;  %v15400_v57 = vld [vmem:[#allocation2 + $0x6a8] ss:$16 sps:$4 sm:$0xff]   ;;  %v15408_v63 = vld [vmem:[#allocation2 + $0x6cc] ss:$16 sps:$4 sm:$0xff]  }
 0x5ed   :  { %v13768_v46 = vpop.f32.mrf.mxu0  ;;  %v15406_v62 = vld [vmem:[#allocation2 + $0x6c8] ss:$16 sps:$4 sm:$0xff]  }
 0x5ee   :  { %v3433_v45 = vadd.f32 %v13767_v0, %v13703_v43  ;;  %v15414_v43 = vld [vmem:[#allocation2 + $0x6ec] ss:$16 sps:$4 sm:$0xff]   ;;  %v15412_v0 = vld [vmem:[#allocation2 + $0x6e8] ss:$16 sps:$4 sm:$0xff]  }
 0x5ef   :  { %v13769_v19 = vpop.f32.mrf.mxu0 }
 0x5f0   :  { %v3450_v13 = vpack.c.bf16 %v3433_v45, %v3430_v23  ;;  %v13770_v4 = vadd.f32 %v13769_v19, %v13768_v46  ;;  %v4016_v46 = vsel %vm1223_vm0, %v3628_v15, 0  ;;  %v17960_v23 = vld [vmem:[%s19452_s0 + $0xf8] sm:$0xff]  }
 0x5f1   :  { %v13771_v61 = vpop.f32.mrf.mxu0  ;;  %14519 = vmatpush3.bf16.msra.mxu0 %v4016_v46 }
 0x5f2   :  { %14514 = vmatprep.mubr.msk.bf16.mxu1 %vm1198_vm1, %v3450_v13  ;;  %v3438_v49 = vadd.f32 %v13770_v4, %v13706_v7  ;;  %13984 = vmatprep.subr.bf16.mxu0 %v17960_v23  ;;  %v15417_v13 = vld [vmem:[#allocation2 + $0x704] ss:$16 sps:$4 sm:$0xff]  }
 0x5f3   :  { %v13772_v52 = vpop.f32.mrf.mxu0 }
 0x5f4   :  { %v13773_v58 = vadd.f32 %v13772_v52, %v13771_v61 }
 0x5f5   :  { %v17963_v45 = vpop.f32.mrf.mxu0 }
 0x5f6   :  { %v3441_v54 = vadd.f32 %v13773_v58, %v13709_v24 }
 0x5f7   :  { %v17965_v19 = vpop.f32.mrf.mxu0 }
 0x5f8   :  { %v3451_v1 = vpack.c.bf16 %v3441_v54, %v3438_v49  ;;  %v15423_v54 = vld [vmem:[#allocation2 + $0x724] ss:$16 sps:$4 sm:$0xff]  }
 0x5f9   :  { %v17967_v4 = vpop.f32.mrf.mxu0 }
 0x5fa   :  { %14515 = vmatmul.mubr.msk.bf16.gmra.mxu1 %vm1198_vm1, %v3451_v1  ;;  %v15421_v1 = vld [vmem:[#allocation2 + $0x720] ss:$16 sps:$4 sm:$0xff]  }
 0x5fb   :  { %3918 = vmatprep.mubr.bf16.mxu1 %v15372_v33  ;;  %v17975_v49 = vpop.f32.mrf.mxu0 }
 0x602   :  { %3919 = vmatmul.mubr.bf16.vlgmr.msra.gmra.mxu1 %v15370_v21  ;;  %v17980_v21 = vpop.f32.mrf.mxu0 }
 0x603   :  { %3926 = vmatprep.mubr.bf16.mxu1 %v15378_v48  ;;  %13921 = vmatpush3.bf16.msra.mxu1 %v17865_v2 }
 0x604   :  { %13922 = vmatprep.subr.bf16.mxu1 %v17871_v30  ;;  %v17982_v48 = vpop.f32.mrf.mxu0 }
 0x607   :  { %13923 = vmatpush3.bf16.msra.mxu1 %v17877_v17 }
 0x608   :  { %13924 = vmatprep.subr.bf16.mxu1 %v17883_v11 }
 0x60a   :  { %3927 = vmatmul.mubr.bf16.gmra.mxu1 %v15376_v56  ;;  %v15427_v56 = vld [vmem:[#allocation2 + $0x740] ss:$16 sps:$4 sm:$0xff]  }
 0x60b   :  { %3934 = vmatprep.mubr.bf16.mxu1 %v15384_v42  ;;  %13925 = vmatpush3.bf16.msra.mxu1 %v17889_v26 }
 0x60c   :  { %13926 = vmatprep.subr.bf16.mxu1 %v17895_v14 }
 0x60f   :  { %13927 = vmatpush3.bf16.msra.mxu1 %v17901_v18 }
 0x610   :  { %13928 = vmatprep.subr.bf16.mxu1 %v17907_v55 }
 0x612   :  { %3935 = vmatmul.mubr.bf16.gmra.mxu1 %v15382_v29  ;;  %v17986_v29 = vpop.f32.mrf.mxu0 }
 0x613   :  { %3942 = vmatprep.mubr.bf16.mxu1 %v15390_v22  ;;  %13929 = vmatpush3.bf16.msra.mxu1 %v17913_v3 }
 0x614   :  { %13930 = vmatprep.subr.bf16.mxu1 %v17919_v32 }
 0x617   :  { %13931 = vmatpush3.bf16.msra.mxu1 %v17925_v9 }
 0x618   :  { %13932 = vmatprep.subr.bf16.mxu1 %v17931_v28 }
 0x61a   :  { %3943 = vmatmul.mubr.bf16.gmra.mxu1 %v15388_v6 }
 0x61b   :  { %3950 = vmatprep.mubr.bf16.mxu1 %v15396_v27  ;;  %13933 = vmatpush3.bf16.msra.mxu1 %v17937_v20 }
 0x61c   :  { %13934 = vmatprep.subr.bf16.mxu1 %v17943_v41 }
 0x61f   :  { %13935 = vmatpush3.bf16.msra.mxu1 %v17949_v50 }
 0x622   :  { %3951 = vmatmul.mubr.bf16.gmra.mxu1 %v15394_v25  ;;  %v17994_v25 = vpop.f32.mrf.mxu0 }
 0x623   :  { %3958 = vmatprep.mubr.bf16.mxu1 %v15402_v8  ;;  %v15435_v8 = vld [vmem:[#allocation2 + $0x764] ss:$16 sps:$4 sm:$0xff]  }
 0x62a   :  { %3959 = vmatmul.mubr.bf16.gmra.mxu1 %v15400_v57 }
 0x62b   :  { %3966 = vmatprep.mubr.bf16.mxu1 %v15408_v63  ;;  %v15433_v63 = vld [vmem:[#allocation2 + $0x760] ss:$16 sps:$4 sm:$0xff]  }
 0x632   :  { %3967 = vmatmul.mubr.bf16.gmra.mxu1 %v15406_v62 }
 0x633   :  { %3974 = vmatprep.mubr.bf16.mxu1 %v15414_v43 }
 0x63a   :  { %3975 = vmatmul.mubr.bf16.gmra.mxu1 %v15412_v0  ;;  %v15439_v0 = vld [vmem:[#allocation2 + $0x780] ss:$16 sps:$4 sm:$0xff]  }
 0x63b   :  { %4356 = vmatprep.mubr.bf16.mxu1 %v15417_v13 }
 0x640   :  { %v17999_v62 = vpop.f32.mrf.mxu0 }
 0x642   :  { %4357 = vmatmul.mubr.bf16.vlgmr.msra.gmra.mxu1 %v15415_v39  ;;  %v18001_v43 = vpop.f32.mrf.mxu0 }
 0x643   :  { %4364 = vmatprep.mubr.bf16.mxu1 %v15423_v54 }
 0x644   :  { %v18005_v46 = vpop.f32.mrf.mxu0 }
 0x64a   :  { %4365 = vmatmul.mubr.bf16.gmra.mxu1 %v15421_v1  ;;  %v15445_v1 = vld [vmem:[#allocation2 + $0x7a0] ss:$16 sps:$4 sm:$0xff]  }
 0x68a   :  { %v14504_v61 = vpop.f32.mrf.mxu1 }
 0x68b   :  { %v17970_v52 = vadd.f32 %v14504_v61, %v17742_v44  ;;  %v15429_v44 = vld [vmem:[#allocation2 + $0x744] ss:$16 sps:$4 sm:$0xff]  }
 0x68c   :  { %v3517_v7 = vpop.f32.mrf.mxu1  ;;  %4372 = vmatprep.mubr.bf16.mxu1 %v15429_v44 }
 0x68d   :  { %v17973_v24 = vadd.f32 %v3517_v7, %v17745_v37  ;;  %4373 = vmatmul.mubr.bf16.gmra.mxu1 %v15427_v56  ;;  %v18013_v7 = vpop.f32.mrf.mxu0 }
 0x68e   :  { %v14505_v58 = vpop.f32.mrf.mxu1  ;;  %4380 = vmatprep.mubr.bf16.mxu1 %v15435_v8 }
 0x68f   :  { %v17978_v33 = vadd.f32 %v14505_v58, %v17750_v40  ;;  %v15447_v58 = vld [vmem:[#allocation2 + $0x7a4] ss:$16 sps:$4 sm:$0xff]   ;;  %v18018_v44 = vpop.f32.mrf.mxu0 }
 0x690   :  { %v17984_v42 = vpop.f32.mrf.mxu1 }
 0x691   :  { %19549 = vst [vmem:[#allocation29_spill] sm:$0xff] %v17984_v42  ;;  %v18020_v56 = vpop.f32.mrf.mxu0  ;;  %v13801_v42 = vadd.f32 %v17965_v19, %v17963_v45  ;;  %v13807_v45 = vadd.f32 %v17982_v48, %v17980_v21  ;;  %v13810_v19 = vadd.f32 %v17994_v25, %v17986_v29  ;;  %v18064_v21 = vld [vmem:[%s19452_s0 + $0xb8] sm:$0xff]   ;;  %v13816_v48 = vadd.f32 %v18013_v7, %v18005_v46  ;;  %v18074_v25 = vld [vmem:[%s19452_s0 + $0xf0] sm:$0xff]   ;;  %v18086_v46 = vld [vmem:[%s19452_s0 + $0xe8] sm:$0xff]  }
 0x695   :  { %4381 = vmatmul.mubr.bf16.gmra.mxu1 %v15433_v63 }
 0x69a   :  { %v14508_v37 = vpop.f32.mrf.mxu1 }
 0x69b   :  { %v17989_v22 = vadd.f32 %v14508_v37, %v17761_v5  ;;  %v15441_v5 = vld [vmem:[#allocation2 + $0x784] ss:$16 sps:$4 sm:$0xff]   ;;  %v15451_v37 = vld [vmem:[#allocation2 + $0x7c0] ss:$16 sps:$4 sm:$0xff]  }
 0x69c   :  { %v3533_v40 = vpop.f32.mrf.mxu1  ;;  %4388 = vmatprep.mubr.bf16.mxu1 %v15441_v5 }
 0x69d   :  { %v17992_v6 = vadd.f32 %v3533_v40, %v17764_v60  ;;  %4389 = vmatmul.mubr.bf16.gmra.mxu1 %v15439_v0 }
 0x69e   :  { %v14509_v27 = vpop.f32.mrf.mxu1  ;;  %4396 = vmatprep.mubr.bf16.mxu1 %v15447_v58 }
 0x69f   :  { %v17997_v57 = vadd.f32 %v14509_v27, %v17769_v34  ;;  %v18024_v27 = vpop.f32.mrf.mxu0 }
 0x6a0   :  { %v18003_v15 = vpop.f32.mrf.mxu1 }
 0x6a1   :  { %19550 = vst [vmem:[#allocation31_spill] sm:$0xff] %v18003_v15  ;;  %v18032_v0 = vpop.f32.mrf.mxu0 }
 0x6a5   :  { %4397 = vmatmul.mubr.bf16.gmra.mxu1 %v15445_v1 }
 0x6aa   :  { %v14512_v60 = vpop.f32.mrf.mxu1 }
 0x6ab   :  { %v18008_v13 = vadd.f32 %v14512_v60, %v17780_v12  ;;  %v15453_v12 = vld [vmem:[#allocation2 + $0x7c4] ss:$16 sps:$4 sm:$0xff]  }
 0x6ac   :  { %v3549_v34 = vpop.f32.mrf.mxu1  ;;  %4404 = vmatprep.mubr.bf16.mxu1 %v15453_v12  ;;  %v15459_v60 = vld [vmem:[#allocation2 + $0x7e4] ss:$16 sps:$4 sm:$0xff]   ;;  %v18039_v12 = vpop.f32.mrf.mxu0 }
 0x6ad   :  { %v18011_v39 = vadd.f32 %v3549_v34, %v17783_v51  ;;  %4405 = vmatmul.mubr.bf16.gmra.mxu1 %v15451_v37 }
 0x6ae   :  { %v14513_v61 = vpop.f32.mrf.mxu1  ;;  %4412 = vmatprep.mubr.bf16.mxu1 %v15459_v60 }
 0x6af   :  { %v18016_v54 = vadd.f32 %v14513_v61, %v17788_v10  ;;  %v15457_v61 = vld [vmem:[#allocation2 + $0x7e0] ss:$16 sps:$4 sm:$0xff]  }
 0x6b0   :  { %v18022_v40 = vpop.f32.mrf.mxu1 }
 0x6b1   :  { %19551 = vst [vmem:[#allocation32_spill] sm:$0xff] %v18022_v40 }
 0x6b5   :  { %4413 = vmatmul.mubr.bf16.gmra.mxu1 %v15457_v61 }
 0x6ba   :  { %v14516_v51 = vpop.f32.mrf.mxu1 }
 0x6bb   :  { %v18027_v8 = vadd.f32 %v14516_v51, %v17799_v16  ;;  %v18041_v51 = vpop.f32.mrf.mxu0 }
 0x6bc   :  { %v3565_v10 = vpop.f32.mrf.mxu1 }
 0x6bd   :  { %v18030_v63 = vadd.f32 %v3565_v10, %v17802_v47  ;;  %v18047_v15 = vpop.f32.mrf.mxu0 }
 0x6be   :  { %v14517_v5 = vpop.f32.mrf.mxu1 }
 0x6bf   :  { %v18035_v34 = vadd.f32 %v14517_v5, %v17805_v31  ;;  %v13804_v31 = vadd.f32 %v17975_v49, %v17967_v4  ;;  %v18049_v59 = vpop.f32.mrf.mxu0 }
 0x6c0   :  { %v18037_v58 = vpop.f32.mrf.mxu1 }
 0x6c1   :  { %19552 = vst [vmem:[#allocation33_spill] sm:$0xff] %v18037_v58 }
 0x6c2   :  { %v13863_v1 = vpop.f32.mrf.mxu1 }
 0x6c4   :  { %v13864_v16 = vpop.f32.mrf.mxu1 }
 0x6c5   :  { %v13865_v47 = vadd.f32 %v13864_v16, %v13863_v1  ;;  %v18056_v16 = vpop.f32.mrf.mxu0 }
 0x6c6   :  { %v13866_v37 = vpop.f32.mrf.mxu1 }
 0x6c7   :  { %v3921_v60 = vadd.f32 %v13865_v47, %v13801_v42 }
 0x6c8   :  { %v13867_v10 = vpop.f32.mrf.mxu1 }
 0x6c9   :  { %v13868_v5 = vadd.f32 %v13867_v10, %v13866_v37 }
 0x6ca   :  { %v13869_v53 = vpop.f32.mrf.mxu1 }
 0x6cb   :  { %v3924_v61 = vadd.f32 %v13868_v5, %v13804_v31  ;;  %v18058_v5 = vpop.f32.mrf.mxu0 }
 0x6cc   :  { %v13870_v38 = vpop.f32.mrf.mxu1 }
 0x6cd   :  { %v3983_v40 = vpack.c.bf16 %v3924_v61, %v3921_v60  ;;  %v13871_v36 = vadd.f32 %v13870_v38, %v13869_v53 }
 0x6ce   :  { %v13872_v58 = vpop.f32.mrf.mxu1 }
 0x6cf   :  { %14520 = vmatprep.mubr.msk.bf16.mxu0 %vm1198_vm1, %v3983_v40  ;;  %v3929_v42 = vadd.f32 %v13871_v36, %v13807_v45  ;;  %v13813_v36 = vadd.f32 %v18001_v43, %v17999_v62  ;;  %v18080_v62 = vld [vmem:[%s19452_s0 + $0xb0] sm:$0xff]  }
 0x6d0   :  { %v13873_v1 = vpop.f32.mrf.mxu1 }
 0x6d1   :  { %v13874_v4 = vadd.f32 %v13873_v1, %v13872_v58  ;;  %v13832_v58 = vpop.f32.mrf.mxu0 }
 0x6d2   :  { %v13875_v49 = vpop.f32.mrf.mxu1 }
 0x6d3   :  { %v3932_v37 = vadd.f32 %v13874_v4, %v13810_v19  ;;  %v13833_v45 = vpop.f32.mrf.mxu0 }
 0x6d4   :  { %v13876_v47 = vpop.f32.mrf.mxu1 }
 0x6d5   :  { %v3984_v10 = vpack.c.bf16 %v3932_v37, %v3929_v42  ;;  %v13877_v53 = vadd.f32 %v13876_v47, %v13875_v49  ;;  %v18093_v49 = vld [vmem:[%s19452_s0 + $0xa8] sm:$0xff]   ;;  %v13819_v42 = vadd.f32 %v18020_v56, %v18018_v44  ;;  %v13822_v37 = vadd.f32 %v18032_v0, %v18024_v27  ;;  %v18109_v44 = vld [vmem:[%s19452_s0 + $0xa0] sm:$0xff]   ;;  %v18115_v27 = vld [vmem:[%s19452_s0 + $0xd8] sm:$0xff]  }
 0x6d6   :  { %v13878_v31 = vpop.f32.mrf.mxu1 }
 0x6d7   :  { %14521 = vmatmul.mubr.msk.bf16.vlgmr.msra.gmra.mxu0 %vm1198_vm1, %v3984_v10  ;;  %v3937_v60 = vadd.f32 %v13877_v53, %v13813_v36  ;;  %v18103_v10 = vld [vmem:[%s19452_s0 + $0xe0] sm:$0xff]   ;;  %v13835_v53 = vpop.f32.mrf.mxu0 }
 0x6d8   :  { %v13879_v38 = vpop.f32.mrf.mxu1  ;;  %13985 = vmatpush3.bf16.msra.mxu0 %v18064_v21 }
 0x6d9   :  { %v13880_v29 = vadd.f32 %v13879_v38, %v13878_v31  ;;  %13986 = vmatprep.subr.bf16.mxu0 %v18074_v25 }
 0x6da   :  { %v13881_v40 = vpop.f32.mrf.mxu1 }
 0x6db   :  { %v3940_v61 = vadd.f32 %v13880_v29, %v13816_v48  ;;  %v13836_v29 = vpop.f32.mrf.mxu0 }
 0x6dc   :  { %v13882_v1 = vpop.f32.mrf.mxu1  ;;  %13987 = vmatpush3.bf16.msra.mxu0 %v18080_v62 }
 0x6dd   :  { %v3985_v43 = vpack.c.bf16 %v3940_v61, %v3937_v60  ;;  %13988 = vmatprep.subr.bf16.mxu0 %v18086_v46  ;;  %v13883_v19 = vadd.f32 %v13882_v1, %v13881_v40  ;;  %v18122_v61 = vld [vmem:[%s19452_s0 + $0x98] sm:$0xff]   ;;  %v13825_v1 = vadd.f32 %v18041_v51, %v18039_v12  ;;  %v18138_v12 = vld [vmem:[%s19452_s0 + $0x90] sm:$0xff]  }
 0x6de   :  { %v13884_v7 = vpop.f32.mrf.mxu1  ;;  %19554 = vst [vmem:[#allocation36_spill] sm:$0xff] %v18138_v12 }
 0x6df   :  { %14524 = vmatprep.mubr.msk.bf16.mxu0 %vm1198_vm1, %v3985_v43  ;;  %v3945_v38 = vadd.f32 %v13883_v19, %v13819_v42  ;;  %v13828_v43 = vadd.f32 %v18049_v59, %v18047_v15  ;;  %v18132_v19 = vld [vmem:[%s19452_s0 + $0xd0] sm:$0xff]   ;;  %v13838_v42 = vpop.f32.mrf.mxu0  ;;  %v18144_v15 = vld [vmem:[%s19452_s0 + $0xc8] sm:$0xff]  }
 0x6e0   :  { %v13885_v4 = vpop.f32.mrf.mxu1  ;;  %13989 = vmatpush3.bf16.msra.mxu0 %v18093_v49  ;;  %19553 = vst [vmem:[#allocation35_spill] sm:$0xff] %v18132_v19  ;;  %19555 = vst [vmem:[#allocation49_spill] sm:$0xff] %v18144_v15 }
 0x6e1   :  { %v13886_v47 = vadd.f32 %v13885_v4, %v13884_v7  ;;  %13990 = vmatprep.subr.bf16.mxu0 %v18103_v10 }
 0x6e2   :  { %v13887_v31 = vpop.f32.mrf.mxu1 }
 0x6e3   :  { %v3948_v36 = vadd.f32 %v13886_v47, %v13822_v37 }
 0x6e4   :  { %v13888_v48 = vpop.f32.mrf.mxu1  ;;  %13991 = vmatpush3.bf16.msra.mxu0 %v18109_v44 }
 0x6e5   :  { %v3986_v56 = vpack.c.bf16 %v3948_v36, %v3945_v38  ;;  %13992 = vmatprep.subr.bf16.mxu0 %v18115_v27  ;;  %v13889_v40 = vadd.f32 %v13888_v48, %v13887_v31  ;;  %v13839_v38 = vpop.f32.mrf.mxu0 }
 0x6e6   :  { %v13890_v0 = vpop.f32.mrf.mxu1 }
 0x6e7   :  { %14525 = vmatmul.mubr.msk.bf16.gmra.mxu0 %vm1198_vm1, %v3986_v56  ;;  %v3953_v37 = vadd.f32 %v13889_v40, %v13825_v1  ;;  %v18151_v56 = vld [vmem:[%s19452_s0 + $0x88] sm:$0xff]   ;;  %v13834_v40 = vadd.f32 %v13833_v45, %v13832_v58  ;;  %v18159_v1 = vld [vmem:[%s19452_s0 + $0xc0] sm:$0xff]  }
 0x6e8   :  { %v13891_v60 = vpop.f32.mrf.mxu1  ;;  %13993 = vmatpush3.bf16.msra.mxu0 %v18122_v61  ;;  %19556 = vst [vmem:[#allocation50_spill] sm:$0xff] %v18151_v56  ;;  %19557 = vst [vmem:[#allocation51_spill] sm:$0xff] %v18159_v1 }
 0x6e9   :  { %v13892_v7 = vadd.f32 %v13891_v60, %v13890_v0  ;;  %13994 = vmatprep.subr.bf16.mxu0 %v18132_v19  ;;  %v13831_v0 = vadd.f32 %v18058_v5, %v18056_v16 }
 0x6ea   :  { %v13893_v4 = vpop.f32.mrf.mxu1 }
 0x6eb   :  { %v3956_v47 = vadd.f32 %v13892_v7, %v13828_v43  ;;  %v13841_v7 = vpop.f32.mrf.mxu0 }
 0x6ec   :  { %v13894_v31 = vpop.f32.mrf.mxu1  ;;  %13995 = vmatpush3.bf16.msra.mxu0 %v18138_v12 }
 0x6ed   :  { %v3987_v59 = vpack.c.bf16 %v3956_v47, %v3953_v37  ;;  %13996 = vmatprep.subr.bf16.mxu0 %v18144_v15  ;;  %v13895_v36 = vadd.f32 %v13894_v31, %v13893_v4  ;;  %v18165_v31 = vld [vmem:[%s19452_s0 + $0x80] sm:$0xff]   ;;  %v13842_v5 = vpop.f32.mrf.mxu0 }
 0x6ee   :  { %v13896_v51 = vpop.f32.mrf.mxu1  ;;  %19558 = vst [vmem:[#allocation52_spill] sm:$0xff] %v18165_v31 }
 0x6ef   :  { %14528 = vmatprep.mubr.msk.bf16.mxu0 %vm1198_vm1, %v3987_v59  ;;  %v3961_v4 = vadd.f32 %v13895_v36, %v13831_v0  ;;  %v13840_v36 = vadd.f32 %v13839_v38, %v13838_v42  ;;  %v13844_v0 = vpop.f32.mrf.mxu0  ;;  %v15418_v42 = vld [vmem:[#allocation2 + $0x708] ss:$16 sps:$4 sm:$0xff]   ;;  %v15426_v38 = vld [vmem:[#allocation2 + $0x72c] ss:$16 sps:$4 sm:$0xff]  }
 0x6f0   :  { %v13897_v48 = vpop.f32.mrf.mxu1  ;;  %13997 = vmatpush3.bf16.msra.mxu0 %v18151_v56 }
 0x6f1   :  { %v13898_v60 = vadd.f32 %v13897_v48, %v13896_v51  ;;  %13998 = vmatprep.subr.bf16.mxu0 %v18159_v1  ;;  %v13837_v51 = vadd.f32 %v13836_v29, %v13835_v53  ;;  %v13845_v12 = vpop.f32.mrf.mxu0  ;;  %v15420_v53 = vld [vmem:[#allocation2 + $0x70c] ss:$16 sps:$4 sm:$0xff]  }
 0x6f2   :  { %v13899_v43 = vpop.f32.mrf.mxu1 }
 0x6f3   :  { %v3964_v37 = vadd.f32 %v13898_v60, %v13834_v40 }
 0x6f4   :  { %v13900_v47 = vpop.f32.mrf.mxu1  ;;  %13999 = vmatpush3.bf16.msra.mxu0 %v18165_v31 }
 0x6f5   :  { %v3988_v16 = vpack.c.bf16 %v3964_v37, %v3961_v4  ;;  %14057 = vmatprep.subr.bf16.mxu0 %v17856_v35  ;;  %v13901_v45 = vadd.f32 %v13900_v47, %v13899_v43  ;;  %v13843_v37 = vadd.f32 %v13842_v5, %v13841_v7  ;;  %v13846_v43 = vadd.f32 %v13845_v12, %v13844_v0  ;;  %v15438_v12 = vld [vmem:[#allocation2 + $0x76c] ss:$16 sps:$4 sm:$0xff]  }
 0x6f6   :  { %v13902_v58 = vpop.f32.mrf.mxu1 }
 0x6f7   :  { %14529 = vmatmul.mubr.msk.bf16.gmra.mxu0 %vm1198_vm1, %v3988_v16  ;;  %v3969_v60 = vadd.f32 %v13901_v45, %v13837_v51  ;;  %v15472_v51 = vld [vmem:[#allocation2 + $0x824] ss:$16 sps:$4 sm:$0xff]  }
 0x6f8   :  { %v13903_v59 = vpop.f32.mrf.mxu1 }
 0x6f9   :  { %v13904_v48 = vadd.f32 %v13903_v59, %v13902_v58 }
 0x6fa   :  { %v13905_v40 = vpop.f32.mrf.mxu1 }
 0x6fb   :  { %v3972_v1 = vadd.f32 %v13904_v48, %v13840_v36  ;;  %v15470_v48 = vld [vmem:[#allocation2 + $0x820] ss:$16 sps:$4 sm:$0xff]  }
 0x6fc   :  { %v13906_v56 = vpop.f32.mrf.mxu1 }
 0x6fd   :  { %v3989_v15 = vpack.c.bf16 %v3972_v1, %v3969_v60  ;;  %v13907_v4 = vadd.f32 %v13906_v56, %v13905_v40  ;;  %v15432_v56 = vld [vmem:[#allocation2 + $0x74c] ss:$16 sps:$4 sm:$0xff]   ;;  %v15464_v1 = vld [vmem:[#allocation2 + $0x800] ss:$16 sps:$4 sm:$0xff]  }
 0x6fe   :  { %v13908_v31 = vpop.f32.mrf.mxu1  ;;  %v15476_v60 = vld [vmem:[#allocation2 + $0x840] ss:$16 sps:$4 sm:$0xff]  }
 0x6ff   :  { %14532 = vmatprep.mubr.msk.bf16.mxu0 %vm1198_vm1, %v3989_v15  ;;  %v3977_v16 = vadd.f32 %v13907_v4, %v13843_v37  ;;  %v15424_v15 = vld [vmem:[#allocation2 + $0x728] ss:$16 sps:$4 sm:$0xff]  }
 0x700   :  { %v13909_v35 = vpop.f32.mrf.mxu1 }
 0x701   :  { %v13910_v47 = vadd.f32 %v13909_v35, %v13908_v31 }
 0x703   :  { %v3980_v19 = vadd.f32 %v13910_v47, %v13846_v43 }
 0x705   :  { %v3990_v29 = vpack.c.bf16 %v3980_v19, %v3977_v16  ;;  %v15430_v19 = vld [vmem:[#allocation2 + $0x748] ss:$16 sps:$4 sm:$0xff]  }
 0x707   :  { %14533 = vmatmul.mubr.msk.bf16.gmra.mxu0 %vm1198_vm1, %v3990_v29 }
 0x708   :  { %4453 = vmatprep.mubr.bf16.mxu0 %v15420_v53  ;;  %v15484_v53 = vld [vmem:[#allocation2 + $0x864] ss:$16 sps:$4 sm:$0xff]  }
 0x70f   :  { %4454 = vmatmul.mubr.bf16.vlgmr.msra.gmra.mxu0 %v15418_v42  ;;  %v15482_v42 = vld [vmem:[#allocation2 + $0x860] ss:$16 sps:$4 sm:$0xff]  }
 0x710   :  { %4461 = vmatprep.mubr.bf16.mxu0 %v15426_v38  ;;  %14058 = vmatpush3.bf16.msra.mxu0 %v17865_v2  ;;  %v15436_v2 = vld [vmem:[#allocation2 + $0x768] ss:$16 sps:$4 sm:$0xff]  }
 0x711   :  { %14059 = vmatprep.subr.bf16.mxu0 %v17871_v30  ;;  %v15444_v30 = vld [vmem:[#allocation2 + $0x78c] ss:$16 sps:$4 sm:$0xff]  }
 0x714   :  { %14060 = vmatpush3.bf16.msra.mxu0 %v17877_v17  ;;  %v15442_v17 = vld [vmem:[#allocation2 + $0x788] ss:$16 sps:$4 sm:$0xff]  }
 0x715   :  { %14061 = vmatprep.subr.bf16.mxu0 %v17883_v11  ;;  %v15450_v11 = vld [vmem:[#allocation2 + $0x7ac] ss:$16 sps:$4 sm:$0xff]  }
 0x717   :  { %4462 = vmatmul.mubr.bf16.gmra.mxu0 %v15424_v15 }
 0x718   :  { %4469 = vmatprep.mubr.bf16.mxu0 %v15432_v56  ;;  %14062 = vmatpush3.bf16.msra.mxu0 %v17889_v26  ;;  %v15448_v26 = vld [vmem:[#allocation2 + $0x7a8] ss:$16 sps:$4 sm:$0xff]   ;;  %v15488_v56 = vld [vmem:[#allocation2 + $0x880] ss:$16 sps:$4 sm:$0xff]  }
 0x719   :  { %14063 = vmatprep.subr.bf16.mxu0 %v17895_v14  ;;  %v15456_v14 = vld [vmem:[#allocation2 + $0x7cc] ss:$16 sps:$4 sm:$0xff]  }
 0x71c   :  { %14064 = vmatpush3.bf16.msra.mxu0 %v17901_v18  ;;  %v15454_v18 = vld [vmem:[#allocation2 + $0x7c8] ss:$16 sps:$4 sm:$0xff]  }
 0x71d   :  { %14065 = vmatprep.subr.bf16.mxu0 %v17907_v55  ;;  %v15462_v55 = vld [vmem:[#allocation2 + $0x7ec] ss:$16 sps:$4 sm:$0xff]  }
 0x71f   :  { %4470 = vmatmul.mubr.bf16.gmra.mxu0 %v15430_v19 }
 0x720   :  { %4477 = vmatprep.mubr.bf16.mxu0 %v15438_v12  ;;  %14066 = vmatpush3.bf16.msra.mxu0 %v17913_v3  ;;  %v15460_v3 = vld [vmem:[#allocation2 + $0x7e8] ss:$16 sps:$4 sm:$0xff]  }
 0x721   :  { %14067 = vmatprep.subr.bf16.mxu0 %v17919_v32  ;;  %v15463_v32 = vld [vmem:[%s19454_s2 + $0xc] ss:$0 sps:$4 sm:$0xcc]  }
 0x724   :  { %14068 = vmatpush3.bf16.msra.mxu0 %v17925_v9  ;;  %v4529_v9 = vrot.slane %v15463_v32, 2  ;;  %v15500_v32 = vld [vmem:[#allocation2 + $0x8c0] ss:$16 sps:$4 sm:$0xff]  }
 0x725   :  { %14069 = vmatprep.subr.bf16.mxu0 %v17931_v28 }
 0x726   :  { %15027 = vmatprep.subr.msk.bf16.mxu1 %vm1223_vm0, %v4529_v9  ;;  %v4555_v28 = vsel %vm1223_vm0, %v4529_v9, 0 }
 0x727   :  { %4478 = vmatmul.mubr.bf16.gmra.mxu0 %v15436_v2  ;;  %14537 = vmatpush3.bf16.msra.mxu1 %v4555_v28 }
 0x728   :  { %4485 = vmatprep.mubr.bf16.mxu0 %v15444_v30  ;;  %14070 = vmatpush3.bf16.msra.mxu0 %v17937_v20  ;;  %v18193_v20 = vpop.f32.mrf.mxu1 }
 0x729   :  { %14071 = vmatprep.subr.bf16.mxu0 %v17943_v41  ;;  %14121 = vmatprep.subr.bf16.mxu1 %v17960_v23 }
 0x72a   :  { %v18195_v41 = vpop.f32.mrf.mxu1 }
 0x72c   :  { %14072 = vmatpush3.bf16.msra.mxu0 %v17949_v50  ;;  %v15466_v50 = vld [vmem:[#allocation2 + $0x804] ss:$16 sps:$4 sm:$0xff]   ;;  %v18197_v31 = vpop.f32.mrf.mxu1 }
 0x72e   :  { %v18205_v23 = vpop.f32.mrf.mxu1 }
 0x72f   :  { %4486 = vmatmul.mubr.bf16.gmra.mxu0 %v15442_v17 }
 0x730   :  { %4493 = vmatprep.mubr.bf16.mxu0 %v15450_v11  ;;  %v18210_v0 = vpop.f32.mrf.mxu1 }
 0x732   :  { %v18212_v40 = vpop.f32.mrf.mxu1 }
 0x734   :  { %v18216_v35 = vpop.f32.mrf.mxu1 }
 0x736   :  { %v18224_v16 = vpop.f32.mrf.mxu1 }
 0x737   :  { %4494 = vmatmul.mubr.bf16.gmra.mxu0 %v15448_v26  ;;  %v15496_v26 = vld [vmem:[#allocation2 + $0x8a4] ss:$16 sps:$4 sm:$0xff]  }
 0x738   :  { %4501 = vmatprep.mubr.bf16.mxu0 %v15456_v14 }
 0x73f   :  { %4502 = vmatmul.mubr.bf16.gmra.mxu0 %v15454_v18  ;;  %v15494_v18 = vld [vmem:[#allocation2 + $0x8a0] ss:$16 sps:$4 sm:$0xff]  }
 0x740   :  { %4509 = vmatprep.mubr.bf16.mxu0 %v15462_v55 }
 0x747   :  { %4510 = vmatmul.mubr.bf16.gmra.mxu0 %v15460_v3 }
 0x748   :  { %4895 = vmatprep.mubr.bf16.mxu0 %v15466_v50 }
 0x74d   :  { %v18229_v38 = vpop.f32.mrf.mxu1 }
 0x74f   :  { %4896 = vmatmul.mubr.bf16.vlgmr.msra.gmra.mxu0 %v15464_v1  ;;  %v18231_v15 = vpop.f32.mrf.mxu1 }
 0x750   :  { %4903 = vmatprep.mubr.bf16.mxu0 %v15472_v51 }
 0x751   :  { %v18235_v12 = vpop.f32.mrf.mxu1 }
 0x753   :  { %v18243_v11 = vpop.f32.mrf.mxu1 }
 0x755   :  { %v18248_v55 = vpop.f32.mrf.mxu1 }
 0x757   :  { %4904 = vmatmul.mubr.bf16.gmra.mxu0 %v15470_v48  ;;  %v18250_v3 = vpop.f32.mrf.mxu1  ;;  %v15506_v48 = vld [vmem:[#allocation2 + $0x8e0] ss:$16 sps:$4 sm:$0xff]  }
 0x759   :  { %v18254_v28 = vpop.f32.mrf.mxu1 }
 0x797   :  { %v14522_v7 = vpop.f32.mrf.mxu0 }
 0x798   :  { %v18200_v5 = vadd.f32 %v14522_v7, %v17970_v52  ;;  %v15478_v52 = vld [vmem:[#allocation2 + $0x844] ss:$16 sps:$4 sm:$0xff]  }
 0x799   :  { %v4052_v58 = vpop.f32.mrf.mxu0  ;;  %4911 = vmatprep.mubr.bf16.mxu0 %v15478_v52 }
 0x79a   :  { %v18203_v45 = vadd.f32 %v4052_v58, %v17973_v24  ;;  %4912 = vmatmul.mubr.bf16.gmra.mxu0 %v15476_v60  ;;  %v13958_v58 = vpop.f32.mrf.mxu1 }
 0x79b   :  { %v14523_v59 = vpop.f32.mrf.mxu0  ;;  %4919 = vmatprep.mubr.bf16.mxu0 %v15484_v53 }
 0x79c   :  { %v18208_v36 = vadd.f32 %v14523_v59, %v17978_v33  ;;  %v15508_v59 = vld [vmem:[#allocation2 + $0x8e4] ss:$16 sps:$4 sm:$0xff]  }
 0x79d   :  { %v18214_v4 = vpop.f32.mrf.mxu0 }
 0x7a2   :  { %4920 = vmatmul.mubr.bf16.gmra.mxu0 %v15482_v42  ;;  %v13938_v42 = vadd.f32 %v18195_v41, %v18193_v20  ;;  %v13947_v20 = vadd.f32 %v18224_v16, %v18216_v35 }
 0x7a7   :  { %v14526_v24 = vpop.f32.mrf.mxu0 }
 0x7a8   :  { %v18219_v37 = vadd.f32 %v14526_v24, %v17989_v22  ;;  %v15490_v22 = vld [vmem:[#allocation2 + $0x884] ss:$16 sps:$4 sm:$0xff]   ;;  %v18267_v24 = vpop.f32.mrf.mxu1 }
 0x7a9   :  { %v4068_v33 = vpop.f32.mrf.mxu0  ;;  %4927 = vmatprep.mubr.bf16.mxu0 %v15490_v22 }
 0x7aa   :  { %v18222_v43 = vadd.f32 %v4068_v33, %v17992_v6  ;;  %4928 = vmatmul.mubr.bf16.gmra.mxu0 %v15488_v56 }
 0x7ab   :  { %v14527_v47 = vpop.f32.mrf.mxu0  ;;  %4935 = vmatprep.mubr.bf16.mxu0 %v15496_v26 }
 0x7ac   :  { %v18227_v29 = vadd.f32 %v14527_v47, %v17997_v57  ;;  %v18269_v47 = vpop.f32.mrf.mxu1 }
 0x7ad   :  { %v18233_v19 = vpop.f32.mrf.mxu0 }
 0x7b2   :  { %4936 = vmatmul.mubr.bf16.gmra.mxu0 %v15494_v18 }
 0x7b7   :  { %v14530_v6 = vpop.f32.mrf.mxu0 }
 0x7b8   :  { %v18238_v2 = vadd.f32 %v14530_v6, %v18008_v13  ;;  %v15502_v13 = vld [vmem:[#allocation2 + $0x8c4] ss:$16 sps:$4 sm:$0xff]   ;;  %v13963_v6 = vpop.f32.mrf.mxu1 }
 0x7b9   :  { %v4084_v57 = vpop.f32.mrf.mxu0  ;;  %4943 = vmatprep.mubr.bf16.mxu0 %v15502_v13 }
 0x7ba   :  { %v18241_v30 = vadd.f32 %v4084_v57, %v18011_v39  ;;  %4944 = vmatmul.mubr.bf16.gmra.mxu0 %v15500_v32  ;;  %v13964_v32 = vpop.f32.mrf.mxu1 }
 0x7bb   :  { %v14531_v17 = vpop.f32.mrf.mxu0  ;;  %4951 = vmatprep.mubr.bf16.mxu0 %v15508_v59 }
 0x7bc   :  { %v18246_v14 = vadd.f32 %v14531_v17, %v18016_v54 }
 0x7bd   :  { %v18252_v9 = vpop.f32.mrf.mxu0 }
 0x7c2   :  { %4952 = vmatmul.mubr.bf16.gmra.mxu0 %v15506_v48 }
 0x7c7   :  { %v14534_v39 = vpop.f32.mrf.mxu0 }
 0x7c8   :  { %v18257_v50 = vadd.f32 %v14534_v39, %v18027_v8 }
 0x7c9   :  { %v4100_v54 = vpop.f32.mrf.mxu0 }
 0x7ca   :  { %v18260_v1 = vadd.f32 %v4100_v54, %v18030_v63 }
 0x7cb   :  { %v14535_v7 = vpop.f32.mrf.mxu0 }
 0x7cc   :  { %v18263_v51 = vadd.f32 %v14535_v7, %v18035_v34  ;;  %v13941_v34 = vadd.f32 %v18205_v23, %v18197_v31  ;;  %v13944_v7 = vadd.f32 %v18212_v40, %v18210_v0  ;;  %v18280_v23 = vpop.f32.mrf.mxu1  ;;  %v13950_v0 = vadd.f32 %v18231_v15, %v18229_v38 }
 0x7cd   :  { %v18265_v52 = vpop.f32.mrf.mxu0  ;;  %v13953_v40 = vadd.f32 %v18243_v11, %v18235_v12  ;;  %v13959_v15 = vadd.f32 %v13958_v58, %v18254_v28  ;;  %v19559_v58 = vld [vmem:[#allocation35_spill] sm:$0xff] }
 0x7cf   :  { %v14000_v60 = vpop.f32.mrf.mxu0 }
 0x7d1   :  { %v14001_v8 = vpop.f32.mrf.mxu0 }
 0x7d2   :  { %v14002_v63 = vadd.f32 %v14001_v8, %v14000_v60 }
 0x7d3   :  { %v14003_v33 = vpop.f32.mrf.mxu0 }
 0x7d4   :  { %v4456_v57 = vadd.f32 %v14002_v63, %v13938_v42  ;;  %v13967_v63 = vpop.f32.mrf.mxu1 }
 0x7d5   :  { %v14004_v53 = vpop.f32.mrf.mxu0 }
 0x7d6   :  { %v14005_v22 = vadd.f32 %v14004_v53, %v14003_v33 }
 0x7d7   :  { %v14006_v56 = vpop.f32.mrf.mxu0 }
 0x7d8   :  { %v4459_v17 = vadd.f32 %v14005_v22, %v13941_v34  ;;  %v13969_v34 = vpop.f32.mrf.mxu1 }
 0x7d9   :  { %v14007_v26 = vpop.f32.mrf.mxu0 }
 0x7da   :  { %v4518_v18 = vpack.c.bf16 %v4459_v17, %v4456_v57  ;;  %v14008_v39 = vadd.f32 %v14007_v26, %v14006_v56  ;;  %v13970_v26 = vpop.f32.mrf.mxu1 }
 0x7db   :  { %v14009_v13 = vpop.f32.mrf.mxu0 }
 0x7dc   :  { %14538 = vmatprep.mubr.msk.bf16.mxu1 %vm1198_vm1, %v4518_v18  ;;  %v4464_v59 = vadd.f32 %v14008_v39, %v13944_v7  ;;  %v13972_v11 = vpop.f32.mrf.mxu1 }
 0x7dd   :  { %v14010_v54 = vpop.f32.mrf.mxu0 }
 0x7de   :  { %v14011_v41 = vadd.f32 %v14010_v54, %v14009_v13 }
 0x7df   :  { %v14012_v31 = vpop.f32.mrf.mxu0 }
 0x7e0   :  { %v4467_v48 = vadd.f32 %v14011_v41, %v13947_v20 }
 0x7e1   :  { %v14013_v60 = vpop.f32.mrf.mxu0 }
 0x7e2   :  { %v4519_v8 = vpack.c.bf16 %v4467_v48, %v4464_v59  ;;  %v14014_v53 = vadd.f32 %v14013_v60, %v14012_v31  ;;  %v19560_v48 = vld [vmem:[#allocation36_spill] sm:$0xff] }
 0x7e3   :  { %v14015_v33 = vpop.f32.mrf.mxu0 }
 0x7e4   :  { %14539 = vmatmul.mubr.msk.bf16.vlgmr.msra.gmra.mxu1 %vm1198_vm1, %v4519_v8  ;;  %v4472_v22 = vadd.f32 %v14014_v53, %v13950_v0  ;;  %v19561_v8 = vld [vmem:[#allocation49_spill] sm:$0xff]  ;;  %v19563_v0 = vld [vmem:[#allocation51_spill] sm:$0xff] }
 0x7e5   :  { %v14016_v42 = vpop.f32.mrf.mxu0  ;;  %14122 = vmatpush3.bf16.msra.mxu1 %v18064_v21 }
 0x7e6   :  { %v14017_v35 = vadd.f32 %v14016_v42, %v14015_v33  ;;  %14123 = vmatprep.subr.bf16.mxu1 %v18074_v25  ;;  %v13956_v25 = vadd.f32 %v18250_v3, %v18248_v55  ;;  %v13965_v3 = vadd.f32 %v13964_v32, %v13963_v6  ;;  %v13968_v6 = vadd.f32 %v13967_v63, %v18280_v23 }
 0x7e7   :  { %v14018_v16 = vpop.f32.mrf.mxu0  ;;  %v13971_v32 = vadd.f32 %v13970_v26, %v13969_v34 }
 0x7e8   :  { %v4475_v56 = vadd.f32 %v14017_v35, %v13953_v40 }
 0x7e9   :  { %v14019_v57 = vpop.f32.mrf.mxu0  ;;  %14124 = vmatpush3.bf16.msra.mxu1 %v18080_v62 }
 0x7ea   :  { %v4520_v17 = vpack.c.bf16 %v4475_v56, %v4472_v22  ;;  %14125 = vmatprep.subr.bf16.mxu1 %v18086_v46  ;;  %v14020_v18 = vadd.f32 %v14019_v57, %v14018_v16  ;;  %v19564_v57 = vld [vmem:[#allocation52_spill] sm:$0xff] }
 0x7eb   :  { %v14021_v21 = vpop.f32.mrf.mxu0 }
 0x7ec   :  { %14542 = vmatprep.mubr.msk.bf16.mxu1 %vm1198_vm1, %v4520_v17  ;;  %v4480_v13 = vadd.f32 %v14020_v18, %v13956_v25 }
 0x7ed   :  { %v14022_v38 = vpop.f32.mrf.mxu0  ;;  %14126 = vmatpush3.bf16.msra.mxu1 %v18093_v49  ;;  %v13973_v49 = vpop.f32.mrf.mxu1 }
 0x7ee   :  { %v14023_v12 = vadd.f32 %v14022_v38, %v14021_v21  ;;  %14127 = vmatprep.subr.bf16.mxu1 %v18103_v10  ;;  %v13962_v10 = vadd.f32 %v18269_v47, %v18267_v24  ;;  %v19562_v47 = vld [vmem:[#allocation50_spill] sm:$0xff] }
 0x7ef   :  { %v14024_v62 = vpop.f32.mrf.mxu0 }
 0x7f0   :  { %v4483_v46 = vadd.f32 %v14023_v12, %v13959_v15  ;;  %v13974_v15 = vadd.f32 %v13973_v49, %v13972_v11  ;;  %v15469_v11 = vld [vmem:[#allocation2 + $0x80c] ss:$16 sps:$4 sm:$0xff]  }
 0x7f1   :  { %v14025_v39 = vpop.f32.mrf.mxu0  ;;  %14128 = vmatpush3.bf16.msra.mxu1 %v18109_v44  ;;  %v13975_v44 = vpop.f32.mrf.mxu1 }
 0x7f2   :  { %v4521_v54 = vpack.c.bf16 %v4483_v46, %v4480_v13  ;;  %14129 = vmatprep.subr.bf16.mxu1 %v18115_v27  ;;  %v14026_v20 = vadd.f32 %v14025_v39, %v14024_v62 }
 0x7f3   :  { %v14027_v7 = vpop.f32.mrf.mxu0  ;;  %v13976_v53 = vpop.f32.mrf.mxu1 }
 0x7f4   :  { %14543 = vmatmul.mubr.msk.bf16.gmra.mxu1 %vm1198_vm1, %v4521_v54  ;;  %v4488_v31 = vadd.f32 %v14026_v20, %v13962_v10  ;;  %v13977_v23 = vadd.f32 %v13976_v53, %v13975_v44  ;;  %v15475_v44 = vld [vmem:[#allocation2 + $0x82c] ss:$16 sps:$4 sm:$0xff]  }
 0x7f5   :  { %v14028_v55 = vpop.f32.mrf.mxu0  ;;  %14130 = vmatpush3.bf16.msra.mxu1 %v18122_v61  ;;  %v13978_v35 = vpop.f32.mrf.mxu1  ;;  %v15499_v53 = vld [vmem:[#allocation2 + $0x8ac] ss:$16 sps:$4 sm:$0xff]  }
 0x7f6   :  { %v14029_v28 = vadd.f32 %v14028_v55, %v14027_v7  ;;  %14131 = vmatprep.subr.bf16.mxu1 %v19559_v58 }
 0x7f7   :  { %v14030_v41 = vpop.f32.mrf.mxu0  ;;  %v13979_v21 = vpop.f32.mrf.mxu1 }
 0x7f8   :  { %v4491_v59 = vadd.f32 %v14029_v28, %v13965_v3  ;;  %v13980_v55 = vadd.f32 %v13979_v21, %v13978_v35 }
 0x7f9   :  { %v14031_v27 = vpop.f32.mrf.mxu0  ;;  %14132 = vmatpush3.bf16.msra.mxu1 %v19560_v48  ;;  %v13981_v34 = vpop.f32.mrf.mxu1  ;;  %v15487_v48 = vld [vmem:[#allocation2 + $0x86c] ss:$16 sps:$4 sm:$0xff]  }
 0x7fa   :  { %v4522_v60 = vpack.c.bf16 %v4491_v59, %v4488_v31  ;;  %14133 = vmatprep.subr.bf16.mxu1 %v19561_v8  ;;  %v14032_v61 = vadd.f32 %v14031_v27, %v14030_v41  ;;  %v15467_v41 = vld [vmem:[#allocation2 + $0x808] ss:$16 sps:$4 sm:$0xff]   ;;  %v15481_v59 = vld [vmem:[#allocation2 + $0x84c] ss:$16 sps:$4 sm:$0xff]  }
 0x7fb   :  { %v14033_v33 = vpop.f32.mrf.mxu0  ;;  %v13982_v39 = vpop.f32.mrf.mxu1  ;;  %v15473_v31 = vld [vmem:[#allocation2 + $0x828] ss:$16 sps:$4 sm:$0xff]   ;;  %v15493_v8 = vld [vmem:[#allocation2 + $0x88c] ss:$16 sps:$4 sm:$0xff]  }
 0x7fc   :  { %14546 = vmatprep.mubr.msk.bf16.mxu1 %vm1198_vm1, %v4522_v60  ;;  %v4496_v16 = vadd.f32 %v14032_v61, %v13968_v6  ;;  %v13983_v10 = vadd.f32 %v13982_v39, %v13981_v34  ;;  %v15479_v27 = vld [vmem:[#allocation2 + $0x848] ss:$16 sps:$4 sm:$0xff]   ;;  %v15511_v6 = vld [vmem:[#allocation2 + $0x8ec] ss:$16 sps:$4 sm:$0xff]  }
 0x7fd   :  { %v14034_v24 = vpop.f32.mrf.mxu0  ;;  %14134 = vmatpush3.bf16.msra.mxu1 %v19562_v47  ;;  %v15485_v60 = vld [vmem:[#allocation2 + $0x868] ss:$16 sps:$4 sm:$0xff]  }
 0x7fe   :  { %v14035_v42 = vadd.f32 %v14034_v24, %v14033_v33  ;;  %14135 = vmatprep.subr.bf16.mxu1 %v19563_v0  ;;  %v15491_v33 = vld [vmem:[#allocation2 + $0x888] ss:$16 sps:$4 sm:$0xff]   ;;  %v15505_v24 = vld [vmem:[#allocation2 + $0x8cc] ss:$16 sps:$4 sm:$0xff]  }
 0x7ff   :  { %v14036_v40 = vpop.f32.mrf.mxu0  ;;  %v15497_v61 = vld [vmem:[#allocation2 + $0x8a8] ss:$16 sps:$4 sm:$0xff]  }
 0x800   :  { %v4499_v22 = vadd.f32 %v14035_v42, %v13971_v32  ;;  %v15503_v47 = vld [vmem:[#allocation2 + $0x8c8] ss:$16 sps:$4 sm:$0xff]   ;;  %v4702_v42 = vld [vmem:[%s19454_s2 + $0x10] sm:$0x3] }
 0x801   :  { %v14037_v56 = vpop.f32.mrf.mxu0  ;;  %14136 = vmatpush3.bf16.msra.mxu1 %v19564_v57  ;;  %v15509_v32 = vld [vmem:[#allocation2 + $0x8e8] ss:$16 sps:$4 sm:$0xff]   ;;  %15028 = vmatprep.subr.msk.bf16.mxu0 %vm1223_vm0, %v4702_v42  ;;  %v5090_v0 = vsel %vm1223_vm0, %v4702_v42, 0 }
 0x802   :  { %v4523_v17 = vpack.c.bf16 %v4499_v22, %v4496_v16  ;;  %v14038_v38 = vadd.f32 %v14037_v56, %v14036_v40  ;;  %14555 = vmatpush3.bf16.msra.mxu0 %v5090_v0 }
 0x803   :  { %v14039_v18 = vpop.f32.mrf.mxu0 }
 0x804   :  { %14547 = vmatmul.mubr.msk.bf16.gmra.mxu1 %vm1198_vm1, %v4523_v17  ;;  %v4504_v12 = vadd.f32 %v14038_v38, %v13974_v15 }
 0x805   :  { %v14040_v25 = vpop.f32.mrf.mxu0 }
 0x806   :  { %v14041_v63 = vadd.f32 %v14040_v25, %v14039_v18 }
 0x807   :  { %v14042_v26 = vpop.f32.mrf.mxu0 }
 0x808   :  { %v4507_v62 = vadd.f32 %v14041_v63, %v13977_v23 }
 0x809   :  { %v14043_v13 = vpop.f32.mrf.mxu0 }
 0x80a   :  { %v4524_v46 = vpack.c.bf16 %v4507_v62, %v4504_v12  ;;  %v14044_v7 = vadd.f32 %v14043_v13, %v14042_v26 }
 0x80b   :  { %v14045_v54 = vpop.f32.mrf.mxu0 }
 0x80c   :  { %14550 = vmatprep.mubr.msk.bf16.mxu1 %vm1198_vm1, %v4524_v46  ;;  %v4512_v28 = vadd.f32 %v14044_v7, %v13980_v55 }
 0x80d   :  { %v14046_v20 = vpop.f32.mrf.mxu0 }
 0x80e   :  { %v14047_v3 = vadd.f32 %v14046_v20, %v14045_v54 }
 0x80f   :  { %v14073_v40 = vpop.f32.mrf.mxu0 }
 0x810   :  { %v4515_v58 = vadd.f32 %v14047_v3, %v13983_v10 }
 0x811   :  { %v14074_v35 = vpop.f32.mrf.mxu0 }
 0x812   :  { %v4525_v49 = vpack.c.bf16 %v4515_v58, %v4512_v28 }
 0x813   :  { %v14076_v22 = vpop.f32.mrf.mxu0 }
 0x814   :  { %14551 = vmatmul.mubr.msk.bf16.gmra.mxu1 %vm1198_vm1, %v4525_v49 }
 0x815   :  { %4992 = vmatprep.mubr.bf16.mxu1 %v15469_v11  ;;  %v14077_v18 = vpop.f32.mrf.mxu0 }
 0x817   :  { %v14079_v25 = vpop.f32.mrf.mxu0 }
 0x819   :  { %v14080_v15 = vpop.f32.mrf.mxu0 }
 0x81b   :  { %v14082_v34 = vpop.f32.mrf.mxu0 }
 0x81c   :  { %4993 = vmatmul.mubr.bf16.vlgmr.msra.gmra.mxu1 %v15467_v41 }
 0x81d   :  { %5000 = vmatprep.mubr.bf16.mxu1 %v15475_v44  ;;  %v14083_v62 = vpop.f32.mrf.mxu0 }
 0x824   :  { %5001 = vmatmul.mubr.bf16.gmra.mxu1 %v15473_v31 }
 0x825   :  { %5008 = vmatprep.mubr.bf16.mxu1 %v15481_v59 }
 0x82c   :  { %5009 = vmatmul.mubr.bf16.gmra.mxu1 %v15479_v27 }
 0x82d   :  { %5016 = vmatprep.mubr.bf16.mxu1 %v15487_v48 }
 0x834   :  { %5017 = vmatmul.mubr.bf16.gmra.mxu1 %v15485_v60 }
 0x835   :  { %5024 = vmatprep.mubr.bf16.mxu1 %v15493_v8 }
 0x83c   :  { %5025 = vmatmul.mubr.bf16.gmra.mxu1 %v15491_v33 }
 0x83d   :  { %5032 = vmatprep.mubr.bf16.mxu1 %v15499_v53 }
 0x844   :  { %5033 = vmatmul.mubr.bf16.gmra.mxu1 %v15497_v61 }
 0x845   :  { %5040 = vmatprep.mubr.bf16.mxu1 %v15505_v24  ;;  %v14078_v24 = vadd.f32 %v14077_v18, %v14076_v22 }
 0x84c   :  { %5041 = vmatmul.mubr.bf16.gmra.mxu1 %v15503_v47 }
 0x84d   :  { %5048 = vmatprep.mubr.bf16.mxu1 %v15511_v6 }
 0x854   :  { %5049 = vmatmul.mubr.bf16.gmra.mxu1 %v15509_v32 }
 0x8a4   :  { %v14540_v16 = vpop.f32.mrf.mxu1 }
 0x8a5   :  { %v18320_v56 = vadd.f32 %v14540_v16, %v18200_v5 }
 0x8a6   :  { %v4591_v57 = vpop.f32.mrf.mxu1 }
 0x8a7   :  { %v18323_v17 = vadd.f32 %v4591_v57, %v18203_v45 }
 0x8a8   :  { %v14541_v21 = vpop.f32.mrf.mxu1 }
 0x8a9   :  { %v18326_v38 = vadd.f32 %v14541_v21, %v18208_v36  ;;  %v14085_v36 = vpop.f32.mrf.mxu0 }
 0x8aa   :  { %v18328_v23 = vpop.f32.mrf.mxu1 }
 0x8ab   :  { %v14086_v46 = vpop.f32.mrf.mxu0 }
 0x8ad   :  { %v14088_v7 = vpop.f32.mrf.mxu0 }
 0x8af   :  { %v14089_v10 = vpop.f32.mrf.mxu0 }
 0x8b4   :  { %v14544_v63 = vpop.f32.mrf.mxu1 }
 0x8b5   :  { %v18331_v26 = vadd.f32 %v14544_v63, %v18219_v37 }
 0x8b6   :  { %v4607_v5 = vpop.f32.mrf.mxu1 }
 0x8b7   :  { %v18334_v12 = vadd.f32 %v4607_v5, %v18222_v43  ;;  %v14081_v5 = vadd.f32 %v14080_v15, %v14079_v25 }
 0x8b8   :  { %v14545_v45 = vpop.f32.mrf.mxu1 }
 0x8b9   :  { %v18337_v13 = vadd.f32 %v14545_v45, %v18227_v29  ;;  %v14091_v29 = vpop.f32.mrf.mxu0  ;;  %v14084_v45 = vadd.f32 %v14083_v62, %v14082_v34 }
 0x8ba   :  { %v18339_v39 = vpop.f32.mrf.mxu1 }
 0x8bb   :  { %v14092_v28 = vpop.f32.mrf.mxu0 }
 0x8bd   :  { %v14094_v49 = vpop.f32.mrf.mxu0 }
 0x8bf   :  { %v14095_v31 = vpop.f32.mrf.mxu0 }
 0x8c1   :  { %v14097_v48 = vpop.f32.mrf.mxu0 }
 0x8c3   :  { %v14098_v33 = vpop.f32.mrf.mxu0 }
 0x8c4   :  { %v14548_v54 = vpop.f32.mrf.mxu1 }
 0x8c5   :  { %v18342_v20 = vadd.f32 %v14548_v54, %v18238_v2 }
 0x8c6   :  { %v4623_v37 = vpop.f32.mrf.mxu1 }
 0x8c7   :  { %v18345_v55 = vadd.f32 %v4623_v37, %v18241_v30 }
 0x8c8   :  { %v14549_v43 = vpop.f32.mrf.mxu1 }
 0x8c9   :  { %v18348_v3 = vadd.f32 %v14549_v43, %v18246_v14 }
 0x8ca   :  { %v18350_v58 = vpop.f32.mrf.mxu1 }
 0x8d4   :  { %v14552_v11 = vpop.f32.mrf.mxu1 }
 0x8d5   :  { %v18353_v41 = vadd.f32 %v14552_v11, %v18257_v50  ;;  %v14075_v50 = vadd.f32 %v14074_v35, %v14073_v40 }
 0x8d6   :  { %v4639_v2 = vpop.f32.mrf.mxu1 }
 0x8d7   :  { %v18356_v44 = vadd.f32 %v4639_v2, %v18260_v1  ;;  %v14100_v1 = vpop.f32.mrf.mxu0 }
 0x8d8   :  { %v14553_v30 = vpop.f32.mrf.mxu1 }
 0x8d9   :  { %v18359_v59 = vadd.f32 %v14553_v30, %v18263_v51  ;;  %v14101_v57 = vpop.f32.mrf.mxu0 }
 0x8da   :  { %v18361_v14 = vpop.f32.mrf.mxu1 }
 0x8db   :  { %v14103_v43 = vpop.f32.mrf.mxu0 }
 0x8dc   :  { %v14137_v27 = vpop.f32.mrf.mxu1 }
 0x8dd   :  { %v14104_v2 = vpop.f32.mrf.mxu0 }
 0x8de   :  { %v14138_v60 = vpop.f32.mrf.mxu1 }
 0x8df   :  { %v14139_v53 = vadd.f32 %v14138_v60, %v14137_v27  ;;  %v14087_v60 = vadd.f32 %v14086_v46, %v14085_v36 }
 0x8e0   :  { %v14140_v8 = vpop.f32.mrf.mxu1 }
 0x8e1   :  { %v4995_v32 = vadd.f32 %v14139_v53, %v14075_v50  ;;  %v14106_v50 = vpop.f32.mrf.mxu0 }
 0x8e2   :  { %v14141_v61 = vpop.f32.mrf.mxu1 }
 0x8e3   :  { %v14142_v47 = vadd.f32 %v14141_v61, %v14140_v8  ;;  %v14090_v8 = vadd.f32 %v14089_v10, %v14088_v7 }
 0x8e4   :  { %v14143_v6 = vpop.f32.mrf.mxu1 }
 0x8e5   :  { %v4998_v42 = vadd.f32 %v14142_v47, %v14078_v24  ;;  %v14107_v47 = vpop.f32.mrf.mxu0 }
 0x8e6   :  { %v14144_v0 = vpop.f32.mrf.mxu1 }
 0x8e7   :  { %v5057_v16 = vpack.c.bf16 %v4998_v42, %v4995_v32  ;;  %v14145_v21 = vadd.f32 %v14144_v0, %v14143_v6  ;;  %v14093_v42 = vadd.f32 %v14092_v28, %v14091_v29  ;;  %v14096_v0 = vadd.f32 %v14095_v31, %v14094_v49 }
 0x8e8   :  { %v14146_v51 = vpop.f32.mrf.mxu1 }
 0x8e9   :  { %14556 = vmatprep.mubr.msk.bf16.mxu0 %vm1198_vm1, %v5057_v16  ;;  %v5003_v40 = vadd.f32 %v14145_v21, %v14081_v5  ;;  %v14109_v21 = vpop.f32.mrf.mxu0 }
 0x8ea   :  { %v14147_v63 = vpop.f32.mrf.mxu1 }
 0x8eb   :  { %v14148_v54 = vadd.f32 %v14147_v63, %v14146_v51  ;;  %v14110_v5 = vpop.f32.mrf.mxu0 }
 0x8ec   :  { %v14149_v37 = vpop.f32.mrf.mxu1 }
 0x8ed   :  { %v5006_v35 = vadd.f32 %v14148_v54, %v14084_v45 }
 0x8ee   :  { %v14150_v22 = vpop.f32.mrf.mxu1 }
 0x8ef   :  { %v5058_v18 = vpack.c.bf16 %v5006_v35, %v5003_v40  ;;  %v14151_v30 = vadd.f32 %v14150_v22, %v14149_v37  ;;  %v14099_v37 = vadd.f32 %v14098_v33, %v14097_v48  ;;  %v14102_v40 = vadd.f32 %v14101_v57, %v14100_v1 }
 0x8f0   :  { %v14152_v11 = vpop.f32.mrf.mxu1 }
 0x8f1   :  { %14557 = vmatmul.mubr.msk.bf16.vlgmr.msra.gmra.mxu0 %vm1198_vm1, %v5058_v18  ;;  %v5011_v25 = vadd.f32 %v14151_v30, %v14087_v60  ;;  %v14112_v18 = vpop.f32.mrf.mxu0 }
 0x8f2   :  { %v14153_v27 = vpop.f32.mrf.mxu1 }
 0x8f3   :  { %v14154_v53 = vadd.f32 %v14153_v27, %v14152_v11  ;;  %v14113_v30 = vpop.f32.mrf.mxu0 }
 0x8f4   :  { %v14155_v61 = vpop.f32.mrf.mxu1 }
 0x8f5   :  { %v5014_v15 = vadd.f32 %v14154_v53, %v14090_v8  ;;  %v14105_v8 = vadd.f32 %v14104_v2, %v14103_v43  ;;  %v14108_v53 = vadd.f32 %v14107_v47, %v14106_v50 }
 0x8f6   :  { %v14156_v34 = vpop.f32.mrf.mxu1 }
 0x8f7   :  { %v5059_v62 = vpack.c.bf16 %v5014_v15, %v5011_v25  ;;  %v14157_v6 = vadd.f32 %v14156_v34, %v14155_v61  ;;  %v14115_v15 = vpop.f32.mrf.mxu0 }
 0x8f8   :  { %v14158_v24 = vpop.f32.mrf.mxu1 }
 0x8f9   :  { %14560 = vmatprep.mubr.msk.bf16.mxu0 %vm1198_vm1, %v5059_v62  ;;  %v5019_v36 = vadd.f32 %v14157_v6, %v14093_v42  ;;  %v14116_v34 = vpop.f32.mrf.mxu0  ;;  %v14114_v42 = vadd.f32 %v14113_v30, %v14112_v18 }
 0x8fa   :  { %v14159_v32 = vpop.f32.mrf.mxu1 }
 0x8fb   :  { %v14160_v16 = vadd.f32 %v14159_v32, %v14158_v24  ;;  %v14111_v32 = vadd.f32 %v14110_v5, %v14109_v21  ;;  %v15512_v5 = vld [vmem:[#allocation7 + $0x10] sm:$0xff]  }
 0x8fc   :  { %v14161_v51 = vpop.f32.mrf.mxu1 }
 0x8fd   :  { %v5022_v46 = vadd.f32 %v14160_v16, %v14096_v0  ;;  %v14118_v16 = vpop.f32.mrf.mxu0 }
 0x8fe   :  { %v14162_v7 = vpop.f32.mrf.mxu1 }
 0x8ff   :  { %v5060_v10 = vpack.c.bf16 %v5022_v46, %v5019_v36  ;;  %v14163_v45 = vadd.f32 %v14162_v7, %v14161_v51  ;;  %v14119_v36 = vpop.f32.mrf.mxu0 }
 0x900   :  { %v14164_v63 = vpop.f32.mrf.mxu1 }
 0x901   :  { %14561 = vmatmul.mubr.msk.bf16.gmra.mxu0 %vm1198_vm1, %v5060_v10  ;;  %v5027_v29 = vadd.f32 %v14163_v45, %v14099_v37  ;;  %v14120_v45 = vadd.f32 %v14119_v36, %v14118_v16  ;;  %v19568_v36 = vld [vmem:[#allocation25_spill] sm:$0xff] }
 0x902   :  { %v14165_v54 = vpop.f32.mrf.mxu1 }
 0x903   :  { %v14166_v35 = vadd.f32 %v14165_v54, %v14164_v63  ;;  %v14117_v63 = vadd.f32 %v14116_v34, %v14115_v15 }
 0x904   :  { %v14167_v22 = vpop.f32.mrf.mxu1 }
 0x905   :  { %v5030_v28 = vadd.f32 %v14166_v35, %v14102_v40  ;;  %v15516_v35 = vld [vmem:[#allocation7] sm:$0xff]  }
 0x906   :  { %v14168_v49 = vpop.f32.mrf.mxu1  ;;  %14588 = vmatprep.mubr.bf16.mxu1 %v15516_v35 }
 0x907   :  { %v5061_v31 = vpack.c.bf16 %v5030_v28, %v5027_v29  ;;  %v14169_v27 = vadd.f32 %v14168_v49, %v14167_v22  ;;  %v18372_v29 = vld [vmem:[#allocation5] ss:$0 sm:$0xff] }
 0x908   :  { %v14170_v11 = vpop.f32.mrf.mxu1 }
 0x909   :  { %14564 = vmatprep.mubr.msk.bf16.mxu0 %vm1198_vm1, %v5061_v31  ;;  %v5035_v48 = vadd.f32 %v14169_v27, %v14105_v8 }
 0x90a   :  { %v14171_v60 = vpop.f32.mrf.mxu1 }
 0x90b   :  { %v14172_v61 = vadd.f32 %v14171_v60, %v14170_v11 }
 0x90c   :  { %v14173_v25 = vpop.f32.mrf.mxu1 }
 0x90d   :  { %v5038_v33 = vadd.f32 %v14172_v61, %v14108_v53 }
 0x90e   :  { %v14174_v1 = vpop.f32.mrf.mxu1 }
 0x90f   :  { %v5062_v57 = vpack.c.bf16 %v5038_v33, %v5035_v48  ;;  %v14175_v24 = vadd.f32 %v14174_v1, %v14173_v25 }
 0x910   :  { %v14176_v62 = vpop.f32.mrf.mxu1 }
 0x911   :  { %14565 = vmatmul.mubr.msk.bf16.gmra.mxu0 %vm1198_vm1, %v5062_v57  ;;  %v5043_v43 = vadd.f32 %v14175_v24, %v14111_v32 }
 0x912   :  { %v14177_v6 = vpop.f32.mrf.mxu1 }
 0x913   :  { %v14178_v0 = vadd.f32 %v14177_v6, %v14176_v62 }
 0x914   :  { %v14179_v51 = vpop.f32.mrf.mxu1 }
 0x915   :  { %v5046_v2 = vadd.f32 %v14178_v0, %v14114_v42 }
 0x916   :  { %v14180_v50 = vpop.f32.mrf.mxu1 }
 0x917   :  { %v5063_v47 = vpack.c.bf16 %v5046_v2, %v5043_v43  ;;  %v14181_v7 = vadd.f32 %v14180_v50, %v14179_v51  ;;  %v19566_v51 = vld [vmem:[#allocation26_spill] sm:$0xff] }
 0x918   :  { %v14182_v46 = vpop.f32.mrf.mxu1 }
 0x919   :  { %14568 = vmatprep.mubr.msk.bf16.mxu0 %vm1198_vm1, %v5063_v47  ;;  %v5051_v37 = vadd.f32 %v14181_v7, %v14117_v63  ;;  %v19567_v47 = vld [vmem:[#allocation34_spill] sm:$0xff]  ;;  %v19569_v7 = vld [vmem:[#allocation45_spill] sm:$0xff] }
 0x91a   :  { %v14183_v10 = vpop.f32.mrf.mxu1 }
 0x91b   :  { %v14184_v54 = vadd.f32 %v14183_v10, %v14182_v46  ;;  %v1421_v46 = vadd.f32 %v19568_v36, %v19567_v47 }
 0x91d   :  { %v5054_v40 = vadd.f32 %v14184_v54, %v14120_v45  ;;  %v19571_v54 = vld [vmem:[#allocation28_spill] sm:$0xff] }
 0x91f   :  { %v5064_v21 = vpack.c.bf16 %v5054_v40, %v5051_v37 }
 0x921   :  { %14569 = vmatmul.mubr.msk.bf16.gmra.mxu0 %vm1198_vm1, %v5064_v21 }
 0x922   :  { %14608 = vmatprep.mubr.bf16.mxu0 %v15512_v5  ;;  %v19573_v5 = vld [vmem:[#allocation48_spill] sm:$0xff] }
 0x9b1   :  { %v14558_v22 = vpop.f32.mrf.mxu0 }
 0x9b2   :  { %v5191_v18 = vadd.f32 %v14558_v22, %v18320_v56 }
 0x9b3   :  { %v18374_v28 = vpop.f32.mrf.mxu0 }
 0x9b4   :  { %v5214_v31 = vadd.f32 %v18372_v29, %v5191_v18  ;;  %v19574_v18 = vld [vmem:[#allocation47_spill] sm:$0xff] }
 0x9b5   :  { %v14559_v49 = vpop.f32.mrf.mxu0 }
 0x9b6   :  { %v5192_v11 = vadd.f32 %v14559_v49, %v18326_v38  ;;  %v5230_v27 = vmax.f32 %v5214_v31, 0.0  ;;  %v19575_v31 = vld [vmem:[#allocation33_spill] sm:$0xff] }
 0x9b7   :  { %v18381_v53 = vpop.f32.mrf.mxu0 }
 0x9b8   :  { %v5215_v30 = vadd.f32 %v18372_v29, %v5192_v11 }
 0x9ba   :  { %v5231_v60 = vmax.f32 %v5215_v30, 0.0 }
 0x9bc   :  { %v18379_v8 = vpack.c.bf16 %v5231_v60, %v5230_v27  ;;  %v19576_v27 = vld [vmem:[#allocation30_spill] sm:$0xff]  ;;  %v19577_v60 = vld [vmem:[#allocation24_spill] sm:$0xff] }
 0x9c1   :  { %v14562_v61 = vpop.f32.mrf.mxu0 }
 0x9c2   :  { %v5195_v56 = vadd.f32 %v14562_v61, %v18331_v26  ;;  %v1405_v61 = vadd.f32 %v19577_v60, %v19576_v27 }
 0x9c3   :  { %v18384_v25 = vpop.f32.mrf.mxu0 }
 0x9c4   :  { %v5218_v48 = vadd.f32 %v18372_v29, %v5195_v56 }
 0x9c5   :  { %v14563_v15 = vpop.f32.mrf.mxu0 }
 0x9c6   :  { %v5196_v33 = vadd.f32 %v14563_v15, %v18337_v13  ;;  %v5234_v1 = vmax.f32 %v5218_v48, 0.0  ;;  %v19565_v13 = vld [vmem:[#allocation38_spill] sm:$0xff]  ;;  %v19578_v15 = vld [vmem:[#allocation32_spill] sm:$0xff] }
 0x9c7   :  { %v18391_v62 = vpop.f32.mrf.mxu0  ;;  %v1437_v43 = vadd.f32 %v19566_v51, %v19565_v13 }
 0x9c8   :  { %v5219_v38 = vadd.f32 %v18372_v29, %v5196_v33 }
 0x9c9   :  { %v1980_v10 = vadd.f32 %v19569_v7, %v1437_v43  ;;  %v19583_v7 = vld [vmem:[#allocation23_spill] sm:$0xff] }
 0x9ca   :  { %v5235_v57 = vmax.f32 %v5219_v38, 0.0 }
 0x9cb   :  { %v2519_v37 = vadd.f32 %v19571_v54, %v1980_v10  ;;  %v19584_v10 = vld [vmem:[#allocation31_spill] sm:$0xff] }
 0x9cc   :  { %v18389_v34 = vpack.c.bf16 %v5235_v57, %v5234_v1  ;;  %v19579_v1 = vld [vmem:[#allocation43_spill] sm:$0xff] }
 0x9cd   :  { %v3054_v35 = vadd.f32 %v19573_v5, %v2519_v37  ;;  %v1972_v57 = vadd.f32 %v19579_v1, %v1405_v61 }
 0x9cf   :  { %v3593_v11 = vadd.f32 %v19575_v31, %v3054_v35 }
 0x9d1   :  { %v14566_v24 = vpop.f32.mrf.mxu0  ;;  %v4128_v33 = vadd.f32 %v18265_v52, %v3593_v11 }
 0x9d2   :  { %v5199_v6 = vadd.f32 %v14566_v24, %v18342_v20  ;;  %v19570_v20 = vld [vmem:[#allocation44_spill] sm:$0xff] }
 0x9d3   :  { %v5158_v32 = vpop.f32.mrf.mxu0  ;;  %v1976_v45 = vadd.f32 %v19570_v20, %v1421_v46  ;;  %v19582_v46 = vld [vmem:[#allocation27_spill] sm:$0xff] }
 0x9d4   :  { %v5222_v42 = vadd.f32 %v18372_v29, %v5199_v6 }
 0x9d5   :  { %v14567_v26 = vpop.f32.mrf.mxu0 }
 0x9d6   :  { %v5200_v0 = vadd.f32 %v14567_v26, %v18348_v3  ;;  %v5238_v2 = vmax.f32 %v5222_v42, 0.0  ;;  %v19572_v3 = vld [vmem:[#allocation42_spill] sm:$0xff]  ;;  %v4667_v26 = vadd.f32 %v18361_v14, %v4128_v33 }
 0x9d7   :  { %v5161_v40 = vpop.f32.mrf.mxu0  ;;  %v2515_v21 = vadd.f32 %v19572_v3, %v1976_v45  ;;  %v5197_v45 = vadd.f32 %v5158_v32, %v18345_v55  ;;  %v19585_v3 = vld [vmem:[#allocation41_spill] sm:$0xff]  ;;  %v19586_v55 = vld [vmem:[#allocation39_spill] sm:$0xff] }
 0x9d8   :  { %v5223_v16 = vadd.f32 %v18372_v29, %v5200_v0  ;;  %v19580_v0 = vld [vmem:[#allocation40_spill] sm:$0xff] }
 0x9d9   :  { %v3050_v49 = vadd.f32 %v19574_v18, %v2515_v21  ;;  %v5220_v18 = vadd.f32 %v18372_v29, %v5197_v45 }
 0x9da   :  { %v5239_v50 = vmax.f32 %v5223_v16, 0.0  ;;  %v2511_v16 = vadd.f32 %v19580_v0, %v1972_v57  ;;  %v15513_v57 = vld [vmem:[#allocation7 + $0x18] sm:$0xff]  }
 0x9db   :  { %v3589_v48 = vadd.f32 %v19578_v15, %v3050_v49  ;;  %v5236_v60 = vmax.f32 %v5220_v18, 0.0 }
 0x9dc   :  { %v18402_v63 = vpack.c.bf16 %v5239_v50, %v5238_v2  ;;  %v19581_v2 = vld [vmem:[#allocation46_spill] sm:$0xff] }
 0x9dd   :  { %v4124_v6 = vadd.f32 %v18252_v9, %v3589_v48  ;;  %v3046_v50 = vadd.f32 %v19581_v2, %v2511_v16 }
 0x9df   :  { %v4663_v51 = vadd.f32 %v18350_v58, %v4124_v6  ;;  %v3585_v20 = vadd.f32 %v19584_v10, %v3046_v50  ;;  %v15515_v6 = vld [vmem:[%s19457_s5 + $0x20] sm:$0xff]   ;;  %v15525_v10 = vld [vmem:[%s19457_s5 + $0x30] sm:$0xff]  }
 0x9e1   :  { %v14570_v22 = vpop.f32.mrf.mxu0  ;;  %v5198_v47 = vadd.f32 %v5161_v40, %v4663_v51  ;;  %v4120_v5 = vadd.f32 %v18233_v19, %v3585_v20  ;;  %v19587_v19 = vld [vmem:[#allocation37_spill] sm:$0xff] }
 0x9e2   :  { %v5203_v30 = vadd.f32 %v14570_v22, %v18353_v41 }
 0x9e3   :  { %v5174_v56 = vpop.f32.mrf.mxu0  ;;  %v5221_v40 = vadd.f32 %v18372_v29, %v5198_v47  ;;  %v4659_v22 = vadd.f32 %v18339_v39, %v4120_v5  ;;  %v5193_v39 = vadd.f32 %v18384_v25, %v18334_v12 }
 0x9e4   :  { %v5201_v38 = vadd.f32 %v5174_v56, %v18356_v44  ;;  %v5226_v42 = vadd.f32 %v18372_v29, %v5203_v30  ;;  %v19588_v30 = vld [vmem:[#allocation29_spill] sm:$0xff] }
 0x9e5   :  { %v14571_v24 = vpop.f32.mrf.mxu0  ;;  %v5194_v31 = vadd.f32 %v18391_v62, %v4659_v22  ;;  %v5237_v11 = vmax.f32 %v5221_v40, 0.0  ;;  %v5216_v48 = vadd.f32 %v18372_v29, %v5193_v39  ;;  %v15528_v39 = vld [vmem:[%s19457_s5 + $0x48] sm:$0xff]  }
 0x9e6   :  { %v5204_v41 = vadd.f32 %v14571_v24, %v18359_v59  ;;  %v5224_v52 = vadd.f32 %v18372_v29, %v5201_v38  ;;  %v5242_v9 = vmax.f32 %v5226_v42, 0.0  ;;  %v1389_v59 = vadd.f32 %v19583_v7, %v19582_v46  ;;  %v15517_v24 = vld [vmem:[#allocation7 + $0x8] sm:$0xff]   ;;  %v15524_v7 = vld [vmem:[%s19457_s5 + $0x38] sm:$0xff]  }
 0x9e7   :  { %v5177_v13 = vpop.f32.mrf.mxu0  ;;  %v5217_v56 = vadd.f32 %v18372_v29, %v5194_v31  ;;  %v18458_v62 = vpack.c.bf16 %v5237_v11, %v5236_v60  ;;  %v5232_v33 = vmax.f32 %v5216_v48, 0.0  ;;  %v15519_v42 = vld [vmem:[%s19457_s5 + $0x10] sm:$0xff]   ;;  %v15527_v60 = vld [vmem:[#allocation7 + $0x38] sm:$0xff]  }
 0x9e8   :  { %v5227_v44 = vadd.f32 %v18372_v29, %v5204_v41  ;;  %v5202_v43 = vadd.f32 %v5177_v13, %v4667_v26  ;;  %v5240_v58 = vmax.f32 %v5224_v52, 0.0  ;;  %v1968_v21 = vadd.f32 %v19585_v3, %v1389_v59  ;;  %v15518_v26 = vld [vmem:[%s19457_s5 + $0x18] sm:$0xff]   ;;  %v15520_v41 = vld [vmem:[%s19457_s5 + $0x8] sm:$0xff]  }
 0x9e9   :  { %v5233_v25 = vmax.f32 %v5217_v56, 0.0  ;;  %v15523_v59 = vld [vmem:[#allocation7 + $0x28] sm:$0xff]  }
 0x9ea   :  { %v5243_v36 = vmax.f32 %v5227_v44, 0.0  ;;  %v5225_v14 = vadd.f32 %v18372_v29, %v5202_v43  ;;  %v2507_v32 = vadd.f32 %v19586_v55, %v1968_v21 }
 0x9eb   :  { %v18474_v38 = vpack.c.bf16 %v5233_v25, %v5232_v33 }
 0x9ec   :  { %v18431_v54 = vpack.c.bf16 %v5243_v36, %v5242_v9  ;;  %v5241_v37 = vmax.f32 %v5225_v14, 0.0  ;;  %v3042_v49 = vadd.f32 %v19587_v19, %v2507_v32  ;;  %v15521_v36 = vld [vmem:[%s19457_s5] sm:$0xff]  }
 0x9ed   :  { %v15522_v14 = vld [vmem:[#allocation7 + $0x20] sm:$0xff]  }
 0x9ee   :  { %v18436_v35 = vpack.c.bf16 %v5241_v37, %v5240_v58  ;;  %14572 = vmatprep.subr.bf16.mxu1 %v18431_v54  ;;  %14592 = vmatprep.subr.bf16.mxu0 %v18431_v54  ;;  %v3581_v27 = vadd.f32 %v19588_v30, %v3042_v49  ;;  %v15526_v30 = vld [vmem:[#allocation7 + $0x30] sm:$0xff]  }
 0x9ef   :  { %14573 = vmatpush3.bf16.msra.mxu1 %v18431_v54  ;;  %14593 = vmatpush3.bf16.msra.mxu0 %v18431_v54 }
 0x9f0   :  { %14574 = vmatprep.subr.bf16.mxu1 %v18436_v35  ;;  %14594 = vmatprep.subr.bf16.mxu0 %v18436_v35  ;;  %v4116_v61 = vadd.f32 %v18214_v4, %v3581_v27  ;;  %v5189_v4 = vadd.f32 %v18374_v28, %v18323_v17 }
 0x9f2   :  { %v4655_v15 = vadd.f32 %v18328_v23, %v4116_v61  ;;  %v15529_v61 = vld [vmem:[%s19457_s5 + $0x40] sm:$0xff]  }
 0x9f3   :  { %14575 = vmatpush3.bf16.msra.mxu1 %v18436_v35  ;;  %14595 = vmatpush3.bf16.msra.mxu0 %v18436_v35 }
 0x9f4   :  { %14576 = vmatprep.subr.bf16.mxu1 %v18402_v63  ;;  %14596 = vmatprep.subr.bf16.mxu0 %v18402_v63  ;;  %v5190_v12 = vadd.f32 %v18381_v53, %v4655_v15  ;;  %v5212_v53 = vadd.f32 %v18372_v29, %v5189_v4 }
 0x9f6   :  { %v5213_v23 = vadd.f32 %v18372_v29, %v5190_v12  ;;  %v5228_v28 = vmax.f32 %v5212_v53, 0.0  ;;  %v15514_v29 = vld [vmem:[%s19457_s5 + $0x28] sm:$0xff]  }
 0x9f7   :  { %14577 = vmatpush3.bf16.msra.mxu1 %v18402_v63  ;;  %14597 = vmatpush3.bf16.msra.mxu0 %v18402_v63 }
 0x9f8   :  { %14578 = vmatprep.subr.bf16.mxu1 %v18458_v62  ;;  %14598 = vmatprep.subr.bf16.mxu0 %v18458_v62  ;;  %v5229_v17 = vmax.f32 %v5213_v23, 0.0 }
 0x9fa   :  { %v18485_v1 = vpack.c.bf16 %v5229_v17, %v5228_v28 }
 0x9fb   :  { %14579 = vmatpush3.bf16.msra.mxu1 %v18458_v62  ;;  %14599 = vmatpush3.bf16.msra.mxu0 %v18458_v62 }
 0x9fc   :  { %14580 = vmatprep.subr.bf16.mxu1 %v18389_v34  ;;  %14600 = vmatprep.subr.bf16.mxu0 %v18389_v34 }
 0x9ff   :  { %14581 = vmatpush3.bf16.msra.mxu1 %v18389_v34  ;;  %14601 = vmatpush3.bf16.msra.mxu0 %v18389_v34 }
 0xa00   :  { %14582 = vmatprep.subr.bf16.mxu1 %v18474_v38  ;;  %14602 = vmatprep.subr.bf16.mxu0 %v18474_v38 }
 0xa03   :  { %14583 = vmatpush3.bf16.msra.mxu1 %v18474_v38  ;;  %14603 = vmatpush3.bf16.msra.mxu0 %v18474_v38 }
 0xa04   :  { %14584 = vmatprep.subr.bf16.mxu1 %v18379_v8  ;;  %14604 = vmatprep.subr.bf16.mxu0 %v18379_v8 }
 0xa07   :  { %14585 = vmatpush3.bf16.msra.mxu1 %v18379_v8  ;;  %14605 = vmatpush3.bf16.msra.mxu0 %v18379_v8 }
 0xa08   :  { %14586 = vmatprep.subr.bf16.mxu1 %v18485_v1  ;;  %14606 = vmatprep.subr.bf16.mxu0 %v18485_v1 }
 0xa0b   :  { %14587 = vmatpush3.bf16.msra.mxu1 %v18485_v1  ;;  %14607 = vmatpush3.bf16.msra.mxu0 %v18485_v1 }
 0xa0c   :  { %14648 = vmatprep.subr.bf16.mxu0 %v15514_v29  ;;  %14612 = vmatprep.subr.bf16.mxu1 %v15518_v26 }
 0xa0e   :  { %14609 = vmatmul.mubr.bf16.vlgmr.msra.gmra.mxu0 %v15513_v57  ;;  %14589 = vmatmul.mubr.bf16.vlgmr.msra.gmra.mxu1 %v15517_v24  ;;  %v15530_v57 = vld [vmem:[#allocation7 + $0x40] sm:$0xff]  }
 0xa0f   :  { %14649 = vmatpush3.bf16.msra.mxu0 %v15514_v29  ;;  %14613 = vmatpush3.bf16.msra.mxu1 %v15518_v26  ;;  %v15531_v26 = vld [vmem:[#allocation7 + $0x48] sm:$0xff]  }
 0xa10   :  { %14650 = vmatprep.subr.bf16.mxu0 %v15515_v6  ;;  %14614 = vmatprep.subr.bf16.mxu1 %v15519_v42 }
 0xa13   :  { %14651 = vmatpush3.bf16.msra.mxu0 %v15515_v6  ;;  %14615 = vmatpush3.bf16.msra.mxu1 %v15519_v42  ;;  %v15532_v6 = vld [vmem:[%s19457_s5 + $0x58] sm:$0xff]   ;;  %v15533_v42 = vld [vmem:[%s19457_s5 + $0x50] sm:$0xff]  }
 0xa14   :  { %14656 = vmatprep.subr.bf16.mxu0 %v18431_v54  ;;  %14620 = vmatprep.subr.bf16.mxu1 %v15520_v41 }
 0xace   :  { %v14610_v0 = vpop.f32.mrf.mxu0  ;;  %v14590_v16 = vpop.f32.mrf.mxu1 }
 0xad0   :  { %v5377_v13 = vpop.f32.mrf.mxu0  ;;  %v5306_v51 = vpop.f32.mrf.mxu1 }
 0xad2   :  { %v14611_v52 = vpop.f32.mrf.mxu0  ;;  %v14591_v44 = vpop.f32.mrf.mxu1 }
 0xad3   :  { %v5393_v9 = vpack.c.bf16 %v14611_v52, %v14610_v0  ;;  %v5322_v46 = vpack.c.bf16 %v14591_v44, %v14590_v16 }
 0xad4   :  { %v5380_v43 = vpop.f32.mrf.mxu0  ;;  %v5309_v2 = vpop.f32.mrf.mxu1 }
 0xad5   :  { %v5392_v50 = vpack.c.bf16 %v5380_v43, %v5377_v13  ;;  %v5321_v47 = vpack.c.bf16 %v5309_v2, %v5306_v51 }
 0xad7   :  { %14616 = vmatprep.mubr.msk.bf16.mxu1 %vm5406_vm2, %v5392_v50 }
 0xad8   :  { %14617 = vmatmul.mubr.msk.bf16.vlgmr.msra.gmra.mxu1 %vm5406_vm2, %v5393_v9 }
 0xad9   :  { %14621 = vmatpush3.bf16.msra.mxu1 %v15520_v41  ;;  %14624 = vmatprep.mubr.msk.bf16.mxu1 %vm5406_vm2, %v5321_v47 }
 0xada   :  { %14622 = vmatprep.subr.bf16.mxu1 %v15521_v36 }
 0xadd   :  { %14623 = vmatpush3.bf16.msra.mxu1 %v15521_v36  ;;  %v15534_v36 = vld [vmem:[#allocation7 + $0x50] sm:$0xff]  }
 0xade   :  { %14628 = vmatprep.subr.bf16.mxu1 %v18431_v54 }
 0xae0   :  { %14625 = vmatmul.mubr.msk.bf16.vlgmr.msra.gmra.mxu1 %vm5406_vm2, %v5322_v46  ;;  %v15536_v46 = vld [vmem:[%s19457_s5 + $0x68] sm:$0xff]  }
 0xae1   :  { %14629 = vmatpush3.bf16.msra.mxu1 %v18431_v54  ;;  %14644 = vmatprep.mubr.bf16.mxu1 %v15522_v14 }
 0xae2   :  { %14630 = vmatprep.subr.bf16.mxu1 %v18436_v35 }
 0xae5   :  { %14631 = vmatpush3.bf16.msra.mxu1 %v18436_v35 }
 0xae6   :  { %14632 = vmatprep.subr.bf16.mxu1 %v18402_v63 }
 0xae9   :  { %14633 = vmatpush3.bf16.msra.mxu1 %v18402_v63 }
 0xaea   :  { %14634 = vmatprep.subr.bf16.mxu1 %v18458_v62 }
 0xaed   :  { %14635 = vmatpush3.bf16.msra.mxu1 %v18458_v62 }
 0xaee   :  { %14636 = vmatprep.subr.bf16.mxu1 %v18389_v34 }
 0xaf1   :  { %14637 = vmatpush3.bf16.msra.mxu1 %v18389_v34 }
 0xaf2   :  { %14638 = vmatprep.subr.bf16.mxu1 %v18474_v38 }
 0xaf5   :  { %14639 = vmatpush3.bf16.msra.mxu1 %v18474_v38 }
 0xaf6   :  { %14640 = vmatprep.subr.bf16.mxu1 %v18379_v8 }
 0xaf9   :  { %14641 = vmatpush3.bf16.msra.mxu1 %v18379_v8 }
 0xafa   :  { %14642 = vmatprep.subr.bf16.mxu1 %v18485_v1 }
 0xafd   :  { %14643 = vmatpush3.bf16.msra.mxu1 %v18485_v1 }
 0xafe   :  { %14676 = vmatprep.subr.bf16.mxu1 %v15524_v7 }
 0xb00   :  { %14645 = vmatmul.mubr.bf16.vlgmr.msra.gmra.mxu1 %v15523_v59  ;;  %v15537_v59 = vld [vmem:[%s19457_s5 + $0x60] sm:$0xff]  }
 0xb01   :  { %14677 = vmatpush3.bf16.msra.mxu1 %v15524_v7  ;;  %v15535_v7 = vld [vmem:[#allocation7 + $0x58] sm:$0xff]  }
 0xb02   :  { %14678 = vmatprep.subr.bf16.mxu1 %v15525_v10 }
 0xb05   :  { %14679 = vmatpush3.bf16.msra.mxu1 %v15525_v10 }
 0xb06   :  { %14684 = vmatprep.subr.bf16.mxu1 %v18431_v54 }
 0xb98   :  { %v14618_v20 = vpop.f32.mrf.mxu1 }
 0xb9a   :  { %v5447_v45 = vpop.f32.mrf.mxu1 }
 0xb9c   :  { %v14619_v58 = vpop.f32.mrf.mxu1 }
 0xb9e   :  { %v18539_v37 = vpop.f32.mrf.mxu1 }
 0xba0   :  { %v14626_v3 = vpop.f32.mrf.mxu1 }
 0xba1   :  { %v5523_v21 = vadd.f32 %v14626_v3, %v14618_v20 }
 0xba2   :  { %v5514_v5 = vpop.f32.mrf.mxu1 }
 0xba3   :  { %v5515_v40 = vadd.f32 %v5514_v5, %v5447_v45 }
 0xba4   :  { %v14627_v55 = vpop.f32.mrf.mxu1 }
 0xba5   :  { %v5526_v32 = vadd.f32 %v14627_v55, %v14619_v58 }
 0xba6   :  { %v18541_v22 = vpop.f32.mrf.mxu1 }
 0xbc0   :  { %v14646_v18 = vpop.f32.mrf.mxu1 }
 0xbc2   :  { %v5583_v19 = vpop.f32.mrf.mxu1 }
 0xbc4   :  { %v14647_v49 = vpop.f32.mrf.mxu1 }
 0xbc5   :  { %v5599_v27 = vpack.c.bf16 %v14647_v49, %v14646_v18  ;;  %v15538_v49 = vld [vmem:[#allocation7 + $0x60] sm:$0xff]  }
 0xbc6   :  { %v5586_v31 = vpop.f32.mrf.mxu1 }
 0xbc7   :  { %v5598_v11 = vpack.c.bf16 %v5586_v31, %v5583_v19 }
 0xbc9   :  { %14652 = vmatprep.mubr.msk.bf16.mxu0 %vm5406_vm2, %v5598_v11  ;;  %v15540_v11 = vld [vmem:[%s19457_s5 + $0x78] sm:$0xff]  }
 0xbca   :  { %14653 = vmatmul.mubr.msk.bf16.vlgmr.msra.gmra.mxu0 %vm5406_vm2, %v5599_v27  ;;  %v15541_v27 = vld [vmem:[%s19457_s5 + $0x70] sm:$0xff]  }
 0xbcb   :  { %14657 = vmatpush3.bf16.msra.mxu0 %v18431_v54  ;;  %14672 = vmatprep.mubr.bf16.mxu0 %v15526_v30  ;;  %v15539_v30 = vld [vmem:[#allocation7 + $0x68] sm:$0xff]  }
 0xbcc   :  { %14658 = vmatprep.subr.bf16.mxu0 %v18436_v35 }
 0xbcf   :  { %14659 = vmatpush3.bf16.msra.mxu0 %v18436_v35 }
 0xbd0   :  { %14660 = vmatprep.subr.bf16.mxu0 %v18402_v63 }
 0xbd3   :  { %14661 = vmatpush3.bf16.msra.mxu0 %v18402_v63 }
 0xbd4   :  { %14662 = vmatprep.subr.bf16.mxu0 %v18458_v62 }
 0xbd7   :  { %14663 = vmatpush3.bf16.msra.mxu0 %v18458_v62 }
 0xbd8   :  { %14664 = vmatprep.subr.bf16.mxu0 %v18389_v34 }
 0xbdb   :  { %14665 = vmatpush3.bf16.msra.mxu0 %v18389_v34 }
 0xbdc   :  { %14666 = vmatprep.subr.bf16.mxu0 %v18474_v38 }
 0xbdf   :  { %14667 = vmatpush3.bf16.msra.mxu0 %v18474_v38 }
 0xbe0   :  { %14668 = vmatprep.subr.bf16.mxu0 %v18379_v8 }
 0xbe3   :  { %14669 = vmatpush3.bf16.msra.mxu0 %v18379_v8 }
 0xbe4   :  { %14670 = vmatprep.subr.bf16.mxu0 %v18485_v1 }
 0xbe7   :  { %14671 = vmatpush3.bf16.msra.mxu0 %v18485_v1 }
 0xbe8   :  { %14704 = vmatprep.subr.bf16.mxu0 %v15528_v39 }
 0xbea   :  { %14673 = vmatmul.mubr.bf16.vlgmr.msra.gmra.mxu0 %v15527_v60 }
 0xbeb   :  { %14705 = vmatpush3.bf16.msra.mxu0 %v15528_v39 }
 0xbec   :  { %14706 = vmatprep.subr.bf16.mxu0 %v15529_v61 }
 0xbef   :  { %14707 = vmatpush3.bf16.msra.mxu0 %v15529_v61 }
 0xbf0   :  { %14712 = vmatprep.subr.bf16.mxu0 %v18431_v54 }
 0xc8a   :  { %v14654_v56 = vpop.f32.mrf.mxu0 }
 0xc8b   :  { %v5669_v15 = vadd.f32 %v14654_v56, %v5523_v21 }
 0xc8c   :  { %v5652_v48 = vpop.f32.mrf.mxu0 }
 0xc8d   :  { %v5667_v12 = vadd.f32 %v5652_v48, %v5515_v40 }
 0xc8e   :  { %v14655_v25 = vpop.f32.mrf.mxu0 }
 0xc8f   :  { %v5670_v4 = vadd.f32 %v14655_v25, %v5526_v32 }
 0xc90   :  { %v18567_v33 = vpop.f32.mrf.mxu0 }
 0xcaa   :  { %v14674_v23 = vpop.f32.mrf.mxu0 }
 0xcac   :  { %v5725_v53 = vpop.f32.mrf.mxu0 }
 0xcae   :  { %v14675_v17 = vpop.f32.mrf.mxu0 }
 0xcaf   :  { %v5741_v24 = vpack.c.bf16 %v14675_v17, %v14674_v23 }
 0xcb0   :  { %v5728_v28 = vpop.f32.mrf.mxu0 }
 0xcb1   :  { %v5740_v29 = vpack.c.bf16 %v5728_v28, %v5725_v53  ;;  %v15542_v28 = vld [vmem:[#allocation7 + $0x70] sm:$0xff]  }
 0xcb3   :  { %14680 = vmatprep.mubr.msk.bf16.mxu1 %vm5406_vm2, %v5740_v29 }
 0xcb4   :  { %14681 = vmatmul.mubr.msk.bf16.vlgmr.msra.gmra.mxu1 %vm5406_vm2, %v5741_v24 }
 0xcb5   :  { %14685 = vmatpush3.bf16.msra.mxu1 %v18431_v54  ;;  %14700 = vmatprep.mubr.bf16.mxu1 %v15530_v57  ;;  %v15543_v57 = vld [vmem:[#allocation7 + $0x78] sm:$0xff]  }
 0xcb6   :  { %14686 = vmatprep.subr.bf16.mxu1 %v18436_v35 }
 0xcb9   :  { %14687 = vmatpush3.bf16.msra.mxu1 %v18436_v35 }
 0xcba   :  { %14688 = vmatprep.subr.bf16.mxu1 %v18402_v63 }
 0xcbd   :  { %14689 = vmatpush3.bf16.msra.mxu1 %v18402_v63 }
 0xcbe   :  { %14690 = vmatprep.subr.bf16.mxu1 %v18458_v62 }
 0xcc1   :  { %14691 = vmatpush3.bf16.msra.mxu1 %v18458_v62 }
 0xcc2   :  { %14692 = vmatprep.subr.bf16.mxu1 %v18389_v34 }
 0xcc5   :  { %14693 = vmatpush3.bf16.msra.mxu1 %v18389_v34 }
 0xcc6   :  { %14694 = vmatprep.subr.bf16.mxu1 %v18474_v38 }
 0xcc9   :  { %14695 = vmatpush3.bf16.msra.mxu1 %v18474_v38 }
 0xcca   :  { %14696 = vmatprep.subr.bf16.mxu1 %v18379_v8 }
 0xccd   :  { %14697 = vmatpush3.bf16.msra.mxu1 %v18379_v8 }
 0xcce   :  { %14698 = vmatprep.subr.bf16.mxu1 %v18485_v1 }
 0xcd1   :  { %14699 = vmatpush3.bf16.msra.mxu1 %v18485_v1 }
 0xcd2   :  { %14732 = vmatprep.subr.bf16.mxu1 %v15532_v6 }
 0xcd4   :  { %14701 = vmatmul.mubr.bf16.vlgmr.msra.gmra.mxu1 %v15531_v26 }
 0xcd5   :  { %14733 = vmatpush3.bf16.msra.mxu1 %v15532_v6 }
 0xcd6   :  { %14734 = vmatprep.subr.bf16.mxu1 %v15533_v42 }
 0xcd9   :  { %14735 = vmatpush3.bf16.msra.mxu1 %v15533_v42 }
 0xcda   :  { %14740 = vmatprep.subr.bf16.mxu1 %v18431_v54 }
 0xd74   :  { %v14682_v41 = vpop.f32.mrf.mxu1 }
 0xd75   :  { %v5811_v0 = vadd.f32 %v14682_v41, %v5669_v15 }
 0xd76   :  { %v5794_v16 = vpop.f32.mrf.mxu1 }
 0xd77   :  { %v5809_v13 = vadd.f32 %v5794_v16, %v5667_v12 }
 0xd78   :  { %v14683_v51 = vpop.f32.mrf.mxu1 }
 0xd79   :  { %v5812_v52 = vadd.f32 %v14683_v51, %v5670_v4 }
 0xd7a   :  { %v18593_v44 = vpop.f32.mrf.mxu1 }
 0xd94   :  { %v14702_v43 = vpop.f32.mrf.mxu1 }
 0xd96   :  { %v5867_v2 = vpop.f32.mrf.mxu1 }
 0xd98   :  { %v14703_v50 = vpop.f32.mrf.mxu1 }
 0xd99   :  { %v5883_v14 = vpack.c.bf16 %v14703_v50, %v14702_v43  ;;  %v15544_v50 = vld [vmem:[#allocation7 + $0x80] sm:$0xff]  }
 0xd9a   :  { %v5870_v47 = vpop.f32.mrf.mxu1 }
 0xd9b   :  { %v5882_v9 = vpack.c.bf16 %v5870_v47, %v5867_v2 }
 0xd9d   :  { %14708 = vmatprep.mubr.msk.bf16.mxu0 %vm5406_vm2, %v5882_v9 }
 0xd9e   :  { %14709 = vmatmul.mubr.msk.bf16.vlgmr.msra.gmra.mxu0 %vm5406_vm2, %v5883_v14 }
 0xd9f   :  { %14713 = vmatpush3.bf16.msra.mxu0 %v18431_v54  ;;  %14728 = vmatprep.mubr.bf16.mxu0 %v15534_v36 }
 0xda0   :  { %14714 = vmatprep.subr.bf16.mxu0 %v18436_v35 }
 0xda3   :  { %14715 = vmatpush3.bf16.msra.mxu0 %v18436_v35 }
 0xda4   :  { %14716 = vmatprep.subr.bf16.mxu0 %v18402_v63 }
 0xda7   :  { %14717 = vmatpush3.bf16.msra.mxu0 %v18402_v63 }
 0xda8   :  { %14718 = vmatprep.subr.bf16.mxu0 %v18458_v62 }
 0xdab   :  { %14719 = vmatpush3.bf16.msra.mxu0 %v18458_v62 }
 0xdac   :  { %14720 = vmatprep.subr.bf16.mxu0 %v18389_v34 }
 0xdaf   :  { %14721 = vmatpush3.bf16.msra.mxu0 %v18389_v34 }
 0xdb0   :  { %14722 = vmatprep.subr.bf16.mxu0 %v18474_v38 }
 0xdb3   :  { %14723 = vmatpush3.bf16.msra.mxu0 %v18474_v38 }
 0xdb4   :  { %14724 = vmatprep.subr.bf16.mxu0 %v18379_v8 }
 0xdb7   :  { %14725 = vmatpush3.bf16.msra.mxu0 %v18379_v8 }
 0xdb8   :  { %14726 = vmatprep.subr.bf16.mxu0 %v18485_v1 }
 0xdbb   :  { %14727 = vmatpush3.bf16.msra.mxu0 %v18485_v1 }
 0xdbc   :  { %14760 = vmatprep.subr.bf16.mxu0 %v15536_v46 }
 0xdbe   :  { %14729 = vmatmul.mubr.bf16.vlgmr.msra.gmra.mxu0 %v15535_v7 }
 0xdbf   :  { %14761 = vmatpush3.bf16.msra.mxu0 %v15536_v46 }
 0xdc0   :  { %14762 = vmatprep.subr.bf16.mxu0 %v15537_v59 }
 0xdc3   :  { %14763 = vmatpush3.bf16.msra.mxu0 %v15537_v59 }
 0xdc4   :  { %14768 = vmatprep.subr.bf16.mxu0 %v18431_v54 }
 0xe5e   :  { %v14710_v10 = vpop.f32.mrf.mxu0 }
 0xe5f   :  { %v5953_v20 = vadd.f32 %v14710_v10, %v5811_v0 }
 0xe60   :  { %v5936_v45 = vpop.f32.mrf.mxu0 }
 0xe61   :  { %v5951_v58 = vadd.f32 %v5936_v45, %v5809_v13 }
 0xe62   :  { %v14711_v3 = vpop.f32.mrf.mxu0 }
 0xe63   :  { %v5954_v21 = vadd.f32 %v14711_v3, %v5812_v52  ;;  %v15550_v3 = vld [vmem:[%s19460_s8 + $0x28] sm:$0xff]  }
 0xe64   :  { %v18619_v5 = vpop.f32.mrf.mxu0 }
 0xe7e   :  { %v14730_v40 = vpop.f32.mrf.mxu0 }
 0xe80   :  { %v6009_v55 = vpop.f32.mrf.mxu0 }
 0xe82   :  { %v14731_v32 = vpop.f32.mrf.mxu0 }
 0xe83   :  { %v6025_v31 = vpack.c.bf16 %v14731_v32, %v14730_v40  ;;  %v15552_v40 = vld [vmem:[%s19459_s7] sm:$0xff]  }
 0xe84   :  { %v6012_v18 = vpop.f32.mrf.mxu0 }
 0xe85   :  { %v6024_v19 = vpack.c.bf16 %v6012_v18, %v6009_v55  ;;  %v5518_v55 = vadd.f32 %v18541_v22, %v18539_v37 }
 0xe87   :  { %14736 = vmatprep.mubr.msk.bf16.mxu1 %vm5406_vm2, %v6024_v19  ;;  %v5668_v32 = vadd.f32 %v18567_v33, %v5518_v55 }
 0xe88   :  { %14737 = vmatmul.mubr.msk.bf16.vlgmr.msra.gmra.mxu1 %vm5406_vm2, %v6025_v31 }
 0xe89   :  { %14741 = vmatpush3.bf16.msra.mxu1 %v18431_v54  ;;  %14756 = vmatprep.mubr.bf16.mxu1 %v15538_v49  ;;  %v5810_v18 = vadd.f32 %v18593_v44, %v5668_v32 }
 0xe8a   :  { %14742 = vmatprep.subr.bf16.mxu1 %v18436_v35 }
 0xe8b   :  { %v5952_v19 = vadd.f32 %v18619_v5, %v5810_v18 }
 0xe8d   :  { %14743 = vmatpush3.bf16.msra.mxu1 %v18436_v35 }
 0xe8e   :  { %14744 = vmatprep.subr.bf16.mxu1 %v18402_v63 }
 0xe91   :  { %14745 = vmatpush3.bf16.msra.mxu1 %v18402_v63 }
 0xe92   :  { %14746 = vmatprep.subr.bf16.mxu1 %v18458_v62 }
 0xe95   :  { %14747 = vmatpush3.bf16.msra.mxu1 %v18458_v62 }
 0xe96   :  { %14748 = vmatprep.subr.bf16.mxu1 %v18389_v34 }
 0xe99   :  { %14749 = vmatpush3.bf16.msra.mxu1 %v18389_v34 }
 0xe9a   :  { %14750 = vmatprep.subr.bf16.mxu1 %v18474_v38 }
 0xe9d   :  { %14751 = vmatpush3.bf16.msra.mxu1 %v18474_v38 }
 0xe9e   :  { %14752 = vmatprep.subr.bf16.mxu1 %v18379_v8 }
 0xea1   :  { %14753 = vmatpush3.bf16.msra.mxu1 %v18379_v8 }
 0xea2   :  { %14754 = vmatprep.subr.bf16.mxu1 %v18485_v1 }
 0xea5   :  { %14755 = vmatpush3.bf16.msra.mxu1 %v18485_v1 }
 0xea6   :  { %14788 = vmatprep.subr.bf16.mxu1 %v15540_v11 }
 0xea8   :  { %14757 = vmatmul.mubr.bf16.vlgmr.msra.gmra.mxu1 %v15539_v30  ;;  %v12453_v30 = vld [vmem:[#allocation8] ss:$0 sm:$0xff] }
 0xea9   :  { %14789 = vmatpush3.bf16.msra.mxu1 %v15540_v11 }
 0xeaa   :  { %14790 = vmatprep.subr.bf16.mxu1 %v15541_v27 }
 0xead   :  { %14791 = vmatpush3.bf16.msra.mxu1 %v15541_v27 }
 0xeae   :  { %14796 = vmatprep.subr.bf16.mxu1 %v18431_v54 }
 0xf48   :  { %v14738_v39 = vpop.f32.mrf.mxu1 }
 0xf49   :  { %v6095_v60 = vadd.f32 %v14738_v39, %v5953_v20 }
 0xf4a   :  { %v6078_v61 = vpop.f32.mrf.mxu1 }
 0xf4b   :  { %v6093_v56 = vadd.f32 %v6078_v61, %v5951_v58  ;;  %v15549_v58 = vld [vmem:[%s19460_s8 + $0x30] sm:$0xff]  }
 0xf4c   :  { %v14739_v15 = vpop.f32.mrf.mxu1 }
 0xf4d   :  { %v6096_v48 = vadd.f32 %v14739_v15, %v5954_v21  ;;  %v15551_v21 = vld [vmem:[%s19460_s8 + $0x20] sm:$0xff]  }
 0xf4e   :  { %v18645_v12 = vpop.f32.mrf.mxu1 }
 0xf4f   :  { %v6094_v31 = vadd.f32 %v18645_v12, %v5952_v19 }
 0xf68   :  { %v14758_v25 = vpop.f32.mrf.mxu1 }
 0xf6a   :  { %v6151_v4 = vpop.f32.mrf.mxu1 }
 0xf6c   :  { %v14759_v23 = vpop.f32.mrf.mxu1 }
 0xf6d   :  { %v6167_v29 = vpack.c.bf16 %v14759_v23, %v14758_v25 }
 0xf6e   :  { %v6154_v53 = vpop.f32.mrf.mxu1 }
 0xf6f   :  { %v6166_v17 = vpack.c.bf16 %v6154_v53, %v6151_v4 }
 0xf71   :  { %14764 = vmatprep.mubr.msk.bf16.mxu0 %vm5406_vm2, %v6166_v17 }
 0xf72   :  { %14765 = vmatmul.mubr.msk.bf16.vlgmr.msra.gmra.mxu0 %vm5406_vm2, %v6167_v29  ;;  %v15554_v29 = vld [vmem:[%s19459_s7 + $0x10] sm:$0xff]  }
 0xf73   :  { %14769 = vmatpush3.bf16.msra.mxu0 %v18431_v54  ;;  %14784 = vmatprep.mubr.bf16.mxu0 %v15542_v28  ;;  %v15553_v28 = vld [vmem:[%s19459_s7 + $0x8] sm:$0xff]  }
 0xf74   :  { %14770 = vmatprep.subr.bf16.mxu0 %v18436_v35 }
 0xf77   :  { %14771 = vmatpush3.bf16.msra.mxu0 %v18436_v35 }
 0xf78   :  { %14772 = vmatprep.subr.bf16.mxu0 %v18402_v63 }
 0xf7b   :  { %14773 = vmatpush3.bf16.msra.mxu0 %v18402_v63 }
 0xf7c   :  { %14774 = vmatprep.subr.bf16.mxu0 %v18458_v62 }
 0xf7f   :  { %14775 = vmatpush3.bf16.msra.mxu0 %v18458_v62 }
 0xf80   :  { %14776 = vmatprep.subr.bf16.mxu0 %v18389_v34 }
 0xf83   :  { %14777 = vmatpush3.bf16.msra.mxu0 %v18389_v34 }
 0xf84   :  { %14778 = vmatprep.subr.bf16.mxu0 %v18474_v38 }
 0xf87   :  { %14779 = vmatpush3.bf16.msra.mxu0 %v18474_v38 }
 0xf88   :  { %14780 = vmatprep.subr.bf16.mxu0 %v18379_v8 }
 0xf8b   :  { %14781 = vmatpush3.bf16.msra.mxu0 %v18379_v8 }
 0xf8c   :  { %14782 = vmatprep.subr.bf16.mxu0 %v18485_v1 }
 0xf8f   :  { %14783 = vmatpush3.bf16.msra.mxu0 %v18485_v1 }
 0xf92   :  { %14785 = vmatmul.mubr.bf16.vlgmr.msra.gmra.mxu0 %v15543_v57  ;;  %v15556_v57 = vld [vmem:[%s19460_s8 + $0x18] sm:$0xff]  }
0x1032   :  { %v14766_v24 = vpop.f32.mrf.mxu0 }
0x1033   :  { %v6237_v6 = vadd.f32 %v14766_v24, %v6095_v60  ;;  %v15555_v24 = vld [vmem:[%s19459_s7 + $0x18] sm:$0xff]  }
0x1034   :  { %v6220_v26 = vpop.f32.mrf.mxu0 }
0x1035   :  { %v6235_v42 = vadd.f32 %v6220_v26, %v6093_v56  ;;  %v15558_v26 = vld [vmem:[%s19460_s8 + $0x8] sm:$0xff]  }
0x1036   :  { %v14767_v41 = vpop.f32.mrf.mxu0 }
0x1037   :  { %v6238_v0 = vadd.f32 %v14767_v41, %v6096_v48  ;;  %v15560_v41 = vld [vmem:[%s19460_s8 + $0x58] sm:$0xff]  }
0x1038   :  { %v18664_v16 = vpop.f32.mrf.mxu0 }
0x1039   :  { %v6236_v39 = vadd.f32 %v18664_v16, %v6094_v31 }
0x1052   :  { %v14786_v13 = vpop.f32.mrf.mxu0 }
0x1054   :  { %v6293_v51 = vpop.f32.mrf.mxu0 }
0x1056   :  { %v14787_v52 = vpop.f32.mrf.mxu0 }
0x1057   :  { %v6309_v47 = vpack.c.bf16 %v14787_v52, %v14786_v13 }
0x1058   :  { %v6296_v43 = vpop.f32.mrf.mxu0 }
0x1059   :  { %v6308_v2 = vpack.c.bf16 %v6296_v43, %v6293_v51 }
0x105b   :  { %14792 = vmatprep.mubr.msk.bf16.mxu1 %vm5406_vm2, %v6308_v2 }
0x105c   :  { %14793 = vmatmul.mubr.msk.bf16.vlgmr.msra.gmra.mxu1 %vm5406_vm2, %v6309_v47 }
0x105d   :  { %14797 = vmatpush3.bf16.msra.mxu1 %v18431_v54  ;;  %14812 = vmatprep.mubr.bf16.mxu1 %v15544_v50  ;;  %v15545_v54 = vld [vmem:[#allocation7 + $0x88] sm:$0xff]  }
0x105e   :  { %14798 = vmatprep.subr.bf16.mxu1 %v18436_v35  ;;  %v15561_v50 = vld [vmem:[%s19460_s8 + $0x50] sm:$0xff]  }
0x1061   :  { %14799 = vmatpush3.bf16.msra.mxu1 %v18436_v35 }
0x1062   :  { %14800 = vmatprep.subr.bf16.mxu1 %v18402_v63 }
0x1065   :  { %14801 = vmatpush3.bf16.msra.mxu1 %v18402_v63  ;;  %v15546_v63 = vld [vmem:[%s19457_s5 + $0x88] sm:$0xff]  }
0x1066   :  { %14802 = vmatprep.subr.bf16.mxu1 %v18458_v62  ;;  %14816 = vmatprep.subr.bf16.mxu0 %v15546_v63 }
0x1067   :  { %14817 = vmatpush3.bf16.msra.mxu0 %v15546_v63  ;;  %v15562_v63 = vld [vmem:[%s19460_s8 + $0x48] sm:$0xff]  }
0x1069   :  { %14803 = vmatpush3.bf16.msra.mxu1 %v18458_v62 }
0x106a   :  { %14804 = vmatprep.subr.bf16.mxu1 %v18389_v34 }
0x106d   :  { %14805 = vmatpush3.bf16.msra.mxu1 %v18389_v34  ;;  %v15547_v34 = vld [vmem:[%s19457_s5 + $0x80] sm:$0xff]  }
0x106e   :  { %14806 = vmatprep.subr.bf16.mxu1 %v18474_v38  ;;  %14818 = vmatprep.subr.bf16.mxu0 %v15547_v34 }
0x106f   :  { %14819 = vmatpush3.bf16.msra.mxu0 %v15547_v34 }
0x1071   :  { %14807 = vmatpush3.bf16.msra.mxu1 %v18474_v38 }
0x1072   :  { %14808 = vmatprep.subr.bf16.mxu1 %v18379_v8 }
0x1075   :  { %14809 = vmatpush3.bf16.msra.mxu1 %v18379_v8  ;;  %v15548_v8 = vld [vmem:[%s19460_s8 + $0x38] sm:$0xff]  }
0x1076   :  { %14810 = vmatprep.subr.bf16.mxu1 %v18485_v1 }
0x1079   :  { %14811 = vmatpush3.bf16.msra.mxu1 %v18485_v1 }
0x107a   :  { %14840 = vmatprep.subr.bf16.mxu1 %v15548_v8 }
0x107c   :  { %14813 = vmatmul.mubr.bf16.vlgmr.msra.gmra.mxu1 %v15545_v54 }
0x107d   :  { %14841 = vmatpush3.bf16.msra.mxu1 %v15548_v8 }
0x107e   :  { %14842 = vmatprep.subr.bf16.mxu1 %v15549_v58 }
0x1081   :  { %14843 = vmatpush3.bf16.msra.mxu1 %v15549_v58 }
0x1082   :  { %14844 = vmatprep.subr.bf16.mxu1 %v15550_v3 }
0x1085   :  { %14845 = vmatpush3.bf16.msra.mxu1 %v15550_v3 }
0x1086   :  { %14846 = vmatprep.subr.bf16.mxu1 %v15551_v21 }
0x1089   :  { %14847 = vmatpush3.bf16.msra.mxu1 %v15551_v21 }
0x111c   :  { %v14794_v35 = vpop.f32.mrf.mxu1 }
0x111d   :  { %v6379_v62 = vadd.f32 %v14794_v35, %v6237_v6  ;;  %v15557_v6 = vld [vmem:[%s19460_s8 + $0x10] sm:$0xff]  }
0x111e   :  { %v6362_v38 = vpop.f32.mrf.mxu1 }
0x111f   :  { %v6377_v1 = vadd.f32 %v6362_v38, %v6235_v42  ;;  %v15559_v42 = vld [vmem:[%s19460_s8] sm:$0xff]  }
0x1120   :  { %v14795_v9 = vpop.f32.mrf.mxu1  ;;  %v15564_v38 = vld [vmem:[%s19459_s7 + $0x20] sm:$0xff]  }
0x1121   :  { %v6380_v36 = vadd.f32 %v14795_v9, %v6238_v0  ;;  %v15566_v9 = vld [vmem:[%s19459_s7 + $0x30] sm:$0xff]  }
0x1122   :  { %v6365_v14 = vpop.f32.mrf.mxu1 }
0x1123   :  { %v6378_v56 = vadd.f32 %v6365_v14, %v6236_v39  ;;  %v15568_v14 = vld [vmem:[%s19459_s7 + $0x38] sm:$0xff]  }
0x113c   :  { %v14814_v46 = vpop.f32.mrf.mxu1 }
0x113e   :  { %v6435_v7 = vpop.f32.mrf.mxu1 }
0x1140   :  { %v14815_v59 = vpop.f32.mrf.mxu1 }
0x1141   :  { %v6451_v45 = vpack.c.bf16 %v14815_v59, %v14814_v46  ;;  %v15569_v46 = vld [vmem:[%s19460_s8 + $0x70] sm:$0xff]   ;;  %v15571_v59 = vld [vmem:[%s19460_s8 + $0x60] sm:$0xff]  }
0x1142   :  { %v6438_v10 = vpop.f32.mrf.mxu1 }
0x1143   :  { %v6450_v20 = vpack.c.bf16 %v6438_v10, %v6435_v7  ;;  %v15570_v7 = vld [vmem:[%s19460_s8 + $0x68] sm:$0xff]  }
0x1145   :  { %14820 = vmatprep.mubr.msk.bf16.mxu0 %vm5406_vm2, %v6450_v20 }
0x1146   :  { %14821 = vmatmul.mubr.msk.bf16.vlgmr.msra.gmra.mxu0 %vm5406_vm2, %v6451_v45 }
0x1147   :  { %14828 = vmatprep.mubr.msk.bf16.mxu0 %vm5406_vm2, %v15552_v40 }
0x1206   :  { %v14822_v49 = vpop.f32.mrf.mxu0 }
0x1207   :  { %v6521_v11 = vadd.f32 %v14822_v49, %v6379_v62  ;;  %v15563_v62 = vld [vmem:[%s19460_s8 + $0x40] sm:$0xff]  }
0x1208   :  { %v6504_v27 = vpop.f32.mrf.mxu0 }
0x1209   :  { %v6519_v60 = vadd.f32 %v6504_v27, %v6377_v1  ;;  %v6532_v15 = vadd.f32 %v12453_v30, %v6521_v11  ;;  %v15565_v1 = vld [vmem:[%s19459_s7 + $0x28] sm:$0xff]   ;;  %v15572_v27 = vld [vmem:[%s19459_s7 + $0x40] sm:$0xff]  }
0x120a   :  { %v14823_v61 = vpop.f32.mrf.mxu0 }
0x120b   :  { %v6522_v48 = vadd.f32 %v14823_v61, %v6380_v36  ;;  %v6530_v22 = vadd.f32 %v12453_v30, %v6519_v60  ;;  %v6536_v44 = vmax.f32 %v6532_v15, 0.0  ;;  %v15567_v36 = vld [vmem:[%s19460_s8 + $0x78] sm:$0xff]  }
0x120c   :  { %v6507_v37 = vpop.f32.mrf.mxu0  ;;  %v15573_v15 = vld [vmem:[%s19460_s8 + $0x98] sm:$0xff]  }
0x120d   :  { %v6533_v33 = vadd.f32 %v12453_v30, %v6522_v48  ;;  %v6520_v25 = vadd.f32 %v6507_v37, %v6378_v56  ;;  %v6534_v23 = vmax.f32 %v6530_v22, 0.0  ;;  %v15574_v22 = vld [vmem:[%s19459_s7 + $0x48] sm:$0xff]  }
0x120f   :  { %v6537_v4 = vmax.f32 %v6533_v33, 0.0  ;;  %v6531_v5 = vadd.f32 %v12453_v30, %v6520_v25  ;;  %v15575_v25 = vld [vmem:[%s19460_s8 + $0x90] sm:$0xff]  }
0x1211   :  { %v18714_v53 = vpack.c.bf16 %v6537_v4, %v6536_v44  ;;  %v6535_v12 = vmax.f32 %v6531_v5, 0.0  ;;  %v15577_v44 = vld [vmem:[%s19459_s7 + $0x50] sm:$0xff]   ;;  %v15576_v4 = vld [vmem:[%s19460_s8 + $0x88] sm:$0xff]   ;;  %v15578_v5 = vld [vmem:[%s19460_s8 + $0xb8] sm:$0xff]  }
0x1213   :  { %v18716_v17 = vpack.c.bf16 %v6535_v12, %v6534_v23  ;;  %14824 = vmatprep.subr.bf16.mxu0 %v18714_v53  ;;  %14864 = vmatprep.subr.bf16.mxu1 %v18714_v53  ;;  %v15579_v23 = vld [vmem:[%s19459_s7 + $0x58] sm:$0xff]   ;;  %v15580_v12 = vld [vmem:[%s19460_s8 + $0x80] sm:$0xff]  }
0x1214   :  { %14825 = vmatpush3.bf16.msra.mxu0 %v18714_v53 }
0x1215   :  { %14826 = vmatprep.subr.bf16.mxu0 %v18716_v17 }
0x1218   :  { %14827 = vmatpush3.bf16.msra.mxu0 %v18716_v17 }
0x1219   :  { %14832 = vmatprep.subr.bf16.mxu0 %v18714_v53 }
0x121b   :  { %14829 = vmatmul.mubr.msk.bf16.vlgmr.msra.gmra.mxu0 %vm5406_vm2, %v15553_v28  ;;  %v15581_v28 = vld [vmem:[%s19460_s8 + $0xb0] sm:$0xff]  }
0x121c   :  { %14833 = vmatpush3.bf16.msra.mxu0 %v18714_v53  ;;  %14836 = vmatprep.mubr.msk.bf16.mxu0 %vm5406_vm2, %v15554_v29  ;;  %v15582_v29 = vld [vmem:[%s19460_s8 + $0xa8] sm:$0xff]  }
0x121d   :  { %14834 = vmatprep.subr.bf16.mxu0 %v18716_v17 }
0x1220   :  { %14835 = vmatpush3.bf16.msra.mxu0 %v18716_v17 }
0x1221   :  { %14852 = vmatprep.subr.bf16.mxu0 %v15556_v57 }
0x1223   :  { %14837 = vmatmul.mubr.msk.bf16.vlgmr.msra.gmra.mxu0 %vm5406_vm2, %v15555_v24 }
0x1224   :  { %14853 = vmatpush3.bf16.msra.mxu0 %v15556_v57  ;;  %v15583_v57 = vld [vmem:[%s19460_s8 + $0xa0] sm:$0xff]  }
0x1225   :  { %14854 = vmatprep.subr.bf16.mxu0 %v15557_v6 }
0x1228   :  { %14855 = vmatpush3.bf16.msra.mxu0 %v15557_v6 }
0x1229   :  { %14856 = vmatprep.subr.bf16.mxu0 %v15558_v26 }
0x122c   :  { %14857 = vmatpush3.bf16.msra.mxu0 %v15558_v26 }
0x122d   :  { %14858 = vmatprep.subr.bf16.mxu0 %v15559_v42 }
0x1230   :  { %14859 = vmatpush3.bf16.msra.mxu0 %v15559_v42 }
0x1231   :  { %14872 = vmatprep.subr.bf16.mxu0 %v15560_v41 }
0x12db   :  { %v14830_v0 = vpop.f32.mrf.mxu0 }
0x12dd   :  { %v6602_v16 = vpop.f32.mrf.mxu0 }
0x12df   :  { %v14831_v13 = vpop.f32.mrf.mxu0 }
0x12e0   :  { %v6618_v43 = vpack.c.bf16 %v14831_v13, %v14830_v0 }
0x12e1   :  { %v6605_v51 = vpop.f32.mrf.mxu0 }
0x12e2   :  { %v6617_v52 = vpack.c.bf16 %v6605_v51, %v6602_v16 }
0x12e3   :  { %v14838_v2 = vpop.f32.mrf.mxu0 }
0x12e4   :  { %14860 = vmatprep.mubr.msk.bf16.mxu0 %vm6722_vm3, %v6617_v52 }
0x12e5   :  { %v6681_v47 = vpop.f32.mrf.mxu0  ;;  %14861 = vmatmul.mubr.msk.bf16.vlgmr.msra.gmra.mxu0 %vm6722_vm3, %v6618_v43 }
0x12e6   :  { %14873 = vmatpush3.bf16.msra.mxu0 %v15560_v41 }
0x12e7   :  { %v14839_v54 = vpop.f32.mrf.mxu0  ;;  %14874 = vmatprep.subr.bf16.mxu0 %v15561_v50 }
0x12e8   :  { %v6697_v35 = vpack.c.bf16 %v14839_v54, %v14838_v2 }
0x12e9   :  { %v6684_v34 = vpop.f32.mrf.mxu0 }
0x12ea   :  { %v6696_v8 = vpack.c.bf16 %v6684_v34, %v6681_v47  ;;  %14875 = vmatpush3.bf16.msra.mxu0 %v15561_v50 }
0x12eb   :  { %14876 = vmatprep.subr.bf16.mxu0 %v15562_v63 }
0x12ec   :  { %14848 = vmatprep.mubr.msk.bf16.mxu1 %vm6722_vm3, %v6696_v8 }
0x12ed   :  { %14849 = vmatmul.mubr.msk.bf16.vlgmr.msra.gmra.mxu1 %vm6722_vm3, %v6697_v35 }
0x12ee   :  { %14865 = vmatpush3.bf16.msra.mxu1 %v18714_v53  ;;  %14877 = vmatpush3.bf16.msra.mxu0 %v15562_v63 }
0x12ef   :  { %14866 = vmatprep.subr.bf16.mxu1 %v18716_v17  ;;  %14878 = vmatprep.subr.bf16.mxu0 %v15563_v62 }
0x12f0   :  { %14868 = vmatprep.mubr.msk.bf16.mxu1 %vm5406_vm2, %v15564_v38 }
0x12f2   :  { %14867 = vmatpush3.bf16.msra.mxu1 %v18716_v17  ;;  %14879 = vmatpush3.bf16.msra.mxu0 %v15563_v62 }
0x12f3   :  { %14884 = vmatprep.subr.bf16.mxu1 %v18714_v53  ;;  %14904 = vmatprep.subr.bf16.mxu0 %v18714_v53 }
0x12f5   :  { %14869 = vmatmul.mubr.msk.bf16.vlgmr.msra.gmra.mxu1 %vm5406_vm2, %v15565_v1 }
0x12f6   :  { %14885 = vmatpush3.bf16.msra.mxu1 %v18714_v53  ;;  %14888 = vmatprep.mubr.msk.bf16.mxu1 %vm5406_vm2, %v15566_v9 }
0x12f7   :  { %14886 = vmatprep.subr.bf16.mxu1 %v18716_v17 }
0x12fa   :  { %14887 = vmatpush3.bf16.msra.mxu1 %v18716_v17 }
0x12fb   :  { %14892 = vmatprep.subr.bf16.mxu1 %v15567_v36 }
0x12fd   :  { %14889 = vmatmul.mubr.msk.bf16.vlgmr.msra.gmra.mxu1 %vm5406_vm2, %v15568_v14 }
0x12fe   :  { %14893 = vmatpush3.bf16.msra.mxu1 %v15567_v36  ;;  %v15584_v36 = vld [vmem:[%s19459_s7 + $0x60] sm:$0xff]  }
0x12ff   :  { %14894 = vmatprep.subr.bf16.mxu1 %v15569_v46 }
0x1302   :  { %14895 = vmatpush3.bf16.msra.mxu1 %v15569_v46 }
0x1303   :  { %14896 = vmatprep.subr.bf16.mxu1 %v15570_v7 }
0x1306   :  { %14897 = vmatpush3.bf16.msra.mxu1 %v15570_v7 }
0x1307   :  { %14898 = vmatprep.subr.bf16.mxu1 %v15571_v59 }
0x130a   :  { %14899 = vmatpush3.bf16.msra.mxu1 %v15571_v59 }
0x130b   :  { %14924 = vmatprep.subr.bf16.mxu1 %v18714_v53 }
0x13a5   :  { %v14862_v10 = vpop.f32.mrf.mxu0 }
0x13a7   :  { %v6842_v45 = vpop.f32.mrf.mxu0 }
0x13a9   :  { %v14863_v55 = vpop.f32.mrf.mxu0 }
0x13ab   :  { %v6845_v24 = vpop.f32.mrf.mxu0 }
0x13ad   :  { %v14850_v20 = vpop.f32.mrf.mxu1 }
0x13ae   :  { %v18804_v58 = vadd.f32 %v14862_v10, %v14850_v20  ;;  %v15585_v10 = vld [vmem:[%s19460_s8 + $0xd8] sm:$0xff]  }
0x13af   :  { %v6763_v3 = vpop.f32.mrf.mxu1 }
0x13b0   :  { %v18806_v21 = vadd.f32 %v6842_v45, %v6763_v3 }
0x13b1   :  { %v14851_v40 = vpop.f32.mrf.mxu1 }
0x13b2   :  { %v18808_v32 = vadd.f32 %v14863_v55, %v14851_v40  ;;  %v15589_v40 = vld [vmem:[%s19459_s7 + $0x70] sm:$0xff]   ;;  %v15588_v55 = vld [vmem:[%s19460_s8 + $0xc8] sm:$0xff]  }
0x13b3   :  { %v18810_v18 = vpop.f32.mrf.mxu1 }
0x13b4   :  { %v6846_v16 = vadd.f32 %v6845_v24, %v18810_v18  ;;  %v15591_v18 = vld [vmem:[%s19460_s8 + $0xc0] sm:$0xff]  }
0x13b5   :  { %v14870_v19 = vpop.f32.mrf.mxu1 }
0x13b7   :  { %v6919_v49 = vpop.f32.mrf.mxu1 }
0x13b9   :  { %v14871_v31 = vpop.f32.mrf.mxu1 }
0x13ba   :  { %v6935_v39 = vpack.c.bf16 %v14871_v31, %v14870_v19  ;;  %v15592_v19 = vld [vmem:[%s19460_s8 + $0xf8] sm:$0xff]   ;;  %v15594_v31 = vld [vmem:[%s19460_s8 + $0xe8] sm:$0xff]  }
0x13bb   :  { %v6922_v11 = vpop.f32.mrf.mxu1 }
0x13bc   :  { %v6934_v30 = vpack.c.bf16 %v6922_v11, %v6919_v49  ;;  %v15593_v49 = vld [vmem:[%s19460_s8 + $0xf0] sm:$0xff]   ;;  %v15595_v11 = vld [vmem:[%s19460_s8 + $0xe0] sm:$0xff]  }
0x13bd   :  { %v14890_v60 = vpop.f32.mrf.mxu1 }
0x13be   :  { %14880 = vmatprep.mubr.msk.bf16.mxu0 %vm6722_vm3, %v6934_v30 }
0x13bf   :  { %14881 = vmatmul.mubr.msk.bf16.vlgmr.msra.gmra.mxu0 %vm6722_vm3, %v6935_v39  ;;  %v7081_v61 = vpop.f32.mrf.mxu1 }
0x13c0   :  { %14905 = vmatpush3.bf16.msra.mxu0 %v18714_v53  ;;  %14908 = vmatprep.mubr.msk.bf16.mxu0 %vm5406_vm2, %v15572_v27 }
0x13c1   :  { %14906 = vmatprep.subr.bf16.mxu0 %v18716_v17  ;;  %v14891_v56 = vpop.f32.mrf.mxu1 }
0x13c2   :  { %v7097_v48 = vpack.c.bf16 %v14891_v56, %v14890_v60 }
0x13c3   :  { %v7084_v37 = vpop.f32.mrf.mxu1 }
0x13c4   :  { %v7096_v33 = vpack.c.bf16 %v7084_v37, %v7081_v61  ;;  %14907 = vmatpush3.bf16.msra.mxu0 %v18716_v17 }
0x13c5   :  { %14912 = vmatprep.subr.bf16.mxu0 %v15573_v15 }
0x13c6   :  { %14900 = vmatprep.mubr.msk.bf16.mxu1 %vm6722_vm3, %v7096_v33 }
0x13c7   :  { %14901 = vmatmul.mubr.msk.bf16.vlgmr.msra.gmra.mxu1 %vm6722_vm3, %v7097_v48  ;;  %14909 = vmatmul.mubr.msk.bf16.vlgmr.msra.gmra.mxu0 %vm5406_vm2, %v15574_v22 }
0x13c8   :  { %14913 = vmatpush3.bf16.msra.mxu0 %v15573_v15  ;;  %14925 = vmatpush3.bf16.msra.mxu1 %v18714_v53 }
0x13c9   :  { %14926 = vmatprep.subr.bf16.mxu1 %v18716_v17  ;;  %14914 = vmatprep.subr.bf16.mxu0 %v15575_v25 }
0x13ca   :  { %14928 = vmatprep.mubr.msk.bf16.mxu1 %vm5406_vm2, %v15577_v44 }
0x13cc   :  { %14915 = vmatpush3.bf16.msra.mxu0 %v15575_v25  ;;  %14927 = vmatpush3.bf16.msra.mxu1 %v18716_v17 }
0x13cd   :  { %14916 = vmatprep.subr.bf16.mxu0 %v15576_v4  ;;  %14932 = vmatprep.subr.bf16.mxu1 %v15578_v5 }
0x13cf   :  { %14929 = vmatmul.mubr.msk.bf16.vlgmr.msra.gmra.mxu1 %vm5406_vm2, %v15579_v23 }
0x13d0   :  { %14917 = vmatpush3.bf16.msra.mxu0 %v15576_v4  ;;  %14933 = vmatpush3.bf16.msra.mxu1 %v15578_v5 }
0x13d1   :  { %14918 = vmatprep.subr.bf16.mxu0 %v15580_v12  ;;  %14934 = vmatprep.subr.bf16.mxu1 %v15581_v28 }
0x13d4   :  { %14919 = vmatpush3.bf16.msra.mxu0 %v15580_v12  ;;  %14935 = vmatpush3.bf16.msra.mxu1 %v15581_v28 }
0x13d5   :  { %14944 = vmatprep.subr.bf16.mxu0 %v18714_v53  ;;  %14936 = vmatprep.subr.bf16.mxu1 %v15582_v29 }
0x13d8   :  { %14937 = vmatpush3.bf16.msra.mxu1 %v15582_v29 }
0x13d9   :  { %14938 = vmatprep.subr.bf16.mxu1 %v15583_v57 }
0x13dc   :  { %14939 = vmatpush3.bf16.msra.mxu1 %v15583_v57 }
0x13dd   :  { %14964 = vmatprep.subr.bf16.mxu1 %v18714_v53 }
0x147f   :  { %v14882_v6 = vpop.f32.mrf.mxu0 }
0x1480   :  { %v7017_v26 = vadd.f32 %v14882_v6, %v18804_v58  ;;  %v15586_v58 = vld [vmem:[%s19459_s7 + $0x68] sm:$0xff]   ;;  %v15596_v6 = vld [vmem:[%s19459_s7 + $0x80] sm:$0xff]  }
0x1481   :  { %v7000_v42 = vpop.f32.mrf.mxu0 }
0x1482   :  { %v7015_v41 = vadd.f32 %v7000_v42, %v18806_v21  ;;  %v15587_v21 = vld [vmem:[%s19460_s8 + $0xd0] sm:$0xff]  }
0x1483   :  { %v14883_v0 = vpop.f32.mrf.mxu0 }
0x1484   :  { %v7018_v13 = vadd.f32 %v14883_v0, %v18808_v32  ;;  %v15590_v32 = vld [vmem:[%s19459_s7 + $0x78] sm:$0xff]  }
0x1485   :  { %v7003_v51 = vpop.f32.mrf.mxu0 }
0x1486   :  { %v7016_v52 = vadd.f32 %v7003_v51, %v6846_v16  ;;  %v15597_v51 = vld [vmem:[%s19459_s7 + $0x88] sm:$0xff]  }
0x1487   :  { %v14902_v43 = vpop.f32.mrf.mxu1  ;;  %v14910_v2 = vpop.f32.mrf.mxu0 }
0x1488   :  { %v7179_v50 = vadd.f32 %v14902_v43, %v7017_v26  ;;  %v15599_v43 = vld [vmem:[%s19460_s8 + $0x110] sm:$0xff]  }
0x1489   :  { %v7162_v47 = vpop.f32.mrf.mxu1  ;;  %v7243_v54 = vpop.f32.mrf.mxu0 }
0x148a   :  { %v7177_v63 = vadd.f32 %v7162_v47, %v7015_v41 }
0x148b   :  { %v14903_v34 = vpop.f32.mrf.mxu1  ;;  %v14911_v8 = vpop.f32.mrf.mxu0 }
0x148c   :  { %v7180_v35 = vadd.f32 %v14903_v34, %v7018_v13  ;;  %v7259_v14 = vpack.c.bf16 %v14911_v8, %v14910_v2  ;;  %v15601_v2 = vld [vmem:[%s19460_s8 + $0x100] sm:$0xff]  }
0x148d   :  { %v7165_v62 = vpop.f32.mrf.mxu1  ;;  %v7246_v38 = vpop.f32.mrf.mxu0 }
0x148e   :  { %v7178_v1 = vadd.f32 %v7165_v62, %v7016_v52  ;;  %v7258_v9 = vpack.c.bf16 %v7246_v38, %v7243_v54 }
0x148f   :  { %v14930_v46 = vpop.f32.mrf.mxu1 }
0x1490   :  { %14920 = vmatprep.mubr.msk.bf16.mxu0 %vm6722_vm3, %v7258_v9 }
0x1491   :  { %14921 = vmatmul.mubr.msk.bf16.vlgmr.msra.gmra.mxu0 %vm6722_vm3, %v7259_v14  ;;  %v7405_v7 = vpop.f32.mrf.mxu1 }
0x1492   :  { %14945 = vmatpush3.bf16.msra.mxu0 %v18714_v53  ;;  %14948 = vmatprep.mubr.msk.bf16.mxu0 %vm5406_vm2, %v15584_v36 }
0x1493   :  { %14946 = vmatprep.subr.bf16.mxu0 %v18716_v17  ;;  %v14931_v59 = vpop.f32.mrf.mxu1 }
0x1494   :  { %v7421_v20 = vpack.c.bf16 %v14931_v59, %v14930_v46 }
0x1495   :  { %v7408_v45 = vpop.f32.mrf.mxu1 }
0x1496   :  { %v7420_v3 = vpack.c.bf16 %v7408_v45, %v7405_v7  ;;  %14947 = vmatpush3.bf16.msra.mxu0 %v18716_v17 }
0x1497   :  { %14952 = vmatprep.subr.bf16.mxu0 %v15585_v10 }
0x1498   :  { %14940 = vmatprep.mubr.msk.bf16.mxu1 %vm6722_vm3, %v7420_v3  ;;  %v15607_v3 = vld [vmem:[#allocation11 + $0xec] ss:$16 sps:$4 sm:$0xff]  }
0x1499   :  { %14941 = vmatmul.mubr.msk.bf16.vlgmr.msra.gmra.mxu1 %vm6722_vm3, %v7421_v20  ;;  %14949 = vmatmul.mubr.msk.bf16.vlgmr.msra.gmra.mxu0 %vm5406_vm2, %v15586_v58  ;;  %v15604_v58 = vld [vmem:[#allocation11 + $0xe4] ss:$16 sps:$4 sm:$0xff]  }
0x149a   :  { %14953 = vmatpush3.bf16.msra.mxu0 %v15585_v10  ;;  %14965 = vmatpush3.bf16.msra.mxu1 %v18714_v53 }
0x149b   :  { %14966 = vmatprep.subr.bf16.mxu1 %v18716_v17  ;;  %14954 = vmatprep.subr.bf16.mxu0 %v15587_v21 }
0x149c   :  { %14968 = vmatprep.mubr.msk.bf16.mxu1 %vm5406_vm2, %v15589_v40  ;;  %v15605_v40 = vld [vmem:[#allocation11 + $0xe8] ss:$16 sps:$4 sm:$0xff]  }
0x149e   :  { %14955 = vmatpush3.bf16.msra.mxu0 %v15587_v21  ;;  %14967 = vmatpush3.bf16.msra.mxu1 %v18716_v17  ;;  %v15602_v21 = vld [vmem:[#allocation11 + $0xe0] ss:$16 sps:$4 sm:$0xff]  }
0x149f   :  { %14956 = vmatprep.subr.bf16.mxu0 %v15588_v55  ;;  %14972 = vmatprep.subr.bf16.mxu1 %v15592_v19 }
0x14a1   :  { %14969 = vmatmul.mubr.msk.bf16.vlgmr.msra.gmra.mxu1 %vm5406_vm2, %v15590_v32  ;;  %v15613_v32 = vld [vmem:[#allocation11 + $0xcc] ss:$16 sps:$4 sm:$0xff]  }
0x14a2   :  { %14957 = vmatpush3.bf16.msra.mxu0 %v15588_v55  ;;  %14973 = vmatpush3.bf16.msra.mxu1 %v15592_v19  ;;  %v15610_v55 = vld [vmem:[#allocation11 + $0xc4] ss:$16 sps:$4 sm:$0xff]   ;;  %v15611_v19 = vld [vmem:[#allocation11 + $0xc8] ss:$16 sps:$4 sm:$0xff]  }
0x14a3   :  { %14958 = vmatprep.subr.bf16.mxu0 %v15591_v18  ;;  %14974 = vmatprep.subr.bf16.mxu1 %v15593_v49 }
0x14a6   :  { %14959 = vmatpush3.bf16.msra.mxu0 %v15591_v18  ;;  %14975 = vmatpush3.bf16.msra.mxu1 %v15593_v49  ;;  %v15608_v18 = vld [vmem:[#allocation11 + $0xc0] ss:$16 sps:$4 sm:$0xff]   ;;  %v15616_v49 = vld [vmem:[#allocation11 + $0xa4] ss:$16 sps:$4 sm:$0xff]  }
0x14a7   :  { %14984 = vmatprep.subr.bf16.mxu0 %v18714_v53  ;;  %14976 = vmatprep.subr.bf16.mxu1 %v15594_v31 }
0x14aa   :  { %14977 = vmatpush3.bf16.msra.mxu1 %v15594_v31  ;;  %v15619_v31 = vld [vmem:[#allocation11 + $0xac] ss:$16 sps:$4 sm:$0xff]  }
0x14ab   :  { %14978 = vmatprep.subr.bf16.mxu1 %v15595_v11 }
0x14ae   :  { %14979 = vmatpush3.bf16.msra.mxu1 %v15595_v11  ;;  %v15614_v11 = vld [vmem:[#allocation11 + $0xa0] ss:$16 sps:$4 sm:$0xff]  }
0x14af   :  { %8133 = vmatprep.subr.bf16.mxu1 %v15604_v58  ;;  %v15664_v58 = vld [vmem:[#allocation11 + $0x124] ss:$16 sps:$4 sm:$0xff]  }
0x1551   :  { %v14922_v30 = vpop.f32.mrf.mxu0 }
0x1552   :  { %v7341_v27 = vadd.f32 %v14922_v30, %v7179_v50  ;;  %v15617_v30 = vld [vmem:[#allocation11 + $0xa8] ss:$16 sps:$4 sm:$0xff]  }
0x1553   :  { %v7324_v39 = vpop.f32.mrf.mxu0 }
0x1554   :  { %v7339_v60 = vadd.f32 %v7324_v39, %v7177_v63  ;;  %v15625_v39 = vld [vmem:[#allocation11 + $0x8c] ss:$16 sps:$4 sm:$0xff]  }
0x1555   :  { %v14923_v61 = vpop.f32.mrf.mxu0 }
0x1556   :  { %v7342_v56 = vadd.f32 %v14923_v61, %v7180_v35  ;;  %v15623_v61 = vld [vmem:[#allocation11 + $0x88] ss:$16 sps:$4 sm:$0xff]  }
0x1557   :  { %v7327_v15 = vpop.f32.mrf.mxu0 }
0x1558   :  { %v7340_v48 = vadd.f32 %v7327_v15, %v7178_v1  ;;  %v15631_v15 = vld [vmem:[#allocation11 + $0x6c] ss:$16 sps:$4 sm:$0xff]  }
0x1559   :  { %v14942_v37 = vpop.f32.mrf.mxu1  ;;  %v14950_v22 = vpop.f32.mrf.mxu0 }
0x155a   :  { %v7503_v33 = vadd.f32 %v14942_v37, %v7341_v27  ;;  %v15622_v27 = vld [vmem:[#allocation11 + $0x84] ss:$16 sps:$4 sm:$0xff]  }
0x155b   :  { %v7486_v25 = vpop.f32.mrf.mxu1  ;;  %v7567_v44 = vpop.f32.mrf.mxu0 }
0x155c   :  { %v7501_v4 = vadd.f32 %v7486_v25, %v7339_v60  ;;  %v15620_v60 = vld [vmem:[#allocation11 + $0x80] ss:$16 sps:$4 sm:$0xff]  }
0x155d   :  { %v14943_v5 = vpop.f32.mrf.mxu1  ;;  %v14951_v23 = vpop.f32.mrf.mxu0 }
0x155e   :  { %v7504_v12 = vadd.f32 %v14943_v5, %v7342_v56  ;;  %v7583_v26 = vpack.c.bf16 %v14951_v23, %v14950_v22  ;;  %v15628_v56 = vld [vmem:[#allocation11 + $0x64] ss:$16 sps:$4 sm:$0xff]   ;;  %v12544_v22 = vld [vmem:[#allocation10] ss:$0 sm:$0xff] }
0x155f   :  { %v7489_v28 = vpop.f32.mrf.mxu1  ;;  %v7570_v29 = vpop.f32.mrf.mxu0 }
0x1560   :  { %v7502_v57 = vadd.f32 %v7489_v28, %v7340_v48  ;;  %v7582_v24 = vpack.c.bf16 %v7570_v29, %v7567_v44  ;;  %v16493_v48 = vmov 0  }
0x1561   :  { %v14970_v42 = vpop.f32.mrf.mxu1 }
0x1562   :  { %14960 = vmatprep.mubr.msk.bf16.mxu0 %vm6722_vm3, %v7582_v24 }
0x1563   :  { %14961 = vmatmul.mubr.msk.bf16.vlgmr.msra.gmra.mxu0 %vm6722_vm3, %v7583_v26  ;;  %v7729_v41 = vpop.f32.mrf.mxu1 }
0x1564   :  { %14985 = vmatpush3.bf16.msra.mxu0 %v18714_v53  ;;  %14988 = vmatprep.mubr.msk.bf16.mxu0 %vm5406_vm2, %v15596_v6  ;;  %v15598_v53 = vld [vmem:[%s19460_s8 + $0x118] sm:$0xff]  }
0x1565   :  { %14986 = vmatprep.subr.bf16.mxu0 %v18716_v17  ;;  %v14971_v0 = vpop.f32.mrf.mxu1 }
0x1566   :  { %v7745_v16 = vpack.c.bf16 %v14971_v0, %v14970_v42 }
0x1567   :  { %v7732_v13 = vpop.f32.mrf.mxu1 }
0x1568   :  { %v7744_v52 = vpack.c.bf16 %v7732_v13, %v7729_v41  ;;  %14987 = vmatpush3.bf16.msra.mxu0 %v18716_v17  ;;  %v15600_v17 = vld [vmem:[%s19460_s8 + $0x108] sm:$0xff]  }
0x1569   :  { %14992 = vmatprep.subr.bf16.mxu0 %v15598_v53 }
0x156a   :  { %14980 = vmatprep.mubr.msk.bf16.mxu1 %vm6722_vm3, %v7744_v52 }
0x156b   :  { %14981 = vmatmul.mubr.msk.bf16.vlgmr.msra.gmra.mxu1 %vm6722_vm3, %v7745_v16  ;;  %14989 = vmatmul.mubr.msk.bf16.vlgmr.msra.gmra.mxu0 %vm5406_vm2, %v15597_v51 }
0x156c   :  { %14993 = vmatpush3.bf16.msra.mxu0 %v15598_v53  ;;  %8134 = vmatpush1.bf16.msra.mxu1 %v15602_v21  ;;  %v15626_v53 = vld [vmem:[#allocation11 + $0x60] ss:$16 sps:$4 sm:$0xff]  }
0x156d   :  { %14994 = vmatprep.subr.bf16.mxu0 %v15599_v43  ;;  %8135 = vmatprep.subr.bf16.mxu1 %v15610_v55  ;;  %v15662_v21 = vld [vmem:[#allocation11 + $0x120] ss:$16 sps:$4 sm:$0xff]   ;;  %v15670_v55 = vld [vmem:[#allocation11 + $0x104] ss:$16 sps:$4 sm:$0xff]  }
0x156e   :  { %8157 = vmatprep.mubr.bf16.mxu1 %v16493_v48 }
0x1570   :  { %14995 = vmatpush3.bf16.msra.mxu0 %v15599_v43  ;;  %8136 = vmatpush1.bf16.msra.mxu1 %v15608_v18  ;;  %v15629_v43 = vld [vmem:[#allocation11 + $0x68] ss:$16 sps:$4 sm:$0xff]   ;;  %v15668_v18 = vld [vmem:[#allocation11 + $0x100] ss:$16 sps:$4 sm:$0xff]  }
0x1571   :  { %14996 = vmatprep.subr.bf16.mxu0 %v15600_v17  ;;  %8137 = vmatprep.subr.bf16.mxu1 %v15616_v49  ;;  %v15676_v49 = vld [vmem:[#allocation11 + $0x1e4] ss:$16 sps:$4 sm:$0xff]  }
0x1574   :  { %14997 = vmatpush3.bf16.msra.mxu0 %v15600_v17  ;;  %8138 = vmatpush1.bf16.msra.mxu1 %v15614_v11  ;;  %v15674_v11 = vld [vmem:[#allocation11 + $0x1e0] ss:$16 sps:$4 sm:$0xff]  }
0x1575   :  { %14998 = vmatprep.subr.bf16.mxu0 %v15601_v2  ;;  %8139 = vmatprep.subr.bf16.mxu1 %v15622_v27 }
0x1578   :  { %14999 = vmatpush3.bf16.msra.mxu0 %v15601_v2  ;;  %8140 = vmatpush1.bf16.msra.mxu1 %v15620_v60  ;;  %v15634_v2 = vld [vmem:[#allocation11 + $0x44] ss:$16 sps:$4 sm:$0xff]   ;;  %v15685_v60 = vld [vmem:[#allocation11 + $0x1cc] ss:$16 sps:$4 sm:$0xff]  }
0x1579   :  { %8174 = vmatprep.subr.bf16.mxu0 %v15607_v3  ;;  %8298 = vmatprep.subr.bf16.mxu1 %v15628_v56  ;;  %v15667_v3 = vld [vmem:[#allocation11 + $0x12c] ss:$16 sps:$4 sm:$0xff]   ;;  %v15683_v56 = vld [vmem:[#allocation11 + $0x1c8] ss:$16 sps:$4 sm:$0xff]  }
0x1623   :  { %v14962_v50 = vpop.f32.mrf.mxu0 }
0x1624   :  { %v7665_v47 = vadd.f32 %v14962_v50, %v7503_v33  ;;  %v15637_v50 = vld [vmem:[#allocation11 + $0x4c] ss:$16 sps:$4 sm:$0xff]  }
0x1625   :  { %v7648_v54 = vpop.f32.mrf.mxu0 }
0x1626   :  { %v7663_v63 = vadd.f32 %v7648_v54, %v7501_v4  ;;  %v15635_v54 = vld [vmem:[#allocation11 + $0x48] ss:$16 sps:$4 sm:$0xff]  }
0x1627   :  { %v14963_v34 = vpop.f32.mrf.mxu0 }
0x1628   :  { %v7666_v8 = vadd.f32 %v14963_v34, %v7504_v12  ;;  %v15643_v34 = vld [vmem:[#allocation11 + $0x2c] ss:$16 sps:$4 sm:$0xff]  }
0x1629   :  { %v7651_v35 = vpop.f32.mrf.mxu0 }
0x162a   :  { %v7664_v62 = vadd.f32 %v7651_v35, %v7502_v57  ;;  %v15641_v35 = vld [vmem:[#allocation11 + $0x28] ss:$16 sps:$4 sm:$0xff]  }
0x162b   :  { %v14982_v38 = vpop.f32.mrf.mxu1  ;;  %v14990_v1 = vpop.f32.mrf.mxu0 }
0x162c   :  { %v7827_v9 = vadd.f32 %v14982_v38, %v7665_v47  ;;  %v15632_v47 = vld [vmem:[#allocation11 + $0x40] ss:$16 sps:$4 sm:$0xff]   ;;  %v15649_v38 = vld [vmem:[#allocation11 + $0xc] ss:$16 sps:$4 sm:$0xff]  }
0x162d   :  { %v7810_v36 = vpop.f32.mrf.mxu1  ;;  %v7891_v14 = vpop.f32.mrf.mxu0 }
0x162e   :  { %v7825_v33 = vadd.f32 %v7810_v36, %v7663_v63  ;;  %v15640_v63 = vld [vmem:[#allocation11 + $0x24] ss:$16 sps:$4 sm:$0xff]  }
0x162f   :  { %v14983_v46 = vpop.f32.mrf.mxu1  ;;  %v14991_v7 = vpop.f32.mrf.mxu0  ;;  %v15652_v36 = vld [vmem:[#allocation11 + $0x164] ss:$16 sps:$4 sm:$0xff]  }
0x1630   :  { %v7828_v59 = vadd.f32 %v14983_v46, %v7666_v8  ;;  %v7907_v45 = vpack.c.bf16 %v14991_v7, %v14990_v1  ;;  %v15638_v8 = vld [vmem:[#allocation11 + $0x20] ss:$16 sps:$4 sm:$0xff]   ;;  %v15653_v7 = vld [vmem:[#allocation11 + $0x168] ss:$16 sps:$4 sm:$0xff]  }
0x1631   :  { %v7894_v10 = vpop.f32.mrf.mxu0  ;;  %v7813_v44 = vpop.f32.mrf.mxu1  ;;  %v15644_v1 = vld [vmem:[#allocation11] ss:$16 sps:$4 sm:$0xff]  }
0x1632   :  { %v7906_v20 = vpack.c.bf16 %v7894_v10, %v7891_v14  ;;  %v7826_v28 = vadd.f32 %v7813_v44, %v7664_v62  ;;  %v15646_v62 = vld [vmem:[#allocation11 + $0x4] ss:$16 sps:$4 sm:$0xff]   ;;  %v15655_v14 = vld [vmem:[#allocation11 + $0x16c] ss:$16 sps:$4 sm:$0xff]   ;;  %v15650_v46 = vld [vmem:[#allocation11 + $0x160] ss:$16 sps:$4 sm:$0xff]  }
0x1633   :  { %v15661_v10 = vld [vmem:[#allocation11 + $0x14c] ss:$16 sps:$4 sm:$0xff]  }
0x1634   :  { %15000 = vmatprep.mubr.msk.bf16.mxu0 %vm6722_vm3, %v7906_v20  ;;  %v15656_v20 = vld [vmem:[#allocation11 + $0x140] ss:$16 sps:$4 sm:$0xff]   ;;  %v15697_v44 = vld [vmem:[#allocation11 + $0x18c] ss:$16 sps:$4 sm:$0xff]  }
0x1635   :  { %15001 = vmatmul.mubr.msk.bf16.vlgmr.msra.gmra.mxu0 %vm6722_vm3, %v7907_v45  ;;  %v15659_v45 = vld [vmem:[#allocation11 + $0x148] ss:$16 sps:$4 sm:$0xff]  }
0x1636   :  { %8175 = vmatpush1.bf16.msra.mxu0 %v15605_v40  ;;  %8198 = vmatprep.mubr.bf16.mxu0 %v16493_v48  ;;  %v15665_v40 = vld [vmem:[#allocation11 + $0x128] ss:$16 sps:$4 sm:$0xff]  }
0x1637   :  { %8176 = vmatprep.subr.bf16.mxu0 %v15613_v32  ;;  %v15673_v32 = vld [vmem:[#allocation11 + $0x10c] ss:$16 sps:$4 sm:$0xff]  }
0x163a   :  { %8177 = vmatpush1.bf16.msra.mxu0 %v15611_v19  ;;  %v15671_v19 = vld [vmem:[#allocation11 + $0x108] ss:$16 sps:$4 sm:$0xff]  }
0x163b   :  { %8178 = vmatprep.subr.bf16.mxu0 %v15619_v31  ;;  %v15679_v31 = vld [vmem:[#allocation11 + $0x1ec] ss:$16 sps:$4 sm:$0xff]  }
0x163e   :  { %8179 = vmatpush1.bf16.msra.mxu0 %v15617_v30  ;;  %v15677_v30 = vld [vmem:[#allocation11 + $0x1e8] ss:$16 sps:$4 sm:$0xff]  }
0x163f   :  { %8180 = vmatprep.subr.bf16.mxu0 %v15625_v39  ;;  %v15682_v39 = vld [vmem:[#allocation11 + $0x1c4] ss:$16 sps:$4 sm:$0xff]  }
0x1642   :  { %8181 = vmatpush1.bf16.msra.mxu0 %v15623_v61  ;;  %v15680_v61 = vld [vmem:[#allocation11 + $0x1c0] ss:$16 sps:$4 sm:$0xff]  }
0x1643   :  { %8339 = vmatprep.subr.bf16.mxu0 %v15631_v15  ;;  %v15688_v15 = vld [vmem:[#allocation11 + $0x1a4] ss:$16 sps:$4 sm:$0xff]  }
0x16f5   :  { %v15002_v37 = vpop.f32.mrf.mxu0 }
0x16f6   :  { %v7989_v25 = vadd.f32 %v15002_v37, %v7827_v9  ;;  %v15647_v9 = vld [vmem:[#allocation11 + $0x8] ss:$16 sps:$4 sm:$0xff]   ;;  %v15691_v37 = vld [vmem:[#allocation11 + $0x1ac] ss:$16 sps:$4 sm:$0xff]  }
0x16f7   :  { %v7972_v4 = vpop.f32.mrf.mxu0 }
0x16f8   :  { %v8000_v5 = vadd.f32 %v12544_v22, %v7989_v25  ;;  %v7987_v23 = vadd.f32 %v7972_v4, %v7825_v33  ;;  %v15689_v33 = vld [vmem:[#allocation11 + $0x1a8] ss:$16 sps:$4 sm:$0xff]   ;;  %v15694_v25 = vld [vmem:[#allocation11 + $0x184] ss:$16 sps:$4 sm:$0xff]   ;;  %v15692_v4 = vld [vmem:[#allocation11 + $0x180] ss:$16 sps:$4 sm:$0xff]  }
0x16f9   :  { %v15003_v12 = vpop.f32.mrf.mxu0 }
0x16fa   :  { %v7990_v29 = vadd.f32 %v15003_v12, %v7828_v59  ;;  %v7998_v24 = vadd.f32 %v12544_v22, %v7987_v23  ;;  %v8004_v42 = vmax.f32 %v8000_v5, 0.0  ;;  %v15658_v59 = vld [vmem:[#allocation11 + $0x144] ss:$16 sps:$4 sm:$0xff]   ;;  %v15695_v5 = vld [vmem:[#allocation11 + $0x188] ss:$16 sps:$4 sm:$0xff]  }
0x16fb   :  { %v7975_v57 = vpop.f32.mrf.mxu0  ;;  %v15700_v23 = vld [vmem:[#allocation11 + $0x264] ss:$16 sps:$4 sm:$0xff]   ;;  %v15703_v12 = vld [vmem:[#allocation11 + $0x26c] ss:$16 sps:$4 sm:$0xff]  }
0x16fc   :  { %v8001_v6 = vadd.f32 %v12544_v22, %v7990_v29  ;;  %v7988_v26 = vadd.f32 %v7975_v57, %v7826_v28  ;;  %v8002_v16 = vmax.f32 %v7998_v24, 0.0  ;;  %v15698_v28 = vld [vmem:[#allocation11 + $0x260] ss:$16 sps:$4 sm:$0xff]   ;;  %v15701_v29 = vld [vmem:[#allocation11 + $0x268] ss:$16 sps:$4 sm:$0xff]  }
0x16fd   :  { %v15706_v24 = vld [vmem:[#allocation11 + $0x244] ss:$16 sps:$4 sm:$0xff]  }
0x16fe   :  { %v8005_v41 = vmax.f32 %v8001_v6, 0.0  ;;  %v7999_v0 = vadd.f32 %v12544_v22, %v7988_v26  ;;  %v15686_v22 = vld [vmem:[#allocation11 + $0x1a0] ss:$16 sps:$4 sm:$0xff]   ;;  %v15709_v6 = vld [vmem:[#allocation11 + $0x24c] ss:$16 sps:$4 sm:$0xff]  }
0x16ff   :  { %v15704_v26 = vld [vmem:[#allocation11 + $0x240] ss:$16 sps:$4 sm:$0xff]  }
0x1700   :  { %v18950_v13 = vpack.c.bf16 %v8005_v41, %v8004_v42  ;;  %v8003_v51 = vmax.f32 %v7999_v0, 0.0  ;;  %v15707_v42 = vld [vmem:[#allocation11 + $0x248] ss:$16 sps:$4 sm:$0xff]   ;;  %v15712_v41 = vld [vmem:[#allocation11 + $0x224] ss:$16 sps:$4 sm:$0xff]  }
0x1701   :  { %v15715_v0 = vld [vmem:[#allocation11 + $0x22c] ss:$16 sps:$4 sm:$0xff]  }
0x1702   :  { %v18952_v52 = vpack.c.bf16 %v8003_v51, %v8002_v16  ;;  %v15710_v16 = vld [vmem:[#allocation11 + $0x220] ss:$16 sps:$4 sm:$0xff]   ;;  %v15713_v51 = vld [vmem:[#allocation11 + $0x228] ss:$16 sps:$4 sm:$0xff]  }
0x1704   :  { %v8041_v17 = vrot.slane %v18952_v52, 1  ;;  %v8388_v27 = vrot.slane %v18952_v52, 2  ;;  %v8574_v57 = vrot.slane %v18952_v52, 3 }
0x1706   :  { %12561 = vmatmul.mubr.msk.bf16.vlgmr.msra.gmra.mxu1 %vm6722_vm3, %v8041_v17  ;;  %12562 = vmatmul.mubr.msk.bf16.vlgmr.msra.gmra.mxu0 %vm6722_vm3, %v8041_v17  ;;  %v15716_v17 = vld [vmem:[#allocation11 + $0x200] ss:$16 sps:$4 sm:$0xff]  }
0x1707   :  { %8299 = vmatpush1.bf16.msra.mxu1 %v15626_v53  ;;  %8340 = vmatpush1.bf16.msra.mxu0 %v15629_v43  ;;  %v15718_v53 = vld [vmem:[#allocation11 + $0x204] ss:$16 sps:$4 sm:$0xff]   ;;  %v15721_v43 = vld [vmem:[#allocation11 + $0x20c] ss:$16 sps:$4 sm:$0xff]  }
0x1708   :  { %8300 = vmatprep.subr.bf16.mxu1 %v15634_v2  ;;  %8341 = vmatprep.subr.bf16.mxu0 %v15637_v50  ;;  %v15719_v2 = vld [vmem:[#allocation11 + $0x208] ss:$16 sps:$4 sm:$0xff]   ;;  %v15724_v50 = vld [vmem:[#allocation11 + $0x2e4] ss:$16 sps:$4 sm:$0xff]  }
0x1709   :  { %8322 = vmatprep.mubr.bf16.mxu1 %v16493_v48  ;;  %8363 = vmatprep.mubr.bf16.mxu0 %v16493_v48 }
0x170b   :  { %8301 = vmatpush1.bf16.msra.mxu1 %v15632_v47  ;;  %8342 = vmatpush1.bf16.msra.mxu0 %v15635_v54  ;;  %v15727_v47 = vld [vmem:[#allocation11 + $0x2ec] ss:$16 sps:$4 sm:$0xff]   ;;  %v15722_v54 = vld [vmem:[#allocation11 + $0x2e0] ss:$16 sps:$4 sm:$0xff]  }
0x170c   :  { %8302 = vmatprep.subr.bf16.mxu1 %v15640_v63  ;;  %8343 = vmatprep.subr.bf16.mxu0 %v15643_v34  ;;  %v15725_v63 = vld [vmem:[#allocation11 + $0x2e8] ss:$16 sps:$4 sm:$0xff]   ;;  %v8760_v34 = vrot.slane %v18952_v52, 4 }
0x170f   :  { %8303 = vmatpush1.bf16.msra.mxu1 %v15638_v8  ;;  %8344 = vmatpush1.bf16.msra.mxu0 %v15641_v35  ;;  %v15730_v8 = vld [vmem:[#allocation11 + $0x2c4] ss:$16 sps:$4 sm:$0xff]   ;;  %v15733_v35 = vld [vmem:[#allocation11 + $0x2cc] ss:$16 sps:$4 sm:$0xff]  }
0x1710   :  { %8304 = vmatprep.subr.bf16.mxu1 %v15646_v62  ;;  %8345 = vmatprep.subr.bf16.mxu0 %v15649_v38  ;;  %v15728_v62 = vld [vmem:[#allocation11 + $0x2c0] ss:$16 sps:$4 sm:$0xff]   ;;  %v15731_v38 = vld [vmem:[#allocation11 + $0x2c8] ss:$16 sps:$4 sm:$0xff]  }
0x1713   :  { %8305 = vmatpush1.bf16.msra.mxu1 %v15644_v1  ;;  %8346 = vmatpush1.bf16.msra.mxu0 %v15647_v9  ;;  %v15736_v1 = vld [vmem:[#allocation11 + $0x2a4] ss:$16 sps:$4 sm:$0xff]   ;;  %v15739_v9 = vld [vmem:[#allocation11 + $0x2ac] ss:$16 sps:$4 sm:$0xff]  }
0x1714   :  { %8480 = vmatprep.subr.bf16.mxu1 %v15652_v36  ;;  %8521 = vmatprep.subr.bf16.mxu0 %v15655_v14  ;;  %v15734_v36 = vld [vmem:[#allocation11 + $0x2a0] ss:$16 sps:$4 sm:$0xff]   ;;  %v15737_v14 = vld [vmem:[#allocation11 + $0x2a8] ss:$16 sps:$4 sm:$0xff]  }
0x1716   :  { %12579 = vmatmul.mubr.msk.bf16.vlgmr.msra.gmra.mxu1 %vm6722_vm3, %v18952_v52  ;;  %12580 = vmatmul.mubr.msk.bf16.vlgmr.msra.gmra.mxu0 %vm6722_vm3, %v18952_v52 }
0x1717   :  { %8481 = vmatpush1.bf16.msra.mxu1 %v15650_v46  ;;  %8522 = vmatpush1.bf16.msra.mxu0 %v15653_v7  ;;  %v15742_v46 = vld [vmem:[#allocation11 + $0x284] ss:$16 sps:$4 sm:$0xff]   ;;  %v15745_v7 = vld [vmem:[#allocation11 + $0x28c] ss:$16 sps:$4 sm:$0xff]  }
0x1718   :  { %8482 = vmatprep.subr.bf16.mxu1 %v15658_v59  ;;  %8523 = vmatprep.subr.bf16.mxu0 %v15661_v10  ;;  %v15740_v59 = vld [vmem:[#allocation11 + $0x280] ss:$16 sps:$4 sm:$0xff]   ;;  %v15743_v10 = vld [vmem:[#allocation11 + $0x288] ss:$16 sps:$4 sm:$0xff]  }
0x1719   :  { %8504 = vmatprep.mubr.bf16.mxu1 %v16493_v48  ;;  %8545 = vmatprep.mubr.bf16.mxu0 %v16493_v48 }
0x171b   :  { %8483 = vmatpush1.bf16.msra.mxu1 %v15656_v20  ;;  %8524 = vmatpush1.bf16.msra.mxu0 %v15659_v45  ;;  %v15748_v20 = vld [vmem:[#allocation11 + $0x364] ss:$16 sps:$4 sm:$0xff]   ;;  %v15751_v45 = vld [vmem:[#allocation11 + $0x36c] ss:$16 sps:$4 sm:$0xff]  }
0x171c   :  { %8484 = vmatprep.subr.bf16.mxu1 %v15664_v58  ;;  %8525 = vmatprep.subr.bf16.mxu0 %v15667_v3  ;;  %v15746_v58 = vld [vmem:[#allocation11 + $0x360] ss:$16 sps:$4 sm:$0xff]   ;;  %v15749_v3 = vld [vmem:[#allocation11 + $0x368] ss:$16 sps:$4 sm:$0xff]  }
0x171f   :  { %8485 = vmatpush1.bf16.msra.mxu1 %v15662_v21  ;;  %8526 = vmatpush1.bf16.msra.mxu0 %v15665_v40  ;;  %v8946_v21 = vrot.slane %v18952_v52, 5  ;;  %v15754_v40 = vld [vmem:[#allocation11 + $0x344] ss:$16 sps:$4 sm:$0xff]  }
0x1720   :  { %8486 = vmatprep.subr.bf16.mxu1 %v15670_v55  ;;  %8527 = vmatprep.subr.bf16.mxu0 %v15673_v32  ;;  %v15757_v55 = vld [vmem:[#allocation11 + $0x34c] ss:$16 sps:$4 sm:$0xff]   ;;  %v15752_v32 = vld [vmem:[#allocation11 + $0x340] ss:$16 sps:$4 sm:$0xff]  }
0x1723   :  { %8487 = vmatpush1.bf16.msra.mxu1 %v15668_v18  ;;  %8528 = vmatpush1.bf16.msra.mxu0 %v15671_v19  ;;  %v15755_v18 = vld [vmem:[#allocation11 + $0x348] ss:$16 sps:$4 sm:$0xff]   ;;  %v15760_v19 = vld [vmem:[#allocation11 + $0x324] ss:$16 sps:$4 sm:$0xff]  }
0x1724   :  { %8666 = vmatprep.subr.bf16.mxu1 %v15676_v49  ;;  %8707 = vmatprep.subr.bf16.mxu0 %v15679_v31  ;;  %v15763_v49 = vld [vmem:[#allocation11 + $0x32c] ss:$16 sps:$4 sm:$0xff]   ;;  %v15758_v31 = vld [vmem:[#allocation11 + $0x320] ss:$16 sps:$4 sm:$0xff]  }
0x1726   :  { %12597 = vmatmul.mubr.msk.bf16.vlgmr.msra.gmra.mxu1 %vm6722_vm3, %v8388_v27  ;;  %12598 = vmatmul.mubr.msk.bf16.vlgmr.msra.gmra.mxu0 %vm6722_vm3, %v8388_v27  ;;  %v15769_v27 = vld [vmem:[#allocation11 + $0x30c] ss:$16 sps:$4 sm:$0xff]  }
0x1727   :  { %8667 = vmatpush1.bf16.msra.mxu1 %v15674_v11  ;;  %8708 = vmatpush1.bf16.msra.mxu0 %v15677_v30  ;;  %v15761_v11 = vld [vmem:[#allocation11 + $0x328] ss:$16 sps:$4 sm:$0xff]   ;;  %v15766_v30 = vld [vmem:[#allocation11 + $0x304] ss:$16 sps:$4 sm:$0xff]  }
0x1728   :  { %8668 = vmatprep.subr.bf16.mxu1 %v15682_v39  ;;  %8709 = vmatprep.subr.bf16.mxu0 %v15685_v60  ;;  %v15764_v39 = vld [vmem:[#allocation11 + $0x300] ss:$16 sps:$4 sm:$0xff]   ;;  %v15767_v60 = vld [vmem:[#allocation11 + $0x308] ss:$16 sps:$4 sm:$0xff]  }
0x1729   :  { %8690 = vmatprep.mubr.bf16.mxu1 %v16493_v48  ;;  %8731 = vmatprep.mubr.bf16.mxu0 %v16493_v48 }
0x172b   :  { %8669 = vmatpush1.bf16.msra.mxu1 %v15680_v61  ;;  %8710 = vmatpush1.bf16.msra.mxu0 %v15683_v56  ;;  %v15772_v61 = vld [vmem:[#allocation11 + $0x3e4] ss:$16 sps:$4 sm:$0xff]   ;;  %v15775_v56 = vld [vmem:[#allocation11 + $0x3ec] ss:$16 sps:$4 sm:$0xff]  }
0x172c   :  { %8670 = vmatprep.subr.bf16.mxu1 %v15688_v15  ;;  %8711 = vmatprep.subr.bf16.mxu0 %v15691_v37  ;;  %v15770_v15 = vld [vmem:[#allocation11 + $0x3e0] ss:$16 sps:$4 sm:$0xff]   ;;  %v15773_v37 = vld [vmem:[#allocation11 + $0x3e8] ss:$16 sps:$4 sm:$0xff]  }
0x172f   :  { %8671 = vmatpush1.bf16.msra.mxu1 %v15686_v22  ;;  %8712 = vmatpush1.bf16.msra.mxu0 %v15689_v33  ;;  %v9132_v22 = vrot.slane %v18952_v52, 6  ;;  %v15778_v33 = vld [vmem:[#allocation11 + $0x3c4] ss:$16 sps:$4 sm:$0xff]  }
0x1730   :  { %8672 = vmatprep.subr.bf16.mxu1 %v15694_v25  ;;  %8713 = vmatprep.subr.bf16.mxu0 %v15697_v44  ;;  %v15781_v25 = vld [vmem:[#allocation11 + $0x3cc] ss:$16 sps:$4 sm:$0xff]   ;;  %v15776_v44 = vld [vmem:[#allocation11 + $0x3c0] ss:$16 sps:$4 sm:$0xff]  }
0x1733   :  { %8673 = vmatpush1.bf16.msra.mxu1 %v15692_v4  ;;  %8714 = vmatpush1.bf16.msra.mxu0 %v15695_v5  ;;  %v15779_v4 = vld [vmem:[#allocation11 + $0x3c8] ss:$16 sps:$4 sm:$0xff]   ;;  %v15784_v5 = vld [vmem:[#allocation11 + $0x3a4] ss:$16 sps:$4 sm:$0xff]  }
0x1734   :  { %8852 = vmatprep.subr.bf16.mxu1 %v15700_v23  ;;  %8893 = vmatprep.subr.bf16.mxu0 %v15703_v12  ;;  %v15787_v23 = vld [vmem:[#allocation11 + $0x3ac] ss:$16 sps:$4 sm:$0xff]   ;;  %v15782_v12 = vld [vmem:[#allocation11 + $0x3a0] ss:$16 sps:$4 sm:$0xff]  }
0x1736   :  { %12615 = vmatmul.mubr.msk.bf16.vlgmr.msra.gmra.mxu1 %vm6722_vm3, %v8574_v57  ;;  %12616 = vmatmul.mubr.msk.bf16.vlgmr.msra.gmra.mxu0 %vm6722_vm3, %v8574_v57  ;;  %v15793_v57 = vld [vmem:[#allocation11 + $0x38c] ss:$16 sps:$4 sm:$0xff]  }
0x1737   :  { %8853 = vmatpush1.bf16.msra.mxu1 %v15698_v28  ;;  %8894 = vmatpush1.bf16.msra.mxu0 %v15701_v29  ;;  %v15785_v28 = vld [vmem:[#allocation11 + $0x3a8] ss:$16 sps:$4 sm:$0xff]   ;;  %v15790_v29 = vld [vmem:[#allocation11 + $0x384] ss:$16 sps:$4 sm:$0xff]  }
0x1738   :  { %8854 = vmatprep.subr.bf16.mxu1 %v15706_v24  ;;  %8895 = vmatprep.subr.bf16.mxu0 %v15709_v6  ;;  %v15788_v24 = vld [vmem:[#allocation11 + $0x380] ss:$16 sps:$4 sm:$0xff]   ;;  %v15791_v6 = vld [vmem:[#allocation11 + $0x388] ss:$16 sps:$4 sm:$0xff]  }
0x1739   :  { %8876 = vmatprep.mubr.bf16.mxu1 %v16493_v48  ;;  %8917 = vmatprep.mubr.bf16.mxu0 %v16493_v48 }
0x173b   :  { %8855 = vmatpush1.bf16.msra.mxu1 %v15704_v26  ;;  %8896 = vmatpush1.bf16.msra.mxu0 %v15707_v42  ;;  %v15796_v26 = vld [vmem:[#allocation11 + $0x464] ss:$16 sps:$4 sm:$0xff]   ;;  %v15799_v42 = vld [vmem:[#allocation11 + $0x46c] ss:$16 sps:$4 sm:$0xff]  }
0x173c   :  { %8856 = vmatprep.subr.bf16.mxu1 %v15712_v41  ;;  %8897 = vmatprep.subr.bf16.mxu0 %v15715_v0  ;;  %v15794_v41 = vld [vmem:[#allocation11 + $0x460] ss:$16 sps:$4 sm:$0xff]   ;;  %v15797_v0 = vld [vmem:[#allocation11 + $0x468] ss:$16 sps:$4 sm:$0xff]  }
0x173f   :  { %8857 = vmatpush1.bf16.msra.mxu1 %v15710_v16  ;;  %8898 = vmatpush1.bf16.msra.mxu0 %v15713_v51  ;;  %v9318_v16 = vrot.slane %v18952_v52, 7  ;;  %v15802_v51 = vld [vmem:[#allocation11 + $0x444] ss:$16 sps:$4 sm:$0xff]   ;;  %v15806_v52 = vld [vmem:[#allocation11 + $0x420] ss:$16 sps:$4 sm:$0xff]  }
0x1740   :  { %8858 = vmatprep.subr.bf16.mxu1 %v15718_v53  ;;  %8899 = vmatprep.subr.bf16.mxu0 %v15721_v43  ;;  %v15805_v53 = vld [vmem:[#allocation11 + $0x44c] ss:$16 sps:$4 sm:$0xff]   ;;  %v15800_v43 = vld [vmem:[#allocation11 + $0x440] ss:$16 sps:$4 sm:$0xff]  }
0x1743   :  { %8859 = vmatpush1.bf16.msra.mxu1 %v15716_v17  ;;  %8900 = vmatpush1.bf16.msra.mxu0 %v15719_v2  ;;  %v15803_v17 = vld [vmem:[#allocation11 + $0x448] ss:$16 sps:$4 sm:$0xff]   ;;  %v15808_v2 = vld [vmem:[#allocation11 + $0x424] ss:$16 sps:$4 sm:$0xff]  }
0x1744   :  { %9038 = vmatprep.subr.bf16.mxu1 %v15724_v50  ;;  %9079 = vmatprep.subr.bf16.mxu0 %v15727_v47  ;;  %v15811_v50 = vld [vmem:[#allocation11 + $0x42c] ss:$16 sps:$4 sm:$0xff]   ;;  %v15809_v47 = vld [vmem:[#allocation11 + $0x428] ss:$16 sps:$4 sm:$0xff]  }
0x1746   :  { %12633 = vmatmul.mubr.msk.bf16.vlgmr.msra.gmra.mxu1 %vm6722_vm3, %v8760_v34  ;;  %12634 = vmatmul.mubr.msk.bf16.vlgmr.msra.gmra.mxu0 %vm6722_vm3, %v8760_v34  ;;  %v15812_v34 = vld [vmem:[#allocation11 + $0x400] ss:$16 sps:$4 sm:$0xff]  }
0x1747   :  { %9039 = vmatpush1.bf16.msra.mxu1 %v15722_v54  ;;  %9080 = vmatpush1.bf16.msra.mxu0 %v15725_v63  ;;  %v15814_v54 = vld [vmem:[#allocation11 + $0x404] ss:$16 sps:$4 sm:$0xff]   ;;  %v15817_v63 = vld [vmem:[#allocation11 + $0x40c] ss:$16 sps:$4 sm:$0xff]  }
0x1748   :  { %9040 = vmatprep.subr.bf16.mxu1 %v15730_v8  ;;  %9081 = vmatprep.subr.bf16.mxu0 %v15733_v35  ;;  %v15815_v8 = vld [vmem:[#allocation11 + $0x408] ss:$16 sps:$4 sm:$0xff]   ;;  %v15820_v35 = vld [vmem:[#allocation11 + $0x4e4] ss:$16 sps:$4 sm:$0xff]  }
0x1749   :  { %9062 = vmatprep.mubr.bf16.mxu1 %v16493_v48  ;;  %9103 = vmatprep.mubr.bf16.mxu0 %v16493_v48 }
0x174b   :  { %9041 = vmatpush1.bf16.msra.mxu1 %v15728_v62  ;;  %9082 = vmatpush1.bf16.msra.mxu0 %v15731_v38  ;;  %v15823_v62 = vld [vmem:[#allocation11 + $0x4ec] ss:$16 sps:$4 sm:$0xff]   ;;  %v15818_v38 = vld [vmem:[#allocation11 + $0x4e0] ss:$16 sps:$4 sm:$0xff]  }
0x174c   :  { %9042 = vmatprep.subr.bf16.mxu1 %v15736_v1  ;;  %9083 = vmatprep.subr.bf16.mxu0 %v15739_v9  ;;  %v15821_v1 = vld [vmem:[#allocation11 + $0x4e8] ss:$16 sps:$4 sm:$0xff]   ;;  %v15826_v9 = vld [vmem:[#allocation11 + $0x4c4] ss:$16 sps:$4 sm:$0xff]  }
0x174f   :  { %9043 = vmatpush1.bf16.msra.mxu1 %v15734_v36  ;;  %9084 = vmatpush1.bf16.msra.mxu0 %v15737_v14  ;;  %v15829_v36 = vld [vmem:[#allocation11 + $0x4cc] ss:$16 sps:$4 sm:$0xff]   ;;  %v15824_v14 = vld [vmem:[#allocation11 + $0x4c0] ss:$16 sps:$4 sm:$0xff]  }
0x1750   :  { %9044 = vmatprep.subr.bf16.mxu1 %v15742_v46  ;;  %9085 = vmatprep.subr.bf16.mxu0 %v15745_v7  ;;  %v15827_v46 = vld [vmem:[#allocation11 + $0x4c8] ss:$16 sps:$4 sm:$0xff]   ;;  %v15832_v7 = vld [vmem:[#allocation11 + $0x4a4] ss:$16 sps:$4 sm:$0xff]  }
0x1753   :  { %9045 = vmatpush1.bf16.msra.mxu1 %v15740_v59  ;;  %9086 = vmatpush1.bf16.msra.mxu0 %v15743_v10  ;;  %v15835_v59 = vld [vmem:[#allocation11 + $0x4ac] ss:$16 sps:$4 sm:$0xff]   ;;  %v15830_v10 = vld [vmem:[#allocation11 + $0x4a0] ss:$16 sps:$4 sm:$0xff]  }
0x1754   :  { %9224 = vmatprep.subr.bf16.mxu1 %v15748_v20  ;;  %9265 = vmatprep.subr.bf16.mxu0 %v15751_v45  ;;  %v15833_v20 = vld [vmem:[#allocation11 + $0x4a8] ss:$16 sps:$4 sm:$0xff]   ;;  %v15838_v45 = vld [vmem:[#allocation11 + $0x484] ss:$16 sps:$4 sm:$0xff]  }
0x1756   :  { %12651 = vmatmul.mubr.msk.bf16.vlgmr.msra.gmra.mxu1 %vm6722_vm3, %v8946_v21  ;;  %12652 = vmatmul.mubr.msk.bf16.vlgmr.msra.gmra.mxu0 %vm6722_vm3, %v8946_v21  ;;  %v15839_v21 = vld [vmem:[#allocation11 + $0x488] ss:$16 sps:$4 sm:$0xff]  }
0x1757   :  { %9225 = vmatpush1.bf16.msra.mxu1 %v15746_v58  ;;  %9266 = vmatpush1.bf16.msra.mxu0 %v15749_v3  ;;  %v15841_v58 = vld [vmem:[#allocation11 + $0x48c] ss:$16 sps:$4 sm:$0xff]   ;;  %v15836_v3 = vld [vmem:[#allocation11 + $0x480] ss:$16 sps:$4 sm:$0xff]  }
0x1758   :  { %9226 = vmatprep.subr.bf16.mxu1 %v15754_v40  ;;  %9267 = vmatprep.subr.bf16.mxu0 %v15757_v55  ;;  %v15844_v40 = vld [vmem:[#allocation11 + $0x564] ss:$16 sps:$4 sm:$0xff]   ;;  %v15847_v55 = vld [vmem:[#allocation11 + $0x56c] ss:$16 sps:$4 sm:$0xff]  }
0x1759   :  { %9248 = vmatprep.mubr.bf16.mxu1 %v16493_v48  ;;  %9289 = vmatprep.mubr.bf16.mxu0 %v16493_v48 }
0x175b   :  { %9227 = vmatpush1.bf16.msra.mxu1 %v15752_v32  ;;  %9268 = vmatpush1.bf16.msra.mxu0 %v15755_v18  ;;  %v15842_v32 = vld [vmem:[#allocation11 + $0x560] ss:$16 sps:$4 sm:$0xff]   ;;  %v15845_v18 = vld [vmem:[#allocation11 + $0x568] ss:$16 sps:$4 sm:$0xff]  }
0x175c   :  { %9228 = vmatprep.subr.bf16.mxu1 %v15760_v19  ;;  %9269 = vmatprep.subr.bf16.mxu0 %v15763_v49  ;;  %v9690_v19 = vrot.slane %v18950_v13, 1  ;;  %v15850_v49 = vld [vmem:[#allocation11 + $0x544] ss:$16 sps:$4 sm:$0xff]  }
0x175f   :  { %9229 = vmatpush1.bf16.msra.mxu1 %v15758_v31  ;;  %9270 = vmatpush1.bf16.msra.mxu0 %v15761_v11  ;;  %v15853_v31 = vld [vmem:[#allocation11 + $0x54c] ss:$16 sps:$4 sm:$0xff]   ;;  %v15848_v11 = vld [vmem:[#allocation11 + $0x540] ss:$16 sps:$4 sm:$0xff]  }
0x1760   :  { %9230 = vmatprep.subr.bf16.mxu1 %v15766_v30  ;;  %9271 = vmatprep.subr.bf16.mxu0 %v15769_v27  ;;  %v15851_v30 = vld [vmem:[#allocation11 + $0x548] ss:$16 sps:$4 sm:$0xff]   ;;  %v15856_v27 = vld [vmem:[#allocation11 + $0x524] ss:$16 sps:$4 sm:$0xff]  }
0x1763   :  { %9231 = vmatpush1.bf16.msra.mxu1 %v15764_v39  ;;  %9272 = vmatpush1.bf16.msra.mxu0 %v15767_v60  ;;  %v15859_v39 = vld [vmem:[#allocation11 + $0x52c] ss:$16 sps:$4 sm:$0xff]   ;;  %v15854_v60 = vld [vmem:[#allocation11 + $0x520] ss:$16 sps:$4 sm:$0xff]  }
0x1764   :  { %9410 = vmatprep.subr.bf16.mxu1 %v15772_v61  ;;  %9451 = vmatprep.subr.bf16.mxu0 %v15775_v56  ;;  %v15857_v61 = vld [vmem:[#allocation11 + $0x528] ss:$16 sps:$4 sm:$0xff]   ;;  %v15862_v56 = vld [vmem:[#allocation11 + $0x504] ss:$16 sps:$4 sm:$0xff]  }
0x1766   :  { %12669 = vmatmul.mubr.msk.bf16.vlgmr.msra.gmra.mxu1 %vm6722_vm3, %v9132_v22  ;;  %12670 = vmatmul.mubr.msk.bf16.vlgmr.msra.gmra.mxu0 %vm6722_vm3, %v9132_v22  ;;  %v15863_v22 = vld [vmem:[#allocation11 + $0x508] ss:$16 sps:$4 sm:$0xff]  }
0x1767   :  { %9411 = vmatpush1.bf16.msra.mxu1 %v15770_v15  ;;  %9452 = vmatpush1.bf16.msra.mxu0 %v15773_v37  ;;  %v15865_v15 = vld [vmem:[#allocation11 + $0x50c] ss:$16 sps:$4 sm:$0xff]   ;;  %v15860_v37 = vld [vmem:[#allocation11 + $0x500] ss:$16 sps:$4 sm:$0xff]  }
0x1768   :  { %9412 = vmatprep.subr.bf16.mxu1 %v15778_v33  ;;  %9453 = vmatprep.subr.bf16.mxu0 %v15781_v25  ;;  %v15868_v33 = vld [vmem:[#allocation11 + $0x5e4] ss:$16 sps:$4 sm:$0xff]   ;;  %v15871_v25 = vld [vmem:[#allocation11 + $0x5ec] ss:$16 sps:$4 sm:$0xff]  }
0x1769   :  { %9434 = vmatprep.mubr.bf16.mxu1 %v16493_v48  ;;  %9475 = vmatprep.mubr.bf16.mxu0 %v16493_v48 }
0x176b   :  { %9413 = vmatpush1.bf16.msra.mxu1 %v15776_v44  ;;  %9454 = vmatpush1.bf16.msra.mxu0 %v15779_v4  ;;  %v15866_v44 = vld [vmem:[#allocation11 + $0x5e0] ss:$16 sps:$4 sm:$0xff]   ;;  %v15869_v4 = vld [vmem:[#allocation11 + $0x5e8] ss:$16 sps:$4 sm:$0xff]  }
0x176c   :  { %9414 = vmatprep.subr.bf16.mxu1 %v15784_v5  ;;  %9455 = vmatprep.subr.bf16.mxu0 %v15787_v23  ;;  %v9876_v5 = vrot.slane %v18950_v13, 2  ;;  %v15874_v23 = vld [vmem:[#allocation11 + $0x5c4] ss:$16 sps:$4 sm:$0xff]  }
0x176f   :  { %9415 = vmatpush1.bf16.msra.mxu1 %v15782_v12  ;;  %9456 = vmatpush1.bf16.msra.mxu0 %v15785_v28  ;;  %v15877_v12 = vld [vmem:[#allocation11 + $0x5cc] ss:$16 sps:$4 sm:$0xff]   ;;  %v15872_v28 = vld [vmem:[#allocation11 + $0x5c0] ss:$16 sps:$4 sm:$0xff]  }
0x1770   :  { %9416 = vmatprep.subr.bf16.mxu1 %v15790_v29  ;;  %9457 = vmatprep.subr.bf16.mxu0 %v15793_v57  ;;  %v15875_v29 = vld [vmem:[#allocation11 + $0x5c8] ss:$16 sps:$4 sm:$0xff]   ;;  %v15880_v57 = vld [vmem:[#allocation11 + $0x5a4] ss:$16 sps:$4 sm:$0xff]  }
0x1773   :  { %9417 = vmatpush1.bf16.msra.mxu1 %v15788_v24  ;;  %9458 = vmatpush1.bf16.msra.mxu0 %v15791_v6  ;;  %v15883_v24 = vld [vmem:[#allocation11 + $0x5ac] ss:$16 sps:$4 sm:$0xff]   ;;  %v15878_v6 = vld [vmem:[#allocation11 + $0x5a0] ss:$16 sps:$4 sm:$0xff]  }
0x1774   :  { %9595 = vmatprep.subr.bf16.mxu1 %v15796_v26  ;;  %9636 = vmatprep.subr.bf16.mxu0 %v15799_v42  ;;  %v15881_v26 = vld [vmem:[#allocation11 + $0x5a8] ss:$16 sps:$4 sm:$0xff]   ;;  %v15886_v42 = vld [vmem:[#allocation11 + $0x584] ss:$16 sps:$4 sm:$0xff]  }
0x1776   :  { %12687 = vmatmul.mubr.msk.bf16.vlgmr.msra.gmra.mxu1 %vm6722_vm3, %v9318_v16  ;;  %12688 = vmatmul.mubr.msk.bf16.vlgmr.msra.gmra.mxu0 %vm6722_vm3, %v9318_v16  ;;  %v15887_v16 = vld [vmem:[#allocation11 + $0x588] ss:$16 sps:$4 sm:$0xff]  }
0x1777   :  { %9596 = vmatpush1.bf16.msra.mxu1 %v15794_v41  ;;  %9637 = vmatpush1.bf16.msra.mxu0 %v15797_v0  ;;  %v15889_v41 = vld [vmem:[#allocation11 + $0x58c] ss:$16 sps:$4 sm:$0xff]   ;;  %v15884_v0 = vld [vmem:[#allocation11 + $0x580] ss:$16 sps:$4 sm:$0xff]  }
0x1778   :  { %9597 = vmatprep.subr.bf16.mxu1 %v15802_v51  ;;  %9638 = vmatprep.subr.bf16.mxu0 %v15805_v53  ;;  %v15892_v51 = vld [vmem:[#allocation11 + $0x664] ss:$16 sps:$4 sm:$0xff]   ;;  %v15895_v53 = vld [vmem:[#allocation11 + $0x66c] ss:$16 sps:$4 sm:$0xff]  }
0x1779   :  { %9619 = vmatprep.mubr.bf16.mxu1 %v16493_v48  ;;  %9660 = vmatprep.mubr.bf16.mxu0 %v16493_v48 }
0x177b   :  { %9598 = vmatpush1.bf16.msra.mxu1 %v15800_v43  ;;  %9639 = vmatpush1.bf16.msra.mxu0 %v15803_v17  ;;  %v15890_v43 = vld [vmem:[#allocation11 + $0x660] ss:$16 sps:$4 sm:$0xff]   ;;  %v15893_v17 = vld [vmem:[#allocation11 + $0x668] ss:$16 sps:$4 sm:$0xff]  }
0x177c   :  { %9599 = vmatprep.subr.bf16.mxu1 %v15808_v2  ;;  %9640 = vmatprep.subr.bf16.mxu0 %v15811_v50  ;;  %v10062_v2 = vrot.slane %v18950_v13, 3  ;;  %v15898_v50 = vld [vmem:[#allocation11 + $0x644] ss:$16 sps:$4 sm:$0xff]  }
0x177f   :  { %9600 = vmatpush1.bf16.msra.mxu1 %v15806_v52  ;;  %9641 = vmatpush1.bf16.msra.mxu0 %v15809_v47  ;;  %v15901_v52 = vld [vmem:[#allocation11 + $0x64c] ss:$16 sps:$4 sm:$0xff]   ;;  %v15896_v47 = vld [vmem:[#allocation11 + $0x640] ss:$16 sps:$4 sm:$0xff]  }
0x1780   :  { %9601 = vmatprep.subr.bf16.mxu1 %v15814_v54  ;;  %9642 = vmatprep.subr.bf16.mxu0 %v15817_v63  ;;  %v15899_v54 = vld [vmem:[#allocation11 + $0x648] ss:$16 sps:$4 sm:$0xff]   ;;  %v15904_v63 = vld [vmem:[#allocation11 + $0x624] ss:$16 sps:$4 sm:$0xff]  }
0x1783   :  { %9602 = vmatpush1.bf16.msra.mxu1 %v15812_v34  ;;  %9643 = vmatpush1.bf16.msra.mxu0 %v15815_v8  ;;  %v15907_v34 = vld [vmem:[#allocation11 + $0x62c] ss:$16 sps:$4 sm:$0xff]   ;;  %v15902_v8 = vld [vmem:[#allocation11 + $0x620] ss:$16 sps:$4 sm:$0xff]  }
0x1784   :  { %9782 = vmatprep.subr.bf16.mxu1 %v15820_v35  ;;  %9823 = vmatprep.subr.bf16.mxu0 %v15823_v62  ;;  %v15905_v35 = vld [vmem:[#allocation11 + $0x628] ss:$16 sps:$4 sm:$0xff]   ;;  %v15910_v62 = vld [vmem:[#allocation11 + $0x604] ss:$16 sps:$4 sm:$0xff]  }
0x1786   :  { %12705 = vmatmul.mubr.msk.bf16.vlgmr.msra.gmra.mxu1 %vm6722_vm3, %v18950_v13  ;;  %12706 = vmatmul.mubr.msk.bf16.vlgmr.msra.gmra.mxu0 %vm6722_vm3, %v18950_v13 }
0x1787   :  { %9783 = vmatpush1.bf16.msra.mxu1 %v15818_v38  ;;  %9824 = vmatpush1.bf16.msra.mxu0 %v15821_v1  ;;  %v15913_v38 = vld [vmem:[#allocation11 + $0x60c] ss:$16 sps:$4 sm:$0xff]   ;;  %v15908_v1 = vld [vmem:[#allocation11 + $0x600] ss:$16 sps:$4 sm:$0xff]  }
0x1788   :  { %9784 = vmatprep.subr.bf16.mxu1 %v15826_v9  ;;  %9825 = vmatprep.subr.bf16.mxu0 %v15829_v36  ;;  %v15911_v9 = vld [vmem:[#allocation11 + $0x608] ss:$16 sps:$4 sm:$0xff]   ;;  %v15916_v36 = vld [vmem:[#allocation11 + $0x6e4] ss:$16 sps:$4 sm:$0xff]  }
0x1789   :  { %9806 = vmatprep.mubr.bf16.mxu1 %v16493_v48  ;;  %9847 = vmatprep.mubr.bf16.mxu0 %v16493_v48 }
0x178b   :  { %9785 = vmatpush1.bf16.msra.mxu1 %v15824_v14  ;;  %9826 = vmatpush1.bf16.msra.mxu0 %v15827_v46  ;;  %v15919_v14 = vld [vmem:[#allocation11 + $0x6ec] ss:$16 sps:$4 sm:$0xff]   ;;  %v15914_v46 = vld [vmem:[#allocation11 + $0x6e0] ss:$16 sps:$4 sm:$0xff]  }
0x178c   :  { %9786 = vmatprep.subr.bf16.mxu1 %v15832_v7  ;;  %9827 = vmatprep.subr.bf16.mxu0 %v15835_v59  ;;  %v15917_v7 = vld [vmem:[#allocation11 + $0x6e8] ss:$16 sps:$4 sm:$0xff]   ;;  %v10248_v59 = vrot.slane %v18950_v13, 4 }
0x178f   :  { %9787 = vmatpush1.bf16.msra.mxu1 %v15830_v10  ;;  %9828 = vmatpush1.bf16.msra.mxu0 %v15833_v20  ;;  %v15922_v10 = vld [vmem:[#allocation11 + $0x6c4] ss:$16 sps:$4 sm:$0xff]   ;;  %v15925_v20 = vld [vmem:[#allocation11 + $0x6cc] ss:$16 sps:$4 sm:$0xff]  }
0x1790   :  { %9788 = vmatprep.subr.bf16.mxu1 %v15838_v45  ;;  %9829 = vmatprep.subr.bf16.mxu0 %v15841_v58 }
0x1793   :  { %9789 = vmatpush1.bf16.msra.mxu1 %v15836_v3  ;;  %9830 = vmatpush1.bf16.msra.mxu0 %v15839_v21  ;;  %v15920_v3 = vld [vmem:[#allocation11 + $0x6c0] ss:$16 sps:$4 sm:$0xff]   ;;  %v15923_v21 = vld [vmem:[#allocation11 + $0x6c8] ss:$16 sps:$4 sm:$0xff]  }
0x1794   :  { %9968 = vmatprep.subr.bf16.mxu1 %v15844_v40  ;;  %10009 = vmatprep.subr.bf16.mxu0 %v15847_v55 }
0x1796   :  { %12723 = vmatmul.mubr.msk.bf16.vlgmr.msra.gmra.mxu1 %vm6722_vm3, %v9690_v19  ;;  %12724 = vmatmul.mubr.msk.bf16.vlgmr.msra.gmra.mxu0 %vm6722_vm3, %v9690_v19 }
0x1797   :  { %9969 = vmatpush1.bf16.msra.mxu1 %v15842_v32  ;;  %10010 = vmatpush1.bf16.msra.mxu0 %v15845_v18  ;;  %v15928_v32 = vld [vmem:[#allocation11 + $0x6a4] ss:$16 sps:$4 sm:$0xff]   ;;  %v15931_v18 = vld [vmem:[#allocation11 + $0x6ac] ss:$16 sps:$4 sm:$0xff]  }
0x1798   :  { %9970 = vmatprep.subr.bf16.mxu1 %v15850_v49  ;;  %10011 = vmatprep.subr.bf16.mxu0 %v15853_v31  ;;  %v15926_v31 = vld [vmem:[#allocation11 + $0x6a0] ss:$16 sps:$4 sm:$0xff]  }
0x1799   :  { %9992 = vmatprep.mubr.bf16.mxu1 %v16493_v48  ;;  %10033 = vmatprep.mubr.bf16.mxu0 %v16493_v48 }
0x179b   :  { %9971 = vmatpush1.bf16.msra.mxu1 %v15848_v11  ;;  %10012 = vmatpush1.bf16.msra.mxu0 %v15851_v30  ;;  %v15929_v11 = vld [vmem:[#allocation11 + $0x6a8] ss:$16 sps:$4 sm:$0xff]  }
0x179c   :  { %9972 = vmatprep.subr.bf16.mxu1 %v15856_v27  ;;  %10013 = vmatprep.subr.bf16.mxu0 %v15859_v39  ;;  %v15934_v39 = vld [vmem:[#allocation11 + $0x684] ss:$16 sps:$4 sm:$0xff]  }
0x179f   :  { %9973 = vmatpush1.bf16.msra.mxu1 %v15854_v60  ;;  %10014 = vmatpush1.bf16.msra.mxu0 %v15857_v61  ;;  %v15937_v60 = vld [vmem:[#allocation11 + $0x68c] ss:$16 sps:$4 sm:$0xff]   ;;  %v15932_v61 = vld [vmem:[#allocation11 + $0x680] ss:$16 sps:$4 sm:$0xff]  }
0x17a0   :  { %9974 = vmatprep.subr.bf16.mxu1 %v15862_v56  ;;  %10015 = vmatprep.subr.bf16.mxu0 %v15865_v15  ;;  %v15935_v56 = vld [vmem:[#allocation11 + $0x688] ss:$16 sps:$4 sm:$0xff]   ;;  %v15940_v15 = vld [vmem:[#allocation11 + $0x764] ss:$16 sps:$4 sm:$0xff]  }
0x17a3   :  { %9975 = vmatpush1.bf16.msra.mxu1 %v15860_v37  ;;  %10016 = vmatpush1.bf16.msra.mxu0 %v15863_v22  ;;  %v15943_v37 = vld [vmem:[#allocation11 + $0x76c] ss:$16 sps:$4 sm:$0xff]   ;;  %v15938_v22 = vld [vmem:[#allocation11 + $0x760] ss:$16 sps:$4 sm:$0xff]  }
0x17a4   :  { %10154 = vmatprep.subr.bf16.mxu1 %v15868_v33  ;;  %10195 = vmatprep.subr.bf16.mxu0 %v15871_v25  ;;  %v15941_v33 = vld [vmem:[#allocation11 + $0x768] ss:$16 sps:$4 sm:$0xff]   ;;  %v10434_v25 = vrot.slane %v18950_v13, 5 }
0x17a6   :  { %12741 = vmatmul.mubr.msk.bf16.vlgmr.msra.gmra.mxu1 %vm6722_vm3, %v9876_v5  ;;  %12742 = vmatmul.mubr.msk.bf16.vlgmr.msra.gmra.mxu0 %vm6722_vm3, %v9876_v5 }
0x17a7   :  { %10155 = vmatpush1.bf16.msra.mxu1 %v15866_v44  ;;  %10196 = vmatpush1.bf16.msra.mxu0 %v15869_v4  ;;  %v15946_v44 = vld [vmem:[#allocation11 + $0x744] ss:$16 sps:$4 sm:$0xff]   ;;  %v15949_v4 = vld [vmem:[#allocation11 + $0x74c] ss:$16 sps:$4 sm:$0xff]  }
0x17a8   :  { %10156 = vmatprep.subr.bf16.mxu1 %v15874_v23  ;;  %10197 = vmatprep.subr.bf16.mxu0 %v15877_v12 }
0x17a9   :  { %10178 = vmatprep.mubr.bf16.mxu1 %v16493_v48  ;;  %10219 = vmatprep.mubr.bf16.mxu0 %v16493_v48 }
0x17ab   :  { %10157 = vmatpush1.bf16.msra.mxu1 %v15872_v28  ;;  %10198 = vmatpush1.bf16.msra.mxu0 %v15875_v29  ;;  %v15944_v29 = vld [vmem:[#allocation11 + $0x740] ss:$16 sps:$4 sm:$0xff]  }
0x17ac   :  { %10158 = vmatprep.subr.bf16.mxu1 %v15880_v57  ;;  %10199 = vmatprep.subr.bf16.mxu0 %v15883_v24  ;;  %v15947_v57 = vld [vmem:[#allocation11 + $0x748] ss:$16 sps:$4 sm:$0xff]  }
0x17af   :  { %10159 = vmatpush1.bf16.msra.mxu1 %v15878_v6  ;;  %10200 = vmatpush1.bf16.msra.mxu0 %v15881_v26  ;;  %v15952_v26 = vld [vmem:[#allocation11 + $0x724] ss:$16 sps:$4 sm:$0xff]  }
0x17b0   :  { %10160 = vmatprep.subr.bf16.mxu1 %v15886_v42  ;;  %10201 = vmatprep.subr.bf16.mxu0 %v15889_v41  ;;  %v15955_v42 = vld [vmem:[#allocation11 + $0x72c] ss:$16 sps:$4 sm:$0xff]  }
0x17b3   :  { %10161 = vmatpush1.bf16.msra.mxu1 %v15884_v0  ;;  %10202 = vmatpush1.bf16.msra.mxu0 %v15887_v16 }
0x17b4   :  { %10340 = vmatprep.subr.bf16.mxu1 %v15892_v51  ;;  %10381 = vmatprep.subr.bf16.mxu0 %v15895_v53  ;;  %v15950_v53 = vld [vmem:[#allocation11 + $0x720] ss:$16 sps:$4 sm:$0xff]  }
0x17b6   :  { %12759 = vmatmul.mubr.msk.bf16.vlgmr.msra.gmra.mxu1 %vm6722_vm3, %v10062_v2  ;;  %12760 = vmatmul.mubr.msk.bf16.vlgmr.msra.gmra.mxu0 %vm6722_vm3, %v10062_v2 }
0x17b7   :  { %10341 = vmatpush1.bf16.msra.mxu1 %v15890_v43  ;;  %10382 = vmatpush1.bf16.msra.mxu0 %v15893_v17  ;;  %v15953_v43 = vld [vmem:[#allocation11 + $0x728] ss:$16 sps:$4 sm:$0xff]  }
0x17b8   :  { %10342 = vmatprep.subr.bf16.mxu1 %v15898_v50  ;;  %10383 = vmatprep.subr.bf16.mxu0 %v15901_v52  ;;  %v15958_v50 = vld [vmem:[#allocation11 + $0x704] ss:$16 sps:$4 sm:$0xff]   ;;  %v15961_v52 = vld [vmem:[#allocation11 + $0x70c] ss:$16 sps:$4 sm:$0xff]  }
0x17b9   :  { %10364 = vmatprep.mubr.bf16.mxu1 %v16493_v48  ;;  %10405 = vmatprep.mubr.bf16.mxu0 %v16493_v48 }
0x17bb   :  { %10343 = vmatpush1.bf16.msra.mxu1 %v15896_v47  ;;  %10384 = vmatpush1.bf16.msra.mxu0 %v15899_v54  ;;  %v15956_v47 = vld [vmem:[#allocation11 + $0x700] ss:$16 sps:$4 sm:$0xff]   ;;  %v15959_v54 = vld [vmem:[#allocation11 + $0x708] ss:$16 sps:$4 sm:$0xff]  }
0x17bc   :  { %10344 = vmatprep.subr.bf16.mxu1 %v15904_v63  ;;  %10385 = vmatprep.subr.bf16.mxu0 %v15907_v34  ;;  %v15964_v63 = vld [vmem:[#allocation11 + $0x7e4] ss:$16 sps:$4 sm:$0xff]   ;;  %v15967_v34 = vld [vmem:[#allocation11 + $0x7ec] ss:$16 sps:$4 sm:$0xff]  }
0x17bf   :  { %10345 = vmatpush1.bf16.msra.mxu1 %v15902_v8  ;;  %10386 = vmatpush1.bf16.msra.mxu0 %v15905_v35  ;;  %v15962_v8 = vld [vmem:[#allocation11 + $0x7e0] ss:$16 sps:$4 sm:$0xff]   ;;  %v15965_v35 = vld [vmem:[#allocation11 + $0x7e8] ss:$16 sps:$4 sm:$0xff]  }
0x17c0   :  { %10346 = vmatprep.subr.bf16.mxu1 %v15910_v62  ;;  %10387 = vmatprep.subr.bf16.mxu0 %v15913_v38  ;;  %v10620_v62 = vrot.slane %v18950_v13, 6  ;;  %v15970_v38 = vld [vmem:[#allocation11 + $0x7c4] ss:$16 sps:$4 sm:$0xff]  }
0x17c3   :  { %10347 = vmatpush1.bf16.msra.mxu1 %v15908_v1  ;;  %10388 = vmatpush1.bf16.msra.mxu0 %v15911_v9  ;;  %v15973_v1 = vld [vmem:[#allocation11 + $0x7cc] ss:$16 sps:$4 sm:$0xff]  }
0x17c4   :  { %10526 = vmatprep.subr.bf16.mxu1 %v15916_v36  ;;  %10567 = vmatprep.subr.bf16.mxu0 %v15919_v14 }
0x17c6   :  { %12777 = vmatmul.mubr.msk.bf16.vlgmr.msra.gmra.mxu1 %vm6722_vm3, %v10248_v59  ;;  %12778 = vmatmul.mubr.msk.bf16.vlgmr.msra.gmra.mxu0 %vm6722_vm3, %v10248_v59  ;;  %v8159_v45 = vpop.f32.mrf.mxu1  ;;  %v8200_v58 = vpop.f32.mrf.mxu0  ;;  %v15971_v59 = vld [vmem:[#allocation11 + $0x7c8] ss:$16 sps:$4 sm:$0xff]  }
0x17c7   :  { %10527 = vmatpush1.bf16.msra.mxu1 %v15914_v46  ;;  %10568 = vmatpush1.bf16.msra.mxu0 %v15917_v7  ;;  %v15968_v7 = vld [vmem:[#allocation11 + $0x7c0] ss:$16 sps:$4 sm:$0xff]  }
0x17c8   :  { %v8161_v40 = vpop.f32.mrf.mxu1  ;;  %v8202_v55 = vpop.f32.mrf.mxu0  ;;  %10528 = vmatprep.subr.bf16.mxu1 %v15922_v10  ;;  %10569 = vmatprep.subr.bf16.mxu0 %v15925_v20 }
0x17c9   :  { %10550 = vmatprep.mubr.bf16.mxu1 %v16493_v48  ;;  %10591 = vmatprep.mubr.bf16.mxu0 %v16493_v48 }
0x17ca   :  { %v8163_v19 = vpop.f32.mrf.mxu1  ;;  %v8204_v49 = vpop.f32.mrf.mxu0 }
0x17cb   :  { %10529 = vmatpush1.bf16.msra.mxu1 %v15920_v3  ;;  %10570 = vmatpush1.bf16.msra.mxu0 %v15923_v21 }
0x17cc   :  { %v8164_v30 = vpop.f32.mrf.mxu1  ;;  %v8205_v27 = vpop.f32.mrf.mxu0  ;;  %10530 = vmatprep.subr.bf16.mxu1 %v15928_v32  ;;  %10571 = vmatprep.subr.bf16.mxu0 %v15931_v18  ;;  %v15974_v32 = vld [vmem:[#allocation11 + $0x7a0] ss:$16 sps:$4 sm:$0xff]   ;;  %v15977_v18 = vld [vmem:[#allocation11 + $0x7a8] ss:$16 sps:$4 sm:$0xff]  }
0x17cd   :  { %v15980_v30 = vld [vmem:[#allocation11 + $0x780] ss:$16 sps:$4 sm:$0xff]   ;;  %v15983_v27 = vld [vmem:[#allocation11 + $0x788] ss:$16 sps:$4 sm:$0xff]  }
0x17cf   :  { %10531 = vmatpush1.bf16.msra.mxu1 %v15926_v31  ;;  %10572 = vmatpush1.bf16.msra.mxu0 %v15929_v11  ;;  %v15982_v31 = vld [vmem:[#allocation11 + $0x784] ss:$16 sps:$4 sm:$0xff]   ;;  %v15985_v11 = vld [vmem:[#allocation11 + $0x78c] ss:$16 sps:$4 sm:$0xff]  }
0x17d0   :  { %10532 = vmatprep.subr.bf16.mxu1 %v15934_v39  ;;  %10573 = vmatprep.subr.bf16.mxu0 %v15937_v60 }
0x17d3   :  { %10533 = vmatpush1.bf16.msra.mxu1 %v15932_v61  ;;  %10574 = vmatpush1.bf16.msra.mxu0 %v15935_v56 }
0x17d4   :  { %10712 = vmatprep.subr.bf16.mxu1 %v15940_v15  ;;  %10753 = vmatprep.subr.bf16.mxu0 %v15943_v37 }
0x17d6   :  { %v8324_v5 = vpop.f32.mrf.mxu1  ;;  %v8365_v23 = vpop.f32.mrf.mxu0  ;;  %12795 = vmatmul.mubr.msk.bf16.vlgmr.msra.gmra.mxu1 %vm6722_vm3, %v10434_v25  ;;  %12796 = vmatmul.mubr.msk.bf16.vlgmr.msra.gmra.mxu0 %vm6722_vm3, %v10434_v25 }
0x17d7   :  { %v8325_v12 = vadd.f32 %v8324_v5, %v8159_v45  ;;  %v8366_v28 = vadd.f32 %v8365_v23, %v8200_v58  ;;  %10713 = vmatpush1.bf16.msra.mxu1 %v15938_v22  ;;  %10754 = vmatpush1.bf16.msra.mxu0 %v15941_v33  ;;  %v15976_v45 = vld [vmem:[#allocation11 + $0x7a4] ss:$16 sps:$4 sm:$0xff]   ;;  %v15979_v58 = vld [vmem:[#allocation11 + $0x7ac] ss:$16 sps:$4 sm:$0xff]  }
0x17d8   :  { %v8326_v24 = vpop.f32.mrf.mxu1  ;;  %v8367_v6 = vpop.f32.mrf.mxu0  ;;  %10714 = vmatprep.subr.bf16.mxu1 %v15946_v44  ;;  %10755 = vmatprep.subr.bf16.mxu0 %v15949_v4  ;;  %v15988_v23 = vld [vmem:[%s19464_s12 + $0xe4] ss:$16 sps:$4 sm:$0xff]  }
0x17d9   :  { %v8327_v41 = vadd.f32 %v8326_v24, %v8161_v40  ;;  %v8368_v0 = vadd.f32 %v8367_v6, %v8202_v55  ;;  %10736 = vmatprep.mubr.bf16.mxu1 %v16493_v48  ;;  %10777 = vmatprep.mubr.bf16.mxu0 %v16493_v48  ;;  %v15992_v24 = vld [vmem:[%s19464_s12 + $0xc0] ss:$16 sps:$4 sm:$0xff]  }
0x17da   :  { %v8328_v16 = vpop.f32.mrf.mxu1  ;;  %v8369_v51 = vpop.f32.mrf.mxu0  ;;  %v15995_v6 = vld [vmem:[%s19464_s12 + $0x2c0] ss:$16 sps:$4 sm:$0xff]  }
0x17db   :  { %10715 = vmatpush1.bf16.msra.mxu1 %v15944_v29  ;;  %10756 = vmatpush1.bf16.msra.mxu0 %v15947_v57  ;;  %v15994_v29 = vld [vmem:[%s19464_s12 + $0xc4] ss:$16 sps:$4 sm:$0xff]   ;;  %v15998_v16 = vld [vmem:[%s19464_s12 + $0xa0] ss:$16 sps:$4 sm:$0xff]  }
0x17dc   :  { %v8329_v17 = vpop.f32.mrf.mxu1  ;;  %v8370_v2 = vpop.f32.mrf.mxu0  ;;  %10716 = vmatprep.subr.bf16.mxu1 %v15952_v26  ;;  %10757 = vmatprep.subr.bf16.mxu0 %v15955_v42  ;;  %v15997_v57 = vld [vmem:[%s19464_s12 + $0x2c4] ss:$16 sps:$4 sm:$0xff]   ;;  %v16001_v51 = vld [vmem:[%s19464_s12 + $0x2a0] ss:$16 sps:$4 sm:$0xff]  }
0x17dd   :  { %v16000_v26 = vld [vmem:[%s19464_s12 + $0xa4] ss:$16 sps:$4 sm:$0xff]  }
0x17de   :  { %v16003_v42 = vld [vmem:[%s19464_s12 + $0x2a4] ss:$16 sps:$4 sm:$0xff]  }
0x17df   :  { %10717 = vmatpush1.bf16.msra.mxu1 %v15950_v53  ;;  %10758 = vmatpush1.bf16.msra.mxu0 %v15953_v43 }
0x17e0   :  { %10718 = vmatprep.subr.bf16.mxu1 %v15958_v50  ;;  %10759 = vmatprep.subr.bf16.mxu0 %v15961_v52 }
0x17e3   :  { %10719 = vmatpush1.bf16.msra.mxu1 %v15956_v47  ;;  %10760 = vmatpush1.bf16.msra.mxu0 %v15959_v54  ;;  %v16006_v47 = vld [vmem:[%s19464_s12 + $0x84] ss:$16 sps:$4 sm:$0xff]  }
0x17e4   :  { %10898 = vmatprep.subr.bf16.mxu1 %v15964_v63  ;;  %10939 = vmatprep.subr.bf16.mxu0 %v15967_v34  ;;  %v16009_v54 = vld [vmem:[%s19464_s12 + $0x284] ss:$16 sps:$4 sm:$0xff]  }
0x17e6   :  { %v8506_v9 = vpop.f32.mrf.mxu1  ;;  %v8547_v36 = vpop.f32.mrf.mxu0  ;;  %12813 = vmatmul.mubr.msk.bf16.vlgmr.msra.gmra.mxu1 %vm6722_vm3, %v10620_v62  ;;  %12814 = vmatmul.mubr.msk.bf16.vlgmr.msra.gmra.mxu0 %vm6722_vm3, %v10620_v62 }
0x17e7   :  { %v8554_v14 = vadd.f32 %v8506_v9, %v8325_v12  ;;  %v8556_v46 = vadd.f32 %v8547_v36, %v8366_v28  ;;  %10899 = vmatpush1.bf16.msra.mxu1 %v15962_v8  ;;  %10940 = vmatpush1.bf16.msra.mxu0 %v15965_v35  ;;  %v15989_v12 = vld [vmem:[%s19464_s12 + $0x2e0] ss:$16 sps:$4 sm:$0xff]   ;;  %v15991_v28 = vld [vmem:[%s19464_s12 + $0x2e4] ss:$16 sps:$4 sm:$0xff]  }
0x17e8   :  { %v8508_v10 = vpop.f32.mrf.mxu1  ;;  %v8549_v20 = vpop.f32.mrf.mxu0  ;;  %10900 = vmatprep.subr.bf16.mxu1 %v15970_v38  ;;  %10941 = vmatprep.subr.bf16.mxu0 %v15973_v1  ;;  %v16004_v8 = vld [vmem:[%s19464_s12 + $0x80] ss:$16 sps:$4 sm:$0xff]   ;;  %v16012_v9 = vld [vmem:[%s19464_s12 + $0x64] ss:$16 sps:$4 sm:$0xff]  }
0x17e9   :  { %v8555_v3 = vadd.f32 %v8508_v10, %v8327_v41  ;;  %v8557_v21 = vadd.f32 %v8549_v20, %v8368_v0  ;;  %10922 = vmatprep.mubr.bf16.mxu1 %v16493_v48  ;;  %10963 = vmatprep.mubr.bf16.mxu0 %v16493_v48  ;;  %v10806_v48 = vrot.slane %v18950_v13, 7  ;;  %v15986_v13 = vld [vmem:[%s19464_s12 + $0xe0] ss:$16 sps:$4 sm:$0xff]   ;;  %v16024_v20 = vld [vmem:[%s19464_s12 + $0x24] ss:$16 sps:$4 sm:$0xff]  }
0x17ea   :  { %v8510_v40 = vpop.f32.mrf.mxu1  ;;  %v8551_v55 = vpop.f32.mrf.mxu0  ;;  %v16007_v35 = vld [vmem:[%s19464_s12 + $0x280] ss:$16 sps:$4 sm:$0xff]  }
0x17eb   :  { %10901 = vmatpush1.bf16.msra.mxu1 %v15968_v7  ;;  %10942 = vmatpush1.bf16.msra.mxu0 %v15971_v59  ;;  %v16010_v1 = vld [vmem:[%s19464_s12 + $0x60] ss:$16 sps:$4 sm:$0xff]   ;;  %v16021_v7 = vld [vmem:[%s19464_s12 + $0x244] ss:$16 sps:$4 sm:$0xff]  }
0x17ec   :  { %v8511_v19 = vpop.f32.mrf.mxu1  ;;  %v8552_v49 = vpop.f32.mrf.mxu0  ;;  %10902 = vmatprep.subr.bf16.mxu1 %v15976_v45  ;;  %10943 = vmatprep.subr.bf16.mxu0 %v15979_v58  ;;  %v16013_v36 = vld [vmem:[%s19464_s12 + $0x260] ss:$16 sps:$4 sm:$0xff]   ;;  %v16027_v45 = vld [vmem:[%s19464_s12 + $0x224] ss:$16 sps:$4 sm:$0xff]  }
0x17ed   :  { %v16016_v59 = vld [vmem:[%s19464_s12 + $0x40] ss:$16 sps:$4 sm:$0xff]  }
0x17ee   :  { %v16019_v10 = vld [vmem:[%s19464_s12 + $0x240] ss:$16 sps:$4 sm:$0xff]  }
0x17ef   :  { %10903 = vmatpush1.bf16.msra.mxu1 %v15974_v32  ;;  %10944 = vmatpush1.bf16.msra.mxu0 %v15977_v18  ;;  %v16025_v40 = vld [vmem:[%s19464_s12 + $0x220] ss:$16 sps:$4 sm:$0xff]  }
0x17f0   :  { %10904 = vmatprep.subr.bf16.mxu1 %v15982_v31  ;;  %10945 = vmatprep.subr.bf16.mxu0 %v15985_v11  ;;  %v16030_v11 = vld [vmem:[%s19464_s12 + $0x4] ss:$16 sps:$4 sm:$0xff]  }
0x17f3   :  { %10905 = vmatpush1.bf16.msra.mxu1 %v15980_v30  ;;  %10946 = vmatpush1.bf16.msra.mxu0 %v15983_v27  ;;  %v16033_v30 = vld [vmem:[%s19464_s12 + $0x204] ss:$16 sps:$4 sm:$0xff]  }
0x17f4   :  { %11796 = vmatprep.subr.bf16.mxu1 %v15988_v23  ;;  %11837 = vmatprep.subr.bf16.mxu0 %v15991_v28  ;;  %v16051_v23 = vld [vmem:[%s19464_s12 + $0x3a4] ss:$16 sps:$4 sm:$0xff]  }
0x17f6   :  { %v8692_v39 = vpop.f32.mrf.mxu1  ;;  %v8733_v60 = vpop.f32.mrf.mxu0  ;;  %12831 = vmatmul.mubr.msk.bf16.vlgmr.msra.gmra.mxu1 %vm6722_vm3, %v10806_v48  ;;  %12832 = vmatmul.mubr.msk.bf16.vlgmr.msra.gmra.mxu0 %vm6722_vm3, %v10806_v48 }
0x17f7   :  { %v8740_v61 = vadd.f32 %v8692_v39, %v8554_v14  ;;  %v8742_v56 = vadd.f32 %v8733_v60, %v8556_v46  ;;  %11797 = vmatpush1.bf16.msra.mxu1 %v15986_v13  ;;  %11838 = vmatpush1.bf16.msra.mxu0 %v15989_v12  ;;  %v16015_v14 = vld [vmem:[%s19464_s12 + $0x264] ss:$16 sps:$4 sm:$0xff]   ;;  %v16028_v39 = vld [vmem:[%s19464_s12] ss:$16 sps:$4 sm:$0xff]  }
0x17f8   :  { %v8694_v15 = vpop.f32.mrf.mxu1  ;;  %v8735_v37 = vpop.f32.mrf.mxu0  ;;  %11798 = vmatprep.subr.bf16.mxu1 %v15994_v29  ;;  %11839 = vmatprep.subr.bf16.mxu0 %v15997_v57  ;;  %v16018_v46 = vld [vmem:[%s19464_s12 + $0x44] ss:$16 sps:$4 sm:$0xff]   ;;  %v16031_v60 = vld [vmem:[%s19464_s12 + $0x200] ss:$16 sps:$4 sm:$0xff]  }
0x17f9   :  { %v8741_v22 = vadd.f32 %v8694_v15, %v8555_v3  ;;  %v8743_v33 = vadd.f32 %v8735_v37, %v8557_v21  ;;  %v16022_v21 = vld [vmem:[%s19464_s12 + $0x20] ss:$16 sps:$4 sm:$0xff]   ;;  %v16036_v37 = vld [vmem:[%s19464_s12 + $0x1e4] ss:$16 sps:$4 sm:$0xff]  }
0x17fa   :  { %v8696_v25 = vpop.f32.mrf.mxu1  ;;  %v8737_v44 = vpop.f32.mrf.mxu0  ;;  %v16034_v15 = vld [vmem:[%s19464_s12 + $0x1e0] ss:$16 sps:$4 sm:$0xff]   ;;  %v16048_v13 = vld [vmem:[%s19464_s12 + $0x1a4] ss:$16 sps:$4 sm:$0xff]  }
0x17fb   :  { %11799 = vmatpush1.bf16.msra.mxu1 %v15992_v24  ;;  %11840 = vmatpush1.bf16.msra.mxu0 %v15995_v6  ;;  %v16042_v25 = vld [vmem:[%s19464_s12 + $0x1c4] ss:$16 sps:$4 sm:$0xff]   ;;  %v16046_v29 = vld [vmem:[%s19464_s12 + $0x1a0] ss:$16 sps:$4 sm:$0xff]  }
0x17fc   :  { %v8697_v4 = vpop.f32.mrf.mxu1  ;;  %v8738_v5 = vpop.f32.mrf.mxu0  ;;  %11800 = vmatprep.subr.bf16.mxu1 %v16000_v26  ;;  %11841 = vmatprep.subr.bf16.mxu0 %v16003_v42  ;;  %v16045_v44 = vld [vmem:[%s19464_s12 + $0x3c4] ss:$16 sps:$4 sm:$0xff]   ;;  %v16049_v57 = vld [vmem:[%s19464_s12 + $0x3a0] ss:$16 sps:$4 sm:$0xff]  }
0x17fd   :  { %v16040_v4 = vld [vmem:[%s19464_s12 + $0x1c0] ss:$16 sps:$4 sm:$0xff]  }
0x17fe   :  { %v16043_v5 = vld [vmem:[%s19464_s12 + $0x3c0] ss:$16 sps:$4 sm:$0xff]  }
0x17ff   :  { %11801 = vmatpush1.bf16.msra.mxu1 %v15998_v16  ;;  %11842 = vmatpush1.bf16.msra.mxu0 %v16001_v51  ;;  %v16054_v16 = vld [vmem:[%s19464_s12 + $0x184] ss:$16 sps:$4 sm:$0xff]  }
0x1800   :  { %11802 = vmatprep.subr.bf16.mxu1 %v16006_v47  ;;  %11843 = vmatprep.subr.bf16.mxu0 %v16009_v54  ;;  %v16057_v51 = vld [vmem:[%s19464_s12 + $0x384] ss:$16 sps:$4 sm:$0xff]   ;;  %v16058_v47 = vld [vmem:[%s19464_s12 + $0x160] ss:$16 sps:$4 sm:$0xff]  }
0x1801   :  { %v16060_v54 = vld [vmem:[%s19464_s12 + $0x164] ss:$16 sps:$4 sm:$0xff]  }
0x1803   :  { %11803 = vmatpush1.bf16.msra.mxu1 %v16004_v8  ;;  %11844 = vmatpush1.bf16.msra.mxu0 %v16007_v35  ;;  %v16066_v8 = vld [vmem:[%s19464_s12 + $0x144] ss:$16 sps:$4 sm:$0xff]  }
0x1804   :  { %11804 = vmatprep.subr.bf16.mxu1 %v16012_v9  ;;  %11845 = vmatprep.subr.bf16.mxu0 %v16015_v14  ;;  %v16069_v35 = vld [vmem:[%s19464_s12 + $0x344] ss:$16 sps:$4 sm:$0xff]  }
0x1805   :  { %v16075_v9 = vld [vmem:[%s19464_s12 + $0x324] ss:$16 sps:$4 sm:$0xff]  }
0x1806   :  { %v8878_v41 = vpop.f32.mrf.mxu1  ;;  %v8919_v0 = vpop.f32.mrf.mxu0 }
0x1807   :  { %v8926_v53 = vadd.f32 %v8878_v41, %v8740_v61  ;;  %v8928_v43 = vadd.f32 %v8919_v0, %v8742_v56  ;;  %11805 = vmatpush1.bf16.msra.mxu1 %v16010_v1  ;;  %11846 = vmatpush1.bf16.msra.mxu0 %v16013_v36  ;;  %v16072_v1 = vld [vmem:[%s19464_s12 + $0x124] ss:$16 sps:$4 sm:$0xff]  }
0x1808   :  { %v8880_v17 = vpop.f32.mrf.mxu1  ;;  %v8921_v2 = vpop.f32.mrf.mxu0  ;;  %11806 = vmatprep.subr.bf16.mxu1 %v16018_v46  ;;  %11847 = vmatprep.subr.bf16.mxu0 %v16021_v7  ;;  %v16070_v46 = vld [vmem:[%s19464_s12 + $0x120] ss:$16 sps:$4 sm:$0xff]  }
0x1809   :  { %v8927_v50 = vadd.f32 %v8880_v17, %v8741_v22  ;;  %v8929_v52 = vadd.f32 %v8921_v2, %v8743_v33  ;;  %v16037_v22 = vld [vmem:[%s19464_s12 + $0x3e0] ss:$16 sps:$4 sm:$0xff]   ;;  %v16039_v33 = vld [vmem:[%s19464_s12 + $0x3e4] ss:$16 sps:$4 sm:$0xff]  }
0x180a   :  { %v8882_v63 = vpop.f32.mrf.mxu1  ;;  %v8923_v34 = vpop.f32.mrf.mxu0  ;;  %v16052_v17 = vld [vmem:[%s19464_s12 + $0x180] ss:$16 sps:$4 sm:$0xff]  }
0x180b   :  { %11807 = vmatpush1.bf16.msra.mxu1 %v16016_v59  ;;  %11848 = vmatpush1.bf16.msra.mxu0 %v16019_v10  ;;  %v16055_v2 = vld [vmem:[%s19464_s12 + $0x380] ss:$16 sps:$4 sm:$0xff]   ;;  %v16063_v34 = vld [vmem:[%s19464_s12 + $0x364] ss:$16 sps:$4 sm:$0xff]  }
0x180c   :  { %v8883_v62 = vpop.f32.mrf.mxu1  ;;  %v8924_v38 = vpop.f32.mrf.mxu0  ;;  %11808 = vmatprep.subr.bf16.mxu1 %v16024_v20  ;;  %11849 = vmatprep.subr.bf16.mxu0 %v16027_v45  ;;  %v16061_v63 = vld [vmem:[%s19464_s12 + $0x360] ss:$16 sps:$4 sm:$0xff]  }
0x180d   :  { %v16064_v62 = vld [vmem:[%s19464_s12 + $0x140] ss:$16 sps:$4 sm:$0xff]  }
0x180e   :  { %v16067_v38 = vld [vmem:[%s19464_s12 + $0x340] ss:$16 sps:$4 sm:$0xff]  }
0x180f   :  { %11809 = vmatpush1.bf16.msra.mxu1 %v16022_v21  ;;  %11850 = vmatpush1.bf16.msra.mxu0 %v16025_v40  ;;  %v16073_v7 = vld [vmem:[%s19464_s12 + $0x320] ss:$16 sps:$4 sm:$0xff]   ;;  %v16078_v21 = vld [vmem:[%s19464_s12 + $0x104] ss:$16 sps:$4 sm:$0xff]  }
0x1810   :  { %11810 = vmatprep.subr.bf16.mxu1 %v16030_v11  ;;  %11851 = vmatprep.subr.bf16.mxu0 %v16033_v30  ;;  %v16081_v40 = vld [vmem:[%s19464_s12 + $0x304] ss:$16 sps:$4 sm:$0xff]   ;;  %v16084_v11 = vld [vmem:[%s19464_s12 + $0xec] ss:$16 sps:$4 sm:$0xff]  }
0x1811   :  { %v16087_v30 = vld [vmem:[%s19464_s12 + $0x2ec] ss:$16 sps:$4 sm:$0xff]  }
0x1813   :  { %11811 = vmatpush1.bf16.msra.mxu1 %v16028_v39  ;;  %11852 = vmatpush1.bf16.msra.mxu0 %v16031_v60 }
0x1814   :  { %11812 = vmatprep.subr.bf16.mxu1 %v16036_v37  ;;  %11853 = vmatprep.subr.bf16.mxu0 %v16039_v33 }
0x1816   :  { %v9064_v58 = vpop.f32.mrf.mxu1  ;;  %v9105_v3 = vpop.f32.mrf.mxu0 }
0x1817   :  { %v9112_v55 = vadd.f32 %v9064_v58, %v8926_v53  ;;  %v9114_v32 = vadd.f32 %v9105_v3, %v8928_v43  ;;  %11813 = vmatpush2.bf16.msra.mxu1 %v16034_v15  ;;  %11854 = vmatpush2.bf16.msra.mxu0 %v16037_v22 }
0x1818   :  { %v9066_v18 = vpop.f32.mrf.mxu1  ;;  %v9107_v19 = vpop.f32.mrf.mxu0  ;;  %11814 = vmatprep.subr.bf16.mxu1 %v16042_v25  ;;  %11855 = vmatprep.subr.bf16.mxu0 %v16045_v44 }
0x1819   :  { %v9113_v49 = vadd.f32 %v9066_v18, %v8927_v50  ;;  %v9115_v31 = vadd.f32 %v9107_v19, %v8929_v52  ;;  %v16076_v18 = vld [vmem:[%s19464_s12 + $0x100] ss:$16 sps:$4 sm:$0xff]  }
0x181a   :  { %v9068_v27 = vpop.f32.mrf.mxu1  ;;  %v9109_v48 = vpop.f32.mrf.mxu0  ;;  %v16079_v19 = vld [vmem:[%s19464_s12 + $0x300] ss:$16 sps:$4 sm:$0xff]  }
0x181b   :  { %11815 = vmatpush2.bf16.msra.mxu1 %v16040_v4  ;;  %11856 = vmatpush2.bf16.msra.mxu0 %v16043_v5 }
0x181c   :  { %v9069_v61 = vpop.f32.mrf.mxu1  ;;  %v9110_v56 = vpop.f32.mrf.mxu0  ;;  %11816 = vmatprep.subr.bf16.mxu1 %v16048_v13  ;;  %11857 = vmatprep.subr.bf16.mxu0 %v16051_v23 }
0x181f   :  { %11817 = vmatpush2.bf16.msra.mxu1 %v16046_v29  ;;  %11858 = vmatpush2.bf16.msra.mxu0 %v16049_v57 }
0x1820   :  { %11818 = vmatprep.subr.bf16.mxu1 %v16054_v16  ;;  %11859 = vmatprep.subr.bf16.mxu0 %v16057_v51 }
0x1823   :  { %11819 = vmatpush2.bf16.msra.mxu1 %v16052_v17  ;;  %11860 = vmatpush2.bf16.msra.mxu0 %v16055_v2 }
0x1824   :  { %11820 = vmatprep.subr.bf16.mxu1 %v16060_v54  ;;  %11861 = vmatprep.subr.bf16.mxu0 %v16063_v34 }
0x1826   :  { %v9250_v12 = vpop.f32.mrf.mxu1  ;;  %v9291_v28 = vpop.f32.mrf.mxu0 }
0x1827   :  { %v9298_v24 = vadd.f32 %v9250_v12, %v9112_v55  ;;  %v9300_v6 = vadd.f32 %v9291_v28, %v9114_v32  ;;  %11821 = vmatpush2.bf16.msra.mxu1 %v16058_v47  ;;  %11862 = vmatpush2.bf16.msra.mxu0 %v16061_v63 }
0x1828   :  { %v9252_v26 = vpop.f32.mrf.mxu1  ;;  %v9293_v42 = vpop.f32.mrf.mxu0  ;;  %11822 = vmatprep.subr.bf16.mxu1 %v16066_v8  ;;  %11863 = vmatprep.subr.bf16.mxu0 %v16069_v35 }
0x1829   :  { %v9299_v41 = vadd.f32 %v9252_v26, %v9113_v49  ;;  %v9301_v0 = vadd.f32 %v9293_v42, %v9115_v31 }
0x182a   :  { %v9254_v53 = vpop.f32.mrf.mxu1  ;;  %v9295_v43 = vpop.f32.mrf.mxu0 }
0x182b   :  { %11823 = vmatpush2.bf16.msra.mxu1 %v16064_v62  ;;  %11864 = vmatpush2.bf16.msra.mxu0 %v16067_v38 }
0x182c   :  { %v9255_v50 = vpop.f32.mrf.mxu1  ;;  %v9296_v52 = vpop.f32.mrf.mxu0  ;;  %11824 = vmatprep.subr.bf16.mxu1 %v16072_v1  ;;  %11865 = vmatprep.subr.bf16.mxu0 %v16075_v9 }
0x182f   :  { %11825 = vmatpush2.bf16.msra.mxu1 %v16070_v46  ;;  %11866 = vmatpush2.bf16.msra.mxu0 %v16073_v7 }
0x1830   :  { %11826 = vmatprep.subr.bf16.mxu1 %v16078_v21  ;;  %11867 = vmatprep.subr.bf16.mxu0 %v16081_v40 }
0x1833   :  { %11827 = vmatpush2.bf16.msra.mxu1 %v16076_v18  ;;  %11868 = vmatpush2.bf16.msra.mxu0 %v16079_v19 }
0x1834   :  { %11878 = vmatprep.subr.bf16.mxu1 %v16084_v11  ;;  %11919 = vmatprep.subr.bf16.mxu0 %v16087_v30 }
0x1836   :  { %v9436_v36 = vpop.f32.mrf.mxu1  ;;  %v9477_v14 = vpop.f32.mrf.mxu0 }
0x1837   :  { %v9484_v59 = vadd.f32 %v9436_v36, %v9298_v24  ;;  %v9486_v10 = vadd.f32 %v9477_v14, %v9300_v6 }
0x1838   :  { %v9438_v20 = vpop.f32.mrf.mxu1  ;;  %v9479_v45 = vpop.f32.mrf.mxu0 }
0x1839   :  { %v9485_v58 = vadd.f32 %v9438_v20, %v9299_v41  ;;  %v9487_v3 = vadd.f32 %v9479_v45, %v9301_v0 }
0x183a   :  { %v9440_v55 = vpop.f32.mrf.mxu1  ;;  %v9481_v32 = vpop.f32.mrf.mxu0 }
0x183c   :  { %v9441_v49 = vpop.f32.mrf.mxu1  ;;  %v9482_v31 = vpop.f32.mrf.mxu0 }
0x1846   :  { %v9621_v27 = vpop.f32.mrf.mxu1  ;;  %v9662_v48 = vpop.f32.mrf.mxu0 }
0x1847   :  { %v9669_v39 = vadd.f32 %v9621_v27, %v9484_v59  ;;  %v9671_v60 = vadd.f32 %v9662_v48, %v9486_v10 }
0x1848   :  { %v9623_v61 = vpop.f32.mrf.mxu1  ;;  %v9664_v56 = vpop.f32.mrf.mxu0 }
0x1849   :  { %v9670_v15 = vadd.f32 %v9623_v61, %v9485_v58  ;;  %v9672_v37 = vadd.f32 %v9664_v56, %v9487_v3 }
0x184a   :  { %v9625_v22 = vpop.f32.mrf.mxu1  ;;  %v9666_v33 = vpop.f32.mrf.mxu0 }
0x184c   :  { %v9626_v25 = vpop.f32.mrf.mxu1  ;;  %v9667_v44 = vpop.f32.mrf.mxu0 }
0x1856   :  { %v9808_v4 = vpop.f32.mrf.mxu1  ;;  %v9849_v5 = vpop.f32.mrf.mxu0 }
0x1857   :  { %v9856_v13 = vadd.f32 %v9808_v4, %v9669_v39  ;;  %v9858_v23 = vadd.f32 %v9849_v5, %v9671_v60  ;;  %v10978_v39 = vlaneseq }
0x1858   :  { %v9810_v12 = vpop.f32.mrf.mxu1  ;;  %v9851_v28 = vpop.f32.mrf.mxu0 }
0x1859   :  { %v9857_v29 = vadd.f32 %v9810_v12, %v9670_v15  ;;  %v9859_v57 = vadd.f32 %v9851_v28, %v9672_v37  ;;  %v19232_v56 = vshrl.u32 %v10978_v39, 7  ;;  %v16111_v39 = vld [vmem:[%s19464_s12 + $0x26c] ss:$16 sps:$4 sm:$0xff]  }
0x185a   :  { %v9812_v24 = vpop.f32.mrf.mxu1  ;;  %v9853_v6 = vpop.f32.mrf.mxu0 }
0x185b   :  { %v10980_v4 = vsub.s32 0, %v19232_v56  ;;  %v10988_v5 = vsub.s32 2, %v19232_v56  ;;  %v10976_v24 = vld [vmem:[#allocation13] sm:$0xf] }
0x185c   :  { %v9813_v26 = vpop.f32.mrf.mxu1  ;;  %v9854_v42 = vpop.f32.mrf.mxu0 }
0x1866   :  { %v9994_v41 = vpop.f32.mrf.mxu1  ;;  %v10035_v0 = vpop.f32.mrf.mxu0 }
0x1867   :  { %v10042_v16 = vadd.f32 %v9994_v41, %v9856_v13  ;;  %v10044_v51 = vadd.f32 %v10035_v0, %v9858_v23  ;;  %v10984_v13 = vsub.s32 1, %v19232_v56  ;;  %v10992_v23 = vsub.s32 3, %v19232_v56 }
0x1868   :  { %v9996_v53 = vpop.f32.mrf.mxu1  ;;  %v10037_v43 = vpop.f32.mrf.mxu0 }
0x1869   :  { %v10043_v17 = vadd.f32 %v9996_v53, %v9857_v29  ;;  %v10045_v2 = vadd.f32 %v10037_v43, %v9859_v57  ;;  %v10989_v53 = vrot.slane %v10976_v24, %v10988_v5  ;;  %v10985_v43 = vrot.slane %v10976_v24, %v10984_v13 }
0x186a   :  { %v9998_v50 = vpop.f32.mrf.mxu1  ;;  %v10039_v52 = vpop.f32.mrf.mxu0 }
0x186c   :  { %v9999_v47 = vpop.f32.mrf.mxu1  ;;  %v10040_v54 = vpop.f32.mrf.mxu0 }
0x1876   :  { %v10180_v63 = vpop.f32.mrf.mxu1  ;;  %v10221_v34 = vpop.f32.mrf.mxu0 }
0x1877   :  { %v10228_v15 = vadd.f32 %v10180_v63, %v10042_v16  ;;  %v10230_v37 = vadd.f32 %v10221_v34, %v10044_v51  ;;  %v10981_v16 = vrot.slane %v10976_v24, %v10980_v4 }
0x1878   :  { %v10182_v8 = vpop.f32.mrf.mxu1  ;;  %v10223_v35 = vpop.f32.mrf.mxu0 }
0x1879   :  { %v10229_v22 = vadd.f32 %v10182_v8, %v10043_v17  ;;  %v10231_v33 = vadd.f32 %v10223_v35, %v10045_v2  ;;  %v10993_v17 = vrot.slane %v10976_v24, %v10992_v23  ;;  %v16124_v24 = vld [vmem:[%s19464_s12 + $0x8] ss:$16 sps:$4 sm:$0xff]  }
0x187a   :  { %v10184_v62 = vpop.f32.mrf.mxu1  ;;  %v10225_v38 = vpop.f32.mrf.mxu0 }
0x187c   :  { %v10185_v1 = vpop.f32.mrf.mxu1  ;;  %v10226_v9 = vpop.f32.mrf.mxu0 }
0x1886   :  { %v10366_v36 = vpop.f32.mrf.mxu1  ;;  %v10407_v14 = vpop.f32.mrf.mxu0 }
0x1887   :  { %v10414_v25 = vadd.f32 %v10366_v36, %v10228_v15  ;;  %v10416_v44 = vadd.f32 %v10407_v14, %v10230_v37  ;;  %v16114_v15 = vld [vmem:[%s19464_s12 + $0x4c] ss:$16 sps:$4 sm:$0xff]  }
0x1888   :  { %v10368_v46 = vpop.f32.mrf.mxu1  ;;  %v10409_v7 = vpop.f32.mrf.mxu0  ;;  %v16117_v37 = vld [vmem:[%s19464_s12 + $0x24c] ss:$16 sps:$4 sm:$0xff]  }
0x1889   :  { %v10415_v12 = vadd.f32 %v10368_v46, %v10229_v22  ;;  %v10417_v28 = vadd.f32 %v10409_v7, %v10231_v33  ;;  %v16112_v22 = vld [vmem:[%s19464_s12 + $0x48] ss:$16 sps:$4 sm:$0xff]  }
0x188a   :  { %v10370_v59 = vpop.f32.mrf.mxu1  ;;  %v10411_v10 = vpop.f32.mrf.mxu0  ;;  %v16115_v33 = vld [vmem:[%s19464_s12 + $0x248] ss:$16 sps:$4 sm:$0xff]  }
0x188b   :  { %v16082_v10 = vld [vmem:[%s19464_s12 + $0xe8] ss:$16 sps:$4 sm:$0xff]  }
0x188c   :  { %v10371_v20 = vpop.f32.mrf.mxu1  ;;  %v10412_v45 = vpop.f32.mrf.mxu0 }
0x188d   :  { %v16085_v20 = vld [vmem:[%s19464_s12 + $0x2e8] ss:$16 sps:$4 sm:$0xff]  }
0x1896   :  { %v10552_v58 = vpop.f32.mrf.mxu1  ;;  %v10593_v3 = vpop.f32.mrf.mxu0 }
0x1897   :  { %v10600_v29 = vadd.f32 %v10552_v58, %v10414_v25  ;;  %v10602_v57 = vadd.f32 %v10593_v3, %v10416_v44  ;;  %v16090_v3 = vld [vmem:[%s19464_s12 + $0xcc] ss:$16 sps:$4 sm:$0xff]  }
0x1898   :  { %v10554_v21 = vpop.f32.mrf.mxu1  ;;  %v10595_v40 = vpop.f32.mrf.mxu0  ;;  %v16120_v25 = vld [vmem:[%s19464_s12 + $0x2c] ss:$16 sps:$4 sm:$0xff]  }
0x1899   :  { %v10601_v6 = vadd.f32 %v10554_v21, %v10415_v12  ;;  %v10603_v26 = vadd.f32 %v10595_v40, %v10417_v28  ;;  %v16093_v21 = vld [vmem:[%s19464_s12 + $0x2cc] ss:$16 sps:$4 sm:$0xff]   ;;  %v16088_v40 = vld [vmem:[%s19464_s12 + $0xc8] ss:$16 sps:$4 sm:$0xff]  }
0x189a   :  { %v10556_v55 = vpop.f32.mrf.mxu1  ;;  %v10597_v32 = vpop.f32.mrf.mxu0  ;;  %v16123_v44 = vld [vmem:[%s19464_s12 + $0x22c] ss:$16 sps:$4 sm:$0xff]   ;;  %v16118_v12 = vld [vmem:[%s19464_s12 + $0x28] ss:$16 sps:$4 sm:$0xff]  }
0x189b   :  { %v16091_v55 = vld [vmem:[%s19464_s12 + $0x2c8] ss:$16 sps:$4 sm:$0xff]   ;;  %v16096_v32 = vld [vmem:[%s19464_s12 + $0xac] ss:$16 sps:$4 sm:$0xff]  }
0x189c   :  { %v10557_v18 = vpop.f32.mrf.mxu1  ;;  %v10598_v19 = vpop.f32.mrf.mxu0  ;;  %v16121_v28 = vld [vmem:[%s19464_s12 + $0x228] ss:$16 sps:$4 sm:$0xff]  }
0x189d   :  { %v16099_v18 = vld [vmem:[%s19464_s12 + $0x2ac] ss:$16 sps:$4 sm:$0xff]   ;;  %v16094_v19 = vld [vmem:[%s19464_s12 + $0xa8] ss:$16 sps:$4 sm:$0xff]  }
0x18a6   :  { %v10738_v49 = vpop.f32.mrf.mxu1  ;;  %v10779_v31 = vpop.f32.mrf.mxu0 }
0x18a7   :  { %v10786_v42 = vadd.f32 %v10738_v49, %v10600_v29  ;;  %v10788_v41 = vadd.f32 %v10779_v31, %v10602_v57  ;;  %v16097_v49 = vld [vmem:[%s19464_s12 + $0x2a8] ss:$16 sps:$4 sm:$0xff]   ;;  %v16102_v31 = vld [vmem:[%s19464_s12 + $0x8c] ss:$16 sps:$4 sm:$0xff]  }
0x18a8   :  { %v10740_v11 = vpop.f32.mrf.mxu1  ;;  %v10781_v30 = vpop.f32.mrf.mxu0  ;;  %v16126_v29 = vld [vmem:[%s19464_s12 + $0xc] ss:$16 sps:$4 sm:$0xff]  }
0x18a9   :  { %v10787_v2 = vadd.f32 %v10740_v11, %v10601_v6  ;;  %v10789_v50 = vadd.f32 %v10781_v30, %v10603_v26  ;;  %v16105_v11 = vld [vmem:[%s19464_s12 + $0x28c] ss:$16 sps:$4 sm:$0xff]   ;;  %v16100_v30 = vld [vmem:[%s19464_s12 + $0x88] ss:$16 sps:$4 sm:$0xff]  }
0x18aa   :  { %v10742_v27 = vpop.f32.mrf.mxu1  ;;  %v10783_v48 = vpop.f32.mrf.mxu0  ;;  %v16129_v57 = vld [vmem:[%s19464_s12 + $0x20c] ss:$16 sps:$4 sm:$0xff]   ;;  %v16127_v6 = vld [vmem:[%s19464_s12 + $0x208] ss:$16 sps:$4 sm:$0xff]  }
0x18ab   :  { %v16103_v27 = vld [vmem:[%s19464_s12 + $0x288] ss:$16 sps:$4 sm:$0xff]   ;;  %v16108_v48 = vld [vmem:[%s19464_s12 + $0x6c] ss:$16 sps:$4 sm:$0xff]  }
0x18ac   :  { %v10743_v60 = vpop.f32.mrf.mxu1  ;;  %v10784_v61 = vpop.f32.mrf.mxu0  ;;  %v16132_v26 = vld [vmem:[%s19464_s12 + $0x1ec] ss:$16 sps:$4 sm:$0xff]  }
0x18ad   :  { %v16106_v60 = vld [vmem:[%s19464_s12 + $0x68] ss:$16 sps:$4 sm:$0xff]  }
0x18ae   :  { %v16109_v61 = vld [vmem:[%s19464_s12 + $0x268] ss:$16 sps:$4 sm:$0xff]  }
0x18b6   :  { %v10924_v0 = vpop.f32.mrf.mxu1  ;;  %v10965_v51 = vpop.f32.mrf.mxu0 }
0x18b7   :  { %v10972_v52 = vadd.f32 %v10924_v0, %v10786_v42  ;;  %v10974_v47 = vadd.f32 %v10965_v51, %v10788_v41  ;;  %v16135_v42 = vld [vmem:[%s19464_s12 + $0x3ec] ss:$16 sps:$4 sm:$0xff]   ;;  %v16130_v41 = vld [vmem:[%s19464_s12 + $0x1e8] ss:$16 sps:$4 sm:$0xff]  }
0x18b8   :  { %v10926_v54 = vpop.f32.mrf.mxu1  ;;  %v10967_v63 = vpop.f32.mrf.mxu0  ;;  %v16133_v0 = vld [vmem:[%s19464_s12 + $0x3e8] ss:$16 sps:$4 sm:$0xff]   ;;  %v16141_v51 = vld [vmem:[%s19464_s12 + $0x3cc] ss:$16 sps:$4 sm:$0xff]  }
0x18b9   :  { %v10973_v34 = vadd.f32 %v10926_v54, %v10787_v2  ;;  %v10975_v8 = vadd.f32 %v10967_v63, %v10789_v50  ;;  %v10998_v35 = vadd.f32 %v10981_v16, %v10972_v52  ;;  %v11000_v62 = vadd.f32 %v10989_v53, %v10974_v47  ;;  %v16138_v16 = vld [vmem:[%s19464_s12 + $0x1cc] ss:$16 sps:$4 sm:$0xff]   ;;  %v16136_v53 = vld [vmem:[%s19464_s12 + $0x1c8] ss:$16 sps:$4 sm:$0xff]  }
0x18ba   :  { %v10928_v38 = vpop.f32.mrf.mxu1  ;;  %v10969_v1 = vpop.f32.mrf.mxu0  ;;  %v16147_v2 = vld [vmem:[%s19464_s12 + $0x3ac] ss:$16 sps:$4 sm:$0xff]   ;;  %v16142_v50 = vld [vmem:[%s19464_s12 + $0x1a8] ss:$16 sps:$4 sm:$0xff]  }
0x18bb   :  { %v10999_v9 = vadd.f32 %v10985_v43, %v10973_v34  ;;  %v11001_v36 = vadd.f32 %v10993_v17, %v10975_v8  ;;  %v19252_v45 = vpack.c.bf16 %v10998_v35, %v10998_v35  ;;  %v19254_v58 = vpack.c.bf16 %v11000_v62, %v11000_v62  ;;  %v16139_v43 = vld [vmem:[%s19464_s12 + $0x3c8] ss:$16 sps:$4 sm:$0xff]   ;;  %v16144_v17 = vld [vmem:[%s19464_s12 + $0x1ac] ss:$16 sps:$4 sm:$0xff]  }
0x18bc   :  { %v10929_v14 = vpop.f32.mrf.mxu1  ;;  %v10970_v46 = vpop.f32.mrf.mxu0  ;;  %v16145_v52 = vld [vmem:[%s19464_s12 + $0x3a8] ss:$16 sps:$4 sm:$0xff]   ;;  %v16150_v47 = vld [vmem:[%s19464_s12 + $0x18c] ss:$16 sps:$4 sm:$0xff]  }
0x18bd   :  { %v11003_v7 = vpack.c.bf16 %v10999_v9, %v10999_v9  ;;  %v11005_v59 = vpack.c.bf16 %v11001_v36, %v11001_v36  ;;  %v16153_v54 = vld [vmem:[%s19464_s12 + $0x38c] ss:$16 sps:$4 sm:$0xff]   ;;  %v16148_v63 = vld [vmem:[%s19464_s12 + $0x188] ss:$16 sps:$4 sm:$0xff]  }
0x18be   :  { %v16151_v34 = vld [vmem:[%s19464_s12 + $0x388] ss:$16 sps:$4 sm:$0xff]   ;;  %v16156_v8 = vld [vmem:[%s19464_s12 + $0x16c] ss:$16 sps:$4 sm:$0xff]  }
0x18bf   :  { %11828 = vmatprep.mubr.bf16.mxu1 %v11003_v7  ;;  %11869 = vmatprep.mubr.bf16.mxu0 %v11005_v59  ;;  %v16159_v35 = vld [vmem:[%s19464_s12 + $0x36c] ss:$16 sps:$4 sm:$0xff]   ;;  %v16154_v62 = vld [vmem:[%s19464_s12 + $0x168] ss:$16 sps:$4 sm:$0xff]  }
0x18c0   :  { %11829 = vmatmul.mubr.bf16.vlgmr.msra.gmra.mxu1 %v19252_v45  ;;  %11870 = vmatmul.mubr.bf16.vlgmr.msra.gmra.mxu0 %v19254_v58  ;;  %v16157_v38 = vld [vmem:[%s19464_s12 + $0x368] ss:$16 sps:$4 sm:$0xff]   ;;  %v16162_v1 = vld [vmem:[%s19464_s12 + $0x14c] ss:$16 sps:$4 sm:$0xff]  }
0x18c1   :  { %11879 = vmatpush1.bf16.msra.mxu1 %v16082_v10  ;;  %11920 = vmatpush1.bf16.msra.mxu0 %v16085_v20  ;;  %v16165_v9 = vld [vmem:[%s19464_s12 + $0x34c] ss:$16 sps:$4 sm:$0xff]   ;;  %v16160_v36 = vld [vmem:[%s19464_s12 + $0x148] ss:$16 sps:$4 sm:$0xff]  }
0x18c2   :  { %11910 = vmatprep.mubr.bf16.mxu1 %v11003_v7  ;;  %11951 = vmatprep.mubr.bf16.mxu0 %v11005_v59  ;;  %v16163_v14 = vld [vmem:[%s19464_s12 + $0x348] ss:$16 sps:$4 sm:$0xff]   ;;  %v16168_v46 = vld [vmem:[%s19464_s12 + $0x12c] ss:$16 sps:$4 sm:$0xff]  }
0x18c3   :  { %11880 = vmatprep.subr.bf16.mxu1 %v16090_v3  ;;  %11921 = vmatprep.subr.bf16.mxu0 %v16093_v21  ;;  %v16171_v7 = vld [vmem:[%s19464_s12 + $0x32c] ss:$16 sps:$4 sm:$0xff]   ;;  %v16166_v59 = vld [vmem:[%s19464_s12 + $0x128] ss:$16 sps:$4 sm:$0xff]  }
0x18c4   :  { %v16169_v10 = vld [vmem:[%s19464_s12 + $0x328] ss:$16 sps:$4 sm:$0xff]   ;;  %v16174_v20 = vld [vmem:[%s19464_s12 + $0x10c] ss:$16 sps:$4 sm:$0xff]  }
0x18c5   :  { %11881 = vmatpush1.bf16.msra.mxu1 %v16088_v40  ;;  %11922 = vmatpush1.bf16.msra.mxu0 %v16091_v55  ;;  %v16177_v3 = vld [vmem:[%s19464_s12 + $0x30c] ss:$16 sps:$4 sm:$0xff]   ;;  %v16172_v21 = vld [vmem:[%s19464_s12 + $0x108] ss:$16 sps:$4 sm:$0xff]  }
0x18c6   :  { %11882 = vmatprep.subr.bf16.mxu1 %v16096_v32  ;;  %11923 = vmatprep.subr.bf16.mxu0 %v16099_v18  ;;  %v16175_v40 = vld [vmem:[%s19464_s12 + $0x308] ss:$16 sps:$4 sm:$0xff]   ;;  %s16495_s12 = smov [#allocation16]  }
0x18c7   :  { %v11134_v55 = vld [vmem:[#allocation14] sm:$0xf]  ;;  %s11989_s6 = sshll.u32 %s16495_s12, 4  ;;  %s11990_s6 = int_to_ptr.vmem [resolvable:$true] %s11989_s6 }
0x18c8   :  { %v11139_v32 = vrot.slane %v11134_v55, %v10980_v4  ;;  %v11143_v18 = vrot.slane %v11134_v55, %v10984_v13  ;;  %v11147_v4 = vrot.slane %v11134_v55, %v10988_v5  ;;  %v11151_v13 = vrot.slane %v11134_v55, %v10992_v23  ;;  %s16449_s7 = scalar_lea.vmem %s11990_s6, 128  ;;  %p16454_p13 = scmp.lt.s32.totalorder %s11990_s6, %s11990_s6 }
0x18c9   :  { %11883 = vmatpush1.bf16.msra.mxu1 %v16094_v19  ;;  %11924 = vmatpush1.bf16.msra.mxu0 %v16097_v49  ;;  %p16450_p12 = scmp.ne.s32.totalorder %s11990_s6, %s16449_s7  ;;  %p16455_p0 = scmp.lt.s32.totalorder %s16449_s7, %s16449_s7 }
0x18ca   :  { %11884 = vmatprep.subr.bf16.mxu1 %v16102_v31  ;;  %11925 = vmatprep.subr.bf16.mxu0 %v16105_v11 }
0x18cb   :  { %p16456_p1 = por %p16455_p0, %p16454_p13 }
0x18cd   :  { %11885 = vmatpush1.bf16.msra.mxu1 %v16100_v30  ;;  %11926 = vmatpush1.bf16.msra.mxu0 %v16103_v27  ;;  %p16457_p2 = pnand %p16456_p1, %p16450_p12 }
0x18ce   :  { %11886 = vmatprep.subr.bf16.mxu1 %v16108_v48  ;;  %11927 = vmatprep.subr.bf16.mxu0 %v16111_v39 }
0x18d1   :  { %11887 = vmatpush1.bf16.msra.mxu1 %v16106_v60  ;;  %11928 = vmatpush1.bf16.msra.mxu0 %v16109_v61 }
0x18d2   :  { %11888 = vmatprep.subr.bf16.mxu1 %v16114_v15  ;;  %11929 = vmatprep.subr.bf16.mxu0 %v16117_v37  ;;  %v16494_v37 = vmov 1983009808  }
0x18d5   :  { %11889 = vmatpush1.bf16.msra.mxu1 %v16112_v22  ;;  %11930 = vmatpush1.bf16.msra.mxu0 %v16115_v33  ;;  %v11967_v22 = vunpack.c.l.s4 %v16494_v37 }
0x18d6   :  { %11890 = vmatprep.subr.bf16.mxu1 %v16120_v25  ;;  %11931 = vmatprep.subr.bf16.mxu0 %v16123_v44 }
0x18d7   :  { %v11968_v44 = vunpack.c.0.s8 %v11967_v22 }
0x18d9   :  { %11891 = vmatpush1.bf16.msra.mxu1 %v16118_v12  ;;  %11932 = vmatpush1.bf16.msra.mxu0 %v16121_v28 }
0x18da   :  { %11892 = vmatprep.subr.bf16.mxu1 %v16126_v29  ;;  %11933 = vmatprep.subr.bf16.mxu0 %v16129_v57 }
0x18dd   :  { %11893 = vmatpush1.bf16.msra.mxu1 %v16124_v24  ;;  %11934 = vmatpush1.bf16.msra.mxu0 %v16127_v6 }
0x18de   :  { %11894 = vmatprep.subr.bf16.mxu1 %v16132_v26  ;;  %11935 = vmatprep.subr.bf16.mxu0 %v16135_v42  ;;  %v11971_v26 = vsub.s32 %v11968_v44, %v19232_v56 }
0x18e1   :  { %11895 = vmatpush2.bf16.msra.mxu1 %v16130_v41  ;;  %11936 = vmatpush2.bf16.msra.mxu0 %v16133_v0 }
0x18e2   :  { %11896 = vmatprep.subr.bf16.mxu1 %v16138_v16  ;;  %11937 = vmatprep.subr.bf16.mxu0 %v16141_v51 }
0x18e5   :  { %11897 = vmatpush2.bf16.msra.mxu1 %v16136_v53  ;;  %11938 = vmatpush2.bf16.msra.mxu0 %v16139_v43 }
0x18e6   :  { %11898 = vmatprep.subr.bf16.mxu1 %v16144_v17  ;;  %11939 = vmatprep.subr.bf16.mxu0 %v16147_v2 }
0x18e9   :  { %11899 = vmatpush2.bf16.msra.mxu1 %v16142_v50  ;;  %11940 = vmatpush2.bf16.msra.mxu0 %v16145_v52 }
0x18ea   :  { %11900 = vmatprep.subr.bf16.mxu1 %v16150_v47  ;;  %11941 = vmatprep.subr.bf16.mxu0 %v16153_v54 }
0x18ed   :  { %11901 = vmatpush2.bf16.msra.mxu1 %v16148_v63  ;;  %11942 = vmatpush2.bf16.msra.mxu0 %v16151_v34 }
0x18ee   :  { %11902 = vmatprep.subr.bf16.mxu1 %v16156_v8  ;;  %11943 = vmatprep.subr.bf16.mxu0 %v16159_v35 }
0x18f1   :  { %11903 = vmatpush2.bf16.msra.mxu1 %v16154_v62  ;;  %11944 = vmatpush2.bf16.msra.mxu0 %v16157_v38 }
0x18f2   :  { %11904 = vmatprep.subr.bf16.mxu1 %v16162_v1  ;;  %11945 = vmatprep.subr.bf16.mxu0 %v16165_v9 }
0x18f5   :  { %11905 = vmatpush2.bf16.msra.mxu1 %v16160_v36  ;;  %11946 = vmatpush2.bf16.msra.mxu0 %v16163_v14 }
0x18f6   :  { %11906 = vmatprep.subr.bf16.mxu1 %v16168_v46  ;;  %11947 = vmatprep.subr.bf16.mxu0 %v16171_v7 }
0x18f9   :  { %11907 = vmatpush2.bf16.msra.mxu1 %v16166_v59  ;;  %11948 = vmatpush2.bf16.msra.mxu0 %v16169_v10 }
0x18fa   :  { %11908 = vmatprep.subr.bf16.mxu1 %v16174_v20  ;;  %11949 = vmatprep.subr.bf16.mxu0 %v16177_v3 }
0x18fd   :  { %11909 = vmatpush2.bf16.msra.mxu1 %v16172_v21  ;;  %11950 = vmatpush2.bf16.msra.mxu0 %v16175_v40 }
0x1900   :  { %11911 = vmatmul.mubr.bf16.vlgmr.msra.gmra.mxu1 %v19252_v45  ;;  %11952 = vmatmul.mubr.bf16.vlgmr.msra.gmra.mxu0 %v19254_v58 }
0x1980   :  { %v11830_v19 = vpop.f32.mrf.mxu1  ;;  %v11871_v49 = vpop.f32.mrf.mxu0 }
0x1981   :  { %v11831_v31 = vadd.f32 %v11830_v19, %v11139_v32 }
0x1982   :  { %v11832_v11 = vpop.f32.mrf.mxu1  ;;  %v11873_v30 = vpop.f32.mrf.mxu0 }
0x1983   :  { %v11872_v27 = vadd.f32 %v11871_v49, %v11831_v31  ;;  %v11833_v48 = vadd.f32 %v11832_v11, %v11143_v18 }
0x1984   :  { %v11834_v39 = vpop.f32.mrf.mxu1  ;;  %v11875_v60 = vpop.f32.mrf.mxu0 }
0x1985   :  { %v11874_v61 = vadd.f32 %v11873_v30, %v11833_v48 }
0x1986   :  { %v11835_v45 = vpop.f32.mrf.mxu1  ;;  %v11876_v15 = vpop.f32.mrf.mxu0 }
0x1987   :  { %v11964_v58 = vcombine.low %v11872_v27, %v11874_v61 }
0x1989   :  { %v11972_v5 = vrot.slane %v11964_v58, %v11971_v26 }
0x19c0   :  { %v11912_v33 = vpop.f32.mrf.mxu1  ;;  %v11953_v25 = vpop.f32.mrf.mxu0 }
0x19c1   :  { %v11913_v12 = vadd.f32 %v11912_v33, %v11147_v4 }
0x19c2   :  { %v11914_v28 = vpop.f32.mrf.mxu1  ;;  %v11955_v29 = vpop.f32.mrf.mxu0 }
0x19c3   :  { %v11915_v57 = vadd.f32 %v11914_v28, %v11151_v13  ;;  %v11954_v42 = vadd.f32 %v11953_v25, %v11913_v12 }
0x19c4   :  { %v11916_v24 = vpop.f32.mrf.mxu1  ;;  %v11957_v6 = vpop.f32.mrf.mxu0 }
0x19c5   :  { %v11956_v41 = vadd.f32 %v11955_v29, %v11915_v57 }
0x19c6   :  { %v11917_v0 = vpop.f32.mrf.mxu1  ;;  %v11958_v16 = vpop.f32.mrf.mxu0 }
0x19c7   :  { %v11965_v51 = vcombine.low %v11954_v42, %v11956_v41 }
0x19c9   :  { %v11979_v23 = vrot.slane %v11965_v51, %v11971_v26 }
0x19cb   :  { %v11980_v53 = vcombine.low %v11972_v5, %v11979_v23 }
0x19cd   :  { %11982 = vst [vmem:[#allocation16] sm:$0xff] %v11980_v53 }
0x19ce   :  { %16460 = shalt.err (!%p16457_p2)
}
0x19cf   :  { %11992 = dma.vmem_to_hbm [thread:$0]  %s11990_s6, 128, %s19466_s14, [#allocation4]  }
0x19d0   :  { %16479 = dma.done.wait [#allocation4], 128  }
0x19d1   :  { %16480 = vsyncadd [#allocation4], 4294967168 }
0x19d2   :  { %11996 = vsyncpa [#allocation3], 1 }
0x19d3   :  { %11997 = vsyncpa [#allocation6], 1 }
0x19d4   :  { %11998 = vsyncpa [#allocation9], 1 }
0x19d5   :  { %11999 = vsyncpa [#allocation12], 1 }
0x19d6   :  { %12000 = vsyncpa [#allocation15], 1 }
0x19d7   :  { %12001 = vsyncpa [#allocation4], 1 }

</bundles_post_ra>
